<compile_context>
chip_gen: v5e
topology: v5e:2x2
jax: 0.10.0
libtpu: 0.0.40
codegen_flags: <defaults>
</compile_context>

<pallas_src>
import functools

import jax
import jax.numpy as jnp
from jax.experimental import pallas as pl
from jax.experimental.pallas import tpu as pltpu

LANES = 128  # channel padding so the channel axis always fills the 128-lane dim

# (name, cin, cout, kernel, stride, padding) -- mirrors the PyTorch module
LAYER_CFGS = (
    ("h1", 5, 16, 3, 1, 1),
    ("h2", 16, 16, 3, 1, 1),
    ("h3", 16, 32, 3, 2, 0),
    ("h11", 32, 32, 3, 1, 1),
    ("h12", 32, 32, 3, 1, 1),
    ("h13", 32, 64, 3, 2, 0),
    ("h21", 64, 64, 2, 1, 1),
    ("h22", 64, 64, 2, 1, 1),
    ("h23", 64, 128, 2, 2, 0),
    ("h31", 128, 128, 1, 1, 0),
    ("h32", 128, 128, 1, 1, 0),
    ("h33", 128, 128, 1, 1, 0),
)
CONV_LAYERS = LAYER_CFGS[:9]          # lowered to the slab-conv kernel
HEAD_LAYERS = ("h31", "h32", "h33")   # fused 1x1 convs + linear + tanh head


# --------------------------------------------------------------------------- #
# Conv (kxk, stride-1 slab form) + bias + ReLU, one batch element per program. #
# --------------------------------------------------------------------------- #
def _conv_kernel(x_ref, w_ref, b_ref, o_ref, *, wp, m, taps):
    """x_ref: (1, L, 128) spatially-flattened padded input,
    w_ref: (T, 128, 128) per-tap (cin, cout) matrices, b_ref: (1, 128),
    o_ref: (1, m, 128) with m = ohf * wp (full stride-1 output, slab layout)."""
    dy, dx = taps[0]
    o_ref[0] = jnp.dot(x_ref[0, pl.ds(dy * wp + dx, m), :], w_ref[0],
                       preferred_element_type=jnp.float32)
    for t in range(1, len(taps)):
        dy, dx = taps[t]
        o_ref[0] += jnp.dot(x_ref[0, pl.ds(dy * wp + dx, m), :], w_ref[t],
                            preferred_element_type=jnp.float32)
    # Fused bias + ReLU epilogue (no second HBM pass over the activation).
    o_ref[0] = jnp.maximum(o_ref[0] + b_ref[...], 0.0)


def conv2d_relu(x, w, b, *, stride, padding):
    """Conv2d(+bias)+ReLU on an NHWC, channel-padded (to LANES) activation.

    x: (N, H, W, LANES) f32, channels >= cin are zero.
    w: torch-layout conv weight (cout, cin, kh, kw); b: (cout,).
    Returns (N, OH, OW, LANES) f32 with channels >= cout zero.
    """
    N, H, W, Cp = x.shape
    assert Cp == LANES
    cout, cin, kh, kw = w.shape

    # Per-tap (cin, cout) matrices, zero-padded to (LANES, LANES): lane-dense
    # output, and padded input channels contribute exactly zero.
    wt = jnp.transpose(w, (2, 3, 1, 0)).reshape(kh * kw, cin, cout)
    wt = jnp.pad(wt, ((0, 0), (0, LANES - cin), (0, LANES - cout)))
    bt = jnp.pad(b, (0, LANES - cout)).reshape(1, LANES).astype(jnp.float32)

    if padding:
        x = jnp.pad(x, ((0, 0), (padding, padding), (padding, padding), (0, 0)))
    Hp, Wp = H + 2 * padding, W + 2 * padding
    ohf, owf = Hp - kh + 1, Wp - kw + 1       # full stride-1 output size
    m = ohf * Wp                              # slab-layout output rows / image
    L = Hp * Wp + (kw - 1)                    # flattened input rows (+ tail pad)

    xf = x.reshape(N, Hp * Wp, LANES)
    if kw > 1:
        xf = jnp.pad(xf, ((0, 0), (0, kw - 1), (0, 0)))

    taps = tuple((dy, dx) for dy in range(kh) for dx in range(kw))
    out = pl.pallas_call(
        functools.partial(_conv_kernel, wp=Wp, m=m, taps=taps),
        out_shape=jax.ShapeDtypeStruct((N, m, LANES), jnp.float32),
        grid_spec=pltpu.PrefetchScalarGridSpec(
            num_scalar_prefetch=0,
            grid=(N,),
            in_specs=[
                pl.BlockSpec((1, L, LANES), lambda n: (n, 0, 0)),
                pl.BlockSpec((kh * kw, LANES, LANES), lambda n: (0, 0, 0)),
                pl.BlockSpec((1, LANES), lambda n: (0, 0)),
            ],
            out_specs=pl.BlockSpec((1, m, LANES), lambda n: (n, 0, 0)),
        ),
        compiler_params=pltpu.CompilerParams(
            dimension_semantics=("parallel",)),
    )(xf.astype(jnp.float32), wt.astype(jnp.float32), bt)

    # slab -> (N, OH, OW, LANES): drop wrap-around columns, then apply stride.
    out = out.reshape(N, ohf, Wp, LANES)[:, :, :owf, :]
    if stride > 1:
        out = out[:, ::stride, ::stride, :]
    return out


# --------------------------------------------------------------------------- #
# Fused head: h31/h32/h33 (1x1 conv + ReLU) -> view(-1,128) -> Linear -> tanh. #
# --------------------------------------------------------------------------- #
def _head_kernel(x_ref, w1_ref, b1_ref, w2_ref, b2_ref, w3_ref, b3_ref,
                 wl_ref, bl_ref, o_ref, *, n_spatial):
    y = x_ref[0]                                            # (S, 128)
    for w_ref, b_ref in ((w1_ref, b1_ref), (w2_ref, b2_ref), (w3_ref, b3_ref)):
        y = jnp.maximum(
            jnp.dot(y, w_ref[...], preferred_element_type=jnp.float32)
            + b_ref[...], 0.0)
    # Flatten + Linear(128,1) folded into per-spatial-position contractions.
    o = jnp.dot(y[0:1, :], wl_ref[0], preferred_element_type=jnp.float32)
    for s in range(1, n_spatial):
        o = o + jnp.dot(y[s:s + 1, :], wl_ref[s],
                        preferred_element_type=jnp.float32)
    o_ref[0] = jnp.tanh(o + bl_ref[...])                    # fused tanh epilogue


def head_forward(x, conv_ws, conv_bs, lin_w, lin_b):
    """x: (N, Hf, Wf, 128) output of h23 (already ReLU'd). Returns (N*S, 1)."""
    N, Hf, Wf, Cp = x.shape
    assert Cp == LANES
    S = Hf * Wf
    assert LANES % S == 0, "view(-1,128) row remap assumes spatial size | 128"
    cpr = LANES // S                       # channels per flattened torch row

    xf = x.reshape(N, S, LANES)
    mats = [jnp.transpose(w[:, :, 0, 0]).astype(jnp.float32) for w in conv_ws]
    biases = [b.reshape(1, LANES).astype(jnp.float32) for b in conv_bs]

    # Torch view(-1,128) on NCHW: row r of image n holds channels
    # [cpr*r, cpr*(r+1)) at all S spatial positions, ordered (c, h, w).
    # Fold that permutation into the linear weight (no on-device transpose):
    #   wl[s, c, r] = lin_w[0, (c - cpr*r)*S + s]   (zero outside block r)
    wv = lin_w.reshape(cpr, S)             # [c_off, s]
    blocks = wv.T                          # [s, c_off]
    wl = jnp.zeros((S, LANES, S), jnp.float32)
    for r in range(S):
        wl = wl.at[:, cpr * r:cpr * (r + 1), r].set(blocks)
    wl = jnp.pad(wl, ((0, 0), (0, 0), (0, LANES - S)))      # lane-dense output
    bl = jnp.full((1, LANES), lin_b[0], jnp.float32)

    full = pl.BlockSpec((LANES, LANES), lambda n: (0, 0))
    row = pl.BlockSpec((1, LANES), lambda n: (0, 0))
    out = pl.pallas_call(
        functools.partial(_head_kernel, n_spatial=S),
        out_shape=jax.ShapeDtypeStruct((N, 1, LANES), jnp.float32),
        grid_spec=pltpu.PrefetchScalarGridSpec(
            num_scalar_prefetch=0,
            grid=(N,),
            in_specs=[
                pl.BlockSpec((1, S, LANES), lambda n: (n, 0, 0)),
                full, row, full, row, full, row,
                pl.BlockSpec((S, LANES, LANES), lambda n: (0, 0, 0)),
                row,
            ],
            out_specs=pl.BlockSpec((1, 1, LANES), lambda n: (n, 0, 0)),
        ),
        compiler_params=pltpu.CompilerParams(
            dimension_semantics=("parallel",)),
    )(xf, mats[0], biases[0], mats[1], biases[1], mats[2], biases[2], wl, bl)
    return out[:, 0, :S].reshape(N * S, 1)


# --------------------------------------------------------------------------- #
# Full forward pass, parameter init, and a pure-XLA numerics reference.        #
# --------------------------------------------------------------------------- #
def network_forward(params, x_nchw):
    """Matches PyTorch Network.forward. x_nchw: (N, 5, H, W) float32."""
    x = jnp.transpose(x_nchw, (0, 2, 3, 1)).astype(jnp.float32)     # -> NHWC
    x = jnp.pad(x, ((0, 0), (0, 0), (0, 0), (0, LANES - x.shape[-1])))
    for name, _cin, _cout, _k, s, p in CONV_LAYERS:
        x = conv2d_relu(x, params[name]["w"], params[name]["b"],
                        stride=s, padding=p)
    return head_forward(
        x,
        [params[n]["w"] for n in HEAD_LAYERS],
        [params[n]["b"] for n in HEAD_LAYERS],
        params["output"]["w"], params["output"]["b"])


def init_params(key):
    params = {}
    for name, cin, cout, k, _s, _p in LAYER_CFGS:
        key, k_w, k_b = jax.random.split(key, 3)
        fan_in = cin * k * k
        params[name] = {
            "w": jax.random.normal(k_w, (cout, cin, k, k), jnp.float32)
                 * (2.0 / fan_in) ** 0.5,
            "b": jax.random.normal(k_b, (cout,), jnp.float32) * 0.01,
        }
    key, k_w, k_b = jax.random.split(key, 3)
    params["output"] = {
        "w": jax.random.normal(k_w, (1, 128), jnp.float32) * (1.0 / 128.0) ** 0.5,
        "b": jax.random.normal(k_b, (1,), jnp.float32) * 0.01,
    }
    return params


def reference_forward(params, x_nchw):
    """Pure-XLA reference mirroring the PyTorch module (numerics check only)."""
    x = x_nchw.astype(jnp.float32)
    for name, _cin, _cout, _k, s, p in LAYER_CFGS:
        w, b = params[name]["w"], params[name]["b"]
        x = jax.lax.conv_general_dilated(
            x, w, window_strides=(s, s), padding=[(p, p), (p, p)],
            dimension_numbers=("NCHW", "OIHW", "NCHW"),
            precision=jax.lax.Precision.HIGHEST)
        x = jnp.maximum(x + b[None, :, None, None], 0.0)
    x = x.reshape(-1, 128)
    x = jnp.dot(x, params["output"]["w"].T,
                precision=jax.lax.Precision.HIGHEST) + params["output"]["b"]
    return jnp.tanh(x)


if __name__ == "__main__":
    key = jax.random.PRNGKey(0)
    pkey, xkey = jax.random.split(key)
    params = init_params(pkey)
    x = jax.random.normal(xkey, (2, 5, 16, 16), jnp.float32)   # NCHW, as in torch

    fwd = jax.jit(network_forward)
    out = jax.block_until_ready(fwd(params, x))

    assert out.shape == (8, 1), out.shape           # (N*C*H*W / 128, 1) = (8, 1)
    assert bool(jnp.all(jnp.isfinite(out)))
    ref = jax.block_until_ready(jax.jit(reference_forward)(params, x))
    max_err = float(jnp.max(jnp.abs(out - ref)))
    assert max_err < 5e-3, f"Pallas forward mismatch vs XLA reference: {max_err}"
    print("KERNEL_OK")
</pallas_src>

<mosaic_0001>
module attributes {stable_mosaic.version = 11 : i64} {
  func.func @_conv_kernel(%arg0: i32, %arg1: memref<1x326x128xf32, #tpu.memory_space<vmem>>, %arg2: memref<9x128x128xf32, #tpu.memory_space<vmem>>, %arg3: memref<1x128xf32, #tpu.memory_space<vmem>>, %arg4: memref<1x288x128xf32, #tpu.memory_space<vmem>>) attributes {dimension_semantics = [#tpu.dimension_semantics<parallel>], iteration_bounds = array<i64: 2>, scalar_prefetch = 0 : i64, scratch_operands = 0 : i64, tpu.core_type = #tpu.core_type<tc>, window_params = [{transform_indices = @transform_0, window_bounds = array<i64: 1, 326, 128>}, {pipeline_mode = #tpu.pipeline_mode<synchronous>, transform_indices = @transform_1, window_bounds = array<i64: 9, 128, 128>}, {pipeline_mode = #tpu.pipeline_mode<synchronous>, transform_indices = @transform_2, window_bounds = array<i64: 1, 128>}, {transform_indices = @transform_3, window_bounds = array<i64: 1, 288, 128>}]} {
    %c0 = arith.constant 0 : index
    %c0_0 = arith.constant 0 : index
    %c0_1 = arith.constant 0 : index
    %0 = vector.load %arg1[%c0, %c0_0, %c0_1] : memref<1x326x128xf32, #tpu.memory_space<vmem>>, vector<1x288x128xf32>
    %1 = vector.shape_cast %0 : vector<1x288x128xf32> to vector<288x128xf32>
    %c0_2 = arith.constant 0 : index
    %c0_3 = arith.constant 0 : index
    %c0_4 = arith.constant 0 : index
    %2 = vector.load %arg2[%c0_2, %c0_3, %c0_4] : memref<9x128x128xf32, #tpu.memory_space<vmem>>, vector<1x128x128xf32>
    %3 = vector.shape_cast %2 : vector<1x128x128xf32> to vector<128x128xf32>
    %cst = arith.constant dense<0.000000e+00> : vector<288x128xf32>
    %4 = tpu.matmul %1, %3, %cst {dimension_numbers = #tpu.dot_dimension_numbers<[1], [0], [0], [1], [0, 0, 1, 1], [], []>} : vector<288x128xf32>, vector<128x128xf32>, vector<288x128xf32> -> vector<288x128xf32>
    %c0_5 = arith.constant 0 : index
    %c0_6 = arith.constant 0 : index
    %c0_7 = arith.constant 0 : index
    %5 = vector.load %arg4[%c0_5, %c0_6, %c0_7] : memref<1x288x128xf32, #tpu.memory_space<vmem>>, vector<1x288x128xf32>
    %6 = vector.shape_cast %5 : vector<1x288x128xf32> to vector<288x128xf32>
    %7 = vector.shape_cast %4 : vector<288x128xf32> to vector<1x288x128xf32>
    tpu.vector_store %arg4[%c0_5, %c0_6, %c0_7], %7 {strides = array<i32>} : memref<1x288x128xf32, #tpu.memory_space<vmem>>, vector<1x288x128xf32>,
    %c0_8 = arith.constant 0 : index
    %c0_9 = arith.constant 0 : index
    %c0_10 = arith.constant 0 : index
    %8 = vector.load %arg4[%c0_8, %c0_9, %c0_10] : memref<1x288x128xf32, #tpu.memory_space<vmem>>, vector<1x288x128xf32>
    %9 = vector.shape_cast %8 : vector<1x288x128xf32> to vector<288x128xf32>
    %c0_11 = arith.constant 0 : index
    %c1 = arith.constant 1 : index
    %c0_12 = arith.constant 0 : index
    %10 = vector.load %arg1[%c0_11, %c1, %c0_12] : memref<1x326x128xf32, #tpu.memory_space<vmem>>, vector<1x288x128xf32>
    %11 = vector.shape_cast %10 : vector<1x288x128xf32> to vector<288x128xf32>
    %c1_13 = arith.constant 1 : index
    %c0_14 = arith.constant 0 : index
    %c0_15 = arith.constant 0 : index
    %12 = vector.load %arg2[%c1_13, %c0_14, %c0_15] : memref<9x128x128xf32, #tpu.memory_space<vmem>>, vector<1x128x128xf32>
    %13 = vector.shape_cast %12 : vector<1x128x128xf32> to vector<128x128xf32>
    %cst_16 = arith.constant dense<0.000000e+00> : vector<288x128xf32>
    %14 = tpu.matmul %11, %13, %cst_16 {dimension_numbers = #tpu.dot_dimension_numbers<[1], [0], [0], [1], [0, 0, 1, 1], [], []>} : vector<288x128xf32>, vector<128x128xf32>, vector<288x128xf32> -> vector<288x128xf32>
    %15 = arith.addf %9, %14 : vector<288x128xf32>
    %c0_17 = arith.constant 0 : index
    %c0_18 = arith.constant 0 : index
    %c0_19 = arith.constant 0 : index
    %16 = vector.load %arg4[%c0_17, %c0_18, %c0_19] : memref<1x288x128xf32, #tpu.memory_space<vmem>>, vector<1x288x128xf32>
    %17 = vector.shape_cast %16 : vector<1x288x128xf32> to vector<288x128xf32>
    %18 = vector.shape_cast %15 : vector<288x128xf32> to vector<1x288x128xf32>
    tpu.vector_store %arg4[%c0_17, %c0_18, %c0_19], %18 {strides = array<i32>} : memref<1x288x128xf32, #tpu.memory_space<vmem>>, vector<1x288x128xf32>,
    %c0_20 = arith.constant 0 : index
    %c0_21 = arith.constant 0 : index
    %c0_22 = arith.constant 0 : index
    %19 = vector.load %arg4[%c0_20, %c0_21, %c0_22] : memref<1x288x128xf32, #tpu.memory_space<vmem>>, vector<1x288x128xf32>
    %20 = vector.shape_cast %19 : vector<1x288x128xf32> to vector<288x128xf32>
    %c0_23 = arith.constant 0 : index
    %c2 = arith.constant 2 : index
    %c0_24 = arith.constant 0 : index
    %21 = vector.load %arg1[%c0_23, %c2, %c0_24] : memref<1x326x128xf32, #tpu.memory_space<vmem>>, vector<1x288x128xf32>
    %22 = vector.shape_cast %21 : vector<1x288x128xf32> to vector<288x128xf32>
    %c2_25 = arith.constant 2 : index
    %c0_26 = arith.constant 0 : index
    %c0_27 = arith.constant 0 : index
    %23 = vector.load %arg2[%c2_25, %c0_26, %c0_27] : memref<9x128x128xf32, #tpu.memory_space<vmem>>, vector<1x128x128xf32>
    %24 = vector.shape_cast %23 : vector<1x128x128xf32> to vector<128x128xf32>
    %cst_28 = arith.constant dense<0.000000e+00> : vector<288x128xf32>
    %25 = tpu.matmul %22, %24, %cst_28 {dimension_numbers = #tpu.dot_dimension_numbers<[1], [0], [0], [1], [0, 0, 1, 1], [], []>} : vector<288x128xf32>, vector<128x128xf32>, vector<288x128xf32> -> vector<288x128xf32>
    %26 = arith.addf %20, %25 : vector<288x128xf32>
    %c0_29 = arith.constant 0 : index
    %c0_30 = arith.constant 0 : index
    %c0_31 = arith.constant 0 : index
    %27 = vector.load %arg4[%c0_29, %c0_30, %c0_31] : memref<1x288x128xf32, #tpu.memory_space<vmem>>, vector<1x288x128xf32>
    %28 = vector.shape_cast %27 : vector<1x288x128xf32> to vector<288x128xf32>
    %29 = vector.shape_cast %26 : vector<288x128xf32> to vector<1x288x128xf32>
    tpu.vector_store %arg4[%c0_29, %c0_30, %c0_31], %29 {strides = array<i32>} : memref<1x288x128xf32, #tpu.memory_space<vmem>>, vector<1x288x128xf32>,
    %c0_32 = arith.constant 0 : index
    %c0_33 = arith.constant 0 : index
    %c0_34 = arith.constant 0 : index
    %30 = vector.load %arg4[%c0_32, %c0_33, %c0_34] : memref<1x288x128xf32, #tpu.memory_space<vmem>>, vector<1x288x128xf32>
    %31 = vector.shape_cast %30 : vector<1x288x128xf32> to vector<288x128xf32>
    %c0_35 = arith.constant 0 : index
    %c18 = arith.constant 18 : index
    %c0_36 = arith.constant 0 : index
    %32 = vector.load %arg1[%c0_35, %c18, %c0_36] : memref<1x326x128xf32, #tpu.memory_space<vmem>>, vector<1x288x128xf32>
    %33 = vector.shape_cast %32 : vector<1x288x128xf32> to vector<288x128xf32>
    %c3 = arith.constant 3 : index
    %c0_37 = arith.constant 0 : index
    %c0_38 = arith.constant 0 : index
    %34 = vector.load %arg2[%c3, %c0_37, %c0_38] : memref<9x128x128xf32, #tpu.memory_space<vmem>>, vector<1x128x128xf32>
    %35 = vector.shape_cast %34 : vector<1x128x128xf32> to vector<128x128xf32>
    %cst_39 = arith.constant dense<0.000000e+00> : vector<288x128xf32>
    %36 = tpu.matmul %33, %35, %cst_39 {dimension_numbers = #tpu.dot_dimension_numbers<[1], [0], [0], [1], [0, 0, 1, 1], [], []>} : vector<288x128xf32>, vector<128x128xf32>, vector<288x128xf32> -> vector<288x128xf32>
    %37 = arith.addf %31, %36 : vector<288x128xf32>
    %c0_40 = arith.constant 0 : index
    %c0_41 = arith.constant 0 : index
    %c0_42 = arith.constant 0 : index
    %38 = vector.load %arg4[%c0_40, %c0_41, %c0_42] : memref<1x288x128xf32, #tpu.memory_space<vmem>>, vector<1x288x128xf32>
    %39 = vector.shape_cast %38 : vector<1x288x128xf32> to vector<288x128xf32>
    %40 = vector.shape_cast %37 : vector<288x128xf32> to vector<1x288x128xf32>
    tpu.vector_store %arg4[%c0_40, %c0_41, %c0_42], %40 {strides = array<i32>} : memref<1x288x128xf32, #tpu.memory_space<vmem>>, vector<1x288x128xf32>,
    %c0_43 = arith.constant 0 : index
    %c0_44 = arith.constant 0 : index
    %c0_45 = arith.constant 0 : index
    %41 = vector.load %arg4[%c0_43, %c0_44, %c0_45] : memref<1x288x128xf32, #tpu.memory_space<vmem>>, vector<1x288x128xf32>
    %42 = vector.shape_cast %41 : vector<1x288x128xf32> to vector<288x128xf32>
    %c0_46 = arith.constant 0 : index
    %c19 = arith.constant 19 : index
    %c0_47 = arith.constant 0 : index
    %43 = vector.load %arg1[%c0_46, %c19, %c0_47] : memref<1x326x128xf32, #tpu.memory_space<vmem>>, vector<1x288x128xf32>
    %44 = vector.shape_cast %43 : vector<1x288x128xf32> to vector<288x128xf32>
    %c4 = arith.constant 4 : index
    %c0_48 = arith.constant 0 : index
    %c0_49 = arith.constant 0 : index
    %45 = vector.load %arg2[%c4, %c0_48, %c0_49] : memref<9x128x128xf32, #tpu.memory_space<vmem>>, vector<1x128x128xf32>
    %46 = vector.shape_cast %45 : vector<1x128x128xf32> to vector<128x128xf32>
    %cst_50 = arith.constant dense<0.000000e+00> : vector<288x128xf32>
    %47 = tpu.matmul %44, %46, %cst_50 {dimension_numbers = #tpu.dot_dimension_numbers<[1], [0], [0], [1], [0, 0, 1, 1], [], []>} : vector<288x128xf32>, vector<128x128xf32>, vector<288x128xf32> -> vector<288x128xf32>
    %48 = arith.addf %42, %47 : vector<288x128xf32>
    %c0_51 = arith.constant 0 : index
    %c0_52 = arith.constant 0 : index
    %c0_53 = arith.constant 0 : index
    %49 = vector.load %arg4[%c0_51, %c0_52, %c0_53] : memref<1x288x128xf32, #tpu.memory_space<vmem>>, vector<1x288x128xf32>
    %50 = vector.shape_cast %49 : vector<1x288x128xf32> to vector<288x128xf32>
    %51 = vector.shape_cast %48 : vector<288x128xf32> to vector<1x288x128xf32>
    tpu.vector_store %arg4[%c0_51, %c0_52, %c0_53], %51 {strides = array<i32>} : memref<1x288x128xf32, #tpu.memory_space<vmem>>, vector<1x288x128xf32>,
    %c0_54 = arith.constant 0 : index
    %c0_55 = arith.constant 0 : index
    %c0_56 = arith.constant 0 : index
    %52 = vector.load %arg4[%c0_54, %c0_55, %c0_56] : memref<1x288x128xf32, #tpu.memory_space<vmem>>, vector<1x288x128xf32>
    %53 = vector.shape_cast %52 : vector<1x288x128xf32> to vector<288x128xf32>
    %c0_57 = arith.constant 0 : index
    %c20 = arith.constant 20 : index
    %c0_58 = arith.constant 0 : index
    %54 = vector.load %arg1[%c0_57, %c20, %c0_58] : memref<1x326x128xf32, #tpu.memory_space<vmem>>, vector<1x288x128xf32>
    %55 = vector.shape_cast %54 : vector<1x288x128xf32> to vector<288x128xf32>
    %c5 = arith.constant 5 : index
    %c0_59 = arith.constant 0 : index
    %c0_60 = arith.constant 0 : index
    %56 = vector.load %arg2[%c5, %c0_59, %c0_60] : memref<9x128x128xf32, #tpu.memory_space<vmem>>, vector<1x128x128xf32>
    %57 = vector.shape_cast %56 : vector<1x128x128xf32> to vector<128x128xf32>
    %cst_61 = arith.constant dense<0.000000e+00> : vector<288x128xf32>
    %58 = tpu.matmul %55, %57, %cst_61 {dimension_numbers = #tpu.dot_dimension_numbers<[1], [0], [0], [1], [0, 0, 1, 1], [], []>} : vector<288x128xf32>, vector<128x128xf32>, vector<288x128xf32> -> vector<288x128xf32>
    %59 = arith.addf %53, %58 : vector<288x128xf32>
    %c0_62 = arith.constant 0 : index
    %c0_63 = arith.constant 0 : index
    %c0_64 = arith.constant 0 : index
    %60 = vector.load %arg4[%c0_62, %c0_63, %c0_64] : memref<1x288x128xf32, #tpu.memory_space<vmem>>, vector<1x288x128xf32>
    %61 = vector.shape_cast %60 : vector<1x288x128xf32> to vector<288x128xf32>
    %62 = vector.shape_cast %59 : vector<288x128xf32> to vector<1x288x128xf32>
    tpu.vector_store %arg4[%c0_62, %c0_63, %c0_64], %62 {strides = array<i32>} : memref<1x288x128xf32, #tpu.memory_space<vmem>>, vector<1x288x128xf32>,
    %c0_65 = arith.constant 0 : index
    %c0_66 = arith.constant 0 : index
    %c0_67 = arith.constant 0 : index
    %63 = vector.load %arg4[%c0_65, %c0_66, %c0_67] : memref<1x288x128xf32, #tpu.memory_space<vmem>>, vector<1x288x128xf32>
    %64 = vector.shape_cast %63 : vector<1x288x128xf32> to vector<288x128xf32>
    %c0_68 = arith.constant 0 : index
    %c36 = arith.constant 36 : index
    %c0_69 = arith.constant 0 : index
    %65 = vector.load %arg1[%c0_68, %c36, %c0_69] : memref<1x326x128xf32, #tpu.memory_space<vmem>>, vector<1x288x128xf32>
    %66 = vector.shape_cast %65 : vector<1x288x128xf32> to vector<288x128xf32>
    %c6 = arith.constant 6 : index
    %c0_70 = arith.constant 0 : index
    %c0_71 = arith.constant 0 : index
    %67 = vector.load %arg2[%c6, %c0_70, %c0_71] : memref<9x128x128xf32, #tpu.memory_space<vmem>>, vector<1x128x128xf32>
    %68 = vector.shape_cast %67 : vector<1x128x128xf32> to vector<128x128xf32>
    %cst_72 = arith.constant dense<0.000000e+00> : vector<288x128xf32>
    %69 = tpu.matmul %66, %68, %cst_72 {dimension_numbers = #tpu.dot_dimension_numbers<[1], [0], [0], [1], [0, 0, 1, 1], [], []>} : vector<288x128xf32>, vector<128x128xf32>, vector<288x128xf32> -> vector<288x128xf32>
    %70 = arith.addf %64, %69 : vector<288x128xf32>
    %c0_73 = arith.constant 0 : index
    %c0_74 = arith.constant 0 : index
    %c0_75 = arith.constant 0 : index
    %71 = vector.load %arg4[%c0_73, %c0_74, %c0_75] : memref<1x288x128xf32, #tpu.memory_space<vmem>>, vector<1x288x128xf32>
    %72 = vector.shape_cast %71 : vector<1x288x128xf32> to vector<288x128xf32>
    %73 = vector.shape_cast %70 : vector<288x128xf32> to vector<1x288x128xf32>
    tpu.vector_store %arg4[%c0_73, %c0_74, %c0_75], %73 {strides = array<i32>} : memref<1x288x128xf32, #tpu.memory_space<vmem>>, vector<1x288x128xf32>,
    %c0_76 = arith.constant 0 : index
    %c0_77 = arith.constant 0 : index
    %c0_78 = arith.constant 0 : index
    %74 = vector.load %arg4[%c0_76, %c0_77, %c0_78] : memref<1x288x128xf32, #tpu.memory_space<vmem>>, vector<1x288x128xf32>
    %75 = vector.shape_cast %74 : vector<1x288x128xf32> to vector<288x128xf32>
    %c0_79 = arith.constant 0 : index
    %c37 = arith.constant 37 : index
    %c0_80 = arith.constant 0 : index
    %76 = vector.load %arg1[%c0_79, %c37, %c0_80] : memref<1x326x128xf32, #tpu.memory_space<vmem>>, vector<1x288x128xf32>
    %77 = vector.shape_cast %76 : vector<1x288x128xf32> to vector<288x128xf32>
    %c7 = arith.constant 7 : index
    %c0_81 = arith.constant 0 : index
    %c0_82 = arith.constant 0 : index
    %78 = vector.load %arg2[%c7, %c0_81, %c0_82] : memref<9x128x128xf32, #tpu.memory_space<vmem>>, vector<1x128x128xf32>
    %79 = vector.shape_cast %78 : vector<1x128x128xf32> to vector<128x128xf32>
    %cst_83 = arith.constant dense<0.000000e+00> : vector<288x128xf32>
    %80 = tpu.matmul %77, %79, %cst_83 {dimension_numbers = #tpu.dot_dimension_numbers<[1], [0], [0], [1], [0, 0, 1, 1], [], []>} : vector<288x128xf32>, vector<128x128xf32>, vector<288x128xf32> -> vector<288x128xf32>
    %81 = arith.addf %75, %80 : vector<288x128xf32>
    %c0_84 = arith.constant 0 : index
    %c0_85 = arith.constant 0 : index
    %c0_86 = arith.constant 0 : index
    %82 = vector.load %arg4[%c0_84, %c0_85, %c0_86] : memref<1x288x128xf32, #tpu.memory_space<vmem>>, vector<1x288x128xf32>
    %83 = vector.shape_cast %82 : vector<1x288x128xf32> to vector<288x128xf32>
    %84 = vector.shape_cast %81 : vector<288x128xf32> to vector<1x288x128xf32>
    tpu.vector_store %arg4[%c0_84, %c0_85, %c0_86], %84 {strides = array<i32>} : memref<1x288x128xf32, #tpu.memory_space<vmem>>, vector<1x288x128xf32>,
    %c0_87 = arith.constant 0 : index
    %c0_88 = arith.constant 0 : index
    %c0_89 = arith.constant 0 : index
    %85 = vector.load %arg4[%c0_87, %c0_88, %c0_89] : memref<1x288x128xf32, #tpu.memory_space<vmem>>, vector<1x288x128xf32>
    %86 = vector.shape_cast %85 : vector<1x288x128xf32> to vector<288x128xf32>
    %c0_90 = arith.constant 0 : index
    %c38 = arith.constant 38 : index
    %c0_91 = arith.constant 0 : index
    %87 = vector.load %arg1[%c0_90, %c38, %c0_91] : memref<1x326x128xf32, #tpu.memory_space<vmem>>, vector<1x288x128xf32>
    %88 = vector.shape_cast %87 : vector<1x288x128xf32> to vector<288x128xf32>
    %c8 = arith.constant 8 : index
    %c0_92 = arith.constant 0 : index
    %c0_93 = arith.constant 0 : index
    %89 = vector.load %arg2[%c8, %c0_92, %c0_93] : memref<9x128x128xf32, #tpu.memory_space<vmem>>, vector<1x128x128xf32>
    %90 = vector.shape_cast %89 : vector<1x128x128xf32> to vector<128x128xf32>
    %cst_94 = arith.constant dense<0.000000e+00> : vector<288x128xf32>
    %91 = tpu.matmul %88, %90, %cst_94 {dimension_numbers = #tpu.dot_dimension_numbers<[1], [0], [0], [1], [0, 0, 1, 1], [], []>} : vector<288x128xf32>, vector<128x128xf32>, vector<288x128xf32> -> vector<288x128xf32>
    %92 = arith.addf %86, %91 : vector<288x128xf32>
    %c0_95 = arith.constant 0 : index
    %c0_96 = arith.constant 0 : index
    %c0_97 = arith.constant 0 : index
    %93 = vector.load %arg4[%c0_95, %c0_96, %c0_97] : memref<1x288x128xf32, #tpu.memory_space<vmem>>, vector<1x288x128xf32>
    %94 = vector.shape_cast %93 : vector<1x288x128xf32> to vector<288x128xf32>
    %95 = vector.shape_cast %92 : vector<288x128xf32> to vector<1x288x128xf32>
    tpu.vector_store %arg4[%c0_95, %c0_96, %c0_97], %95 {strides = array<i32>} : memref<1x288x128xf32, #tpu.memory_space<vmem>>, vector<1x288x128xf32>,
    %c0_98 = arith.constant 0 : index
    %c0_99 = arith.constant 0 : index
    %c0_100 = arith.constant 0 : index
    %96 = vector.load %arg4[%c0_98, %c0_99, %c0_100] : memref<1x288x128xf32, #tpu.memory_space<vmem>>, vector<1x288x128xf32>
    %97 = vector.shape_cast %96 : vector<1x288x128xf32> to vector<288x128xf32>
    %c0_101 = arith.constant 0 : index
    %c0_102 = arith.constant 0 : index
    %98 = vector.load %arg3[%c0_101, %c0_102] : memref<1x128xf32, #tpu.memory_space<vmem>>, vector<1x128xf32>
    %99 = vector.broadcast %98 : vector<1x128xf32> to vector<288x128xf32>
    %100 = arith.addf %97, %99 : vector<288x128xf32>
    %cst_103 = arith.constant 0.000000e+00 : f32
    %101 = vector.broadcast %cst_103 : f32 to vector<288x128xf32>
    %102 = arith.maximumf %100, %101 : vector<288x128xf32>
    %c0_104 = arith.constant 0 : index
    %c0_105 = arith.constant 0 : index
    %c0_106 = arith.constant 0 : index
    %103 = vector.load %arg4[%c0_104, %c0_105, %c0_106] : memref<1x288x128xf32, #tpu.memory_space<vmem>>, vector<1x288x128xf32>
    %104 = vector.shape_cast %103 : vector<1x288x128xf32> to vector<288x128xf32>
    %105 = vector.shape_cast %102 : vector<288x128xf32> to vector<1x288x128xf32>
    tpu.vector_store %arg4[%c0_104, %c0_105, %c0_106], %105 {strides = array<i32>} : memref<1x288x128xf32, #tpu.memory_space<vmem>>, vector<1x288x128xf32>,
    return
  }
  func.func @transform_0(%arg0: i32) -> (i32, i32, i32) {
    %c0_i32 = arith.constant 0 : i32
    %c0_i32_0 = arith.constant 0 : i32
    %c0_i32_1 = arith.constant 0 : i32
    return %arg0, %c0_i32, %c0_i32_0 : i32, i32, i32
  }
  func.func @transform_1(%arg0: i32) -> (i32, i32, i32) {
    %c0_i32 = arith.constant 0 : i32
    %c0_i32_0 = arith.constant 0 : i32
    %c0_i32_1 = arith.constant 0 : i32
    %c0_i32_2 = arith.constant 0 : i32
    return %c0_i32, %c0_i32_0, %c0_i32_1 : i32, i32, i32
  }
  func.func @transform_2(%arg0: i32) -> (i32, i32) {
    %c0_i32 = arith.constant 0 : i32
    %c0_i32_0 = arith.constant 0 : i32
    %c0_i32_1 = arith.constant 0 : i32
    return %c0_i32, %c0_i32_0 : i32, i32
  }
  func.func @transform_3(%arg0: i32) -> (i32, i32, i32) {
    %c0_i32 = arith.constant 0 : i32
    %c0_i32_0 = arith.constant 0 : i32
    %c0_i32_1 = arith.constant 0 : i32
    return %arg0, %c0_i32, %c0_i32_0 : i32, i32, i32
  }
}

module attributes {stable_mosaic.version = 11 : i64} {
  func.func @_conv_kernel(%arg0: i32, %arg1: memref<1x258x128xf32, #tpu.memory_space<vmem>>, %arg2: memref<9x128x128xf32, #tpu.memory_space<vmem>>, %arg3: memref<1x128xf32, #tpu.memory_space<vmem>>, %arg4: memref<1x224x128xf32, #tpu.memory_space<vmem>>) attributes {dimension_semantics = [#tpu.dimension_semantics<parallel>], iteration_bounds = array<i64: 2>, scalar_prefetch = 0 : i64, scratch_operands = 0 : i64, tpu.core_type = #tpu.core_type<tc>, window_params = [{transform_indices = @transform_0, window_bounds = array<i64: 1, 258, 128>}, {pipeline_mode = #tpu.pipeline_mode<synchronous>, transform_indices = @transform_1, window_bounds = array<i64: 9, 128, 128>}, {pipeline_mode = #tpu.pipeline_mode<synchronous>, transform_indices = @transform_2, window_bounds = array<i64: 1, 128>}, {transform_indices = @transform_3, window_bounds = array<i64: 1, 224, 128>}]} {
    %c0 = arith.constant 0 : index
    %c0_0 = arith.constant 0 : index
    %c0_1 = arith.constant 0 : index
    %0 = vector.load %arg1[%c0, %c0_0, %c0_1] : memref<1x258x128xf32, #tpu.memory_space<vmem>>, vector<1x224x128xf32>
    %1 = vector.shape_cast %0 : vector<1x224x128xf32> to vector<224x128xf32>
    %c0_2 = arith.constant 0 : index
    %c0_3 = arith.constant 0 : index
    %c0_4 = arith.constant 0 : index
    %2 = vector.load %arg2[%c0_2, %c0_3, %c0_4] : memref<9x128x128xf32, #tpu.memory_space<vmem>>, vector<1x128x128xf32>
    %3 = vector.shape_cast %2 : vector<1x128x128xf32> to vector<128x128xf32>
    %cst = arith.constant dense<0.000000e+00> : vector<224x128xf32>
    %4 = tpu.matmul %1, %3, %cst {dimension_numbers = #tpu.dot_dimension_numbers<[1], [0], [0], [1], [0, 0, 1, 1], [], []>} : vector<224x128xf32>, vector<128x128xf32>, vector<224x128xf32> -> vector<224x128xf32>
    %c0_5 = arith.constant 0 : index
    %c0_6 = arith.constant 0 : index
    %c0_7 = arith.constant 0 : index
    %5 = vector.load %arg4[%c0_5, %c0_6, %c0_7] : memref<1x224x128xf32, #tpu.memory_space<vmem>>, vector<1x224x128xf32>
    %6 = vector.shape_cast %5 : vector<1x224x128xf32> to vector<224x128xf32>
    %7 = vector.shape_cast %4 : vector<224x128xf32> to vector<1x224x128xf32>
    tpu.vector_store %arg4[%c0_5, %c0_6, %c0_7], %7 {strides = array<i32>} : memref<1x224x128xf32, #tpu.memory_space<vmem>>, vector<1x224x128xf32>,
    %c0_8 = arith.constant 0 : index
    %c0_9 = arith.constant 0 : index
    %c0_10 = arith.constant 0 : index
    %8 = vector.load %arg4[%c0_8, %c0_9, %c0_10] : memref<1x224x128xf32, #tpu.memory_space<vmem>>, vector<1x224x128xf32>
    %9 = vector.shape_cast %8 : vector<1x224x128xf32> to vector<224x128xf32>
    %c0_11 = arith.constant 0 : index
    %c1 = arith.constant 1 : index
    %c0_12 = arith.constant 0 : index
    %10 = vector.load %arg1[%c0_11, %c1, %c0_12] : memref<1x258x128xf32, #tpu.memory_space<vmem>>, vector<1x224x128xf32>
    %11 = vector.shape_cast %10 : vector<1x224x128xf32> to vector<224x128xf32>
    %c1_13 = arith.constant 1 : index
    %c0_14 = arith.constant 0 : index
    %c0_15 = arith.constant 0 : index
    %12 = vector.load %arg2[%c1_13, %c0_14, %c0_15] : memref<9x128x128xf32, #tpu.memory_space<vmem>>, vector<1x128x128xf32>
    %13 = vector.shape_cast %12 : vector<1x128x128xf32> to vector<128x128xf32>
    %cst_16 = arith.constant dense<0.000000e+00> : vector<224x128xf32>
    %14 = tpu.matmul %11, %13, %cst_16 {dimension_numbers = #tpu.dot_dimension_numbers<[1], [0], [0], [1], [0, 0, 1, 1], [], []>} : vector<224x128xf32>, vector<128x128xf32>, vector<224x128xf32> -> vector<224x128xf32>
    %15 = arith.addf %9, %14 : vector<224x128xf32>
    %c0_17 = arith.constant 0 : index
    %c0_18 = arith.constant 0 : index
    %c0_19 = arith.constant 0 : index
    %16 = vector.load %arg4[%c0_17, %c0_18, %c0_19] : memref<1x224x128xf32, #tpu.memory_space<vmem>>, vector<1x224x128xf32>
    %17 = vector.shape_cast %16 : vector<1x224x128xf32> to vector<224x128xf32>
    %18 = vector.shape_cast %15 : vector<224x128xf32> to vector<1x224x128xf32>
    tpu.vector_store %arg4[%c0_17, %c0_18, %c0_19], %18 {strides = array<i32>} : memref<1x224x128xf32, #tpu.memory_space<vmem>>, vector<1x224x128xf32>,
    %c0_20 = arith.constant 0 : index
    %c0_21 = arith.constant 0 : index
    %c0_22 = arith.constant 0 : index
    %19 = vector.load %arg4[%c0_20, %c0_21, %c0_22] : memref<1x224x128xf32, #tpu.memory_space<vmem>>, vector<1x224x128xf32>
    %20 = vector.shape_cast %19 : vector<1x224x128xf32> to vector<224x128xf32>
    %c0_23 = arith.constant 0 : index
    %c2 = arith.constant 2 : index
    %c0_24 = arith.constant 0 : index
    %21 = vector.load %arg1[%c0_23, %c2, %c0_24] : memref<1x258x128xf32, #tpu.memory_space<vmem>>, vector<1x224x128xf32>
    %22 = vector.shape_cast %21 : vector<1x224x128xf32> to vector<224x128xf32>
    %c2_25 = arith.constant 2 : index
    %c0_26 = arith.constant 0 : index
    %c0_27 = arith.constant 0 : index
    %23 = vector.load %arg2[%c2_25, %c0_26, %c0_27] : memref<9x128x128xf32, #tpu.memory_space<vmem>>, vector<1x128x128xf32>
    %24 = vector.shape_cast %23 : vector<1x128x128xf32> to vector<128x128xf32>
    %cst_28 = arith.constant dense<0.000000e+00> : vector<224x128xf32>
    %25 = tpu.matmul %22, %24, %cst_28 {dimension_numbers = #tpu.dot_dimension_numbers<[1], [0], [0], [1], [0, 0, 1, 1], [], []>} : vector<224x128xf32>, vector<128x128xf32>, vector<224x128xf32> -> vector<224x128xf32>
    %26 = arith.addf %20, %25 : vector<224x128xf32>
    %c0_29 = arith.constant 0 : index
    %c0_30 = arith.constant 0 : index
    %c0_31 = arith.constant 0 : index
    %27 = vector.load %arg4[%c0_29, %c0_30, %c0_31] : memref<1x224x128xf32, #tpu.memory_space<vmem>>, vector<1x224x128xf32>
    %28 = vector.shape_cast %27 : vector<1x224x128xf32> to vector<224x128xf32>
    %29 = vector.shape_cast %26 : vector<224x128xf32> to vector<1x224x128xf32>
    tpu.vector_store %arg4[%c0_29, %c0_30, %c0_31], %29 {strides = array<i32>} : memref<1x224x128xf32, #tpu.memory_space<vmem>>, vector<1x224x128xf32>,
    %c0_32 = arith.constant 0 : index
    %c0_33 = arith.constant 0 : index
    %c0_34 = arith.constant 0 : index
    %30 = vector.load %arg4[%c0_32, %c0_33, %c0_34] : memref<1x224x128xf32, #tpu.memory_space<vmem>>, vector<1x224x128xf32>
    %31 = vector.shape_cast %30 : vector<1x224x128xf32> to vector<224x128xf32>
    %c0_35 = arith.constant 0 : index
    %c16 = arith.constant 16 : index
    %c0_36 = arith.constant 0 : index
    %32 = vector.load %arg1[%c0_35, %c16, %c0_36] : memref<1x258x128xf32, #tpu.memory_space<vmem>>, vector<1x224x128xf32>
    %33 = vector.shape_cast %32 : vector<1x224x128xf32> to vector<224x128xf32>
    %c3 = arith.constant 3 : index
    %c0_37 = arith.constant 0 : index
    %c0_38 = arith.constant 0 : index
    %34 = vector.load %arg2[%c3, %c0_37, %c0_38] : memref<9x128x128xf32, #tpu.memory_space<vmem>>, vector<1x128x128xf32>
    %35 = vector.shape_cast %34 : vector<1x128x128xf32> to vector<128x128xf32>
    %cst_39 = arith.constant dense<0.000000e+00> : vector<224x128xf32>
    %36 = tpu.matmul %33, %35, %cst_39 {dimension_numbers = #tpu.dot_dimension_numbers<[1], [0], [0], [1], [0, 0, 1, 1], [], []>} : vector<224x128xf32>, vector<128x128xf32>, vector<224x128xf32> -> vector<224x128xf32>
    %37 = arith.addf %31, %36 : vector<224x128xf32>
    %c0_40 = arith.constant 0 : index
    %c0_41 = arith.constant 0 : index
    %c0_42 = arith.constant 0 : index
    %38 = vector.load %arg4[%c0_40, %c0_41, %c0_42] : memref<1x224x128xf32, #tpu.memory_space<vmem>>, vector<1x224x128xf32>
    %39 = vector.shape_cast %38 : vector<1x224x128xf32> to vector<224x128xf32>
    %40 = vector.shape_cast %37 : vector<224x128xf32> to vector<1x224x128xf32>
    tpu.vector_store %arg4[%c0_40, %c0_41, %c0_42], %40 {strides = array<i32>} : memref<1x224x128xf32, #tpu.memory_space<vmem>>, vector<1x224x128xf32>,
    %c0_43 = arith.constant 0 : index
    %c0_44 = arith.constant 0 : index
    %c0_45 = arith.constant 0 : index
    %41 = vector.load %arg4[%c0_43, %c0_44, %c0_45] : memref<1x224x128xf32, #tpu.memory_space<vmem>>, vector<1x224x128xf32>
    %42 = vector.shape_cast %41 : vector<1x224x128xf32> to vector<224x128xf32>
    %c0_46 = arith.constant 0 : index
    %c17 = arith.constant 17 : index
    %c0_47 = arith.constant 0 : index
    %43 = vector.load %arg1[%c0_46, %c17, %c0_47] : memref<1x258x128xf32, #tpu.memory_space<vmem>>, vector<1x224x128xf32>
    %44 = vector.shape_cast %43 : vector<1x224x128xf32> to vector<224x128xf32>
    %c4 = arith.constant 4 : index
    %c0_48 = arith.constant 0 : index
    %c0_49 = arith.constant 0 : index
    %45 = vector.load %arg2[%c4, %c0_48, %c0_49] : memref<9x128x128xf32, #tpu.memory_space<vmem>>, vector<1x128x128xf32>
    %46 = vector.shape_cast %45 : vector<1x128x128xf32> to vector<128x128xf32>
    %cst_50 = arith.constant dense<0.000000e+00> : vector<224x128xf32>
    %47 = tpu.matmul %44, %46, %cst_50 {dimension_numbers = #tpu.dot_dimension_numbers<[1], [0], [0], [1], [0, 0, 1, 1], [], []>} : vector<224x128xf32>, vector<128x128xf32>, vector<224x128xf32> -> vector<224x128xf32>
    %48 = arith.addf %42, %47 : vector<224x128xf32>
    %c0_51 = arith.constant 0 : index
    %c0_52 = arith.constant 0 : index
    %c0_53 = arith.constant 0 : index
    %49 = vector.load %arg4[%c0_51, %c0_52, %c0_53] : memref<1x224x128xf32, #tpu.memory_space<vmem>>, vector<1x224x128xf32>
    %50 = vector.shape_cast %49 : vector<1x224x128xf32> to vector<224x128xf32>
    %51 = vector.shape_cast %48 : vector<224x128xf32> to vector<1x224x128xf32>
    tpu.vector_store %arg4[%c0_51, %c0_52, %c0_53], %51 {strides = array<i32>} : memref<1x224x128xf32, #tpu.memory_space<vmem>>, vector<1x224x128xf32>,
    %c0_54 = arith.constant 0 : index
    %c0_55 = arith.constant 0 : index
    %c0_56 = arith.constant 0 : index
    %52 = vector.load %arg4[%c0_54, %c0_55, %c0_56] : memref<1x224x128xf32, #tpu.memory_space<vmem>>, vector<1x224x128xf32>
    %53 = vector.shape_cast %52 : vector<1x224x128xf32> to vector<224x128xf32>
    %c0_57 = arith.constant 0 : index
    %c18 = arith.constant 18 : index
    %c0_58 = arith.constant 0 : index
    %54 = vector.load %arg1[%c0_57, %c18, %c0_58] : memref<1x258x128xf32, #tpu.memory_space<vmem>>, vector<1x224x128xf32>
    %55 = vector.shape_cast %54 : vector<1x224x128xf32> to vector<224x128xf32>
    %c5 = arith.constant 5 : index
    %c0_59 = arith.constant 0 : index
    %c0_60 = arith.constant 0 : index
    %56 = vector.load %arg2[%c5, %c0_59, %c0_60] : memref<9x128x128xf32, #tpu.memory_space<vmem>>, vector<1x128x128xf32>
    %57 = vector.shape_cast %56 : vector<1x128x128xf32> to vector<128x128xf32>
    %cst_61 = arith.constant dense<0.000000e+00> : vector<224x128xf32>
    %58 = tpu.matmul %55, %57, %cst_61 {dimension_numbers = #tpu.dot_dimension_numbers<[1], [0], [0], [1], [0, 0, 1, 1], [], []>} : vector<224x128xf32>, vector<128x128xf32>, vector<224x128xf32> -> vector<224x128xf32>
    %59 = arith.addf %53, %58 : vector<224x128xf32>
    %c0_62 = arith.constant 0 : index
    %c0_63 = arith.constant 0 : index
    %c0_64 = arith.constant 0 : index
    %60 = vector.load %arg4[%c0_62, %c0_63, %c0_64] : memref<1x224x128xf32, #tpu.memory_space<vmem>>, vector<1x224x128xf32>
    %61 = vector.shape_cast %60 : vector<1x224x128xf32> to vector<224x128xf32>
    %62 = vector.shape_cast %59 : vector<224x128xf32> to vector<1x224x128xf32>
    tpu.vector_store %arg4[%c0_62, %c0_63, %c0_64], %62 {strides = array<i32>} : memref<1x224x128xf32, #tpu.memory_space<vmem>>, vector<1x224x128xf32>,
    %c0_65 = arith.constant 0 : index
    %c0_66 = arith.constant 0 : index
    %c0_67 = arith.constant 0 : index
    %63 = vector.load %arg4[%c0_65, %c0_66, %c0_67] : memref<1x224x128xf32, #tpu.memory_space<vmem>>, vector<1x224x128xf32>
    %64 = vector.shape_cast %63 : vector<1x224x128xf32> to vector<224x128xf32>
    %c0_68 = arith.constant 0 : index
    %c32 = arith.constant 32 : index
    %c0_69 = arith.constant 0 : index
    %65 = vector.load %arg1[%c0_68, %c32, %c0_69] : memref<1x258x128xf32, #tpu.memory_space<vmem>>, vector<1x224x128xf32>
    %66 = vector.shape_cast %65 : vector<1x224x128xf32> to vector<224x128xf32>
    %c6 = arith.constant 6 : index
    %c0_70 = arith.constant 0 : index
    %c0_71 = arith.constant 0 : index
    %67 = vector.load %arg2[%c6, %c0_70, %c0_71] : memref<9x128x128xf32, #tpu.memory_space<vmem>>, vector<1x128x128xf32>
    %68 = vector.shape_cast %67 : vector<1x128x128xf32> to vector<128x128xf32>
    %cst_72 = arith.constant dense<0.000000e+00> : vector<224x128xf32>
    %69 = tpu.matmul %66, %68, %cst_72 {dimension_numbers = #tpu.dot_dimension_numbers<[1], [0], [0], [1], [0, 0, 1, 1], [], []>} : vector<224x128xf32>, vector<128x128xf32>, vector<224x128xf32> -> vector<224x128xf32>
    %70 = arith.addf %64, %69 : vector<224x128xf32>
    %c0_73 = arith.constant 0 : index
    %c0_74 = arith.constant 0 : index
    %c0_75 = arith.constant 0 : index
    %71 = vector.load %arg4[%c0_73, %c0_74, %c0_75] : memref<1x224x128xf32, #tpu.memory_space<vmem>>, vector<1x224x128xf32>
    %72 = vector.shape_cast %71 : vector<1x224x128xf32> to vector<224x128xf32>
    %73 = vector.shape_cast %70 : vector<224x128xf32> to vector<1x224x128xf32>
    tpu.vector_store %arg4[%c0_73, %c0_74, %c0_75], %73 {strides = array<i32>} : memref<1x224x128xf32, #tpu.memory_space<vmem>>, vector<1x224x128xf32>,
    %c0_76 = arith.constant 0 : index
    %c0_77 = arith.constant 0 : index
    %c0_78 = arith.constant 0 : index
    %74 = vector.load %arg4[%c0_76, %c0_77, %c0_78] : memref<1x224x128xf32, #tpu.memory_space<vmem>>, vector<1x224x128xf32>
    %75 = vector.shape_cast %74 : vector<1x224x128xf32> to vector<224x128xf32>
    %c0_79 = arith.constant 0 : index
    %c33 = arith.constant 33 : index
    %c0_80 = arith.constant 0 : index
    %76 = vector.load %arg1[%c0_79, %c33, %c0_80] : memref<1x258x128xf32, #tpu.memory_space<vmem>>, vector<1x224x128xf32>
    %77 = vector.shape_cast %76 : vector<1x224x128xf32> to vector<224x128xf32>
    %c7 = arith.constant 7 : index
    %c0_81 = arith.constant 0 : index
    %c0_82 = arith.constant 0 : index
    %78 = vector.load %arg2[%c7, %c0_81, %c0_82] : memref<9x128x128xf32, #tpu.memory_space<vmem>>, vector<1x128x128xf32>
    %79 = vector.shape_cast %78 : vector<1x128x128xf32> to vector<128x128xf32>
    %cst_83 = arith.constant dense<0.000000e+00> : vector<224x128xf32>
    %80 = tpu.matmul %77, %79, %cst_83 {dimension_numbers = #tpu.dot_dimension_numbers<[1], [0], [0], [1], [0, 0, 1, 1], [], []>} : vector<224x128xf32>, vector<128x128xf32>, vector<224x128xf32> -> vector<224x128xf32>
    %81 = arith.addf %75, %80 : vector<224x128xf32>
    %c0_84 = arith.constant 0 : index
    %c0_85 = arith.constant 0 : index
    %c0_86 = arith.constant 0 : index
    %82 = vector.load %arg4[%c0_84, %c0_85, %c0_86] : memref<1x224x128xf32, #tpu.memory_space<vmem>>, vector<1x224x128xf32>
    %83 = vector.shape_cast %82 : vector<1x224x128xf32> to vector<224x128xf32>
    %84 = vector.shape_cast %81 : vector<224x128xf32> to vector<1x224x128xf32>
    tpu.vector_store %arg4[%c0_84, %c0_85, %c0_86], %84 {strides = array<i32>} : memref<1x224x128xf32, #tpu.memory_space<vmem>>, vector<1x224x128xf32>,
    %c0_87 = arith.constant 0 : index
    %c0_88 = arith.constant 0 : index
    %c0_89 = arith.constant 0 : index
    %85 = vector.load %arg4[%c0_87, %c0_88, %c0_89] : memref<1x224x128xf32, #tpu.memory_space<vmem>>, vector<1x224x128xf32>
    %86 = vector.shape_cast %85 : vector<1x224x128xf32> to vector<224x128xf32>
    %c0_90 = arith.constant 0 : index
    %c34 = arith.constant 34 : index
    %c0_91 = arith.constant 0 : index
    %87 = vector.load %arg1[%c0_90, %c34, %c0_91] : memref<1x258x128xf32, #tpu.memory_space<vmem>>, vector<1x224x128xf32>
    %88 = vector.shape_cast %87 : vector<1x224x128xf32> to vector<224x128xf32>
    %c8 = arith.constant 8 : index
    %c0_92 = arith.constant 0 : index
    %c0_93 = arith.constant 0 : index
    %89 = vector.load %arg2[%c8, %c0_92, %c0_93] : memref<9x128x128xf32, #tpu.memory_space<vmem>>, vector<1x128x128xf32>
    %90 = vector.shape_cast %89 : vector<1x128x128xf32> to vector<128x128xf32>
    %cst_94 = arith.constant dense<0.000000e+00> : vector<224x128xf32>
    %91 = tpu.matmul %88, %90, %cst_94 {dimension_numbers = #tpu.dot_dimension_numbers<[1], [0], [0], [1], [0, 0, 1, 1], [], []>} : vector<224x128xf32>, vector<128x128xf32>, vector<224x128xf32> -> vector<224x128xf32>
    %92 = arith.addf %86, %91 : vector<224x128xf32>
    %c0_95 = arith.constant 0 : index
    %c0_96 = arith.constant 0 : index
    %c0_97 = arith.constant 0 : index
    %93 = vector.load %arg4[%c0_95, %c0_96, %c0_97] : memref<1x224x128xf32, #tpu.memory_space<vmem>>, vector<1x224x128xf32>
    %94 = vector.shape_cast %93 : vector<1x224x128xf32> to vector<224x128xf32>
    %95 = vector.shape_cast %92 : vector<224x128xf32> to vector<1x224x128xf32>
    tpu.vector_store %arg4[%c0_95, %c0_96, %c0_97], %95 {strides = array<i32>} : memref<1x224x128xf32, #tpu.memory_space<vmem>>, vector<1x224x128xf32>,
    %c0_98 = arith.constant 0 : index
    %c0_99 = arith.constant 0 : index
    %c0_100 = arith.constant 0 : index
    %96 = vector.load %arg4[%c0_98, %c0_99, %c0_100] : memref<1x224x128xf32, #tpu.memory_space<vmem>>, vector<1x224x128xf32>
    %97 = vector.shape_cast %96 : vector<1x224x128xf32> to vector<224x128xf32>
    %c0_101 = arith.constant 0 : index
    %c0_102 = arith.constant 0 : index
    %98 = vector.load %arg3[%c0_101, %c0_102] : memref<1x128xf32, #tpu.memory_space<vmem>>, vector<1x128xf32>
    %99 = vector.broadcast %98 : vector<1x128xf32> to vector<224x128xf32>
    %100 = arith.addf %97, %99 : vector<224x128xf32>
    %cst_103 = arith.constant 0.000000e+00 : f32
    %101 = vector.broadcast %cst_103 : f32 to vector<224x128xf32>
    %102 = arith.maximumf %100, %101 : vector<224x128xf32>
    %c0_104 = arith.constant 0 : index
    %c0_105 = arith.constant 0 : index
    %c0_106 = arith.constant 0 : index
    %103 = vector.load %arg4[%c0_104, %c0_105, %c0_106] : memref<1x224x128xf32, #tpu.memory_space<vmem>>, vector<1x224x128xf32>
    %104 = vector.shape_cast %103 : vector<1x224x128xf32> to vector<224x128xf32>
    %105 = vector.shape_cast %102 : vector<224x128xf32> to vector<1x224x128xf32>
    tpu.vector_store %arg4[%c0_104, %c0_105, %c0_106], %105 {strides = array<i32>} : memref<1x224x128xf32, #tpu.memory_space<vmem>>, vector<1x224x128xf32>,
    return
  }
  func.func @transform_0(%arg0: i32) -> (i32, i32, i32) {
    %c0_i32 = arith.constant 0 : i32
    %c0_i32_0 = arith.constant 0 : i32
    %c0_i32_1 = arith.constant 0 : i32
    return %arg0, %c0_i32, %c0_i32_0 : i32, i32, i32
  }
  func.func @transform_1(%arg0: i32) -> (i32, i32, i32) {
    %c0_i32 = arith.constant 0 : i32
    %c0_i32_0 = arith.constant 0 : i32
    %c0_i32_1 = arith.constant 0 : i32
    %c0_i32_2 = arith.constant 0 : i32
    return %c0_i32, %c0_i32_0, %c0_i32_1 : i32, i32, i32
  }
  func.func @transform_2(%arg0: i32) -> (i32, i32) {
    %c0_i32 = arith.constant 0 : i32
    %c0_i32_0 = arith.constant 0 : i32
    %c0_i32_1 = arith.constant 0 : i32
    return %c0_i32, %c0_i32_0 : i32, i32
  }
  func.func @transform_3(%arg0: i32) -> (i32, i32, i32) {
    %c0_i32 = arith.constant 0 : i32
    %c0_i32_0 = arith.constant 0 : i32
    %c0_i32_1 = arith.constant 0 : i32
    return %arg0, %c0_i32, %c0_i32_0 : i32, i32, i32
  }
}

module attributes {stable_mosaic.version = 11 : i64} {
  func.func @_conv_kernel(%arg0: i32, %arg1: memref<1x83x128xf32, #tpu.memory_space<vmem>>, %arg2: memref<9x128x128xf32, #tpu.memory_space<vmem>>, %arg3: memref<1x128xf32, #tpu.memory_space<vmem>>, %arg4: memref<1x63x128xf32, #tpu.memory_space<vmem>>) attributes {dimension_semantics = [#tpu.dimension_semantics<parallel>], iteration_bounds = array<i64: 2>, scalar_prefetch = 0 : i64, scratch_operands = 0 : i64, tpu.core_type = #tpu.core_type<tc>, window_params = [{transform_indices = @transform_0, window_bounds = array<i64: 1, 83, 128>}, {pipeline_mode = #tpu.pipeline_mode<synchronous>, transform_indices = @transform_1, window_bounds = array<i64: 9, 128, 128>}, {pipeline_mode = #tpu.pipeline_mode<synchronous>, transform_indices = @transform_2, window_bounds = array<i64: 1, 128>}, {transform_indices = @transform_3, window_bounds = array<i64: 1, 63, 128>}]} {
    %c0 = arith.constant 0 : index
    %c0_0 = arith.constant 0 : index
    %c0_1 = arith.constant 0 : index
    %0 = vector.load %arg1[%c0, %c0_0, %c0_1] : memref<1x83x128xf32, #tpu.memory_space<vmem>>, vector<1x63x128xf32>
    %1 = vector.shape_cast %0 : vector<1x63x128xf32> to vector<63x128xf32>
    %c0_2 = arith.constant 0 : index
    %c0_3 = arith.constant 0 : index
    %c0_4 = arith.constant 0 : index
    %2 = vector.load %arg2[%c0_2, %c0_3, %c0_4] : memref<9x128x128xf32, #tpu.memory_space<vmem>>, vector<1x128x128xf32>
    %3 = vector.shape_cast %2 : vector<1x128x128xf32> to vector<128x128xf32>
    %cst = arith.constant dense<0.000000e+00> : vector<63x128xf32>
    %4 = tpu.matmul %1, %3, %cst {dimension_numbers = #tpu.dot_dimension_numbers<[1], [0], [0], [1], [0, 0, 1, 1], [], []>} : vector<63x128xf32>, vector<128x128xf32>, vector<63x128xf32> -> vector<63x128xf32>
    %c0_5 = arith.constant 0 : index
    %c0_6 = arith.constant 0 : index
    %c0_7 = arith.constant 0 : index
    %5 = vector.load %arg4[%c0_5, %c0_6, %c0_7] : memref<1x63x128xf32, #tpu.memory_space<vmem>>, vector<1x63x128xf32>
    %6 = vector.shape_cast %5 : vector<1x63x128xf32> to vector<63x128xf32>
    %7 = vector.shape_cast %4 : vector<63x128xf32> to vector<1x63x128xf32>
    tpu.vector_store %arg4[%c0_5, %c0_6, %c0_7], %7 {strides = array<i32>} : memref<1x63x128xf32, #tpu.memory_space<vmem>>, vector<1x63x128xf32>,
    %c0_8 = arith.constant 0 : index
    %c0_9 = arith.constant 0 : index
    %c0_10 = arith.constant 0 : index
    %8 = vector.load %arg4[%c0_8, %c0_9, %c0_10] : memref<1x63x128xf32, #tpu.memory_space<vmem>>, vector<1x63x128xf32>
    %9 = vector.shape_cast %8 : vector<1x63x128xf32> to vector<63x128xf32>
    %c0_11 = arith.constant 0 : index
    %c1 = arith.constant 1 : index
    %c0_12 = arith.constant 0 : index
    %10 = vector.load %arg1[%c0_11, %c1, %c0_12] : memref<1x83x128xf32, #tpu.memory_space<vmem>>, vector<1x63x128xf32>
    %11 = vector.shape_cast %10 : vector<1x63x128xf32> to vector<63x128xf32>
    %c1_13 = arith.constant 1 : index
    %c0_14 = arith.constant 0 : index
    %c0_15 = arith.constant 0 : index
    %12 = vector.load %arg2[%c1_13, %c0_14, %c0_15] : memref<9x128x128xf32, #tpu.memory_space<vmem>>, vector<1x128x128xf32>
    %13 = vector.shape_cast %12 : vector<1x128x128xf32> to vector<128x128xf32>
    %cst_16 = arith.constant dense<0.000000e+00> : vector<63x128xf32>
    %14 = tpu.matmul %11, %13, %cst_16 {dimension_numbers = #tpu.dot_dimension_numbers<[1], [0], [0], [1], [0, 0, 1, 1], [], []>} : vector<63x128xf32>, vector<128x128xf32>, vector<63x128xf32> -> vector<63x128xf32>
    %15 = arith.addf %9, %14 : vector<63x128xf32>
    %c0_17 = arith.constant 0 : index
    %c0_18 = arith.constant 0 : index
    %c0_19 = arith.constant 0 : index
    %16 = vector.load %arg4[%c0_17, %c0_18, %c0_19] : memref<1x63x128xf32, #tpu.memory_space<vmem>>, vector<1x63x128xf32>
    %17 = vector.shape_cast %16 : vector<1x63x128xf32> to vector<63x128xf32>
    %18 = vector.shape_cast %15 : vector<63x128xf32> to vector<1x63x128xf32>
    tpu.vector_store %arg4[%c0_17, %c0_18, %c0_19], %18 {strides = array<i32>} : memref<1x63x128xf32, #tpu.memory_space<vmem>>, vector<1x63x128xf32>,
    %c0_20 = arith.constant 0 : index
    %c0_21 = arith.constant 0 : index
    %c0_22 = arith.constant 0 : index
    %19 = vector.load %arg4[%c0_20, %c0_21, %c0_22] : memref<1x63x128xf32, #tpu.memory_space<vmem>>, vector<1x63x128xf32>
    %20 = vector.shape_cast %19 : vector<1x63x128xf32> to vector<63x128xf32>
    %c0_23 = arith.constant 0 : index
    %c2 = arith.constant 2 : index
    %c0_24 = arith.constant 0 : index
    %21 = vector.load %arg1[%c0_23, %c2, %c0_24] : memref<1x83x128xf32, #tpu.memory_space<vmem>>, vector<1x63x128xf32>
    %22 = vector.shape_cast %21 : vector<1x63x128xf32> to vector<63x128xf32>
    %c2_25 = arith.constant 2 : index
    %c0_26 = arith.constant 0 : index
    %c0_27 = arith.constant 0 : index
    %23 = vector.load %arg2[%c2_25, %c0_26, %c0_27] : memref<9x128x128xf32, #tpu.memory_space<vmem>>, vector<1x128x128xf32>
    %24 = vector.shape_cast %23 : vector<1x128x128xf32> to vector<128x128xf32>
    %cst_28 = arith.constant dense<0.000000e+00> : vector<63x128xf32>
    %25 = tpu.matmul %22, %24, %cst_28 {dimension_numbers = #tpu.dot_dimension_numbers<[1], [0], [0], [1], [0, 0, 1, 1], [], []>} : vector<63x128xf32>, vector<128x128xf32>, vector<63x128xf32> -> vector<63x128xf32>
    %26 = arith.addf %20, %25 : vector<63x128xf32>
    %c0_29 = arith.constant 0 : index
    %c0_30 = arith.constant 0 : index
    %c0_31 = arith.constant 0 : index
    %27 = vector.load %arg4[%c0_29, %c0_30, %c0_31] : memref<1x63x128xf32, #tpu.memory_space<vmem>>, vector<1x63x128xf32>
    %28 = vector.shape_cast %27 : vector<1x63x128xf32> to vector<63x128xf32>
    %29 = vector.shape_cast %26 : vector<63x128xf32> to vector<1x63x128xf32>
    tpu.vector_store %arg4[%c0_29, %c0_30, %c0_31], %29 {strides = array<i32>} : memref<1x63x128xf32, #tpu.memory_space<vmem>>, vector<1x63x128xf32>,
    %c0_32 = arith.constant 0 : index
    %c0_33 = arith.constant 0 : index
    %c0_34 = arith.constant 0 : index
    %30 = vector.load %arg4[%c0_32, %c0_33, %c0_34] : memref<1x63x128xf32, #tpu.memory_space<vmem>>, vector<1x63x128xf32>
    %31 = vector.shape_cast %30 : vector<1x63x128xf32> to vector<63x128xf32>
    %c0_35 = arith.constant 0 : index
    %c9 = arith.constant 9 : index
    %c0_36 = arith.constant 0 : index
    %32 = vector.load %arg1[%c0_35, %c9, %c0_36] : memref<1x83x128xf32, #tpu.memory_space<vmem>>, vector<1x63x128xf32>
    %33 = vector.shape_cast %32 : vector<1x63x128xf32> to vector<63x128xf32>
    %c3 = arith.constant 3 : index
    %c0_37 = arith.constant 0 : index
    %c0_38 = arith.constant 0 : index
    %34 = vector.load %arg2[%c3, %c0_37, %c0_38] : memref<9x128x128xf32, #tpu.memory_space<vmem>>, vector<1x128x128xf32>
    %35 = vector.shape_cast %34 : vector<1x128x128xf32> to vector<128x128xf32>
    %cst_39 = arith.constant dense<0.000000e+00> : vector<63x128xf32>
    %36 = tpu.matmul %33, %35, %cst_39 {dimension_numbers = #tpu.dot_dimension_numbers<[1], [0], [0], [1], [0, 0, 1, 1], [], []>} : vector<63x128xf32>, vector<128x128xf32>, vector<63x128xf32> -> vector<63x128xf32>
    %37 = arith.addf %31, %36 : vector<63x128xf32>
    %c0_40 = arith.constant 0 : index
    %c0_41 = arith.constant 0 : index
    %c0_42 = arith.constant 0 : index
    %38 = vector.load %arg4[%c0_40, %c0_41, %c0_42] : memref<1x63x128xf32, #tpu.memory_space<vmem>>, vector<1x63x128xf32>
    %39 = vector.shape_cast %38 : vector<1x63x128xf32> to vector<63x128xf32>
    %40 = vector.shape_cast %37 : vector<63x128xf32> to vector<1x63x128xf32>
    tpu.vector_store %arg4[%c0_40, %c0_41, %c0_42], %40 {strides = array<i32>} : memref<1x63x128xf32, #tpu.memory_space<vmem>>, vector<1x63x128xf32>,
    %c0_43 = arith.constant 0 : index
    %c0_44 = arith.constant 0 : index
    %c0_45 = arith.constant 0 : index
    %41 = vector.load %arg4[%c0_43, %c0_44, %c0_45] : memref<1x63x128xf32, #tpu.memory_space<vmem>>, vector<1x63x128xf32>
    %42 = vector.shape_cast %41 : vector<1x63x128xf32> to vector<63x128xf32>
    %c0_46 = arith.constant 0 : index
    %c10 = arith.constant 10 : index
    %c0_47 = arith.constant 0 : index
    %43 = vector.load %arg1[%c0_46, %c10, %c0_47] : memref<1x83x128xf32, #tpu.memory_space<vmem>>, vector<1x63x128xf32>
    %44 = vector.shape_cast %43 : vector<1x63x128xf32> to vector<63x128xf32>
    %c4 = arith.constant 4 : index
    %c0_48 = arith.constant 0 : index
    %c0_49 = arith.constant 0 : index
    %45 = vector.load %arg2[%c4, %c0_48, %c0_49] : memref<9x128x128xf32, #tpu.memory_space<vmem>>, vector<1x128x128xf32>
    %46 = vector.shape_cast %45 : vector<1x128x128xf32> to vector<128x128xf32>
    %cst_50 = arith.constant dense<0.000000e+00> : vector<63x128xf32>
    %47 = tpu.matmul %44, %46, %cst_50 {dimension_numbers = #tpu.dot_dimension_numbers<[1], [0], [0], [1], [0, 0, 1, 1], [], []>} : vector<63x128xf32>, vector<128x128xf32>, vector<63x128xf32> -> vector<63x128xf32>
    %48 = arith.addf %42, %47 : vector<63x128xf32>
    %c0_51 = arith.constant 0 : index
    %c0_52 = arith.constant 0 : index
    %c0_53 = arith.constant 0 : index
    %49 = vector.load %arg4[%c0_51, %c0_52, %c0_53] : memref<1x63x128xf32, #tpu.memory_space<vmem>>, vector<1x63x128xf32>
    %50 = vector.shape_cast %49 : vector<1x63x128xf32> to vector<63x128xf32>
    %51 = vector.shape_cast %48 : vector<63x128xf32> to vector<1x63x128xf32>
    tpu.vector_store %arg4[%c0_51, %c0_52, %c0_53], %51 {strides = array<i32>} : memref<1x63x128xf32, #tpu.memory_space<vmem>>, vector<1x63x128xf32>,
    %c0_54 = arith.constant 0 : index
    %c0_55 = arith.constant 0 : index
    %c0_56 = arith.constant 0 : index
    %52 = vector.load %arg4[%c0_54, %c0_55, %c0_56] : memref<1x63x128xf32, #tpu.memory_space<vmem>>, vector<1x63x128xf32>
    %53 = vector.shape_cast %52 : vector<1x63x128xf32> to vector<63x128xf32>
    %c0_57 = arith.constant 0 : index
    %c11 = arith.constant 11 : index
    %c0_58 = arith.constant 0 : index
    %54 = vector.load %arg1[%c0_57, %c11, %c0_58] : memref<1x83x128xf32, #tpu.memory_space<vmem>>, vector<1x63x128xf32>
    %55 = vector.shape_cast %54 : vector<1x63x128xf32> to vector<63x128xf32>
    %c5 = arith.constant 5 : index
    %c0_59 = arith.constant 0 : index
    %c0_60 = arith.constant 0 : index
    %56 = vector.load %arg2[%c5, %c0_59, %c0_60] : memref<9x128x128xf32, #tpu.memory_space<vmem>>, vector<1x128x128xf32>
    %57 = vector.shape_cast %56 : vector<1x128x128xf32> to vector<128x128xf32>
    %cst_61 = arith.constant dense<0.000000e+00> : vector<63x128xf32>
    %58 = tpu.matmul %55, %57, %cst_61 {dimension_numbers = #tpu.dot_dimension_numbers<[1], [0], [0], [1], [0, 0, 1, 1], [], []>} : vector<63x128xf32>, vector<128x128xf32>, vector<63x128xf32> -> vector<63x128xf32>
    %59 = arith.addf %53, %58 : vector<63x128xf32>
    %c0_62 = arith.constant 0 : index
    %c0_63 = arith.constant 0 : index
    %c0_64 = arith.constant 0 : index
    %60 = vector.load %arg4[%c0_62, %c0_63, %c0_64] : memref<1x63x128xf32, #tpu.memory_space<vmem>>, vector<1x63x128xf32>
    %61 = vector.shape_cast %60 : vector<1x63x128xf32> to vector<63x128xf32>
    %62 = vector.shape_cast %59 : vector<63x128xf32> to vector<1x63x128xf32>
    tpu.vector_store %arg4[%c0_62, %c0_63, %c0_64], %62 {strides = array<i32>} : memref<1x63x128xf32, #tpu.memory_space<vmem>>, vector<1x63x128xf32>,
    %c0_65 = arith.constant 0 : index
    %c0_66 = arith.constant 0 : index
    %c0_67 = arith.constant 0 : index
    %63 = vector.load %arg4[%c0_65, %c0_66, %c0_67] : memref<1x63x128xf32, #tpu.memory_space<vmem>>, vector<1x63x128xf32>
    %64 = vector.shape_cast %63 : vector<1x63x128xf32> to vector<63x128xf32>
    %c0_68 = arith.constant 0 : index
    %c18 = arith.constant 18 : index
    %c0_69 = arith.constant 0 : index
    %65 = vector.load %arg1[%c0_68, %c18, %c0_69] : memref<1x83x128xf32, #tpu.memory_space<vmem>>, vector<1x63x128xf32>
    %66 = vector.shape_cast %65 : vector<1x63x128xf32> to vector<63x128xf32>
    %c6 = arith.constant 6 : index
    %c0_70 = arith.constant 0 : index
    %c0_71 = arith.constant 0 : index
    %67 = vector.load %arg2[%c6, %c0_70, %c0_71] : memref<9x128x128xf32, #tpu.memory_space<vmem>>, vector<1x128x128xf32>
    %68 = vector.shape_cast %67 : vector<1x128x128xf32> to vector<128x128xf32>
    %cst_72 = arith.constant dense<0.000000e+00> : vector<63x128xf32>
    %69 = tpu.matmul %66, %68, %cst_72 {dimension_numbers = #tpu.dot_dimension_numbers<[1], [0], [0], [1], [0, 0, 1, 1], [], []>} : vector<63x128xf32>, vector<128x128xf32>, vector<63x128xf32> -> vector<63x128xf32>
    %70 = arith.addf %64, %69 : vector<63x128xf32>
    %c0_73 = arith.constant 0 : index
    %c0_74 = arith.constant 0 : index
    %c0_75 = arith.constant 0 : index
    %71 = vector.load %arg4[%c0_73, %c0_74, %c0_75] : memref<1x63x128xf32, #tpu.memory_space<vmem>>, vector<1x63x128xf32>
    %72 = vector.shape_cast %71 : vector<1x63x128xf32> to vector<63x128xf32>
    %73 = vector.shape_cast %70 : vector<63x128xf32> to vector<1x63x128xf32>
    tpu.vector_store %arg4[%c0_73, %c0_74, %c0_75], %73 {strides = array<i32>} : memref<1x63x128xf32, #tpu.memory_space<vmem>>, vector<1x63x128xf32>,
    %c0_76 = arith.constant 0 : index
    %c0_77 = arith.constant 0 : index
    %c0_78 = arith.constant 0 : index
    %74 = vector.load %arg4[%c0_76, %c0_77, %c0_78] : memref<1x63x128xf32, #tpu.memory_space<vmem>>, vector<1x63x128xf32>
    %75 = vector.shape_cast %74 : vector<1x63x128xf32> to vector<63x128xf32>
    %c0_79 = arith.constant 0 : index
    %c19 = arith.constant 19 : index
    %c0_80 = arith.constant 0 : index
    %76 = vector.load %arg1[%c0_79, %c19, %c0_80] : memref<1x83x128xf32, #tpu.memory_space<vmem>>, vector<1x63x128xf32>
    %77 = vector.shape_cast %76 : vector<1x63x128xf32> to vector<63x128xf32>
    %c7 = arith.constant 7 : index
    %c0_81 = arith.constant 0 : index
    %c0_82 = arith.constant 0 : index
    %78 = vector.load %arg2[%c7, %c0_81, %c0_82] : memref<9x128x128xf32, #tpu.memory_space<vmem>>, vector<1x128x128xf32>
    %79 = vector.shape_cast %78 : vector<1x128x128xf32> to vector<128x128xf32>
    %cst_83 = arith.constant dense<0.000000e+00> : vector<63x128xf32>
    %80 = tpu.matmul %77, %79, %cst_83 {dimension_numbers = #tpu.dot_dimension_numbers<[1], [0], [0], [1], [0, 0, 1, 1], [], []>} : vector<63x128xf32>, vector<128x128xf32>, vector<63x128xf32> -> vector<63x128xf32>
    %81 = arith.addf %75, %80 : vector<63x128xf32>
    %c0_84 = arith.constant 0 : index
    %c0_85 = arith.constant 0 : index
    %c0_86 = arith.constant 0 : index
    %82 = vector.load %arg4[%c0_84, %c0_85, %c0_86] : memref<1x63x128xf32, #tpu.memory_space<vmem>>, vector<1x63x128xf32>
    %83 = vector.shape_cast %82 : vector<1x63x128xf32> to vector<63x128xf32>
    %84 = vector.shape_cast %81 : vector<63x128xf32> to vector<1x63x128xf32>
    tpu.vector_store %arg4[%c0_84, %c0_85, %c0_86], %84 {strides = array<i32>} : memref<1x63x128xf32, #tpu.memory_space<vmem>>, vector<1x63x128xf32>,
    %c0_87 = arith.constant 0 : index
    %c0_88 = arith.constant 0 : index
    %c0_89 = arith.constant 0 : index
    %85 = vector.load %arg4[%c0_87, %c0_88, %c0_89] : memref<1x63x128xf32, #tpu.memory_space<vmem>>, vector<1x63x128xf32>
    %86 = vector.shape_cast %85 : vector<1x63x128xf32> to vector<63x128xf32>
    %c0_90 = arith.constant 0 : index
    %c20 = arith.constant 20 : index
    %c0_91 = arith.constant 0 : index
    %87 = vector.load %arg1[%c0_90, %c20, %c0_91] : memref<1x83x128xf32, #tpu.memory_space<vmem>>, vector<1x63x128xf32>
    %88 = vector.shape_cast %87 : vector<1x63x128xf32> to vector<63x128xf32>
    %c8 = arith.constant 8 : index
    %c0_92 = arith.constant 0 : index
    %c0_93 = arith.constant 0 : index
    %89 = vector.load %arg2[%c8, %c0_92, %c0_93] : memref<9x128x128xf32, #tpu.memory_space<vmem>>, vector<1x128x128xf32>
    %90 = vector.shape_cast %89 : vector<1x128x128xf32> to vector<128x128xf32>
    %cst_94 = arith.constant dense<0.000000e+00> : vector<63x128xf32>
    %91 = tpu.matmul %88, %90, %cst_94 {dimension_numbers = #tpu.dot_dimension_numbers<[1], [0], [0], [1], [0, 0, 1, 1], [], []>} : vector<63x128xf32>, vector<128x128xf32>, vector<63x128xf32> -> vector<63x128xf32>
    %92 = arith.addf %86, %91 : vector<63x128xf32>
    %c0_95 = arith.constant 0 : index
    %c0_96 = arith.constant 0 : index
    %c0_97 = arith.constant 0 : index
    %93 = vector.load %arg4[%c0_95, %c0_96, %c0_97] : memref<1x63x128xf32, #tpu.memory_space<vmem>>, vector<1x63x128xf32>
    %94 = vector.shape_cast %93 : vector<1x63x128xf32> to vector<63x128xf32>
    %95 = vector.shape_cast %92 : vector<63x128xf32> to vector<1x63x128xf32>
    tpu.vector_store %arg4[%c0_95, %c0_96, %c0_97], %95 {strides = array<i32>} : memref<1x63x128xf32, #tpu.memory_space<vmem>>, vector<1x63x128xf32>,
    %c0_98 = arith.constant 0 : index
    %c0_99 = arith.constant 0 : index
    %c0_100 = arith.constant 0 : index
    %96 = vector.load %arg4[%c0_98, %c0_99, %c0_100] : memref<1x63x128xf32, #tpu.memory_space<vmem>>, vector<1x63x128xf32>
    %97 = vector.shape_cast %96 : vector<1x63x128xf32> to vector<63x128xf32>
    %c0_101 = arith.constant 0 : index
    %c0_102 = arith.constant 0 : index
    %98 = vector.load %arg3[%c0_101, %c0_102] : memref<1x128xf32, #tpu.memory_space<vmem>>, vector<1x128xf32>
    %99 = vector.broadcast %98 : vector<1x128xf32> to vector<63x128xf32>
    %100 = arith.addf %97, %99 : vector<63x128xf32>
    %cst_103 = arith.constant 0.000000e+00 : f32
    %101 = vector.broadcast %cst_103 : f32 to vector<63x128xf32>
    %102 = arith.maximumf %100, %101 : vector<63x128xf32>
    %c0_104 = arith.constant 0 : index
    %c0_105 = arith.constant 0 : index
    %c0_106 = arith.constant 0 : index
    %103 = vector.load %arg4[%c0_104, %c0_105, %c0_106] : memref<1x63x128xf32, #tpu.memory_space<vmem>>, vector<1x63x128xf32>
    %104 = vector.shape_cast %103 : vector<1x63x128xf32> to vector<63x128xf32>
    %105 = vector.shape_cast %102 : vector<63x128xf32> to vector<1x63x128xf32>
    tpu.vector_store %arg4[%c0_104, %c0_105, %c0_106], %105 {strides = array<i32>} : memref<1x63x128xf32, #tpu.memory_space<vmem>>, vector<1x63x128xf32>,
    return
  }
  func.func @transform_0(%arg0: i32) -> (i32, i32, i32) {
    %c0_i32 = arith.constant 0 : i32
    %c0_i32_0 = arith.constant 0 : i32
    %c0_i32_1 = arith.constant 0 : i32
    return %arg0, %c0_i32, %c0_i32_0 : i32, i32, i32
  }
  func.func @transform_1(%arg0: i32) -> (i32, i32, i32) {
    %c0_i32 = arith.constant 0 : i32
    %c0_i32_0 = arith.constant 0 : i32
    %c0_i32_1 = arith.constant 0 : i32
    %c0_i32_2 = arith.constant 0 : i32
    return %c0_i32, %c0_i32_0, %c0_i32_1 : i32, i32, i32
  }
  func.func @transform_2(%arg0: i32) -> (i32, i32) {
    %c0_i32 = arith.constant 0 : i32
    %c0_i32_0 = arith.constant 0 : i32
    %c0_i32_1 = arith.constant 0 : i32
    return %c0_i32, %c0_i32_0 : i32, i32
  }
  func.func @transform_3(%arg0: i32) -> (i32, i32, i32) {
    %c0_i32 = arith.constant 0 : i32
    %c0_i32_0 = arith.constant 0 : i32
    %c0_i32_1 = arith.constant 0 : i32
    return %arg0, %c0_i32, %c0_i32_0 : i32, i32, i32
  }
}

module attributes {stable_mosaic.version = 11 : i64} {
  func.func @_conv_kernel(%arg0: i32, %arg1: memref<1x51x128xf32, #tpu.memory_space<vmem>>, %arg2: memref<9x128x128xf32, #tpu.memory_space<vmem>>, %arg3: memref<1x128xf32, #tpu.memory_space<vmem>>, %arg4: memref<1x35x128xf32, #tpu.memory_space<vmem>>) attributes {dimension_semantics = [#tpu.dimension_semantics<parallel>], iteration_bounds = array<i64: 2>, scalar_prefetch = 0 : i64, scratch_operands = 0 : i64, tpu.core_type = #tpu.core_type<tc>, window_params = [{transform_indices = @transform_0, window_bounds = array<i64: 1, 51, 128>}, {pipeline_mode = #tpu.pipeline_mode<synchronous>, transform_indices = @transform_1, window_bounds = array<i64: 9, 128, 128>}, {pipeline_mode = #tpu.pipeline_mode<synchronous>, transform_indices = @transform_2, window_bounds = array<i64: 1, 128>}, {transform_indices = @transform_3, window_bounds = array<i64: 1, 35, 128>}]} {
    %c0 = arith.constant 0 : index
    %c0_0 = arith.constant 0 : index
    %c0_1 = arith.constant 0 : index
    %0 = vector.load %arg1[%c0, %c0_0, %c0_1] : memref<1x51x128xf32, #tpu.memory_space<vmem>>, vector<1x35x128xf32>
    %1 = vector.shape_cast %0 : vector<1x35x128xf32> to vector<35x128xf32>
    %c0_2 = arith.constant 0 : index
    %c0_3 = arith.constant 0 : index
    %c0_4 = arith.constant 0 : index
    %2 = vector.load %arg2[%c0_2, %c0_3, %c0_4] : memref<9x128x128xf32, #tpu.memory_space<vmem>>, vector<1x128x128xf32>
    %3 = vector.shape_cast %2 : vector<1x128x128xf32> to vector<128x128xf32>
    %cst = arith.constant dense<0.000000e+00> : vector<35x128xf32>
    %4 = tpu.matmul %1, %3, %cst {dimension_numbers = #tpu.dot_dimension_numbers<[1], [0], [0], [1], [0, 0, 1, 1], [], []>} : vector<35x128xf32>, vector<128x128xf32>, vector<35x128xf32> -> vector<35x128xf32>
    %c0_5 = arith.constant 0 : index
    %c0_6 = arith.constant 0 : index
    %c0_7 = arith.constant 0 : index
    %5 = vector.load %arg4[%c0_5, %c0_6, %c0_7] : memref<1x35x128xf32, #tpu.memory_space<vmem>>, vector<1x35x128xf32>
    %6 = vector.shape_cast %5 : vector<1x35x128xf32> to vector<35x128xf32>
    %7 = vector.shape_cast %4 : vector<35x128xf32> to vector<1x35x128xf32>
    tpu.vector_store %arg4[%c0_5, %c0_6, %c0_7], %7 {strides = array<i32>} : memref<1x35x128xf32, #tpu.memory_space<vmem>>, vector<1x35x128xf32>,
    %c0_8 = arith.constant 0 : index
    %c0_9 = arith.constant 0 : index
    %c0_10 = arith.constant 0 : index
    %8 = vector.load %arg4[%c0_8, %c0_9, %c0_10] : memref<1x35x128xf32, #tpu.memory_space<vmem>>, vector<1x35x128xf32>
    %9 = vector.shape_cast %8 : vector<1x35x128xf32> to vector<35x128xf32>
    %c0_11 = arith.constant 0 : index
    %c1 = arith.constant 1 : index
    %c0_12 = arith.constant 0 : index
    %10 = vector.load %arg1[%c0_11, %c1, %c0_12] : memref<1x51x128xf32, #tpu.memory_space<vmem>>, vector<1x35x128xf32>
    %11 = vector.shape_cast %10 : vector<1x35x128xf32> to vector<35x128xf32>
    %c1_13 = arith.constant 1 : index
    %c0_14 = arith.constant 0 : index
    %c0_15 = arith.constant 0 : index
    %12 = vector.load %arg2[%c1_13, %c0_14, %c0_15] : memref<9x128x128xf32, #tpu.memory_space<vmem>>, vector<1x128x128xf32>
    %13 = vector.shape_cast %12 : vector<1x128x128xf32> to vector<128x128xf32>
    %cst_16 = arith.constant dense<0.000000e+00> : vector<35x128xf32>
    %14 = tpu.matmul %11, %13, %cst_16 {dimension_numbers = #tpu.dot_dimension_numbers<[1], [0], [0], [1], [0, 0, 1, 1], [], []>} : vector<35x128xf32>, vector<128x128xf32>, vector<35x128xf32> -> vector<35x128xf32>
    %15 = arith.addf %9, %14 : vector<35x128xf32>
    %c0_17 = arith.constant 0 : index
    %c0_18 = arith.constant 0 : index
    %c0_19 = arith.constant 0 : index
    %16 = vector.load %arg4[%c0_17, %c0_18, %c0_19] : memref<1x35x128xf32, #tpu.memory_space<vmem>>, vector<1x35x128xf32>
    %17 = vector.shape_cast %16 : vector<1x35x128xf32> to vector<35x128xf32>
    %18 = vector.shape_cast %15 : vector<35x128xf32> to vector<1x35x128xf32>
    tpu.vector_store %arg4[%c0_17, %c0_18, %c0_19], %18 {strides = array<i32>} : memref<1x35x128xf32, #tpu.memory_space<vmem>>, vector<1x35x128xf32>,
    %c0_20 = arith.constant 0 : index
    %c0_21 = arith.constant 0 : index
    %c0_22 = arith.constant 0 : index
    %19 = vector.load %arg4[%c0_20, %c0_21, %c0_22] : memref<1x35x128xf32, #tpu.memory_space<vmem>>, vector<1x35x128xf32>
    %20 = vector.shape_cast %19 : vector<1x35x128xf32> to vector<35x128xf32>
    %c0_23 = arith.constant 0 : index
    %c2 = arith.constant 2 : index
    %c0_24 = arith.constant 0 : index
    %21 = vector.load %arg1[%c0_23, %c2, %c0_24] : memref<1x51x128xf32, #tpu.memory_space<vmem>>, vector<1x35x128xf32>
    %22 = vector.shape_cast %21 : vector<1x35x128xf32> to vector<35x128xf32>
    %c2_25 = arith.constant 2 : index
    %c0_26 = arith.constant 0 : index
    %c0_27 = arith.constant 0 : index
    %23 = vector.load %arg2[%c2_25, %c0_26, %c0_27] : memref<9x128x128xf32, #tpu.memory_space<vmem>>, vector<1x128x128xf32>
    %24 = vector.shape_cast %23 : vector<1x128x128xf32> to vector<128x128xf32>
    %cst_28 = arith.constant dense<0.000000e+00> : vector<35x128xf32>
    %25 = tpu.matmul %22, %24, %cst_28 {dimension_numbers = #tpu.dot_dimension_numbers<[1], [0], [0], [1], [0, 0, 1, 1], [], []>} : vector<35x128xf32>, vector<128x128xf32>, vector<35x128xf32> -> vector<35x128xf32>
    %26 = arith.addf %20, %25 : vector<35x128xf32>
    %c0_29 = arith.constant 0 : index
    %c0_30 = arith.constant 0 : index
    %c0_31 = arith.constant 0 : index
    %27 = vector.load %arg4[%c0_29, %c0_30, %c0_31] : memref<1x35x128xf32, #tpu.memory_space<vmem>>, vector<1x35x128xf32>
    %28 = vector.shape_cast %27 : vector<1x35x128xf32> to vector<35x128xf32>
    %29 = vector.shape_cast %26 : vector<35x128xf32> to vector<1x35x128xf32>
    tpu.vector_store %arg4[%c0_29, %c0_30, %c0_31], %29 {strides = array<i32>} : memref<1x35x128xf32, #tpu.memory_space<vmem>>, vector<1x35x128xf32>,
    %c0_32 = arith.constant 0 : index
    %c0_33 = arith.constant 0 : index
    %c0_34 = arith.constant 0 : index
    %30 = vector.load %arg4[%c0_32, %c0_33, %c0_34] : memref<1x35x128xf32, #tpu.memory_space<vmem>>, vector<1x35x128xf32>
    %31 = vector.shape_cast %30 : vector<1x35x128xf32> to vector<35x128xf32>
    %c0_35 = arith.constant 0 : index
    %c7 = arith.constant 7 : index
    %c0_36 = arith.constant 0 : index
    %32 = vector.load %arg1[%c0_35, %c7, %c0_36] : memref<1x51x128xf32, #tpu.memory_space<vmem>>, vector<1x35x128xf32>
    %33 = vector.shape_cast %32 : vector<1x35x128xf32> to vector<35x128xf32>
    %c3 = arith.constant 3 : index
    %c0_37 = arith.constant 0 : index
    %c0_38 = arith.constant 0 : index
    %34 = vector.load %arg2[%c3, %c0_37, %c0_38] : memref<9x128x128xf32, #tpu.memory_space<vmem>>, vector<1x128x128xf32>
    %35 = vector.shape_cast %34 : vector<1x128x128xf32> to vector<128x128xf32>
    %cst_39 = arith.constant dense<0.000000e+00> : vector<35x128xf32>
    %36 = tpu.matmul %33, %35, %cst_39 {dimension_numbers = #tpu.dot_dimension_numbers<[1], [0], [0], [1], [0, 0, 1, 1], [], []>} : vector<35x128xf32>, vector<128x128xf32>, vector<35x128xf32> -> vector<35x128xf32>
    %37 = arith.addf %31, %36 : vector<35x128xf32>
    %c0_40 = arith.constant 0 : index
    %c0_41 = arith.constant 0 : index
    %c0_42 = arith.constant 0 : index
    %38 = vector.load %arg4[%c0_40, %c0_41, %c0_42] : memref<1x35x128xf32, #tpu.memory_space<vmem>>, vector<1x35x128xf32>
    %39 = vector.shape_cast %38 : vector<1x35x128xf32> to vector<35x128xf32>
    %40 = vector.shape_cast %37 : vector<35x128xf32> to vector<1x35x128xf32>
    tpu.vector_store %arg4[%c0_40, %c0_41, %c0_42], %40 {strides = array<i32>} : memref<1x35x128xf32, #tpu.memory_space<vmem>>, vector<1x35x128xf32>,
    %c0_43 = arith.constant 0 : index
    %c0_44 = arith.constant 0 : index
    %c0_45 = arith.constant 0 : index
    %41 = vector.load %arg4[%c0_43, %c0_44, %c0_45] : memref<1x35x128xf32, #tpu.memory_space<vmem>>, vector<1x35x128xf32>
    %42 = vector.shape_cast %41 : vector<1x35x128xf32> to vector<35x128xf32>
    %c0_46 = arith.constant 0 : index
    %c8 = arith.constant 8 : index
    %c0_47 = arith.constant 0 : index
    %43 = vector.load %arg1[%c0_46, %c8, %c0_47] : memref<1x51x128xf32, #tpu.memory_space<vmem>>, vector<1x35x128xf32>
    %44 = vector.shape_cast %43 : vector<1x35x128xf32> to vector<35x128xf32>
    %c4 = arith.constant 4 : index
    %c0_48 = arith.constant 0 : index
    %c0_49 = arith.constant 0 : index
    %45 = vector.load %arg2[%c4, %c0_48, %c0_49] : memref<9x128x128xf32, #tpu.memory_space<vmem>>, vector<1x128x128xf32>
    %46 = vector.shape_cast %45 : vector<1x128x128xf32> to vector<128x128xf32>
    %cst_50 = arith.constant dense<0.000000e+00> : vector<35x128xf32>
    %47 = tpu.matmul %44, %46, %cst_50 {dimension_numbers = #tpu.dot_dimension_numbers<[1], [0], [0], [1], [0, 0, 1, 1], [], []>} : vector<35x128xf32>, vector<128x128xf32>, vector<35x128xf32> -> vector<35x128xf32>
    %48 = arith.addf %42, %47 : vector<35x128xf32>
    %c0_51 = arith.constant 0 : index
    %c0_52 = arith.constant 0 : index
    %c0_53 = arith.constant 0 : index
    %49 = vector.load %arg4[%c0_51, %c0_52, %c0_53] : memref<1x35x128xf32, #tpu.memory_space<vmem>>, vector<1x35x128xf32>
    %50 = vector.shape_cast %49 : vector<1x35x128xf32> to vector<35x128xf32>
    %51 = vector.shape_cast %48 : vector<35x128xf32> to vector<1x35x128xf32>
    tpu.vector_store %arg4[%c0_51, %c0_52, %c0_53], %51 {strides = array<i32>} : memref<1x35x128xf32, #tpu.memory_space<vmem>>, vector<1x35x128xf32>,
    %c0_54 = arith.constant 0 : index
    %c0_55 = arith.constant 0 : index
    %c0_56 = arith.constant 0 : index
    %52 = vector.load %arg4[%c0_54, %c0_55, %c0_56] : memref<1x35x128xf32, #tpu.memory_space<vmem>>, vector<1x35x128xf32>
    %53 = vector.shape_cast %52 : vector<1x35x128xf32> to vector<35x128xf32>
    %c0_57 = arith.constant 0 : index
    %c9 = arith.constant 9 : index
    %c0_58 = arith.constant 0 : index
    %54 = vector.load %arg1[%c0_57, %c9, %c0_58] : memref<1x51x128xf32, #tpu.memory_space<vmem>>, vector<1x35x128xf32>
    %55 = vector.shape_cast %54 : vector<1x35x128xf32> to vector<35x128xf32>
    %c5 = arith.constant 5 : index
    %c0_59 = arith.constant 0 : index
    %c0_60 = arith.constant 0 : index
    %56 = vector.load %arg2[%c5, %c0_59, %c0_60] : memref<9x128x128xf32, #tpu.memory_space<vmem>>, vector<1x128x128xf32>
    %57 = vector.shape_cast %56 : vector<1x128x128xf32> to vector<128x128xf32>
    %cst_61 = arith.constant dense<0.000000e+00> : vector<35x128xf32>
    %58 = tpu.matmul %55, %57, %cst_61 {dimension_numbers = #tpu.dot_dimension_numbers<[1], [0], [0], [1], [0, 0, 1, 1], [], []>} : vector<35x128xf32>, vector<128x128xf32>, vector<35x128xf32> -> vector<35x128xf32>
    %59 = arith.addf %53, %58 : vector<35x128xf32>
    %c0_62 = arith.constant 0 : index
    %c0_63 = arith.constant 0 : index
    %c0_64 = arith.constant 0 : index
    %60 = vector.load %arg4[%c0_62, %c0_63, %c0_64] : memref<1x35x128xf32, #tpu.memory_space<vmem>>, vector<1x35x128xf32>
    %61 = vector.shape_cast %60 : vector<1x35x128xf32> to vector<35x128xf32>
    %62 = vector.shape_cast %59 : vector<35x128xf32> to vector<1x35x128xf32>
    tpu.vector_store %arg4[%c0_62, %c0_63, %c0_64], %62 {strides = array<i32>} : memref<1x35x128xf32, #tpu.memory_space<vmem>>, vector<1x35x128xf32>,
    %c0_65 = arith.constant 0 : index
    %c0_66 = arith.constant 0 : index
    %c0_67 = arith.constant 0 : index
    %63 = vector.load %arg4[%c0_65, %c0_66, %c0_67] : memref<1x35x128xf32, #tpu.memory_space<vmem>>, vector<1x35x128xf32>
    %64 = vector.shape_cast %63 : vector<1x35x128xf32> to vector<35x128xf32>
    %c0_68 = arith.constant 0 : index
    %c14 = arith.constant 14 : index
    %c0_69 = arith.constant 0 : index
    %65 = vector.load %arg1[%c0_68, %c14, %c0_69] : memref<1x51x128xf32, #tpu.memory_space<vmem>>, vector<1x35x128xf32>
    %66 = vector.shape_cast %65 : vector<1x35x128xf32> to vector<35x128xf32>
    %c6 = arith.constant 6 : index
    %c0_70 = arith.constant 0 : index
    %c0_71 = arith.constant 0 : index
    %67 = vector.load %arg2[%c6, %c0_70, %c0_71] : memref<9x128x128xf32, #tpu.memory_space<vmem>>, vector<1x128x128xf32>
    %68 = vector.shape_cast %67 : vector<1x128x128xf32> to vector<128x128xf32>
    %cst_72 = arith.constant dense<0.000000e+00> : vector<35x128xf32>
    %69 = tpu.matmul %66, %68, %cst_72 {dimension_numbers = #tpu.dot_dimension_numbers<[1], [0], [0], [1], [0, 0, 1, 1], [], []>} : vector<35x128xf32>, vector<128x128xf32>, vector<35x128xf32> -> vector<35x128xf32>
    %70 = arith.addf %64, %69 : vector<35x128xf32>
    %c0_73 = arith.constant 0 : index
    %c0_74 = arith.constant 0 : index
    %c0_75 = arith.constant 0 : index
    %71 = vector.load %arg4[%c0_73, %c0_74, %c0_75] : memref<1x35x128xf32, #tpu.memory_space<vmem>>, vector<1x35x128xf32>
    %72 = vector.shape_cast %71 : vector<1x35x128xf32> to vector<35x128xf32>
    %73 = vector.shape_cast %70 : vector<35x128xf32> to vector<1x35x128xf32>
    tpu.vector_store %arg4[%c0_73, %c0_74, %c0_75], %73 {strides = array<i32>} : memref<1x35x128xf32, #tpu.memory_space<vmem>>, vector<1x35x128xf32>,
    %c0_76 = arith.constant 0 : index
    %c0_77 = arith.constant 0 : index
    %c0_78 = arith.constant 0 : index
    %74 = vector.load %arg4[%c0_76, %c0_77, %c0_78] : memref<1x35x128xf32, #tpu.memory_space<vmem>>, vector<1x35x128xf32>
    %75 = vector.shape_cast %74 : vector<1x35x128xf32> to vector<35x128xf32>
    %c0_79 = arith.constant 0 : index
    %c15 = arith.constant 15 : index
    %c0_80 = arith.constant 0 : index
    %76 = vector.load %arg1[%c0_79, %c15, %c0_80] : memref<1x51x128xf32, #tpu.memory_space<vmem>>, vector<1x35x128xf32>
    %77 = vector.shape_cast %76 : vector<1x35x128xf32> to vector<35x128xf32>
    %c7_81 = arith.constant 7 : index
    %c0_82 = arith.constant 0 : index
    %c0_83 = arith.constant 0 : index
    %78 = vector.load %arg2[%c7_81, %c0_82, %c0_83] : memref<9x128x128xf32, #tpu.memory_space<vmem>>, vector<1x128x128xf32>
    %79 = vector.shape_cast %78 : vector<1x128x128xf32> to vector<128x128xf32>
    %cst_84 = arith.constant dense<0.000000e+00> : vector<35x128xf32>
    %80 = tpu.matmul %77, %79, %cst_84 {dimension_numbers = #tpu.dot_dimension_numbers<[1], [0], [0], [1], [0, 0, 1, 1], [], []>} : vector<35x128xf32>, vector<128x128xf32>, vector<35x128xf32> -> vector<35x128xf32>
    %81 = arith.addf %75, %80 : vector<35x128xf32>
    %c0_85 = arith.constant 0 : index
    %c0_86 = arith.constant 0 : index
    %c0_87 = arith.constant 0 : index
    %82 = vector.load %arg4[%c0_85, %c0_86, %c0_87] : memref<1x35x128xf32, #tpu.memory_space<vmem>>, vector<1x35x128xf32>
    %83 = vector.shape_cast %82 : vector<1x35x128xf32> to vector<35x128xf32>
    %84 = vector.shape_cast %81 : vector<35x128xf32> to vector<1x35x128xf32>
    tpu.vector_store %arg4[%c0_85, %c0_86, %c0_87], %84 {strides = array<i32>} : memref<1x35x128xf32, #tpu.memory_space<vmem>>, vector<1x35x128xf32>,
    %c0_88 = arith.constant 0 : index
    %c0_89 = arith.constant 0 : index
    %c0_90 = arith.constant 0 : index
    %85 = vector.load %arg4[%c0_88, %c0_89, %c0_90] : memref<1x35x128xf32, #tpu.memory_space<vmem>>, vector<1x35x128xf32>
    %86 = vector.shape_cast %85 : vector<1x35x128xf32> to vector<35x128xf32>
    %c0_91 = arith.constant 0 : index
    %c16 = arith.constant 16 : index
    %c0_92 = arith.constant 0 : index
    %87 = vector.load %arg1[%c0_91, %c16, %c0_92] : memref<1x51x128xf32, #tpu.memory_space<vmem>>, vector<1x35x128xf32>
    %88 = vector.shape_cast %87 : vector<1x35x128xf32> to vector<35x128xf32>
    %c8_93 = arith.constant 8 : index
    %c0_94 = arith.constant 0 : index
    %c0_95 = arith.constant 0 : index
    %89 = vector.load %arg2[%c8_93, %c0_94, %c0_95] : memref<9x128x128xf32, #tpu.memory_space<vmem>>, vector<1x128x128xf32>
    %90 = vector.shape_cast %89 : vector<1x128x128xf32> to vector<128x128xf32>
    %cst_96 = arith.constant dense<0.000000e+00> : vector<35x128xf32>
    %91 = tpu.matmul %88, %90, %cst_96 {dimension_numbers = #tpu.dot_dimension_numbers<[1], [0], [0], [1], [0, 0, 1, 1], [], []>} : vector<35x128xf32>, vector<128x128xf32>, vector<35x128xf32> -> vector<35x128xf32>
    %92 = arith.addf %86, %91 : vector<35x128xf32>
    %c0_97 = arith.constant 0 : index
    %c0_98 = arith.constant 0 : index
    %c0_99 = arith.constant 0 : index
    %93 = vector.load %arg4[%c0_97, %c0_98, %c0_99] : memref<1x35x128xf32, #tpu.memory_space<vmem>>, vector<1x35x128xf32>
    %94 = vector.shape_cast %93 : vector<1x35x128xf32> to vector<35x128xf32>
    %95 = vector.shape_cast %92 : vector<35x128xf32> to vector<1x35x128xf32>
    tpu.vector_store %arg4[%c0_97, %c0_98, %c0_99], %95 {strides = array<i32>} : memref<1x35x128xf32, #tpu.memory_space<vmem>>, vector<1x35x128xf32>,
    %c0_100 = arith.constant 0 : index
    %c0_101 = arith.constant 0 : index
    %c0_102 = arith.constant 0 : index
    %96 = vector.load %arg4[%c0_100, %c0_101, %c0_102] : memref<1x35x128xf32, #tpu.memory_space<vmem>>, vector<1x35x128xf32>
    %97 = vector.shape_cast %96 : vector<1x35x128xf32> to vector<35x128xf32>
    %c0_103 = arith.constant 0 : index
    %c0_104 = arith.constant 0 : index
    %98 = vector.load %arg3[%c0_103, %c0_104] : memref<1x128xf32, #tpu.memory_space<vmem>>, vector<1x128xf32>
    %99 = vector.broadcast %98 : vector<1x128xf32> to vector<35x128xf32>
    %100 = arith.addf %97, %99 : vector<35x128xf32>
    %cst_105 = arith.constant 0.000000e+00 : f32
    %101 = vector.broadcast %cst_105 : f32 to vector<35x128xf32>
    %102 = arith.maximumf %100, %101 : vector<35x128xf32>
    %c0_106 = arith.constant 0 : index
    %c0_107 = arith.constant 0 : index
    %c0_108 = arith.constant 0 : index
    %103 = vector.load %arg4[%c0_106, %c0_107, %c0_108] : memref<1x35x128xf32, #tpu.memory_space<vmem>>, vector<1x35x128xf32>
    %104 = vector.shape_cast %103 : vector<1x35x128xf32> to vector<35x128xf32>
    %105 = vector.shape_cast %102 : vector<35x128xf32> to vector<1x35x128xf32>
    tpu.vector_store %arg4[%c0_106, %c0_107, %c0_108], %105 {strides = array<i32>} : memref<1x35x128xf32, #tpu.memory_space<vmem>>, vector<1x35x128xf32>,
    return
  }
  func.func @transform_0(%arg0: i32) -> (i32, i32, i32) {
    %c0_i32 = arith.constant 0 : i32
    %c0_i32_0 = arith.constant 0 : i32
    %c0_i32_1 = arith.constant 0 : i32
    return %arg0, %c0_i32, %c0_i32_0 : i32, i32, i32
  }
  func.func @transform_1(%arg0: i32) -> (i32, i32, i32) {
    %c0_i32 = arith.constant 0 : i32
    %c0_i32_0 = arith.constant 0 : i32
    %c0_i32_1 = arith.constant 0 : i32
    %c0_i32_2 = arith.constant 0 : i32
    return %c0_i32, %c0_i32_0, %c0_i32_1 : i32, i32, i32
  }
  func.func @transform_2(%arg0: i32) -> (i32, i32) {
    %c0_i32 = arith.constant 0 : i32
    %c0_i32_0 = arith.constant 0 : i32
    %c0_i32_1 = arith.constant 0 : i32
    return %c0_i32, %c0_i32_0 : i32, i32
  }
  func.func @transform_3(%arg0: i32) -> (i32, i32, i32) {
    %c0_i32 = arith.constant 0 : i32
    %c0_i32_0 = arith.constant 0 : i32
    %c0_i32_1 = arith.constant 0 : i32
    return %arg0, %c0_i32, %c0_i32_0 : i32, i32, i32
  }
}

module attributes {stable_mosaic.version = 11 : i64} {
  func.func @_conv_kernel(%arg0: i32, %arg1: memref<1x37x128xf32, #tpu.memory_space<vmem>>, %arg2: memref<4x128x128xf32, #tpu.memory_space<vmem>>, %arg3: memref<1x128xf32, #tpu.memory_space<vmem>>, %arg4: memref<1x30x128xf32, #tpu.memory_space<vmem>>) attributes {dimension_semantics = [#tpu.dimension_semantics<parallel>], iteration_bounds = array<i64: 2>, scalar_prefetch = 0 : i64, scratch_operands = 0 : i64, tpu.core_type = #tpu.core_type<tc>, window_params = [{transform_indices = @transform_0, window_bounds = array<i64: 1, 37, 128>}, {pipeline_mode = #tpu.pipeline_mode<synchronous>, transform_indices = @transform_1, window_bounds = array<i64: 4, 128, 128>}, {pipeline_mode = #tpu.pipeline_mode<synchronous>, transform_indices = @transform_2, window_bounds = array<i64: 1, 128>}, {transform_indices = @transform_3, window_bounds = array<i64: 1, 30, 128>}]} {
    %c0 = arith.constant 0 : index
    %c0_0 = arith.constant 0 : index
    %c0_1 = arith.constant 0 : index
    %0 = vector.load %arg1[%c0, %c0_0, %c0_1] : memref<1x37x128xf32, #tpu.memory_space<vmem>>, vector<1x30x128xf32>
    %1 = vector.shape_cast %0 : vector<1x30x128xf32> to vector<30x128xf32>
    %c0_2 = arith.constant 0 : index
    %c0_3 = arith.constant 0 : index
    %c0_4 = arith.constant 0 : index
    %2 = vector.load %arg2[%c0_2, %c0_3, %c0_4] : memref<4x128x128xf32, #tpu.memory_space<vmem>>, vector<1x128x128xf32>
    %3 = vector.shape_cast %2 : vector<1x128x128xf32> to vector<128x128xf32>
    %cst = arith.constant dense<0.000000e+00> : vector<30x128xf32>
    %4 = tpu.matmul %1, %3, %cst {dimension_numbers = #tpu.dot_dimension_numbers<[1], [0], [0], [1], [0, 0, 1, 1], [], []>} : vector<30x128xf32>, vector<128x128xf32>, vector<30x128xf32> -> vector<30x128xf32>
    %c0_5 = arith.constant 0 : index
    %c0_6 = arith.constant 0 : index
    %c0_7 = arith.constant 0 : index
    %5 = vector.load %arg4[%c0_5, %c0_6, %c0_7] : memref<1x30x128xf32, #tpu.memory_space<vmem>>, vector<1x30x128xf32>
    %6 = vector.shape_cast %5 : vector<1x30x128xf32> to vector<30x128xf32>
    %7 = vector.shape_cast %4 : vector<30x128xf32> to vector<1x30x128xf32>
    tpu.vector_store %arg4[%c0_5, %c0_6, %c0_7], %7 {strides = array<i32>} : memref<1x30x128xf32, #tpu.memory_space<vmem>>, vector<1x30x128xf32>,
    %c0_8 = arith.constant 0 : index
    %c0_9 = arith.constant 0 : index
    %c0_10 = arith.constant 0 : index
    %8 = vector.load %arg4[%c0_8, %c0_9, %c0_10] : memref<1x30x128xf32, #tpu.memory_space<vmem>>, vector<1x30x128xf32>
    %9 = vector.shape_cast %8 : vector<1x30x128xf32> to vector<30x128xf32>
    %c0_11 = arith.constant 0 : index
    %c1 = arith.constant 1 : index
    %c0_12 = arith.constant 0 : index
    %10 = vector.load %arg1[%c0_11, %c1, %c0_12] : memref<1x37x128xf32, #tpu.memory_space<vmem>>, vector<1x30x128xf32>
    %11 = vector.shape_cast %10 : vector<1x30x128xf32> to vector<30x128xf32>
    %c1_13 = arith.constant 1 : index
    %c0_14 = arith.constant 0 : index
    %c0_15 = arith.constant 0 : index
    %12 = vector.load %arg2[%c1_13, %c0_14, %c0_15] : memref<4x128x128xf32, #tpu.memory_space<vmem>>, vector<1x128x128xf32>
    %13 = vector.shape_cast %12 : vector<1x128x128xf32> to vector<128x128xf32>
    %cst_16 = arith.constant dense<0.000000e+00> : vector<30x128xf32>
    %14 = tpu.matmul %11, %13, %cst_16 {dimension_numbers = #tpu.dot_dimension_numbers<[1], [0], [0], [1], [0, 0, 1, 1], [], []>} : vector<30x128xf32>, vector<128x128xf32>, vector<30x128xf32> -> vector<30x128xf32>
    %15 = arith.addf %9, %14 : vector<30x128xf32>
    %c0_17 = arith.constant 0 : index
    %c0_18 = arith.constant 0 : index
    %c0_19 = arith.constant 0 : index
    %16 = vector.load %arg4[%c0_17, %c0_18, %c0_19] : memref<1x30x128xf32, #tpu.memory_space<vmem>>, vector<1x30x128xf32>
    %17 = vector.shape_cast %16 : vector<1x30x128xf32> to vector<30x128xf32>
    %18 = vector.shape_cast %15 : vector<30x128xf32> to vector<1x30x128xf32>
    tpu.vector_store %arg4[%c0_17, %c0_18, %c0_19], %18 {strides = array<i32>} : memref<1x30x128xf32, #tpu.memory_space<vmem>>, vector<1x30x128xf32>,
    %c0_20 = arith.constant 0 : index
    %c0_21 = arith.constant 0 : index
    %c0_22 = arith.constant 0 : index
    %19 = vector.load %arg4[%c0_20, %c0_21, %c0_22] : memref<1x30x128xf32, #tpu.memory_space<vmem>>, vector<1x30x128xf32>
    %20 = vector.shape_cast %19 : vector<1x30x128xf32> to vector<30x128xf32>
    %c0_23 = arith.constant 0 : index
    %c6 = arith.constant 6 : index
    %c0_24 = arith.constant 0 : index
    %21 = vector.load %arg1[%c0_23, %c6, %c0_24] : memref<1x37x128xf32, #tpu.memory_space<vmem>>, vector<1x30x128xf32>
    %22 = vector.shape_cast %21 : vector<1x30x128xf32> to vector<30x128xf32>
    %c2 = arith.constant 2 : index
    %c0_25 = arith.constant 0 : index
    %c0_26 = arith.constant 0 : index
    %23 = vector.load %arg2[%c2, %c0_25, %c0_26] : memref<4x128x128xf32, #tpu.memory_space<vmem>>, vector<1x128x128xf32>
    %24 = vector.shape_cast %23 : vector<1x128x128xf32> to vector<128x128xf32>
    %cst_27 = arith.constant dense<0.000000e+00> : vector<30x128xf32>
    %25 = tpu.matmul %22, %24, %cst_27 {dimension_numbers = #tpu.dot_dimension_numbers<[1], [0], [0], [1], [0, 0, 1, 1], [], []>} : vector<30x128xf32>, vector<128x128xf32>, vector<30x128xf32> -> vector<30x128xf32>
    %26 = arith.addf %20, %25 : vector<30x128xf32>
    %c0_28 = arith.constant 0 : index
    %c0_29 = arith.constant 0 : index
    %c0_30 = arith.constant 0 : index
    %27 = vector.load %arg4[%c0_28, %c0_29, %c0_30] : memref<1x30x128xf32, #tpu.memory_space<vmem>>, vector<1x30x128xf32>
    %28 = vector.shape_cast %27 : vector<1x30x128xf32> to vector<30x128xf32>
    %29 = vector.shape_cast %26 : vector<30x128xf32> to vector<1x30x128xf32>
    tpu.vector_store %arg4[%c0_28, %c0_29, %c0_30], %29 {strides = array<i32>} : memref<1x30x128xf32, #tpu.memory_space<vmem>>, vector<1x30x128xf32>,
    %c0_31 = arith.constant 0 : index
    %c0_32 = arith.constant 0 : index
    %c0_33 = arith.constant 0 : index
    %30 = vector.load %arg4[%c0_31, %c0_32, %c0_33] : memref<1x30x128xf32, #tpu.memory_space<vmem>>, vector<1x30x128xf32>
    %31 = vector.shape_cast %30 : vector<1x30x128xf32> to vector<30x128xf32>
    %c0_34 = arith.constant 0 : index
    %c7 = arith.constant 7 : index
    %c0_35 = arith.constant 0 : index
    %32 = vector.load %arg1[%c0_34, %c7, %c0_35] : memref<1x37x128xf32, #tpu.memory_space<vmem>>, vector<1x30x128xf32>
    %33 = vector.shape_cast %32 : vector<1x30x128xf32> to vector<30x128xf32>
    %c3 = arith.constant 3 : index
    %c0_36 = arith.constant 0 : index
    %c0_37 = arith.constant 0 : index
    %34 = vector.load %arg2[%c3, %c0_36, %c0_37] : memref<4x128x128xf32, #tpu.memory_space<vmem>>, vector<1x128x128xf32>
    %35 = vector.shape_cast %34 : vector<1x128x128xf32> to vector<128x128xf32>
    %cst_38 = arith.constant dense<0.000000e+00> : vector<30x128xf32>
    %36 = tpu.matmul %33, %35, %cst_38 {dimension_numbers = #tpu.dot_dimension_numbers<[1], [0], [0], [1], [0, 0, 1, 1], [], []>} : vector<30x128xf32>, vector<128x128xf32>, vector<30x128xf32> -> vector<30x128xf32>
    %37 = arith.addf %31, %36 : vector<30x128xf32>
    %c0_39 = arith.constant 0 : index
    %c0_40 = arith.constant 0 : index
    %c0_41 = arith.constant 0 : index
    %38 = vector.load %arg4[%c0_39, %c0_40, %c0_41] : memref<1x30x128xf32, #tpu.memory_space<vmem>>, vector<1x30x128xf32>
    %39 = vector.shape_cast %38 : vector<1x30x128xf32> to vector<30x128xf32>
    %40 = vector.shape_cast %37 : vector<30x128xf32> to vector<1x30x128xf32>
    tpu.vector_store %arg4[%c0_39, %c0_40, %c0_41], %40 {strides = array<i32>} : memref<1x30x128xf32, #tpu.memory_space<vmem>>, vector<1x30x128xf32>,
    %c0_42 = arith.constant 0 : index
    %c0_43 = arith.constant 0 : index
    %c0_44 = arith.constant 0 : index
    %41 = vector.load %arg4[%c0_42, %c0_43, %c0_44] : memref<1x30x128xf32, #tpu.memory_space<vmem>>, vector<1x30x128xf32>
    %42 = vector.shape_cast %41 : vector<1x30x128xf32> to vector<30x128xf32>
    %c0_45 = arith.constant 0 : index
    %c0_46 = arith.constant 0 : index
    %43 = vector.load %arg3[%c0_45, %c0_46] : memref<1x128xf32, #tpu.memory_space<vmem>>, vector<1x128xf32>
    %44 = vector.broadcast %43 : vector<1x128xf32> to vector<30x128xf32>
    %45 = arith.addf %42, %44 : vector<30x128xf32>
    %cst_47 = arith.constant 0.000000e+00 : f32
    %46 = vector.broadcast %cst_47 : f32 to vector<30x128xf32>
    %47 = arith.maximumf %45, %46 : vector<30x128xf32>
    %c0_48 = arith.constant 0 : index
    %c0_49 = arith.constant 0 : index
    %c0_50 = arith.constant 0 : index
    %48 = vector.load %arg4[%c0_48, %c0_49, %c0_50] : memref<1x30x128xf32, #tpu.memory_space<vmem>>, vector<1x30x128xf32>
    %49 = vector.shape_cast %48 : vector<1x30x128xf32> to vector<30x128xf32>
    %50 = vector.shape_cast %47 : vector<30x128xf32> to vector<1x30x128xf32>
    tpu.vector_store %arg4[%c0_48, %c0_49, %c0_50], %50 {strides = array<i32>} : memref<1x30x128xf32, #tpu.memory_space<vmem>>, vector<1x30x128xf32>,
    return
  }
  func.func @transform_0(%arg0: i32) -> (i32, i32, i32) {
    %c0_i32 = arith.constant 0 : i32
    %c0_i32_0 = arith.constant 0 : i32
    %c0_i32_1 = arith.constant 0 : i32
    return %arg0, %c0_i32, %c0_i32_0 : i32, i32, i32
  }
  func.func @transform_1(%arg0: i32) -> (i32, i32, i32) {
    %c0_i32 = arith.constant 0 : i32
    %c0_i32_0 = arith.constant 0 : i32
    %c0_i32_1 = arith.constant 0 : i32
    %c0_i32_2 = arith.constant 0 : i32
    return %c0_i32, %c0_i32_0, %c0_i32_1 : i32, i32, i32
  }
  func.func @transform_2(%arg0: i32) -> (i32, i32) {
    %c0_i32 = arith.constant 0 : i32
    %c0_i32_0 = arith.constant 0 : i32
    %c0_i32_1 = arith.constant 0 : i32
    return %c0_i32, %c0_i32_0 : i32, i32
  }
  func.func @transform_3(%arg0: i32) -> (i32, i32, i32) {
    %c0_i32 = arith.constant 0 : i32
    %c0_i32_0 = arith.constant 0 : i32
    %c0_i32_1 = arith.constant 0 : i32
    return %arg0, %c0_i32, %c0_i32_0 : i32, i32, i32
  }
}

module attributes {stable_mosaic.version = 11 : i64} {
  func.func @_conv_kernel(%arg0: i32, %arg1: memref<1x26x128xf32, #tpu.memory_space<vmem>>, %arg2: memref<4x128x128xf32, #tpu.memory_space<vmem>>, %arg3: memref<1x128xf32, #tpu.memory_space<vmem>>, %arg4: memref<1x20x128xf32, #tpu.memory_space<vmem>>) attributes {dimension_semantics = [#tpu.dimension_semantics<parallel>], iteration_bounds = array<i64: 2>, scalar_prefetch = 0 : i64, scratch_operands = 0 : i64, tpu.core_type = #tpu.core_type<tc>, window_params = [{transform_indices = @transform_0, window_bounds = array<i64: 1, 26, 128>}, {pipeline_mode = #tpu.pipeline_mode<synchronous>, transform_indices = @transform_1, window_bounds = array<i64: 4, 128, 128>}, {pipeline_mode = #tpu.pipeline_mode<synchronous>, transform_indices = @transform_2, window_bounds = array<i64: 1, 128>}, {transform_indices = @transform_3, window_bounds = array<i64: 1, 20, 128>}]} {
    %c0 = arith.constant 0 : index
    %c0_0 = arith.constant 0 : index
    %c0_1 = arith.constant 0 : index
    %0 = vector.load %arg1[%c0, %c0_0, %c0_1] : memref<1x26x128xf32, #tpu.memory_space<vmem>>, vector<1x20x128xf32>
    %1 = vector.shape_cast %0 : vector<1x20x128xf32> to vector<20x128xf32>
    %c0_2 = arith.constant 0 : index
    %c0_3 = arith.constant 0 : index
    %c0_4 = arith.constant 0 : index
    %2 = vector.load %arg2[%c0_2, %c0_3, %c0_4] : memref<4x128x128xf32, #tpu.memory_space<vmem>>, vector<1x128x128xf32>
    %3 = vector.shape_cast %2 : vector<1x128x128xf32> to vector<128x128xf32>
    %cst = arith.constant dense<0.000000e+00> : vector<20x128xf32>
    %4 = tpu.matmul %1, %3, %cst {dimension_numbers = #tpu.dot_dimension_numbers<[1], [0], [0], [1], [0, 0, 1, 1], [], []>} : vector<20x128xf32>, vector<128x128xf32>, vector<20x128xf32> -> vector<20x128xf32>
    %c0_5 = arith.constant 0 : index
    %c0_6 = arith.constant 0 : index
    %c0_7 = arith.constant 0 : index
    %5 = vector.load %arg4[%c0_5, %c0_6, %c0_7] : memref<1x20x128xf32, #tpu.memory_space<vmem>>, vector<1x20x128xf32>
    %6 = vector.shape_cast %5 : vector<1x20x128xf32> to vector<20x128xf32>
    %7 = vector.shape_cast %4 : vector<20x128xf32> to vector<1x20x128xf32>
    tpu.vector_store %arg4[%c0_5, %c0_6, %c0_7], %7 {strides = array<i32>} : memref<1x20x128xf32, #tpu.memory_space<vmem>>, vector<1x20x128xf32>,
    %c0_8 = arith.constant 0 : index
    %c0_9 = arith.constant 0 : index
    %c0_10 = arith.constant 0 : index
    %8 = vector.load %arg4[%c0_8, %c0_9, %c0_10] : memref<1x20x128xf32, #tpu.memory_space<vmem>>, vector<1x20x128xf32>
    %9 = vector.shape_cast %8 : vector<1x20x128xf32> to vector<20x128xf32>
    %c0_11 = arith.constant 0 : index
    %c1 = arith.constant 1 : index
    %c0_12 = arith.constant 0 : index
    %10 = vector.load %arg1[%c0_11, %c1, %c0_12] : memref<1x26x128xf32, #tpu.memory_space<vmem>>, vector<1x20x128xf32>
    %11 = vector.shape_cast %10 : vector<1x20x128xf32> to vector<20x128xf32>
    %c1_13 = arith.constant 1 : index
    %c0_14 = arith.constant 0 : index
    %c0_15 = arith.constant 0 : index
    %12 = vector.load %arg2[%c1_13, %c0_14, %c0_15] : memref<4x128x128xf32, #tpu.memory_space<vmem>>, vector<1x128x128xf32>
    %13 = vector.shape_cast %12 : vector<1x128x128xf32> to vector<128x128xf32>
    %cst_16 = arith.constant dense<0.000000e+00> : vector<20x128xf32>
    %14 = tpu.matmul %11, %13, %cst_16 {dimension_numbers = #tpu.dot_dimension_numbers<[1], [0], [0], [1], [0, 0, 1, 1], [], []>} : vector<20x128xf32>, vector<128x128xf32>, vector<20x128xf32> -> vector<20x128xf32>
    %15 = arith.addf %9, %14 : vector<20x128xf32>
    %c0_17 = arith.constant 0 : index
    %c0_18 = arith.constant 0 : index
    %c0_19 = arith.constant 0 : index
    %16 = vector.load %arg4[%c0_17, %c0_18, %c0_19] : memref<1x20x128xf32, #tpu.memory_space<vmem>>, vector<1x20x128xf32>
    %17 = vector.shape_cast %16 : vector<1x20x128xf32> to vector<20x128xf32>
    %18 = vector.shape_cast %15 : vector<20x128xf32> to vector<1x20x128xf32>
    tpu.vector_store %arg4[%c0_17, %c0_18, %c0_19], %18 {strides = array<i32>} : memref<1x20x128xf32, #tpu.memory_space<vmem>>, vector<1x20x128xf32>,
    %c0_20 = arith.constant 0 : index
    %c0_21 = arith.constant 0 : index
    %c0_22 = arith.constant 0 : index
    %19 = vector.load %arg4[%c0_20, %c0_21, %c0_22] : memref<1x20x128xf32, #tpu.memory_space<vmem>>, vector<1x20x128xf32>
    %20 = vector.shape_cast %19 : vector<1x20x128xf32> to vector<20x128xf32>
    %c0_23 = arith.constant 0 : index
    %c5 = arith.constant 5 : index
    %c0_24 = arith.constant 0 : index
    %21 = vector.load %arg1[%c0_23, %c5, %c0_24] : memref<1x26x128xf32, #tpu.memory_space<vmem>>, vector<1x20x128xf32>
    %22 = vector.shape_cast %21 : vector<1x20x128xf32> to vector<20x128xf32>
    %c2 = arith.constant 2 : index
    %c0_25 = arith.constant 0 : index
    %c0_26 = arith.constant 0 : index
    %23 = vector.load %arg2[%c2, %c0_25, %c0_26] : memref<4x128x128xf32, #tpu.memory_space<vmem>>, vector<1x128x128xf32>
    %24 = vector.shape_cast %23 : vector<1x128x128xf32> to vector<128x128xf32>
    %cst_27 = arith.constant dense<0.000000e+00> : vector<20x128xf32>
    %25 = tpu.matmul %22, %24, %cst_27 {dimension_numbers = #tpu.dot_dimension_numbers<[1], [0], [0], [1], [0, 0, 1, 1], [], []>} : vector<20x128xf32>, vector<128x128xf32>, vector<20x128xf32> -> vector<20x128xf32>
    %26 = arith.addf %20, %25 : vector<20x128xf32>
    %c0_28 = arith.constant 0 : index
    %c0_29 = arith.constant 0 : index
    %c0_30 = arith.constant 0 : index
    %27 = vector.load %arg4[%c0_28, %c0_29, %c0_30] : memref<1x20x128xf32, #tpu.memory_space<vmem>>, vector<1x20x128xf32>
    %28 = vector.shape_cast %27 : vector<1x20x128xf32> to vector<20x128xf32>
    %29 = vector.shape_cast %26 : vector<20x128xf32> to vector<1x20x128xf32>
    tpu.vector_store %arg4[%c0_28, %c0_29, %c0_30], %29 {strides = array<i32>} : memref<1x20x128xf32, #tpu.memory_space<vmem>>, vector<1x20x128xf32>,
    %c0_31 = arith.constant 0 : index
    %c0_32 = arith.constant 0 : index
    %c0_33 = arith.constant 0 : index
    %30 = vector.load %arg4[%c0_31, %c0_32, %c0_33] : memref<1x20x128xf32, #tpu.memory_space<vmem>>, vector<1x20x128xf32>
    %31 = vector.shape_cast %30 : vector<1x20x128xf32> to vector<20x128xf32>
    %c0_34 = arith.constant 0 : index
    %c6 = arith.constant 6 : index
    %c0_35 = arith.constant 0 : index
    %32 = vector.load %arg1[%c0_34, %c6, %c0_35] : memref<1x26x128xf32, #tpu.memory_space<vmem>>, vector<1x20x128xf32>
    %33 = vector.shape_cast %32 : vector<1x20x128xf32> to vector<20x128xf32>
    %c3 = arith.constant 3 : index
    %c0_36 = arith.constant 0 : index
    %c0_37 = arith.constant 0 : index
    %34 = vector.load %arg2[%c3, %c0_36, %c0_37] : memref<4x128x128xf32, #tpu.memory_space<vmem>>, vector<1x128x128xf32>
    %35 = vector.shape_cast %34 : vector<1x128x128xf32> to vector<128x128xf32>
    %cst_38 = arith.constant dense<0.000000e+00> : vector<20x128xf32>
    %36 = tpu.matmul %33, %35, %cst_38 {dimension_numbers = #tpu.dot_dimension_numbers<[1], [0], [0], [1], [0, 0, 1, 1], [], []>} : vector<20x128xf32>, vector<128x128xf32>, vector<20x128xf32> -> vector<20x128xf32>
    %37 = arith.addf %31, %36 : vector<20x128xf32>
    %c0_39 = arith.constant 0 : index
    %c0_40 = arith.constant 0 : index
    %c0_41 = arith.constant 0 : index
    %38 = vector.load %arg4[%c0_39, %c0_40, %c0_41] : memref<1x20x128xf32, #tpu.memory_space<vmem>>, vector<1x20x128xf32>
    %39 = vector.shape_cast %38 : vector<1x20x128xf32> to vector<20x128xf32>
    %40 = vector.shape_cast %37 : vector<20x128xf32> to vector<1x20x128xf32>
    tpu.vector_store %arg4[%c0_39, %c0_40, %c0_41], %40 {strides = array<i32>} : memref<1x20x128xf32, #tpu.memory_space<vmem>>, vector<1x20x128xf32>,
    %c0_42 = arith.constant 0 : index
    %c0_43 = arith.constant 0 : index
    %c0_44 = arith.constant 0 : index
    %41 = vector.load %arg4[%c0_42, %c0_43, %c0_44] : memref<1x20x128xf32, #tpu.memory_space<vmem>>, vector<1x20x128xf32>
    %42 = vector.shape_cast %41 : vector<1x20x128xf32> to vector<20x128xf32>
    %c0_45 = arith.constant 0 : index
    %c0_46 = arith.constant 0 : index
    %43 = vector.load %arg3[%c0_45, %c0_46] : memref<1x128xf32, #tpu.memory_space<vmem>>, vector<1x128xf32>
    %44 = vector.broadcast %43 : vector<1x128xf32> to vector<20x128xf32>
    %45 = arith.addf %42, %44 : vector<20x128xf32>
    %cst_47 = arith.constant 0.000000e+00 : f32
    %46 = vector.broadcast %cst_47 : f32 to vector<20x128xf32>
    %47 = arith.maximumf %45, %46 : vector<20x128xf32>
    %c0_48 = arith.constant 0 : index
    %c0_49 = arith.constant 0 : index
    %c0_50 = arith.constant 0 : index
    %48 = vector.load %arg4[%c0_48, %c0_49, %c0_50] : memref<1x20x128xf32, #tpu.memory_space<vmem>>, vector<1x20x128xf32>
    %49 = vector.shape_cast %48 : vector<1x20x128xf32> to vector<20x128xf32>
    %50 = vector.shape_cast %47 : vector<20x128xf32> to vector<1x20x128xf32>
    tpu.vector_store %arg4[%c0_48, %c0_49, %c0_50], %50 {strides = array<i32>} : memref<1x20x128xf32, #tpu.memory_space<vmem>>, vector<1x20x128xf32>,
    return
  }
  func.func @transform_0(%arg0: i32) -> (i32, i32, i32) {
    %c0_i32 = arith.constant 0 : i32
    %c0_i32_0 = arith.constant 0 : i32
    %c0_i32_1 = arith.constant 0 : i32
    return %arg0, %c0_i32, %c0_i32_0 : i32, i32, i32
  }
  func.func @transform_1(%arg0: i32) -> (i32, i32, i32) {
    %c0_i32 = arith.constant 0 : i32
    %c0_i32_0 = arith.constant 0 : i32
    %c0_i32_1 = arith.constant 0 : i32
    %c0_i32_2 = arith.constant 0 : i32
    return %c0_i32, %c0_i32_0, %c0_i32_1 : i32, i32, i32
  }
  func.func @transform_2(%arg0: i32) -> (i32, i32) {
    %c0_i32 = arith.constant 0 : i32
    %c0_i32_0 = arith.constant 0 : i32
    %c0_i32_1 = arith.constant 0 : i32
    return %c0_i32, %c0_i32_0 : i32, i32
  }
  func.func @transform_3(%arg0: i32) -> (i32, i32, i32) {
    %c0_i32 = arith.constant 0 : i32
    %c0_i32_0 = arith.constant 0 : i32
    %c0_i32_1 = arith.constant 0 : i32
    return %arg0, %c0_i32, %c0_i32_0 : i32, i32, i32
  }
}

module attributes {stable_mosaic.version = 11 : i64} {
  func.func @_head_kernel(%arg0: i32, %arg1: memref<1x4x128xf32, #tpu.memory_space<vmem>>, %arg2: memref<128x128xf32, #tpu.memory_space<vmem>>, %arg3: memref<1x128xf32, #tpu.memory_space<vmem>>, %arg4: memref<128x128xf32, #tpu.memory_space<vmem>>, %arg5: memref<1x128xf32, #tpu.memory_space<vmem>>, %arg6: memref<128x128xf32, #tpu.memory_space<vmem>>, %arg7: memref<1x128xf32, #tpu.memory_space<vmem>>, %arg8: memref<4x128x128xf32, #tpu.memory_space<vmem>>, %arg9: memref<1x128xf32, #tpu.memory_space<vmem>>, %arg10: memref<1x1x128xf32, #tpu.memory_space<vmem>>) attributes {dimension_semantics = [#tpu.dimension_semantics<parallel>], iteration_bounds = array<i64: 2>, scalar_prefetch = 0 : i64, scratch_operands = 0 : i64, tpu.core_type = #tpu.core_type<tc>, window_params = [{transform_indices = @transform_0, window_bounds = array<i64: 1, 4, 128>}, {pipeline_mode = #tpu.pipeline_mode<synchronous>, transform_indices = @transform_1, window_bounds = array<i64: 128, 128>}, {pipeline_mode = #tpu.pipeline_mode<synchronous>, transform_indices = @transform_2, window_bounds = array<i64: 1, 128>}, {pipeline_mode = #tpu.pipeline_mode<synchronous>, transform_indices = @transform_3, window_bounds = array<i64: 128, 128>}, {pipeline_mode = #tpu.pipeline_mode<synchronous>, transform_indices = @transform_4, window_bounds = array<i64: 1, 128>}, {pipeline_mode = #tpu.pipeline_mode<synchronous>, transform_indices = @transform_5, window_bounds = array<i64: 128, 128>}, {pipeline_mode = #tpu.pipeline_mode<synchronous>, transform_indices = @transform_6, window_bounds = array<i64: 1, 128>}, {pipeline_mode = #tpu.pipeline_mode<synchronous>, transform_indices = @transform_7, window_bounds = array<i64: 4, 128, 128>}, {pipeline_mode = #tpu.pipeline_mode<synchronous>, transform_indices = @transform_8, window_bounds = array<i64: 1, 128>}, {transform_indices = @transform_9, window_bounds = array<i64: 1, 1, 128>}]} {
    %c0 = arith.constant 0 : index
    %c0_0 = arith.constant 0 : index
    %c0_1 = arith.constant 0 : index
    %0 = vector.load %arg1[%c0, %c0_0, %c0_1] : memref<1x4x128xf32, #tpu.memory_space<vmem>>, vector<1x4x128xf32>
    %1 = vector.shape_cast %0 : vector<1x4x128xf32> to vector<4x128xf32>
    %c0_2 = arith.constant 0 : index
    %c0_3 = arith.constant 0 : index
    %2 = vector.load %arg2[%c0_2, %c0_3] : memref<128x128xf32, #tpu.memory_space<vmem>>, vector<128x128xf32>
    %cst = arith.constant dense<0.000000e+00> : vector<4x128xf32>
    %3 = tpu.matmul %1, %2, %cst {dimension_numbers = #tpu.dot_dimension_numbers<[1], [0], [0], [1], [0, 0, 1, 1], [], []>} : vector<4x128xf32>, vector<128x128xf32>, vector<4x128xf32> -> vector<4x128xf32>
    %c0_4 = arith.constant 0 : index
    %c0_5 = arith.constant 0 : index
    %4 = vector.load %arg3[%c0_4, %c0_5] : memref<1x128xf32, #tpu.memory_space<vmem>>, vector<1x128xf32>
    %5 = vector.broadcast %4 : vector<1x128xf32> to vector<4x128xf32>
    %6 = arith.addf %3, %5 : vector<4x128xf32>
    %cst_6 = arith.constant 0.000000e+00 : f32
    %7 = vector.broadcast %cst_6 : f32 to vector<4x128xf32>
    %8 = arith.maximumf %6, %7 : vector<4x128xf32>
    %c0_7 = arith.constant 0 : index
    %c0_8 = arith.constant 0 : index
    %9 = vector.load %arg4[%c0_7, %c0_8] : memref<128x128xf32, #tpu.memory_space<vmem>>, vector<128x128xf32>
    %cst_9 = arith.constant dense<0.000000e+00> : vector<4x128xf32>
    %10 = tpu.matmul %8, %9, %cst_9 {dimension_numbers = #tpu.dot_dimension_numbers<[1], [0], [0], [1], [0, 0, 1, 1], [], []>} : vector<4x128xf32>, vector<128x128xf32>, vector<4x128xf32> -> vector<4x128xf32>
    %c0_10 = arith.constant 0 : index
    %c0_11 = arith.constant 0 : index
    %11 = vector.load %arg5[%c0_10, %c0_11] : memref<1x128xf32, #tpu.memory_space<vmem>>, vector<1x128xf32>
    %12 = vector.broadcast %11 : vector<1x128xf32> to vector<4x128xf32>
    %13 = arith.addf %10, %12 : vector<4x128xf32>
    %cst_12 = arith.constant 0.000000e+00 : f32
    %14 = vector.broadcast %cst_12 : f32 to vector<4x128xf32>
    %15 = arith.maximumf %13, %14 : vector<4x128xf32>
    %c0_13 = arith.constant 0 : index
    %c0_14 = arith.constant 0 : index
    %16 = vector.load %arg6[%c0_13, %c0_14] : memref<128x128xf32, #tpu.memory_space<vmem>>, vector<128x128xf32>
    %cst_15 = arith.constant dense<0.000000e+00> : vector<4x128xf32>
    %17 = tpu.matmul %15, %16, %cst_15 {dimension_numbers = #tpu.dot_dimension_numbers<[1], [0], [0], [1], [0, 0, 1, 1], [], []>} : vector<4x128xf32>, vector<128x128xf32>, vector<4x128xf32> -> vector<4x128xf32>
    %c0_16 = arith.constant 0 : index
    %c0_17 = arith.constant 0 : index
    %18 = vector.load %arg7[%c0_16, %c0_17] : memref<1x128xf32, #tpu.memory_space<vmem>>, vector<1x128xf32>
    %19 = vector.broadcast %18 : vector<1x128xf32> to vector<4x128xf32>
    %20 = arith.addf %17, %19 : vector<4x128xf32>
    %cst_18 = arith.constant 0.000000e+00 : f32
    %21 = vector.broadcast %cst_18 : f32 to vector<4x128xf32>
    %22 = arith.maximumf %20, %21 : vector<4x128xf32>
    %23 = vector.extract_strided_slice %22 {offsets = [0, 0], sizes = [1, 128], strides = [1, 1]} : vector<4x128xf32> to vector<1x128xf32>
    %c0_19 = arith.constant 0 : index
    %c0_20 = arith.constant 0 : index
    %c0_21 = arith.constant 0 : index
    %24 = vector.load %arg8[%c0_19, %c0_20, %c0_21] : memref<4x128x128xf32, #tpu.memory_space<vmem>>, vector<1x128x128xf32>
    %25 = vector.shape_cast %24 : vector<1x128x128xf32> to vector<128x128xf32>
    %cst_22 = arith.constant dense<0.000000e+00> : vector<1x128xf32>
    %26 = tpu.matmul %23, %25, %cst_22 {dimension_numbers = #tpu.dot_dimension_numbers<[1], [0], [0], [1], [0, 0, 1, 1], [], []>} : vector<1x128xf32>, vector<128x128xf32>, vector<1x128xf32> -> vector<1x128xf32>
    %27 = vector.extract_strided_slice %22 {offsets = [1, 0], sizes = [1, 128], strides = [1, 1]} : vector<4x128xf32> to vector<1x128xf32>
    %c1 = arith.constant 1 : index
    %c0_23 = arith.constant 0 : index
    %c0_24 = arith.constant 0 : index
    %28 = vector.load %arg8[%c1, %c0_23, %c0_24] : memref<4x128x128xf32, #tpu.memory_space<vmem>>, vector<1x128x128xf32>
    %29 = vector.shape_cast %28 : vector<1x128x128xf32> to vector<128x128xf32>
    %cst_25 = arith.constant dense<0.000000e+00> : vector<1x128xf32>
    %30 = tpu.matmul %27, %29, %cst_25 {dimension_numbers = #tpu.dot_dimension_numbers<[1], [0], [0], [1], [0, 0, 1, 1], [], []>} : vector<1x128xf32>, vector<128x128xf32>, vector<1x128xf32> -> vector<1x128xf32>
    %31 = arith.addf %26, %30 : vector<1x128xf32>
    %32 = vector.extract_strided_slice %22 {offsets = [2, 0], sizes = [1, 128], strides = [1, 1]} : vector<4x128xf32> to vector<1x128xf32>
    %c2 = arith.constant 2 : index
    %c0_26 = arith.constant 0 : index
    %c0_27 = arith.constant 0 : index
    %33 = vector.load %arg8[%c2, %c0_26, %c0_27] : memref<4x128x128xf32, #tpu.memory_space<vmem>>, vector<1x128x128xf32>
    %34 = vector.shape_cast %33 : vector<1x128x128xf32> to vector<128x128xf32>
    %cst_28 = arith.constant dense<0.000000e+00> : vector<1x128xf32>
    %35 = tpu.matmul %32, %34, %cst_28 {dimension_numbers = #tpu.dot_dimension_numbers<[1], [0], [0], [1], [0, 0, 1, 1], [], []>} : vector<1x128xf32>, vector<128x128xf32>, vector<1x128xf32> -> vector<1x128xf32>
    %36 = arith.addf %31, %35 : vector<1x128xf32>
    %37 = vector.extract_strided_slice %22 {offsets = [3, 0], sizes = [1, 128], strides = [1, 1]} : vector<4x128xf32> to vector<1x128xf32>
    %c3 = arith.constant 3 : index
    %c0_29 = arith.constant 0 : index
    %c0_30 = arith.constant 0 : index
    %38 = vector.load %arg8[%c3, %c0_29, %c0_30] : memref<4x128x128xf32, #tpu.memory_space<vmem>>, vector<1x128x128xf32>
    %39 = vector.shape_cast %38 : vector<1x128x128xf32> to vector<128x128xf32>
    %cst_31 = arith.constant dense<0.000000e+00> : vector<1x128xf32>
    %40 = tpu.matmul %37, %39, %cst_31 {dimension_numbers = #tpu.dot_dimension_numbers<[1], [0], [0], [1], [0, 0, 1, 1], [], []>} : vector<1x128xf32>, vector<128x128xf32>, vector<1x128xf32> -> vector<1x128xf32>
    %41 = arith.addf %36, %40 : vector<1x128xf32>
    %c0_32 = arith.constant 0 : index
    %c0_33 = arith.constant 0 : index
    %42 = vector.load %arg9[%c0_32, %c0_33] : memref<1x128xf32, #tpu.memory_space<vmem>>, vector<1x128xf32>
    %43 = arith.addf %41, %42 : vector<1x128xf32>
    %44 = math.tanh %43 : vector<1x128xf32>
    %c0_34 = arith.constant 0 : index
    %c0_35 = arith.constant 0 : index
    %c0_36 = arith.constant 0 : index
    %45 = vector.load %arg10[%c0_34, %c0_35, %c0_36] : memref<1x1x128xf32, #tpu.memory_space<vmem>>, vector<1x1x128xf32>
    %46 = vector.shape_cast %45 : vector<1x1x128xf32> to vector<1x128xf32>
    %47 = vector.shape_cast %44 : vector<1x128xf32> to vector<1x1x128xf32>
    tpu.vector_store %arg10[%c0_34, %c0_35, %c0_36], %47 {strides = array<i32>} : memref<1x1x128xf32, #tpu.memory_space<vmem>>, vector<1x1x128xf32>,
    return
  }
  func.func @transform_0(%arg0: i32) -> (i32, i32, i32) {
    %c0_i32 = arith.constant 0 : i32
    %c0_i32_0 = arith.constant 0 : i32
    %c0_i32_1 = arith.constant 0 : i32
    return %arg0, %c0_i32, %c0_i32_0 : i32, i32, i32
  }
  func.func @transform_1(%arg0: i32) -> (i32, i32) {
    %c0_i32 = arith.constant 0 : i32
    %c0_i32_0 = arith.constant 0 : i32
    %c0_i32_1 = arith.constant 0 : i32
    return %c0_i32, %c0_i32_0 : i32, i32
  }
  func.func @transform_2(%arg0: i32) -> (i32, i32) {
    %c0_i32 = arith.constant 0 : i32
    %c0_i32_0 = arith.constant 0 : i32
    %c0_i32_1 = arith.constant 0 : i32
    return %c0_i32, %c0_i32_0 : i32, i32
  }
  func.func @transform_3(%arg0: i32) -> (i32, i32) {
    %c0_i32 = arith.constant 0 : i32
    %c0_i32_0 = arith.constant 0 : i32
    %c0_i32_1 = arith.constant 0 : i32
    return %c0_i32, %c0_i32_0 : i32, i32
  }
  func.func @transform_4(%arg0: i32) -> (i32, i32) {
    %c0_i32 = arith.constant 0 : i32
    %c0_i32_0 = arith.constant 0 : i32
    %c0_i32_1 = arith.constant 0 : i32
    return %c0_i32, %c0_i32_0 : i32, i32
  }
  func.func @transform_5(%arg0: i32) -> (i32, i32) {
    %c0_i32 = arith.constant 0 : i32
    %c0_i32_0 = arith.constant 0 : i32
    %c0_i32_1 = arith.constant 0 : i32
    return %c0_i32, %c0_i32_0 : i32, i32
  }
  func.func @transform_6(%arg0: i32) -> (i32, i32) {
    %c0_i32 = arith.constant 0 : i32
    %c0_i32_0 = arith.constant 0 : i32
    %c0_i32_1 = arith.constant 0 : i32
    return %c0_i32, %c0_i32_0 : i32, i32
  }
  func.func @transform_7(%arg0: i32) -> (i32, i32, i32) {
    %c0_i32 = arith.constant 0 : i32
    %c0_i32_0 = arith.constant 0 : i32
    %c0_i32_1 = arith.constant 0 : i32
    %c0_i32_2 = arith.constant 0 : i32
    return %c0_i32, %c0_i32_0, %c0_i32_1 : i32, i32, i32
  }
  func.func @transform_8(%arg0: i32) -> (i32, i32) {
    %c0_i32 = arith.constant 0 : i32
    %c0_i32_0 = arith.constant 0 : i32
    %c0_i32_1 = arith.constant 0 : i32
    return %c0_i32, %c0_i32_0 : i32, i32
  }
  func.func @transform_9(%arg0: i32) -> (i32, i32, i32) {
    %c0_i32 = arith.constant 0 : i32
    %c0_i32_0 = arith.constant 0 : i32
    %c0_i32_1 = arith.constant 0 : i32
    return %arg0, %c0_i32, %c0_i32_0 : i32, i32, i32
  }
}

</mosaic_0001>

<bundles_post_ra>
// kernel: network_forward.10
= control target key start
LH: loop header
LB: loop body
LE: loop exit
PB: predicated region body
PF: predicated region fallthrough
CT: control target
= control target key end

     0   :  { %s3100_s12 = smov 0   ;;  %s4055_s0 = inlined_call_operand.vmem [shape: f32[2,326,128], index: 0, kind: input, shape index: {}]   ;;  %s4056_s1 = inlined_call_operand.vmem [shape: f32[9,128,128], index: 1, kind: input, shape index: {}]   ;;  %s4057_s2 = inlined_call_operand.vmem [shape: f32[1,128], index: 2, kind: input, shape index: {}]   ;;  %s4058_s3 = inlined_call_operand.vmem [shape: f32[2,288,128], index: 3, kind: output, shape index: {}]  }
   0x1 LB: > { %s2875_s13 = sadd.s32 4294967295, %s3078_s12   ;;  %p2879_p0 = scmp.ge.s32.totalorder %s3078_s12, 1  ;;  %s3078_s12 = sphi %s3100_s12, %s13_s12  }
   0x2   : > { %p137_p1 = scmp.lt.s32.totalorder %s3078_s12, 3 }
   0x4   : > { %p138_p2 = pnand %p2879_p0, %p137_p1 }
   0x5   : > { %p161_p3 = scmp.lt.s32.totalorder (!%p138_p2), %s2875_s13, 1 }
   0x6   : > { %141 = sbr.rel (%p138_p2) target bundleno = 828 (0x33c), region = 32 }
   0xb   : > { %v222_v0 = vld [vmem:[%s4056_s1 + $0x78] sm:$0xff]  ;;  %v221_v1 = vld [vmem:[%s4056_s1 + $0x70] sm:$0xff]  ;;  %v220_v2 = vld [vmem:[%s4056_s1 + $0x68] sm:$0xff]  ;;  %s4060_s13 = smov (!%p161_p3, %s2875_s13), 1 }
   0xc   : > { %3012 = vmatpush.msra.mxu1 %v222_v0  ;;  %3013 = vmatpush.msra.mxu2 %v222_v0  ;;  %v219_v3 = vld [vmem:[%s4056_s1 + $0x60] sm:$0xff]  ;;  %v218_v4 = vld [vmem:[%s4056_s1 + $0x58] sm:$0xff]  ;;  %v217_v5 = vld [vmem:[%s4056_s1 + $0x50] sm:$0xff]  ;;  %s3060_s15 = smul.u32 328, %s4060_s13 }
   0xd   : > { %3014 = vmatpush.msra.mxu3 %v222_v0  ;;  %223 = vmatpush.msra.mxu0 %v222_v0  ;;  %v216_v6 = vld [vmem:[%s4056_s1 + $0x48] sm:$0xff]  ;;  %v215_v7 = vld [vmem:[%s4056_s1 + $0x40] sm:$0xff]  ;;  %v214_v8 = vld [vmem:[%s4056_s1 + $0x38] sm:$0xff]  ;;  %s3061_s20 = smul.u32 288, %s4060_s13 }
   0xe   : > { %3015 = vmatpush.msra.mxu1 %v221_v1  ;;  %3016 = vmatpush.msra.mxu2 %v221_v1  ;;  %v213_v9 = vld [vmem:[%s4056_s1 + $0x30] sm:$0xff]  ;;  %v212_v10 = vld [vmem:[%s4056_s1 + $0x28] sm:$0xff]  ;;  %v211_v11 = vld [vmem:[%s4056_s1 + $0x20] sm:$0xff]  ;;  %s3163_s22 = scalar_lea.vmem %s4055_s0, %s3060_s15 }
   0xf   : > { %3017 = vmatpush.msra.mxu3 %v221_v1  ;;  %224 = vmatpush.msra.mxu0 %v221_v1  ;;  %v210_v12 = vld [vmem:[%s4056_s1 + $0x18] sm:$0xff]  ;;  %v209_v13 = vld [vmem:[%s4056_s1 + $0x10] sm:$0xff]  ;;  %v208_v14 = vld [vmem:[%s4056_s1 + $0x8] sm:$0xff]  ;;  %s3486_s13 = scalar_lea.vmem %s4058_s3, %s3061_s20 }
  0x10   : > { %3018 = vmatpush.msra.mxu1 %v220_v2  ;;  %3019 = vmatpush.msra.mxu2 %v220_v2  ;;  %v207_v15 = vld [vmem:[%s4056_s1] sm:$0xff]  ;;  %v180_v16 = vld [vmem:[%s3163_s22 + $0x48] sm:$0xff]  ;;  %v189_v17 = vld [vmem:[%s3163_s22 + $0x90] sm:$0xff] }
  0x11   : > { %3020 = vmatpush.msra.mxu3 %v220_v2  ;;  %225 = vmatpush.msra.mxu0 %v220_v2  ;;  %v2897_v18 = vld [vmem:[%s4056_s1 + $0xf8] sm:$0xff]  ;;  %v2896_v20 = vld [vmem:[%s4056_s1 + $0xf0] sm:$0xff]  ;;  %v171_v23 = vld [vmem:[%s3163_s22] sm:$0xff] }
  0x12   : > { %3021 = vmatpush.msra.mxu1 %v219_v3  ;;  %3022 = vmatpush.msra.mxu2 %v219_v3  ;;  %v2913_v19 = vld [vmem:[%s4056_s1 + $0x178] sm:$0xff]  ;;  %v2912_v21 = vld [vmem:[%s4056_s1 + $0x170] sm:$0xff]  ;;  %v2895_v24 = vld [vmem:[%s4056_s1 + $0xe8] sm:$0xff] }
  0x13   : > { %3023 = vmatpush.msra.mxu3 %v219_v3  ;;  %226 = vmatpush.msra.mxu0 %v219_v3  ;;  %v198_v22 = vld [vmem:[%s3163_s22 + $0xd8] sm:$0xff]  ;;  %v2911_v25 = vld [vmem:[%s4056_s1 + $0x168] sm:$0xff]  ;;  %v2894_v28 = vld [vmem:[%s4056_s1 + $0xe0] sm:$0xff] }
  0x14   : > { %3024 = vmatpush.msra.mxu1 %v218_v4  ;;  %3025 = vmatpush.msra.mxu2 %v218_v4  ;;  %v2929_v26 = vld [vmem:[%s4056_s1 + $0x1f8] sm:$0xff]  ;;  %v2910_v29 = vld [vmem:[%s4056_s1 + $0x160] sm:$0xff]  ;;  %v181_v30 = vld [vmem:[%s3163_s22 + $0x50] sm:$0xff] }
  0x15   : > { %3026 = vmatpush.msra.mxu3 %v218_v4  ;;  %227 = vmatpush.msra.mxu0 %v218_v4  ;;  %v2945_v27 = vld [vmem:[%s4056_s1 + $0x278] sm:$0xff]  ;;  %v2928_v33 = vld [vmem:[%s4056_s1 + $0x1f0] sm:$0xff]  ;;  %v2927_v37 = vld [vmem:[%s4056_s1 + $0x1e8] sm:$0xff] }
  0x16   : > { %3027 = vmatpush.msra.mxu1 %v217_v5  ;;  %3028 = vmatpush.msra.mxu2 %v217_v5  ;;  %v190_v31 = vld [vmem:[%s3163_s22 + $0x98] sm:$0xff]  ;;  %v2944_v35 = vld [vmem:[%s4056_s1 + $0x270] sm:$0xff]  ;;  %v199_v38 = vld [vmem:[%s3163_s22 + $0xe0] sm:$0xff] }
  0x17   : > { %3029 = vmatpush.msra.mxu3 %v217_v5  ;;  %228 = vmatpush.msra.mxu0 %v217_v5  ;;  %v2893_v32 = vld [vmem:[%s4056_s1 + $0xd8] sm:$0xff]  ;;  %v2892_v36 = vld [vmem:[%s4056_s1 + $0xd0] sm:$0xff]  ;;  %v2891_v40 = vld [vmem:[%s4056_s1 + $0xc8] sm:$0xff] }
  0x18   : > { %3030 = vmatpush.msra.mxu1 %v216_v6  ;;  %3031 = vmatpush.msra.mxu2 %v216_v6  ;;  %v2909_v34 = vld [vmem:[%s4056_s1 + $0x158] sm:$0xff]  ;;  %v2908_v39 = vld [vmem:[%s4056_s1 + $0x150] sm:$0xff]  ;;  %v2926_v41 = vld [vmem:[%s4056_s1 + $0x1e0] sm:$0xff] }
  0x19   : > { %3032 = vmatpush.msra.mxu3 %v216_v6  ;;  %229 = vmatpush.msra.mxu0 %v216_v6  ;;  %v2907_v42 = vld [vmem:[%s4056_s1 + $0x148] sm:$0xff]  ;;  %v2890_v44 = vld [vmem:[%s4056_s1 + $0xc0] sm:$0xff]  ;;  %v2925_v45 = vld [vmem:[%s4056_s1 + $0x1d8] sm:$0xff] }
  0x1a   : > { %3033 = vmatpush.msra.mxu1 %v215_v7  ;;  %3034 = vmatpush.msra.mxu2 %v215_v7  ;;  %v172_v43 = vld [vmem:[%s3163_s22 + $0x8] sm:$0xff]  ;;  %v182_v46 = vld [vmem:[%s3163_s22 + $0x58] sm:$0xff]  ;;  %v191_v47 = vld [vmem:[%s3163_s22 + $0xa0] sm:$0xff] }
  0x1b   : > { %3035 = vmatpush.msra.mxu3 %v215_v7  ;;  %230 = vmatpush.msra.mxu0 %v215_v7  ;;  %v2889_v48 = vld [vmem:[%s4056_s1 + $0xb8] sm:$0xff]  ;;  %v2906_v49 = vld [vmem:[%s4056_s1 + $0x140] sm:$0xff]  ;;  %v2924_v50 = vld [vmem:[%s4056_s1 + $0x1d0] sm:$0xff] }
  0x1c   : > { %3036 = vmatpush.msra.mxu1 %v214_v8  ;;  %3037 = vmatpush.msra.mxu2 %v214_v8  ;;  %v2943_v51 = vld [vmem:[%s4056_s1 + $0x268] sm:$0xff]  ;;  %v2905_v52 = vld [vmem:[%s4056_s1 + $0x138] sm:$0xff]  ;;  %v2888_v53 = vld [vmem:[%s4056_s1 + $0xb0] sm:$0xff] }
  0x1d   : > { %3038 = vmatpush.msra.mxu3 %v214_v8  ;;  %231 = vmatpush.msra.mxu0 %v214_v8  ;;  %v200_v54 = vld [vmem:[%s3163_s22 + $0xe8] sm:$0xff]  ;;  %v2942_v55 = vld [vmem:[%s4056_s1 + $0x260] sm:$0xff]  ;;  %v2904_v58 = vld [vmem:[%s4056_s1 + $0x130] sm:$0xff] }
  0x1e   : > { %3039 = vmatpush.msra.mxu1 %v213_v9  ;;  %3040 = vmatpush.msra.mxu2 %v213_v9  ;;  %v2923_v56 = vld [vmem:[%s4056_s1 + $0x1c8] sm:$0xff]  ;;  %v173_v59 = vld [vmem:[%s3163_s22 + $0x10] sm:$0xff]  ;;  %v2922_v60 = vld [vmem:[%s4056_s1 + $0x1c0] sm:$0xff] }
  0x1f   : > { %3041 = vmatpush.msra.mxu3 %v213_v9  ;;  %232 = vmatpush.msra.mxu0 %v213_v9  ;;  %v2887_v57 = vld [vmem:[%s4056_s1 + $0xa8] sm:$0xff]  ;;  %v2941_v61 = vld [vmem:[%s4056_s1 + $0x258] sm:$0xff]  ;;  %v183_v62 = vld [vmem:[%s3163_s22 + $0x60] sm:$0xff] }
  0x20   : > { %3042 = vmatpush.msra.mxu1 %v212_v10  ;;  %3043 = vmatpush.msra.mxu2 %v212_v10  ;;  %v192_v63 = vld [vmem:[%s3163_s22 + $0xa8] sm:$0xff]  ;;  %v2886_v1 = vld [vmem:[%s4056_s1 + $0xa0] sm:$0xff]  ;;  %v2921_v2 = vld [vmem:[%s4056_s1 + $0x1b8] sm:$0xff] }
  0x21   : > { %3044 = vmatpush.msra.mxu3 %v212_v10  ;;  %233 = vmatpush.msra.mxu0 %v212_v10  ;;  %v2903_v0 = vld [vmem:[%s4056_s1 + $0x128] sm:$0xff]  ;;  %v2940_v3 = vld [vmem:[%s4056_s1 + $0x250] sm:$0xff]  ;;  %v2885_v4 = vld [vmem:[%s4056_s1 + $0x98] sm:$0xff] }
  0x22   : > { %3045 = vmatpush.msra.mxu1 %v211_v11  ;;  %3046 = vmatpush.msra.mxu2 %v211_v11  ;;  %v2902_v5 = vld [vmem:[%s4056_s1 + $0x120] sm:$0xff]  ;;  %v201_v6 = vld [vmem:[%s3163_s22 + $0xf0] sm:$0xff]  ;;  %v2939_v7 = vld [vmem:[%s4056_s1 + $0x248] sm:$0xff] }
  0x23   : > { %3047 = vmatpush.msra.mxu3 %v211_v11  ;;  %234 = vmatpush.msra.mxu0 %v211_v11  ;;  %v2920_v8 = vld [vmem:[%s4056_s1 + $0x1b0] sm:$0xff]  ;;  %v2901_v9 = vld [vmem:[%s4056_s1 + $0x118] sm:$0xff] }
  0x24   : > { %3048 = vmatpush.msra.mxu1 %v210_v12  ;;  %3049 = vmatpush.msra.mxu2 %v210_v12  ;;  %v174_v10 = vld [vmem:[%s3163_s22 + $0x18] sm:$0xff]  ;;  %v2884_v11 = vld [vmem:[%s4056_s1 + $0x90] sm:$0xff] }
  0x25   : > { %3050 = vmatpush.msra.mxu3 %v210_v12  ;;  %235 = vmatpush.msra.mxu0 %v210_v12  ;;  %v2919_v12 = vld [vmem:[%s4056_s1 + $0x1a8] sm:$0xff] }
  0x26   : > { %3051 = vmatpush.msra.mxu1 %v209_v13  ;;  %3052 = vmatpush.msra.mxu2 %v209_v13 }
  0x27   : > { %3053 = vmatpush.msra.mxu3 %v209_v13  ;;  %236 = vmatpush.msra.mxu0 %v209_v13  ;;  %v2938_v13 = vld [vmem:[%s4056_s1 + $0x240] sm:$0xff] }
  0x28   : > { %3054 = vmatpush.msra.mxu1 %v208_v14  ;;  %3055 = vmatpush.msra.mxu2 %v208_v14 }
  0x29   : > { %3056 = vmatpush.msra.mxu3 %v208_v14  ;;  %237 = vmatpush.msra.mxu0 %v208_v14  ;;  %v184_v14 = vld [vmem:[%s3163_s22 + $0x68] sm:$0xff] }
  0x2a   : > { %3057 = vmatpush.msra.mxu1 %v207_v15  ;;  %3058 = vmatpush.msra.mxu2 %v207_v15 }
  0x2b   : > { %266 = vmatmul.f32.vlgmr.msra.gmra.mxu1 %v180_v16  ;;  %293 = vmatmul.f32.vlgmr.msra.gmra.mxu2 %v189_v17  ;;  %v2883_v16 = vld [vmem:[%s4056_s1 + $0x88] sm:$0xff]  ;;  %v2900_v17 = vld [vmem:[%s4056_s1 + $0x110] sm:$0xff] }
  0x2c   : > { %473 = vmatpush.msrb.mxu1 %v2897_v18  ;;  %759 = vmatpush.msrb.mxu2 %v2913_v19  ;;  %v2918_v18 = vld [vmem:[%s4056_s1 + $0x1a0] sm:$0xff]  ;;  %v2937_v19 = vld [vmem:[%s4056_s1 + $0x238] sm:$0xff] }
  0x2d   : > { %3059 = vmatpush.msra.mxu3 %v207_v15  ;;  %238 = vmatpush.msra.mxu0 %v207_v15  ;;  %v193_v15 = vld [vmem:[%s3163_s22 + $0xb0] sm:$0xff] }
  0x2e   : > { %474 = vmatpush.msrb.mxu1 %v2896_v20  ;;  %760 = vmatpush.msrb.mxu2 %v2912_v21  ;;  %v2899_v20 = vld [vmem:[%s4056_s1 + $0x108] sm:$0xff]  ;;  %v202_v21 = vld [vmem:[%s3163_s22 + $0xf8] sm:$0xff] }
  0x2f   : > { %320 = vmatmul.f32.vlgmr.msra.gmra.mxu3 %v198_v22  ;;  %239 = vmatmul.f32.vlgmr.msra.gmra.mxu0 %v171_v23  ;;  %v2882_v22 = vld [vmem:[%s4056_s1 + $0x80] sm:$0xff]  ;;  %v2917_v23 = vld [vmem:[%s4056_s1 + $0x198] sm:$0xff] }
  0x30   : > { %475 = vmatpush.msrb.mxu1 %v2895_v24  ;;  %761 = vmatpush.msrb.mxu2 %v2911_v25  ;;  %v2936_v24 = vld [vmem:[%s4056_s1 + $0x230] sm:$0xff]  ;;  %v175_v25 = vld [vmem:[%s3163_s22 + $0x20] sm:$0xff] }
  0x31   : > { %1045 = vmatpush.msrb.mxu3 %v2929_v26  ;;  %1331 = vmatpush.msrb.mxu0 %v2945_v27  ;;  %v185_v26 = vld [vmem:[%s3163_s22 + $0x70] sm:$0xff]  ;;  %v194_v27 = vld [vmem:[%s3163_s22 + $0xb8] sm:$0xff] }
  0x32   : > { %476 = vmatpush.msrb.mxu1 %v2894_v28  ;;  %762 = vmatpush.msrb.mxu2 %v2910_v29  ;;  %v2916_v28 = vld [vmem:[%s4056_s1 + $0x190] sm:$0xff]  ;;  %v2898_v29 = vld [vmem:[%s4056_s1 + $0x100] sm:$0xff] }
  0x33   : > { %269 = vmatmul.f32.gmra.mxu1 %v181_v30  ;;  %296 = vmatmul.f32.gmra.mxu2 %v190_v31  ;;  %v2961_v30 = vld [vmem:[%s4056_s1 + $0x2f8] sm:$0xff]  ;;  %v2935_v31 = vld [vmem:[%s4056_s1 + $0x228] sm:$0xff] }
  0x34   : > { %477 = vmatpush.msrb.mxu1 %v2893_v32  ;;  %1046 = vmatpush.msrb.mxu3 %v2928_v33  ;;  %v203_v32 = vld [vmem:[%s3163_s22 + $0x100] sm:$0xff]  ;;  %v2977_v33 = vld [vmem:[%s4056_s1 + $0x378] sm:$0xff] }
  0x35   : > { %763 = vmatpush.msrb.mxu2 %v2909_v34  ;;  %1332 = vmatpush.msrb.mxu0 %v2944_v35  ;;  %v2915_v34 = vld [vmem:[%s4056_s1 + $0x188] sm:$0xff]  ;;  %v2934_v35 = vld [vmem:[%s4056_s1 + $0x220] sm:$0xff] }
  0x36   : > { %478 = vmatpush.msrb.mxu1 %v2892_v36  ;;  %1047 = vmatpush.msrb.mxu3 %v2927_v37  ;;  %v2914_v36 = vld [vmem:[%s4056_s1 + $0x180] sm:$0xff]  ;;  %v176_v37 = vld [vmem:[%s3163_s22 + $0x28] sm:$0xff] }
  0x37   : > { %323 = vmatmul.f32.gmra.mxu3 %v199_v38  ;;  %764 = vmatpush.msrb.mxu2 %v2908_v39  ;;  %v2933_v38 = vld [vmem:[%s4056_s1 + $0x218] sm:$0xff] }
  0x38   : > { %479 = vmatpush.msrb.mxu1 %v2891_v40  ;;  %1048 = vmatpush.msrb.mxu3 %v2926_v41  ;;  %v186_v39 = vld [vmem:[%s3163_s22 + $0x78] sm:$0xff]  ;;  %v195_v40 = vld [vmem:[%s3163_s22 + $0xc0] sm:$0xff]  ;;  %v2932_v41 = vld [vmem:[%s4056_s1 + $0x210] sm:$0xff] }
  0x39   : > { %765 = vmatpush.msrb.mxu2 %v2907_v42  ;;  %242 = vmatmul.f32.gmra.mxu0 %v172_v43  ;;  %v2993_v42 = vld [vmem:[%s4056_s1 + $0x3f8] sm:$0xff]  ;;  %v204_v43 = vld [vmem:[%s3163_s22 + $0x108] sm:$0xff] }
  0x3a   : > { %480 = vmatpush.msrb.mxu1 %v2890_v44  ;;  %1049 = vmatpush.msrb.mxu3 %v2925_v45  ;;  %v2931_v44 = vld [vmem:[%s4056_s1 + $0x208] sm:$0xff]  ;;  %v2930_v45 = vld [vmem:[%s4056_s1 + $0x200] sm:$0xff] }
  0x3b   : > { %272 = vmatmul.f32.gmra.mxu1 %v182_v46  ;;  %299 = vmatmul.f32.gmra.mxu2 %v191_v47  ;;  %v177_v46 = vld [vmem:[%s3163_s22 + $0x30] sm:$0xff]  ;;  %v187_v47 = vld [vmem:[%s3163_s22 + $0x80] sm:$0xff] }
  0x3c   : > { %481 = vmatpush.msrb.mxu1 %v2889_v48  ;;  %766 = vmatpush.msrb.mxu2 %v2906_v49  ;;  %v196_v48 = vld [vmem:[%s3163_s22 + $0xc8] sm:$0xff]  ;;  %v2960_v49 = vld [vmem:[%s4056_s1 + $0x2f0] sm:$0xff] }
  0x3d   : > { %1050 = vmatpush.msrb.mxu3 %v2924_v50  ;;  %1333 = vmatpush.msrb.mxu0 %v2943_v51  ;;  %v2976_v50 = vld [vmem:[%s4056_s1 + $0x370] sm:$0xff] }
  0x3e   : > { %767 = vmatpush.msrb.mxu2 %v2905_v52  ;;  %482 = vmatpush.msrb.mxu1 %v2888_v53  ;;  %v205_v51 = vld [vmem:[%s3163_s22 + $0x110] sm:$0xff]  ;;  %v178_v52 = vld [vmem:[%s3163_s22 + $0x38] sm:$0xff]  ;;  %v188_v53 = vld [vmem:[%s3163_s22 + $0x88] sm:$0xff] }
  0x3f   : > { %326 = vmatmul.f32.gmra.mxu3 %v200_v54  ;;  %1334 = vmatpush.msrb.mxu0 %v2942_v55  ;;  %v197_v54 = vld [vmem:[%s3163_s22 + $0xd0] sm:$0xff]  ;;  %v3009_v55 = vld [vmem:[%s4056_s1 + $0x478] sm:$0xff] }
  0x40   : > { %1051 = vmatpush.msrb.mxu3 %v2923_v56  ;;  %483 = vmatpush.msrb.mxu1 %v2887_v57  ;;  %v206_v56 = vld [vmem:[%s3163_s22 + $0x118] sm:$0xff]  ;;  %v179_v57 = vld [vmem:[%s3163_s22 + $0x40] sm:$0xff] }
  0x41   : > { %768 = vmatpush.msrb.mxu2 %v2904_v58  ;;  %245 = vmatmul.f32.gmra.mxu0 %v173_v59  ;;  %v420_v58 = vld [vmem:[%s3163_s22 + $0x1] sm:$0xff] }
  0x42   : > { %1052 = vmatpush.msrb.mxu3 %v2922_v60  ;;  %1335 = vmatpush.msrb.mxu0 %v2941_v61  ;;  %v706_v59 = vld [vmem:[%s3163_s22 + $0x2] sm:$0xff]  ;;  %v2992_v60 = vld [vmem:[%s4056_s1 + $0x3f0] sm:$0xff] }
  0x43   : > { %275 = vmatmul.f32.gmra.mxu1 %v183_v62  ;;  %302 = vmatmul.f32.gmra.mxu2 %v192_v63  ;;  %v2959_v61 = vld [vmem:[%s4056_s1 + $0x2e8] sm:$0xff]  ;;  %v992_v62 = vld [vmem:[%s3163_s22 + $0x12] sm:$0xff] }
  0x44   : > { %769 = vmatpush.msrb.mxu2 %v2903_v0  ;;  %484 = vmatpush.msrb.mxu1 %v2886_v1  ;;  %v1278_v63 = vld [vmem:[%s3163_s22 + $0x13] sm:$0xff]  ;;  %v421_v0 = vld [vmem:[%s3163_s22 + $0x9] sm:$0xff] }
  0x45   : > { %1053 = vmatpush.msrb.mxu3 %v2921_v2  ;;  %1336 = vmatpush.msrb.mxu0 %v2940_v3  ;;  %v707_v1 = vld [vmem:[%s3163_s22 + $0xa] sm:$0xff]  ;;  %v993_v3 = vld [vmem:[%s3163_s22 + $0x1a] sm:$0xff] }
  0x46   : > { %485 = vmatpush.msrb.mxu1 %v2885_v4  ;;  %770 = vmatpush.msrb.mxu2 %v2902_v5  ;;  %v2975_v2 = vld [vmem:[%s4056_s1 + $0x368] sm:$0xff]  ;;  %v1279_v4 = vld [vmem:[%s3163_s22 + $0x1b] sm:$0xff]  ;;  %v422_v5 = vld [vmem:[%s3163_s22 + $0x11] sm:$0xff] }
  0x47   : > { %329 = vmatmul.f32.gmra.mxu3 %v201_v6  ;;  %1337 = vmatpush.msrb.mxu0 %v2939_v7  ;;  %v3008_v6 = vld [vmem:[%s4056_s1 + $0x470] sm:$0xff]  ;;  %v2991_v7 = vld [vmem:[%s4056_s1 + $0x3e8] sm:$0xff] }
  0x48   : > { %1054 = vmatpush.msrb.mxu3 %v2920_v8  ;;  %771 = vmatpush.msrb.mxu2 %v2901_v9  ;;  %v994_v8 = vld [vmem:[%s3163_s22 + $0x22] sm:$0xff] }
  0x49   : > { %248 = vmatmul.f32.gmra.mxu0 %v174_v10  ;;  %486 = vmatpush.msrb.mxu1 %v2884_v11  ;;  %v1280_v9 = vld [vmem:[%s3163_s22 + $0x23] sm:$0xff]  ;;  %v423_v10 = vld [vmem:[%s3163_s22 + $0x19] sm:$0xff] }
  0x4a   : > { %1055 = vmatpush.msrb.mxu3 %v2919_v12  ;;  %1338 = vmatpush.msrb.mxu0 %v2938_v13  ;;  %v2958_v11 = vld [vmem:[%s4056_s1 + $0x2e0] sm:$0xff]  ;;  %v995_v13 = vld [vmem:[%s3163_s22 + $0x2a] sm:$0xff] }
  0x4b   : > { %278 = vmatmul.f32.gmra.mxu1 %v184_v14  ;;  %305 = vmatmul.f32.gmra.mxu2 %v193_v15  ;;  %v2974_v12 = vld [vmem:[%s4056_s1 + $0x360] sm:$0xff]  ;;  %v1281_v14 = vld [vmem:[%s3163_s22 + $0x2b] sm:$0xff] }
  0x4c   : > { %487 = vmatpush.msrb.mxu1 %v2883_v16  ;;  %772 = vmatpush.msrb.mxu2 %v2900_v17  ;;  %v424_v15 = vld [vmem:[%s3163_s22 + $0x21] sm:$0xff] }
  0x4d   : > { %1056 = vmatpush.msrb.mxu3 %v2918_v18  ;;  %1339 = vmatpush.msrb.mxu0 %v2937_v19  ;;  %v3007_v16 = vld [vmem:[%s4056_s1 + $0x468] sm:$0xff]  ;;  %v2990_v17 = vld [vmem:[%s4056_s1 + $0x3e0] sm:$0xff]  ;;  %v996_v18 = vld [vmem:[%s3163_s22 + $0x32] sm:$0xff] }
  0x4e   : > { %773 = vmatpush.msrb.mxu2 %v2899_v20  ;;  %488 = vmatpush.msrb.mxu1 %v2882_v22  ;;  %v1282_v19 = vld [vmem:[%s3163_s22 + $0x33] sm:$0xff]  ;;  %v425_v20 = vld [vmem:[%s3163_s22 + $0x29] sm:$0xff] }
  0x4f   : > { %332 = vmatmul.f32.gmra.mxu3 %v202_v21  ;;  %1340 = vmatpush.msrb.mxu0 %v2936_v24  ;;  %v2957_v21 = vld [vmem:[%s4056_s1 + $0x2d8] sm:$0xff] }
  0x50   : > { %1057 = vmatpush.msrb.mxu3 %v2917_v23  ;;  %774 = vmatpush.msrb.mxu2 %v2898_v29  ;;  %v2973_v22 = vld [vmem:[%s4056_s1 + $0x358] sm:$0xff] }
  0x51   : > { %251 = vmatmul.f32.gmra.mxu0 %v175_v25  ;;  %1617 = vmatpush.msra.mxu1 %v2961_v30  ;;  %v997_v23 = vld [vmem:[%s3163_s22 + $0x3a] sm:$0xff]  ;;  %v426_v25 = vld [vmem:[%s3163_s22 + $0x31] sm:$0xff] }
  0x52   : > { %1058 = vmatpush.msrb.mxu3 %v2916_v28  ;;  %1341 = vmatpush.msrb.mxu0 %v2935_v31  ;;  %v1283_v24 = vld [vmem:[%s3163_s22 + $0x3b] sm:$0xff]  ;;  %v1284_v28 = vld [vmem:[%s3163_s22 + $0x43] sm:$0xff] }
  0x53   : > { %281 = vmatmul.f32.gmra.mxu1 %v185_v26  ;;  %308 = vmatmul.f32.gmra.mxu2 %v194_v27  ;;  %v3006_v26 = vld [vmem:[%s4056_s1 + $0x460] sm:$0xff]  ;;  %v2989_v31 = vld [vmem:[%s4056_s1 + $0x3d8] sm:$0xff] }
  0x54   : > { %1903 = vmatpush.msra.mxu2 %v2977_v33  ;;  %1059 = vmatpush.msrb.mxu3 %v2915_v34  ;;  %v998_v27 = vld [vmem:[%s3163_s22 + $0x42] sm:$0xff]  ;;  %v427_v30 = vld [vmem:[%s3163_s22 + $0x39] sm:$0xff]  ;;  %v999_v33 = vld [vmem:[%s3163_s22 + $0x4a] sm:$0xff] }
  0x55   : > { %1342 = vmatpush.msrb.mxu0 %v2934_v35  ;;  %1618 = vmatpush.msra.mxu1 %v2960_v49  ;;  %v2988_v49 = vld [vmem:[%s4056_s1 + $0x3d0] sm:$0xff] }
  0x56   : > { %1060 = vmatpush.msrb.mxu3 %v2914_v36  ;;  %1904 = vmatpush.msra.mxu2 %v2976_v50  ;;  %v1285_v36 = vld [vmem:[%s3163_s22 + $0x4b] sm:$0xff] }
  0x57   : > { %335 = vmatmul.f32.gmra.mxu3 %v203_v32  ;;  %1343 = vmatpush.msrb.mxu0 %v2933_v38  ;;  %v2956_v32 = vld [vmem:[%s4056_s1 + $0x2d0] sm:$0xff]  ;;  %v428_v38 = vld [vmem:[%s3163_s22 + $0x41] sm:$0xff] }
  0x58   : > { %2189 = vmatpush.msra.mxu3 %v2993_v42  ;;  %1619 = vmatpush.msra.mxu1 %v2959_v61  ;;  %v2955_v50 = vld [vmem:[%s4056_s1 + $0x2c8] sm:$0xff] }
  0x59   : > { %254 = vmatmul.f32.gmra.mxu0 %v176_v37  ;;  %1905 = vmatpush.msra.mxu2 %v2975_v2  ;;  %v3004_v2 = vld [vmem:[%s4056_s1 + $0x450] sm:$0xff] }
  0x5a   : > { %1344 = vmatpush.msrb.mxu0 %v2932_v41  ;;  %2190 = vmatpush.msra.mxu3 %v2992_v60  ;;  %v1000_v41 = vld [vmem:[%s3163_s22 + $0x52] sm:$0xff] }
  0x5b   : > { %284 = vmatmul.f32.gmra.mxu1 %v186_v39  ;;  %311 = vmatmul.f32.gmra.mxu2 %v195_v40  ;;  %v2972_v39 = vld [vmem:[%s4056_s1 + $0x350] sm:$0xff] }
  0x5c   : > { %1345 = vmatpush.msrb.mxu0 %v2931_v44  ;;  %2191 = vmatpush.msra.mxu3 %v2991_v7  ;;  %v1286_v44 = vld [vmem:[%s3163_s22 + $0x53] sm:$0xff]  ;;  %v1289_v7 = vld [vmem:[%s3163_s22 + $0x6b] sm:$0xff] }
  0x5d   : > { %1620 = vmatpush.msra.mxu1 %v2958_v11  ;;  %1906 = vmatpush.msra.mxu2 %v2974_v12  ;;  %v2970_v12 = vld [vmem:[%s4056_s1 + $0x340] sm:$0xff] }
  0x5e   : > { %1346 = vmatpush.msrb.mxu0 %v2930_v45  ;;  %2192 = vmatpush.msra.mxu3 %v2990_v17 }
  0x5f   : > { %338 = vmatmul.f32.gmra.mxu3 %v204_v43  ;;  %1621 = vmatpush.msra.mxu1 %v2957_v21  ;;  %v2986_v21 = vld [vmem:[%s4056_s1 + $0x3c0] sm:$0xff] }
  0x60   : > { %2475 = vmatpush.msra.mxu0 %v3009_v55  ;;  %1907 = vmatpush.msra.mxu2 %v2973_v22  ;;  %v1005_v22 = vld [vmem:[%s3163_s22 + $0x7a] sm:$0xff] }
  0x61   : > { %257 = vmatmul.f32.gmra.mxu0 %v177_v46  ;;  %2193 = vmatpush.msra.mxu3 %v2989_v31  ;;  %v429_v46 = vld [vmem:[%s3163_s22 + $0x49] sm:$0xff]  ;;  %v2969_v31 = vld [vmem:[%s4056_s1 + $0x338] sm:$0xff] }
  0x62   : > { %2476 = vmatpush.msra.mxu0 %v3008_v6  ;;  %1622 = vmatpush.msra.mxu1 %v2956_v32  ;;  %v1006_v32 = vld [vmem:[%s3163_s22 + $0x82] sm:$0xff] }
  0x63   : > { %287 = vmatmul.f32.gmra.mxu1 %v187_v47  ;;  %314 = vmatmul.f32.gmra.mxu2 %v196_v48  ;;  %v3005_v47 = vld [vmem:[%s4056_s1 + $0x458] sm:$0xff] }
  0x64   : > { %2477 = vmatpush.msra.mxu0 %v3007_v16  ;;  %1908 = vmatpush.msra.mxu2 %v2972_v39  ;;  %v1290_v16 = vld [vmem:[%s3163_s22 + $0x73] sm:$0xff] }
  0x65   : > { %2194 = vmatpush.msra.mxu3 %v2988_v49  ;;  %1623 = vmatpush.msra.mxu1 %v2955_v50  ;;  %v435_v39 = vld [vmem:[%s3163_s22 + $0x79] sm:$0xff]  ;;  %v436_v49 = vld [vmem:[%s3163_s22 + $0x81] sm:$0xff] }
  0x66   : > { %2478 = vmatpush.msra.mxu0 %v3006_v26  ;;  %v2985_v50 = vld [vmem:[%s4056_s1 + $0x3b8] sm:$0xff] }
  0x67   : > { %341 = vmatmul.f32.gmra.mxu3 %v205_v51  ;;  %v1001_v51 = vld [vmem:[%s3163_s22 + $0x5a] sm:$0xff] }
  0x68   : > { %2479 = vmatpush.msra.mxu0 %v3005_v47  ;;  %v1293_v47 = vld [vmem:[%s3163_s22 + $0x8b] sm:$0xff] }
  0x69   : > { %260 = vmatmul.f32.gmra.mxu0 %v178_v52 }
  0x6a   : > { %2480 = vmatpush.msra.mxu0 %v3004_v2 }
  0x6b   : > { %290 = vmatmul.f32.gmra.mxu1 %v188_v53  ;;  %317 = vmatmul.f32.gmra.mxu2 %v197_v54  ;;  %v1287_v54 = vld [vmem:[%s3163_s22 + $0x5b] sm:$0xff] }
  0x6f   : > { %344 = vmatmul.f32.gmra.mxu3 %v206_v56  ;;  %v430_v56 = vld [vmem:[%s3163_s22 + $0x51] sm:$0xff] }
  0x71   : > { %263 = vmatmul.f32.gmra.mxu0 %v179_v57 }
  0x73   : > { %489 = vmatmul.f32.vlgmr.msrb.gmra.mxu1 %v420_v58  ;;  %775 = vmatmul.f32.vlgmr.msrb.gmra.mxu2 %v706_v59  ;;  %v2971_v58 = vld [vmem:[%s4056_s1 + $0x348] sm:$0xff] }
  0x74   : > { %v1002_v59 = vld [vmem:[%s3163_s22 + $0x62] sm:$0xff]  ;;  %1909 = vmatpush.msra.mxu2 %v2971_v58 }
  0x76   : > { %1910 = vmatpush.msra.mxu2 %v2970_v12 }
  0x77   : > { %1061 = vmatmul.f32.vlgmr.msrb.gmra.mxu3 %v992_v62 }
  0x78   : > { %1911 = vmatpush.msra.mxu2 %v2969_v31  ;;  %v439_v31 = vld [vmem:[%s3163_s22 + $0x99] sm:$0xff] }
  0x79   : > { %1347 = vmatmul.f32.vlgmr.msrb.gmra.mxu0 %v1278_v63 }
  0x7b   : > { %492 = vmatmul.f32.gmra.mxu1 %v421_v0  ;;  %778 = vmatmul.f32.gmra.mxu2 %v707_v1  ;;  %v431_v0 = vld [vmem:[%s3163_s22 + $0x59] sm:$0xff] }
  0x7f   : > { %1064 = vmatmul.f32.gmra.mxu3 %v993_v3 }
  0x81   : > { %1350 = vmatmul.f32.gmra.mxu0 %v1279_v4  ;;  %v1003_v4 = vld [vmem:[%s3163_s22 + $0x6a] sm:$0xff] }
  0x83   : > { %495 = vmatmul.f32.gmra.mxu1 %v422_v5  ;;  %781 = vmatmul.f32.gmra.mxu2 %v992_v62  ;;  %v1288_v62 = vld [vmem:[%s3163_s22 + $0x63] sm:$0xff] }
  0x87   : > { %1067 = vmatmul.f32.gmra.mxu3 %v994_v8 }
  0x89   : > { %1353 = vmatmul.f32.gmra.mxu0 %v1280_v9  ;;  %v432_v9 = vld [vmem:[%s3163_s22 + $0x61] sm:$0xff] }
  0x8b   : > { %498 = vmatmul.f32.gmra.mxu1 %v423_v10  ;;  %784 = vmatmul.f32.gmra.mxu2 %v993_v3  ;;  %v2987_v3 = vld [vmem:[%s4056_s1 + $0x3c8] sm:$0xff]  ;;  %v2954_v10 = vld [vmem:[%s4056_s1 + $0x2c0] sm:$0xff] }
  0x8c   : > { %2195 = vmatpush.msra.mxu3 %v2987_v3  ;;  %1624 = vmatpush.msra.mxu1 %v2954_v10  ;;  %v1009_v3 = vld [vmem:[%s3163_s22 + $0x9a] sm:$0xff] }
  0x8d   : > { %v1295_v10 = vld [vmem:[%s3163_s22 + $0x9b] sm:$0xff] }
  0x8e   : > { %2196 = vmatpush.msra.mxu3 %v2986_v21 }
  0x8f   : > { %1070 = vmatmul.f32.gmra.mxu3 %v995_v13 }
  0x90   : > { %2197 = vmatpush.msra.mxu3 %v2985_v50 }
  0x91   : > { %1356 = vmatmul.f32.gmra.mxu0 %v1281_v14 }
  0x93   : > { %501 = vmatmul.f32.gmra.mxu1 %v424_v15  ;;  %787 = vmatmul.f32.gmra.mxu2 %v994_v8 }
  0x97   : > { %1073 = vmatmul.f32.gmra.mxu3 %v996_v18 }
  0x99   : > { %1359 = vmatmul.f32.gmra.mxu0 %v1282_v19 }
  0x9b   : > { %504 = vmatmul.f32.gmra.mxu1 %v425_v20  ;;  %790 = vmatmul.f32.gmra.mxu2 %v995_v13  ;;  %v1004_v13 = vld [vmem:[%s3163_s22 + $0x72] sm:$0xff]  ;;  %v3003_v20 = vld [vmem:[%s4056_s1 + $0x448] sm:$0xff] }
  0x9c   : > { %2481 = vmatpush.msra.mxu0 %v3003_v20  ;;  %v1010_v20 = vld [vmem:[%s3163_s22 + $0xa2] sm:$0xff] }
  0x9f   : > { %1076 = vmatmul.f32.gmra.mxu3 %v997_v23 }
  0xa1   : > { %1362 = vmatmul.f32.gmra.mxu0 %v1283_v24 }
  0xa3   : > { %507 = vmatmul.f32.gmra.mxu1 %v426_v25  ;;  %793 = vmatmul.f32.gmra.mxu2 %v996_v18  ;;  %v433_v18 = vld [vmem:[%s3163_s22 + $0x69] sm:$0xff]  ;;  %v1291_v25 = vld [vmem:[%s3163_s22 + $0x7b] sm:$0xff] }
  0xa7   : > { %1079 = vmatmul.f32.gmra.mxu3 %v998_v27 }
  0xa8   : > { %v3474_v29 = vpop.f32.mrf.mxu1 }
  0xa9   : > { %1365 = vmatmul.f32.gmra.mxu0 %v1284_v28 }
  0xab   : > { %510 = vmatmul.f32.gmra.mxu1 %v427_v30  ;;  %796 = vmatmul.f32.gmra.mxu2 %v997_v23  ;;  %v2953_v30 = vld [vmem:[%s4056_s1 + $0x2b8] sm:$0xff] }
  0xac   : > { %v3489_v34 = vpop.f32.mrf.mxu0  ;;  %1625 = vmatpush.msra.mxu1 %v2953_v30 }
  0xae   : > { %v294_v35 = vpop.f32.mrf.mxu2 }
  0xaf   : > { %366 = vst [vmem:[%s3486_s13 + $0x90] sm:$0xff] %v294_v35  ;;  %1082 = vmatmul.f32.gmra.mxu3 %v999_v33 }
  0xb0   : > { %v3493_v37 = vpop.f32.mrf.mxu1 }
  0xb1   : > { %1368 = vmatmul.f32.gmra.mxu0 %v1285_v36  ;;  %v1292_v36 = vld [vmem:[%s3163_s22 + $0x83] sm:$0xff] }
  0xb2   : > { %v321_v40 = vpop.f32.mrf.mxu3 }
  0xb3   : > { %513 = vmatmul.f32.gmra.mxu1 %v428_v38  ;;  %799 = vmatmul.f32.gmra.mxu2 %v998_v27  ;;  %375 = vst [vmem:[%s3486_s13 + $0xd8] sm:$0xff] %v321_v40  ;;  %v434_v27 = vld [vmem:[%s3163_s22 + $0x71] sm:$0xff] }
  0xb6   : > { %v297_v42 = vpop.f32.mrf.mxu2  ;;  %v3501_v43 = vpop.f32.mrf.mxu0 }
  0xb7   : > { %367 = vst [vmem:[%s3486_s13 + $0x98] sm:$0xff] %v297_v42  ;;  %1085 = vmatmul.f32.gmra.mxu3 %v1000_v41  ;;  %v1007_v42 = vld [vmem:[%s3163_s22 + $0x8a] sm:$0xff] }
  0xb8   : > { %v3505_v45 = vpop.f32.mrf.mxu1 }
  0xb9   : > { %1371 = vmatmul.f32.gmra.mxu0 %v1286_v44 }
  0xba   : > { %v324_v48 = vpop.f32.mrf.mxu3 }
  0xbb   : > { %516 = vmatmul.f32.gmra.mxu1 %v429_v46  ;;  %802 = vmatmul.f32.gmra.mxu2 %v999_v33  ;;  %376 = vst [vmem:[%s3486_s13 + $0xe0] sm:$0xff] %v324_v48 }
  0xbe   : > { %v300_v52 = vpop.f32.mrf.mxu2  ;;  %v3519_v53 = vpop.f32.mrf.mxu0 }
  0xbf   : > { %368 = vst [vmem:[%s3486_s13 + $0xa0] sm:$0xff] %v300_v52  ;;  %1088 = vmatmul.f32.gmra.mxu3 %v1001_v51  ;;  %v2952_v52 = vld [vmem:[%s4056_s1 + $0x2b0] sm:$0xff] }
  0xc0   : > { %v3523_v55 = vpop.f32.mrf.mxu1  ;;  %1626 = vmatpush.msra.mxu1 %v2952_v52  ;;  %v2983_v52 = vld [vmem:[%s4056_s1 + $0x3a8] sm:$0xff] }
  0xc1   : > { %1374 = vmatmul.f32.gmra.mxu0 %v1287_v54  ;;  %v1008_v54 = vld [vmem:[%s3163_s22 + $0x92] sm:$0xff] }
  0xc2   : > { %v327_v57 = vpop.f32.mrf.mxu3 }
  0xc3   : > { %519 = vmatmul.f32.gmra.mxu1 %v430_v56  ;;  %805 = vmatmul.f32.gmra.mxu2 %v1000_v41  ;;  %377 = vst [vmem:[%s3486_s13 + $0xe8] sm:$0xff] %v327_v57  ;;  %v3002_v41 = vld [vmem:[%s4056_s1 + $0x440] sm:$0xff] }
  0xc4   : > { %2482 = vmatpush.msra.mxu0 %v3002_v41 }
  0xc6   : > { %v303_v60 = vpop.f32.mrf.mxu2  ;;  %v3531_v61 = vpop.f32.mrf.mxu0 }
  0xc7   : > { %369 = vst [vmem:[%s3486_s13 + $0xa8] sm:$0xff] %v303_v60  ;;  %1091 = vmatmul.f32.gmra.mxu3 %v1002_v59 }
  0xc8   : > { %v3535_v63 = vpop.f32.mrf.mxu1 }
  0xc9   : > { %1377 = vmatmul.f32.gmra.mxu0 %v1288_v62 }
  0xca   : > { %v330_v1 = vpop.f32.mrf.mxu3 }
  0xcb   : > { %522 = vmatmul.f32.gmra.mxu1 %v431_v0  ;;  %808 = vmatmul.f32.gmra.mxu2 %v1001_v51  ;;  %378 = vst [vmem:[%s3486_s13 + $0xf0] sm:$0xff] %v330_v1  ;;  %v437_v0 = vld [vmem:[%s3163_s22 + $0x89] sm:$0xff] }
  0xcc   : > { %v2968_v1 = vld [vmem:[%s4056_s1 + $0x330] sm:$0xff] }
  0xcd   : > { %1912 = vmatpush.msra.mxu2 %v2968_v1  ;;  %v441_v1 = vld [vmem:[%s3163_s22 + $0xa9] sm:$0xff] }
  0xce   : > { %v306_v5 = vpop.f32.mrf.mxu2  ;;  %v3546_v6 = vpop.f32.mrf.mxu0 }
  0xcf   : > { %370 = vst [vmem:[%s3486_s13 + $0xb0] sm:$0xff] %v306_v5  ;;  %1094 = vmatmul.f32.gmra.mxu3 %v1003_v4 }
  0xd0   : > { %v3550_v8 = vpop.f32.mrf.mxu1 }
  0xd1   : > { %1380 = vmatmul.f32.gmra.mxu0 %v1289_v7 }
  0xd2   : > { %v333_v11 = vpop.f32.mrf.mxu3 }
  0xd3   : > { %525 = vmatmul.f32.gmra.mxu1 %v432_v9  ;;  %811 = vmatmul.f32.gmra.mxu2 %v1002_v59  ;;  %379 = vst [vmem:[%s3486_s13 + $0xf8] sm:$0xff] %v333_v11  ;;  %v1294_v59 = vld [vmem:[%s3163_s22 + $0x93] sm:$0xff] }
  0xd6   : > { %v309_v14 = vpop.f32.mrf.mxu2  ;;  %v3561_v15 = vpop.f32.mrf.mxu0 }
  0xd7   : > { %371 = vst [vmem:[%s3486_s13 + $0xb8] sm:$0xff] %v309_v14  ;;  %1097 = vmatmul.f32.gmra.mxu3 %v1004_v13  ;;  %v3001_v14 = vld [vmem:[%s4056_s1 + $0x438] sm:$0xff] }
  0xd8   : > { %v3565_v17 = vpop.f32.mrf.mxu1  ;;  %2483 = vmatpush.msra.mxu0 %v3001_v14  ;;  %v442_v14 = vld [vmem:[%s3163_s22 + $0xb1] sm:$0xff] }
  0xd9   : > { %1383 = vmatmul.f32.gmra.mxu0 %v1290_v16 }
  0xda   : > { %v336_v19 = vpop.f32.mrf.mxu3 }
  0xdb   : > { %528 = vmatmul.f32.gmra.mxu1 %v433_v18  ;;  %814 = vmatmul.f32.gmra.mxu2 %v1003_v4  ;;  %380 = vst [vmem:[%s3486_s13 + $0x100] sm:$0xff] %v336_v19  ;;  %v2984_v18 = vld [vmem:[%s4056_s1 + $0x3b0] sm:$0xff]  ;;  %v2951_v19 = vld [vmem:[%s4056_s1 + $0x2a8] sm:$0xff] }
  0xdc   : > { %2198 = vmatpush.msra.mxu3 %v2984_v18  ;;  %1627 = vmatpush.msra.mxu1 %v2951_v19  ;;  %v2982_v18 = vld [vmem:[%s4056_s1 + $0x3a0] sm:$0xff] }
  0xdd   : > { %v1014_v19 = vld [vmem:[%s3163_s22 + $0xc2] sm:$0xff] }
  0xde   : > { %v312_v23 = vpop.f32.mrf.mxu2  ;;  %v3576_v24 = vpop.f32.mrf.mxu0  ;;  %2199 = vmatpush.msra.mxu3 %v2983_v52 }
  0xdf   : > { %372 = vst [vmem:[%s3486_s13 + $0xc0] sm:$0xff] %v312_v23  ;;  %1100 = vmatmul.f32.gmra.mxu3 %v1005_v22 }
  0xe0   : > { %v3580_v26 = vpop.f32.mrf.mxu1  ;;  %2200 = vmatpush.msra.mxu3 %v2982_v18  ;;  %v1304_v18 = vld [vmem:[%s3163_s22 + $0xe3] sm:$0xff] }
  0xe1   : > { %1386 = vmatmul.f32.gmra.mxu0 %v1291_v25 }
  0xe2   : > { %v339_v28 = vpop.f32.mrf.mxu3 }
  0xe3   : > { %531 = vmatmul.f32.gmra.mxu1 %v434_v27  ;;  %817 = vmatmul.f32.gmra.mxu2 %v1004_v13  ;;  %381 = vst [vmem:[%s3486_s13 + $0x108] sm:$0xff] %v339_v28  ;;  %v438_v13 = vld [vmem:[%s3163_s22 + $0x91] sm:$0xff]  ;;  %v1296_v27 = vld [vmem:[%s3163_s22 + $0xa3] sm:$0xff] }
  0xe6   : > { %v315_v33 = vpop.f32.mrf.mxu2  ;;  %v3591_v35 = vpop.f32.mrf.mxu0 }
  0xe7   : > { %373 = vst [vmem:[%s3486_s13 + $0xc8] sm:$0xff] %v315_v33  ;;  %1103 = vmatmul.f32.gmra.mxu3 %v1006_v32 }
  0xe8   : > { %v3595_v38 = vpop.f32.mrf.mxu1 }
  0xe9   : > { %1389 = vmatmul.f32.gmra.mxu0 %v1292_v36  ;;  %v1011_v36 = vld [vmem:[%s3163_s22 + $0xaa] sm:$0xff] }
  0xea   : > { %v342_v40 = vpop.f32.mrf.mxu3 }
  0xeb   : > { %534 = vmatmul.f32.gmra.mxu1 %v435_v39  ;;  %820 = vmatmul.f32.gmra.mxu2 %v1005_v22  ;;  %382 = vst [vmem:[%s3486_s13 + $0x110] sm:$0xff] %v342_v40 }
  0xee   : > { %v318_v44 = vpop.f32.mrf.mxu2  ;;  %v3603_v46 = vpop.f32.mrf.mxu0 }
  0xef   : > { %374 = vst [vmem:[%s3486_s13 + $0xd0] sm:$0xff] %v318_v44  ;;  %1106 = vmatmul.f32.gmra.mxu3 %v1007_v42  ;;  %v1297_v44 = vld [vmem:[%s3163_s22 + $0xab] sm:$0xff] }
  0xf0   : > { %v490_v48 = vpop.f32.mrf.mxu1 }
  0xf1   : > { %1392 = vmatmul.f32.gmra.mxu0 %v1293_v47  ;;  %v598_v56 = vadd.f32 %v490_v48, %v3489_v34 }
  0xf2   : > { %v345_v51 = vpop.f32.mrf.mxu3 }
  0xf3   : > { %537 = vmatmul.f32.gmra.mxu1 %v436_v49  ;;  %823 = vmatmul.f32.gmra.mxu2 %v1006_v32  ;;  %383 = vst [vmem:[%s3486_s13 + $0x118] sm:$0xff] %v345_v51  ;;  %v440_v49 = vld [vmem:[%s3163_s22 + $0xa1] sm:$0xff] }
  0xf6   : > { %v776_v57 = vpop.f32.mrf.mxu2  ;;  %v1348_v58 = vpop.f32.mrf.mxu0 }
  0xf7   : > { %v884_v60 = vadd.f32 %v776_v57, %v598_v56  ;;  %1109 = vmatmul.f32.gmra.mxu3 %v1008_v54 }
  0xf8   : > { %v493_v62 = vpop.f32.mrf.mxu1 }
  0xf9   : > { %1395 = vmatmul.f32.gmra.mxu0 %v1294_v59  ;;  %v599_v4 = vadd.f32 %v493_v62, %v3501_v43 }
  0xfa   : > { %v1062_v2 = vpop.f32.mrf.mxu3 }
  0xfb   : > { %540 = vmatmul.f32.gmra.mxu1 %v437_v0  ;;  %826 = vmatmul.f32.gmra.mxu2 %v1007_v42  ;;  %v1170_v34 = vadd.f32 %v1062_v2, %v884_v60  ;;  %v1298_v60 = vld [vmem:[%s3163_s22 + $0xb3] sm:$0xff]  ;;  %v2950_v2 = vld [vmem:[%s4056_s1 + $0x2a0] sm:$0xff] }
  0xfc   : > { %1628 = vmatpush.msra.mxu1 %v2950_v2  ;;  %v1017_v2 = vld [vmem:[%s3163_s22 + $0xda] sm:$0xff] }
  0xfd   : > { %v1456_v5 = vadd.f32 %v1348_v58, %v1170_v34 }
  0xfe   : > { %v779_v7 = vpop.f32.mrf.mxu2  ;;  %v1351_v9 = vpop.f32.mrf.mxu0 }
  0xff   : > { %v885_v11 = vadd.f32 %v779_v7, %v599_v4  ;;  %1112 = vmatmul.f32.gmra.mxu3 %v1009_v3  ;;  %1492 = vst [vmem:[%s3486_s13] sm:$0xff] %v1456_v5  ;;  %v1013_v4 = vld [vmem:[%s3163_s22 + $0xba] sm:$0xff] }
 0x100   : > { %v496_v12 = vpop.f32.mrf.mxu1 }
 0x101   : > { %1398 = vmatmul.f32.gmra.mxu0 %v1295_v10  ;;  %v600_v21 = vadd.f32 %v496_v12, %v3519_v53  ;;  %v2967_v53 = vld [vmem:[%s4056_s1 + $0x328] sm:$0xff] }
 0x102   : > { %v1065_v16 = vpop.f32.mrf.mxu3  ;;  %1913 = vmatpush.msra.mxu2 %v2967_v53  ;;  %v1015_v53 = vld [vmem:[%s3163_s22 + $0xca] sm:$0xff] }
 0x103   : > { %543 = vmatmul.f32.gmra.mxu1 %v438_v13  ;;  %829 = vmatmul.f32.gmra.mxu2 %v1008_v54  ;;  %v1171_v43 = vadd.f32 %v1065_v16, %v885_v11  ;;  %v1012_v54 = vld [vmem:[%s3163_s22 + $0xb2] sm:$0xff]  ;;  %v1299_v11 = vld [vmem:[%s3163_s22 + $0xbb] sm:$0xff] }
 0x105   : > { %v1457_v22 = vadd.f32 %v1351_v9, %v1171_v43 }
 0x106   : > { %v782_v23 = vpop.f32.mrf.mxu2  ;;  %v1354_v25 = vpop.f32.mrf.mxu0 }
 0x107   : > { %v886_v28 = vadd.f32 %v782_v23, %v600_v21  ;;  %1115 = vmatmul.f32.gmra.mxu3 %v1010_v20  ;;  %1493 = vst [vmem:[%s3486_s13 + $0x8] sm:$0xff] %v1457_v22 }
 0x108   : > { %v499_v30 = vpop.f32.mrf.mxu1 }
 0x109   : > { %1401 = vmatmul.f32.gmra.mxu0 %v1296_v27  ;;  %v601_v39 = vadd.f32 %v499_v30, %v3531_v61  ;;  %v3000_v61 = vld [vmem:[%s4056_s1 + $0x430] sm:$0xff]  ;;  %v443_v30 = vld [vmem:[%s3163_s22 + $0xb9] sm:$0xff] }
 0x10a   : > { %v1068_v32 = vpop.f32.mrf.mxu3  ;;  %2484 = vmatpush.msra.mxu0 %v3000_v61 }
 0x10b   : > { %546 = vmatmul.f32.gmra.mxu1 %v439_v31  ;;  %832 = vmatmul.f32.gmra.mxu2 %v1009_v3  ;;  %v1172_v33 = vadd.f32 %v1068_v32, %v886_v28  ;;  %v2966_v3 = vld [vmem:[%s4056_s1 + $0x320] sm:$0xff] }
 0x10c   : > { %1914 = vmatpush.msra.mxu2 %v2966_v3 }
 0x10d   : > { %v1458_v40 = vadd.f32 %v1354_v25, %v1172_v33  ;;  %v1300_v25 = vld [vmem:[%s3163_s22 + $0xc3] sm:$0xff]  ;;  %v2965_v33 = vld [vmem:[%s4056_s1 + $0x318] sm:$0xff] }
 0x10e   : > { %v785_v41 = vpop.f32.mrf.mxu2  ;;  %v1357_v42 = vpop.f32.mrf.mxu0  ;;  %1915 = vmatpush.msra.mxu2 %v2965_v33  ;;  %v1305_v33 = vld [vmem:[%s3163_s22 + $0xeb] sm:$0xff] }
 0x10f   : > { %v887_v47 = vadd.f32 %v785_v41, %v601_v39  ;;  %1118 = vmatmul.f32.gmra.mxu3 %v1011_v36  ;;  %1494 = vst [vmem:[%s3486_s13 + $0x10] sm:$0xff] %v1458_v40 }
 0x110   : > { %v502_v48 = vpop.f32.mrf.mxu1 }
 0x111   : > { %1404 = vmatmul.f32.gmra.mxu0 %v1297_v44  ;;  %v602_v56 = vadd.f32 %v502_v48, %v3546_v6  ;;  %v444_v48 = vld [vmem:[%s3163_s22 + $0xc1] sm:$0xff] }
 0x112   : > { %v1071_v50 = vpop.f32.mrf.mxu3 }
 0x113   : > { %549 = vmatmul.f32.gmra.mxu1 %v440_v49  ;;  %835 = vmatmul.f32.gmra.mxu2 %v1010_v20  ;;  %v1173_v51 = vadd.f32 %v1071_v50, %v887_v47 }
 0x115   : > { %v1459_v57 = vadd.f32 %v1357_v42, %v1173_v51  ;;  %v1301_v42 = vld [vmem:[%s3163_s22 + $0xcb] sm:$0xff] }
 0x116   : > { %v788_v58 = vpop.f32.mrf.mxu2  ;;  %v1360_v59 = vpop.f32.mrf.mxu0  ;;  %v1016_v51 = vld [vmem:[%s3163_s22 + $0xd2] sm:$0xff] }
 0x117   : > { %v888_v62 = vadd.f32 %v788_v58, %v602_v56  ;;  %1121 = vmatmul.f32.gmra.mxu3 %v1012_v54  ;;  %1495 = vst [vmem:[%s3486_s13 + $0x18] sm:$0xff] %v1459_v57  ;;  %v1302_v57 = vld [vmem:[%s3163_s22 + $0xd3] sm:$0xff] }
 0x118   : > { %v505_v0 = vpop.f32.mrf.mxu1 }
 0x119   : > { %1407 = vmatmul.f32.gmra.mxu0 %v1298_v60  ;;  %v603_v5 = vadd.f32 %v505_v0, %v3561_v15  ;;  %v2999_v15 = vld [vmem:[%s4056_s1 + $0x428] sm:$0xff] }
 0x11a   : > { %v1074_v34 = vpop.f32.mrf.mxu3  ;;  %2485 = vmatpush.msra.mxu0 %v2999_v15  ;;  %v445_v60 = vld [vmem:[%s3163_s22 + $0xc9] sm:$0xff] }
 0x11b   : > { %552 = vmatmul.f32.gmra.mxu1 %v441_v1  ;;  %838 = vmatmul.f32.gmra.mxu2 %v1011_v36  ;;  %v1174_v6 = vadd.f32 %v1074_v34, %v888_v62  ;;  %v2981_v62 = vld [vmem:[%s4056_s1 + $0x398] sm:$0xff]  ;;  %v2948_v1 = vld [vmem:[%s4056_s1 + $0x290] sm:$0xff] }
 0x11c   : > { %2201 = vmatpush.msra.mxu3 %v2981_v62 }
 0x11d   : > { %v1460_v7 = vadd.f32 %v1360_v59, %v1174_v6 }
 0x11e   : > { %v791_v9 = vpop.f32.mrf.mxu2  ;;  %v1363_v10 = vpop.f32.mrf.mxu0 }
 0x11f   : > { %v889_v12 = vadd.f32 %v791_v9, %v603_v5  ;;  %1124 = vmatmul.f32.gmra.mxu3 %v1013_v4  ;;  %1496 = vst [vmem:[%s3486_s13 + $0x20] sm:$0xff] %v1460_v7  ;;  %v1303_v5 = vld [vmem:[%s3163_s22 + $0xdb] sm:$0xff] }
 0x120   : > { %v508_v13 = vpop.f32.mrf.mxu1 }
 0x121   : > { %1410 = vmatmul.f32.gmra.mxu0 %v1299_v11  ;;  %v604_v20 = vadd.f32 %v508_v13, %v3576_v24  ;;  %v2949_v24 = vld [vmem:[%s4056_s1 + $0x298] sm:$0xff]  ;;  %v2964_v11 = vld [vmem:[%s4056_s1 + $0x310] sm:$0xff]  ;;  %v1018_v13 = vld [vmem:[%s3163_s22 + $0xe2] sm:$0xff] }
 0x122   : > { %v1077_v16 = vpop.f32.mrf.mxu3  ;;  %1629 = vmatpush.msra.mxu1 %v2949_v24  ;;  %1916 = vmatpush.msra.mxu2 %v2964_v11  ;;  %v1308_v11 = vld [vmem:[%s3163_s22 + $0x103] sm:$0xff] }
 0x123   : > { %555 = vmatmul.f32.gmra.mxu1 %v442_v14  ;;  %841 = vmatmul.f32.gmra.mxu2 %v1012_v54  ;;  %v1175_v43 = vadd.f32 %v1077_v16, %v889_v12 }
 0x124   : > { %1630 = vmatpush.msra.mxu1 %v2948_v1 }
 0x125   : > { %v1461_v21 = vadd.f32 %v1363_v10, %v1175_v43  ;;  %v446_v10 = vld [vmem:[%s3163_s22 + $0xd1] sm:$0xff] }
 0x126   : > { %v794_v22 = vpop.f32.mrf.mxu2  ;;  %v1366_v23 = vpop.f32.mrf.mxu0 }
 0x127   : > { %v890_v27 = vadd.f32 %v794_v22, %v604_v20  ;;  %1127 = vmatmul.f32.gmra.mxu3 %v1014_v19  ;;  %1497 = vst [vmem:[%s3486_s13 + $0x28] sm:$0xff] %v1461_v21  ;;  %v447_v21 = vld [vmem:[%s3163_s22 + $0xd9] sm:$0xff] }
 0x128   : > { %v511_v28 = vpop.f32.mrf.mxu1  ;;  %v2997_v22 = vld [vmem:[%s4056_s1 + $0x418] sm:$0xff] }
 0x129   : > { %1413 = vmatmul.f32.gmra.mxu0 %v1300_v25  ;;  %v605_v36 = vadd.f32 %v511_v28, %v3591_v35  ;;  %v2998_v35 = vld [vmem:[%s4056_s1 + $0x420] sm:$0xff]  ;;  %v2980_v25 = vld [vmem:[%s4056_s1 + $0x390] sm:$0xff] }
 0x12a   : > { %v1080_v31 = vpop.f32.mrf.mxu3  ;;  %2486 = vmatpush.msra.mxu0 %v2998_v35  ;;  %v1019_v28 = vld [vmem:[%s3163_s22 + $0xea] sm:$0xff]  ;;  %2202 = vmatpush.msra.mxu3 %v2980_v25  ;;  %v452_v25 = vld [vmem:[%s3163_s22 + $0x101] sm:$0xff] }
 0x12b   : > { %558 = vmatmul.f32.gmra.mxu1 %v443_v30  ;;  %844 = vmatmul.f32.gmra.mxu2 %v1013_v4  ;;  %v1176_v32 = vadd.f32 %v1080_v31, %v890_v27  ;;  %v2947_v27 = vld [vmem:[%s4056_s1 + $0x288] sm:$0xff] }
 0x12c   : > { %2487 = vmatpush.msra.mxu0 %v2997_v22  ;;  %1631 = vmatpush.msra.mxu1 %v2947_v27  ;;  %v1309_v22 = vld [vmem:[%s3163_s22 + $0x10b] sm:$0xff] }
 0x12d   : > { %v1462_v39 = vadd.f32 %v1366_v23, %v1176_v32 }
 0x12e   : > { %v797_v40 = vpop.f32.mrf.mxu2  ;;  %v1369_v41 = vpop.f32.mrf.mxu0 }
 0x12f   : > { %v891_v44 = vadd.f32 %v797_v40, %v605_v36  ;;  %1130 = vmatmul.f32.gmra.mxu3 %v1015_v53  ;;  %1498 = vst [vmem:[%s3486_s13 + $0x30] sm:$0xff] %v1462_v39  ;;  %v448_v39 = vld [vmem:[%s3163_s22 + $0xe1] sm:$0xff] }
 0x130   : > { %v514_v47 = vpop.f32.mrf.mxu1 }
 0x131   : > { %1416 = vmatmul.f32.gmra.mxu0 %v1301_v42  ;;  %v606_v61 = vadd.f32 %v514_v47, %v3603_v46  ;;  %v1020_v42 = vld [vmem:[%s3163_s22 + $0xf2] sm:$0xff] }
 0x132   : > { %v1083_v49 = vpop.f32.mrf.mxu3 }
 0x133   : > { %561 = vmatmul.f32.gmra.mxu1 %v444_v48  ;;  %847 = vmatmul.f32.gmra.mxu2 %v1014_v19  ;;  %v1177_v50 = vadd.f32 %v1083_v49, %v891_v44 }
 0x135   : > { %v1463_v52 = vadd.f32 %v1369_v41, %v1177_v50  ;;  %v1306_v50 = vld [vmem:[%s3163_s22 + $0xf3] sm:$0xff] }
 0x136   : > { %v800_v54 = vpop.f32.mrf.mxu2  ;;  %v1372_v56 = vpop.f32.mrf.mxu0 }
 0x137   : > { %v892_v58 = vadd.f32 %v800_v54, %v606_v61  ;;  %1133 = vmatmul.f32.gmra.mxu3 %v1016_v51  ;;  %1499 = vst [vmem:[%s3486_s13 + $0x38] sm:$0xff] %v1463_v52  ;;  %v449_v61 = vld [vmem:[%s3163_s22 + $0xe9] sm:$0xff] }
 0x138   : > { %v517_v59 = vpop.f32.mrf.mxu1 }
 0x139   : > { %1419 = vmatmul.f32.gmra.mxu0 %v1302_v57  ;;  %v607_v34 = vadd.f32 %v517_v59, %v3474_v29  ;;  %v1021_v57 = vld [vmem:[%s3163_s22 + $0xfa] sm:$0xff] }
 0x13a   : > { %v1086_v0 = vpop.f32.mrf.mxu3 }
 0x13b   : > { %564 = vmatmul.f32.gmra.mxu1 %v445_v60  ;;  %850 = vmatmul.f32.gmra.mxu2 %v1015_v53  ;;  %v1178_v46 = vadd.f32 %v1086_v0, %v892_v58  ;;  %v1307_v0 = vld [vmem:[%s3163_s22 + $0xfb] sm:$0xff] }
 0x13d   : > { %v1464_v6 = vadd.f32 %v1372_v56, %v1178_v46  ;;  %v2979_v56 = vld [vmem:[%s4056_s1 + $0x388] sm:$0xff] }
 0x13e   : > { %v803_v3 = vpop.f32.mrf.mxu2  ;;  %v1375_v4 = vpop.f32.mrf.mxu0  ;;  %2203 = vmatpush.msra.mxu3 %v2979_v56 }
 0x13f   : > { %v893_v7 = vadd.f32 %v803_v3, %v607_v34  ;;  %1136 = vmatmul.f32.gmra.mxu3 %v1017_v2  ;;  %1500 = vst [vmem:[%s3486_s13 + $0x40] sm:$0xff] %v1464_v6  ;;  %v2946_v34 = vld [vmem:[%s4056_s1 + $0x280] sm:$0xff] }
 0x140   : > { %v520_v9 = vpop.f32.mrf.mxu1  ;;  %1632 = vmatpush.msra.mxu1 %v2946_v34  ;;  %v2962_v3 = vld [vmem:[%s4056_s1 + $0x300] sm:$0xff]  ;;  %v1027_v34 = vld [vmem:[%s3163_s22 + $0x12a] sm:$0xff] }
 0x141   : > { %1422 = vmatmul.f32.gmra.mxu0 %v1303_v5  ;;  %v608_v14 = vadd.f32 %v520_v9, %v3493_v37 }
 0x142   : > { %v1089_v12 = vpop.f32.mrf.mxu3 }
 0x143   : > { %567 = vmatmul.f32.gmra.mxu1 %v446_v10  ;;  %853 = vmatmul.f32.gmra.mxu2 %v1016_v51  ;;  %v1179_v29 = vadd.f32 %v1089_v12, %v893_v7 }
 0x145   : > { %v1465_v16 = vadd.f32 %v1375_v4, %v1179_v29  ;;  %v1022_v4 = vld [vmem:[%s3163_s22 + $0x102] sm:$0xff] }
 0x146   : > { %v806_v43 = vpop.f32.mrf.mxu2  ;;  %v1378_v15 = vpop.f32.mrf.mxu0 }
 0x147   : > { %v894_v19 = vadd.f32 %v806_v43, %v608_v14  ;;  %1139 = vmatmul.f32.gmra.mxu3 %v1018_v13  ;;  %1501 = vst [vmem:[%s3486_s13 + $0x48] sm:$0xff] %v1465_v16  ;;  %v2978_v43 = vld [vmem:[%s4056_s1 + $0x380] sm:$0xff] }
 0x148   : > { %v523_v20 = vpop.f32.mrf.mxu1  ;;  %2204 = vmatpush.msra.mxu3 %v2978_v43 }
 0x149   : > { %1425 = vmatmul.f32.gmra.mxu0 %v1304_v18  ;;  %v609_v30 = vadd.f32 %v523_v20, %v3505_v45  ;;  %v2963_v45 = vld [vmem:[%s4056_s1 + $0x308] sm:$0xff] }
 0x14a   : > { %v1092_v23 = vpop.f32.mrf.mxu3  ;;  %1917 = vmatpush.msra.mxu2 %v2963_v45  ;;  %v1025_v45 = vld [vmem:[%s3163_s22 + $0x11a] sm:$0xff] }
 0x14b   : > { %570 = vmatmul.f32.gmra.mxu1 %v447_v21  ;;  %856 = vmatmul.f32.gmra.mxu2 %v1017_v2  ;;  %v1180_v37 = vadd.f32 %v1092_v23, %v894_v19  ;;  %v450_v2 = vld [vmem:[%s3163_s22 + $0xf1] sm:$0xff] }
 0x14c   : > { %1918 = vmatpush.msra.mxu2 %v2962_v3 }
 0x14d   : > { %v1466_v31 = vadd.f32 %v1378_v15, %v1180_v37  ;;  %v1023_v15 = vld [vmem:[%s3163_s22 + $0x10a] sm:$0xff] }
 0x14e   : > { %v809_v32 = vpop.f32.mrf.mxu2  ;;  %v1381_v24 = vpop.f32.mrf.mxu0 }
 0x14f   : > { %v895_v53 = vadd.f32 %v809_v32, %v609_v30  ;;  %1142 = vmatmul.f32.gmra.mxu3 %v1019_v28  ;;  %1502 = vst [vmem:[%s3486_s13 + $0x50] sm:$0xff] %v1466_v31  ;;  %v1024_v30 = vld [vmem:[%s3163_s22 + $0x112] sm:$0xff] }
 0x150   : > { %v526_v36 = vpop.f32.mrf.mxu1 }
 0x151   : > { %1428 = vmatmul.f32.gmra.mxu0 %v1305_v33  ;;  %v610_v44 = vadd.f32 %v526_v36, %v3523_v55  ;;  %v2996_v55 = vld [vmem:[%s4056_s1 + $0x410] sm:$0xff] }
 0x152   : > { %v1095_v40 = vpop.f32.mrf.mxu3  ;;  %2488 = vmatpush.msra.mxu0 %v2996_v55  ;;  %v1310_v33 = vld [vmem:[%s3163_s22 + $0x113] sm:$0xff] }
 0x153   : > { %573 = vmatmul.f32.gmra.mxu1 %v448_v39  ;;  %859 = vmatmul.f32.gmra.mxu2 %v1018_v13  ;;  %v1181_v41 = vadd.f32 %v1095_v40, %v895_v53  ;;  %v451_v13 = vld [vmem:[%s3163_s22 + $0xf9] sm:$0xff]  ;;  %v453_v39 = vld [vmem:[%s3163_s22 + $0x109] sm:$0xff] }
 0x155   : > { %v1467_v47 = vadd.f32 %v1381_v24, %v1181_v41 }
 0x156   : > { %v812_v48 = vpop.f32.mrf.mxu2  ;;  %v1384_v49 = vpop.f32.mrf.mxu0 }
 0x157   : > { %v896_v35 = vadd.f32 %v812_v48, %v610_v44  ;;  %1145 = vmatmul.f32.gmra.mxu3 %v1020_v42  ;;  %1503 = vst [vmem:[%s3486_s13 + $0x58] sm:$0xff] %v1467_v47 }
 0x158   : > { %v529_v51 = vpop.f32.mrf.mxu1 }
 0x159   : > { %1431 = vmatmul.f32.gmra.mxu0 %v1306_v50  ;;  %v611_v58 = vadd.f32 %v529_v51, %v3535_v63  ;;  %v454_v51 = vld [vmem:[%s3163_s22 + $0x111] sm:$0xff] }
 0x15a   : > { %v1098_v52 = vpop.f32.mrf.mxu3 }
 0x15b   : > { %576 = vmatmul.f32.gmra.mxu1 %v449_v61  ;;  %862 = vmatmul.f32.gmra.mxu2 %v1019_v28  ;;  %v1182_v54 = vadd.f32 %v1098_v52, %v896_v35 }
 0x15d   : > { %v1468_v59 = vadd.f32 %v1384_v49, %v1182_v54  ;;  %v1311_v49 = vld [vmem:[%s3163_s22 + $0x11b] sm:$0xff]  ;;  %v402_v54 = vld [vmem:[%s3486_s13 + $0x90] sm:$0xff] }
 0x15e   : > { %v815_v60 = vpop.f32.mrf.mxu2  ;;  %v1387_v62 = vpop.f32.mrf.mxu0 }
 0x15f   : > { %v897_v46 = vadd.f32 %v815_v60, %v611_v58  ;;  %1148 = vmatmul.f32.gmra.mxu3 %v1021_v57  ;;  %1504 = vst [vmem:[%s3486_s13 + $0x60] sm:$0xff] %v1468_v59  ;;  %v1312_v59 = vld [vmem:[%s3163_s22 + $0x123] sm:$0xff] }
 0x160   : > { %v532_v1 = vpop.f32.mrf.mxu1 }
 0x161   : > { %1434 = vmatmul.f32.gmra.mxu0 %v1307_v0  ;;  %v612_v5 = vadd.f32 %v532_v1, %v3550_v8  ;;  %v2995_v8 = vld [vmem:[%s4056_s1 + $0x408] sm:$0xff]  ;;  %v455_v0 = vld [vmem:[%s3163_s22 + $0x119] sm:$0xff] }
 0x162   : > { %v1101_v6 = vpop.f32.mrf.mxu3  ;;  %2489 = vmatpush.msra.mxu0 %v2995_v8 }
 0x163   : > { %579 = vmatmul.f32.gmra.mxu1 %v450_v2  ;;  %865 = vmatmul.f32.gmra.mxu2 %v1020_v42  ;;  %v1183_v63 = vadd.f32 %v1101_v6, %v897_v46  ;;  %v403_v2 = vld [vmem:[%s3486_s13 + $0x98] sm:$0xff] }
 0x165   : > { %v1469_v7 = vadd.f32 %v1387_v62, %v1183_v63 }
 0x166   : > { %v818_v9 = vpop.f32.mrf.mxu2  ;;  %v1390_v10 = vpop.f32.mrf.mxu0 }
 0x167   : > { %v898_v12 = vadd.f32 %v818_v9, %v612_v5  ;;  %1151 = vmatmul.f32.gmra.mxu3 %v1022_v4  ;;  %1505 = vst [vmem:[%s3486_s13 + $0x68] sm:$0xff] %v1469_v7  ;;  %v1313_v5 = vld [vmem:[%s3163_s22 + $0x12b] sm:$0xff] }
 0x168   : > { %v535_v29 = vpop.f32.mrf.mxu1 }
 0x169   : > { %1437 = vmatmul.f32.gmra.mxu0 %v1308_v11  ;;  %v613_v18 = vadd.f32 %v535_v29, %v3565_v17  ;;  %v1850_v11 = vld [vmem:[%s3163_s22 + $0x24] sm:$0xff] }
 0x16a   : > { %v1104_v14 = vpop.f32.mrf.mxu3 }
 0x16b   : > { %582 = vmatmul.f32.gmra.mxu1 %v451_v13  ;;  %868 = vmatmul.f32.gmra.mxu2 %v1021_v57  ;;  %v1184_v16 = vadd.f32 %v1104_v14, %v898_v12  ;;  %v404_v13 = vld [vmem:[%s3486_s13 + $0xa0] sm:$0xff] }
 0x16c   : > { %v2136_v14 = vld [vmem:[%s3163_s22 + $0x25] sm:$0xff] }
 0x16d   : > { %v1470_v19 = vadd.f32 %v1390_v10, %v1184_v16  ;;  %v1564_v10 = vld [vmem:[%s3163_s22 + $0x14] sm:$0xff] }
 0x16e   : > { %v821_v20 = vpop.f32.mrf.mxu2  ;;  %v1393_v21 = vpop.f32.mrf.mxu0 }
 0x16f   : > { %v899_v23 = vadd.f32 %v821_v20, %v613_v18  ;;  %1154 = vmatmul.f32.gmra.mxu3 %v1023_v15  ;;  %1506 = vst [vmem:[%s3486_s13 + $0x70] sm:$0xff] %v1470_v19  ;;  %v2422_v18 = vld [vmem:[%s3163_s22 + $0x26] sm:$0xff] }
 0x170   : > { %v538_v37 = vpop.f32.mrf.mxu1 }
 0x171   : > { %1440 = vmatmul.f32.gmra.mxu0 %v1309_v22  ;;  %v614_v17 = vadd.f32 %v538_v37, %v3580_v26  ;;  %v2994_v26 = vld [vmem:[%s4056_s1 + $0x400] sm:$0xff]  ;;  %v1851_v22 = vld [vmem:[%s3163_s22 + $0x2c] sm:$0xff] }
 0x172   : > { %v1107_v27 = vpop.f32.mrf.mxu3  ;;  %2490 = vmatpush.msra.mxu0 %v2994_v26 }
 0x173   : > { %585 = vmatmul.f32.gmra.mxu1 %v452_v25  ;;  %871 = vmatmul.f32.gmra.mxu2 %v1022_v4  ;;  %v1185_v28 = vadd.f32 %v1107_v27, %v899_v23  ;;  %v405_v25 = vld [vmem:[%s3486_s13 + $0xa8] sm:$0xff] }
 0x174   : > { %v2137_v27 = vld [vmem:[%s3163_s22 + $0x2d] sm:$0xff] }
 0x175   : > { %v1471_v31 = vadd.f32 %v1393_v21, %v1185_v28  ;;  %v1565_v21 = vld [vmem:[%s3163_s22 + $0x1c] sm:$0xff] }
 0x176   : > { %v824_v32 = vpop.f32.mrf.mxu2  ;;  %v1396_v24 = vpop.f32.mrf.mxu0 }
 0x177   : > { %v900_v53 = vadd.f32 %v824_v32, %v614_v17  ;;  %1157 = vmatmul.f32.gmra.mxu3 %v1024_v30  ;;  %1507 = vst [vmem:[%s3486_s13 + $0x78] sm:$0xff] %v1471_v31  ;;  %v2423_v32 = vld [vmem:[%s3163_s22 + $0x2e] sm:$0xff] }
 0x178   : > { %v541_v36 = vpop.f32.mrf.mxu1 }
 0x179   : > { %1443 = vmatmul.f32.gmra.mxu0 %v1310_v33  ;;  %v615_v42 = vadd.f32 %v541_v36, %v3595_v38  ;;  %v1026_v38 = vld [vmem:[%s3163_s22 + $0x122] sm:$0xff] }
 0x17a   : > { %v1110_v40 = vpop.f32.mrf.mxu3 }
 0x17b   : > { %588 = vmatmul.f32.gmra.mxu1 %v453_v39  ;;  %874 = vmatmul.f32.gmra.mxu2 %v1023_v15  ;;  %v1186_v41 = vadd.f32 %v1110_v40, %v900_v53  ;;  %v1852_v53 = vld [vmem:[%s3163_s22 + $0x34] sm:$0xff] }
 0x17c   : > { %v406_v40 = vld [vmem:[%s3486_s13 + $0xb0] sm:$0xff] }
 0x17d   : > { %v1472_v44 = vadd.f32 %v1396_v24, %v1186_v41  ;;  %v2138_v41 = vld [vmem:[%s3163_s22 + $0x35] sm:$0xff] }
 0x17e   : > { %v827_v47 = vpop.f32.mrf.mxu2  ;;  %v1399_v48 = vpop.f32.mrf.mxu0 }
 0x17f   : > { %v901_v50 = vadd.f32 %v827_v47, %v615_v42  ;;  %1160 = vmatmul.f32.gmra.mxu3 %v1025_v45  ;;  %1508 = vst [vmem:[%s3486_s13 + $0x80] sm:$0xff] %v1472_v44  ;;  %v2424_v47 = vld [vmem:[%s3163_s22 + $0x36] sm:$0xff] }
 0x180   : > { %v544_v35 = vpop.f32.mrf.mxu1 }
 0x181   : > { %1446 = vmatmul.f32.gmra.mxu0 %v1311_v49  ;;  %v616_v55 = vadd.f32 %v544_v35, %v402_v54 }
 0x182   : > { %v1113_v61 = vpop.f32.mrf.mxu3 }
 0x183   : > { %591 = vmatmul.f32.gmra.mxu1 %v454_v51  ;;  %877 = vmatmul.f32.gmra.mxu2 %v1024_v30  ;;  %v1187_v52 = vadd.f32 %v1113_v61, %v901_v50  ;;  %v1853_v50 = vld [vmem:[%s3163_s22 + $0x3c] sm:$0xff] }
 0x184   : > { %v407_v61 = vld [vmem:[%s3486_s13 + $0xb8] sm:$0xff] }
 0x185   : > { %v1473_v56 = vadd.f32 %v1399_v48, %v1187_v52  ;;  %v2139_v52 = vld [vmem:[%s3163_s22 + $0x3d] sm:$0xff] }
 0x186   : > { %v830_v57 = vpop.f32.mrf.mxu2  ;;  %v1402_v58 = vpop.f32.mrf.mxu0 }
 0x187   : > { %v902_v60 = vadd.f32 %v830_v57, %v616_v55  ;;  %1163 = vmatmul.f32.gmra.mxu3 %v1026_v38  ;;  %1509 = vst [vmem:[%s3486_s13 + $0x88] sm:$0xff] %v1473_v56  ;;  %v2425_v57 = vld [vmem:[%s3163_s22 + $0x3e] sm:$0xff] }
 0x188   : > { %v547_v62 = vpop.f32.mrf.mxu1 }
 0x189   : > { %1449 = vmatmul.f32.gmra.mxu0 %v1312_v59  ;;  %v617_v6 = vadd.f32 %v547_v62, %v403_v2 }
 0x18a   : > { %v1116_v46 = vpop.f32.mrf.mxu3 }
 0x18b   : > { %594 = vmatmul.f32.gmra.mxu1 %v455_v0  ;;  %880 = vmatmul.f32.gmra.mxu2 %v1025_v45  ;;  %v1188_v1 = vadd.f32 %v1116_v46, %v902_v60  ;;  %v1854_v60 = vld [vmem:[%s3163_s22 + $0x44] sm:$0xff] }
 0x18c   : > { %v408_v46 = vld [vmem:[%s3486_s13 + $0xc0] sm:$0xff] }
 0x18d   : > { %v1474_v63 = vadd.f32 %v1402_v58, %v1188_v1  ;;  %v2140_v1 = vld [vmem:[%s3163_s22 + $0x45] sm:$0xff] }
 0x18e   : > { %v833_v3 = vpop.f32.mrf.mxu2  ;;  %v1405_v4 = vpop.f32.mrf.mxu0 }
 0x18f   : > { %v903_v7 = vadd.f32 %v833_v3, %v617_v6  ;;  %1166 = vmatmul.f32.gmra.mxu3 %v1027_v34  ;;  %1510 = vst [vmem:[%s3486_s13 + $0x90] sm:$0xff] %v1474_v63  ;;  %v2426_v3 = vld [vmem:[%s3163_s22 + $0x46] sm:$0xff] }
 0x190   : > { %v550_v9 = vpop.f32.mrf.mxu1 }
 0x191   : > { %1452 = vmatmul.f32.gmra.mxu0 %v1313_v5  ;;  %v618_v16 = vadd.f32 %v550_v9, %v404_v13 }
 0x192   : > { %v1119_v12 = vpop.f32.mrf.mxu3 }
 0x193   : > { %1633 = vmatmul.f32.vlgmr.msra.gmra.mxu1 %v1564_v10  ;;  %1919 = vmatmul.f32.vlgmr.msra.gmra.mxu2 %v1850_v11  ;;  %v1189_v29 = vadd.f32 %v1119_v12, %v903_v7  ;;  %v1855_v7 = vld [vmem:[%s3163_s22 + $0x4c] sm:$0xff] }
 0x194   : > { %v2141_v12 = vld [vmem:[%s3163_s22 + $0x4d] sm:$0xff] }
 0x195   : > { %v1475_v8 = vadd.f32 %v1405_v4, %v1189_v29 }
 0x196   : > { %v836_v43 = vpop.f32.mrf.mxu2  ;;  %v1408_v15 = vpop.f32.mrf.mxu0 }
 0x197   : > { %v904_v19 = vadd.f32 %v836_v43, %v618_v16  ;;  %2205 = vmatmul.f32.vlgmr.msra.gmra.mxu3 %v2136_v14  ;;  %1511 = vst [vmem:[%s3486_s13 + $0x98] sm:$0xff] %v1475_v8  ;;  %v2427_v8 = vld [vmem:[%s3163_s22 + $0x4e] sm:$0xff] }
 0x198   : > { %v553_v20 = vpop.f32.mrf.mxu1 }
 0x199   : > { %2491 = vmatmul.f32.vlgmr.msra.gmra.mxu0 %v2422_v18  ;;  %v619_v28 = vadd.f32 %v553_v20, %v405_v25  ;;  %v1856_v18 = vld [vmem:[%s3163_s22 + $0x54] sm:$0xff] }
 0x19a   : > { %v1122_v23 = vpop.f32.mrf.mxu3 }
 0x19b   : > { %1636 = vmatmul.f32.gmra.mxu1 %v1565_v21  ;;  %1922 = vmatmul.f32.gmra.mxu2 %v1851_v22  ;;  %v1190_v37 = vadd.f32 %v1122_v23, %v904_v19  ;;  %v410_v21 = vld [vmem:[%s3486_s13 + $0xd0] sm:$0xff] }
 0x19d   : > { %v1476_v30 = vadd.f32 %v1408_v15, %v1190_v37 }
 0x19e   : > { %v839_v17 = vpop.f32.mrf.mxu2  ;;  %v1411_v31 = vpop.f32.mrf.mxu0 }
 0x19f   : > { %v905_v24 = vadd.f32 %v839_v17, %v619_v28  ;;  %2208 = vmatmul.f32.gmra.mxu3 %v2137_v27  ;;  %1512 = vst [vmem:[%s3486_s13 + $0xa0] sm:$0xff] %v1476_v30  ;;  %v2428_v28 = vld [vmem:[%s3163_s22 + $0x56] sm:$0xff] }
 0x1a0   : > { %v556_v33 = vpop.f32.mrf.mxu1 }
 0x1a1   : > { %2494 = vmatmul.f32.gmra.mxu0 %v2423_v32  ;;  %v620_v26 = vadd.f32 %v556_v33, %v406_v40  ;;  %v411_v33 = vld [vmem:[%s3486_s13 + $0xd8] sm:$0xff] }
 0x1a2   : > { %v1125_v36 = vpop.f32.mrf.mxu3 }
 0x1a3   : > { %1639 = vmatmul.f32.gmra.mxu1 %v1850_v11  ;;  %1925 = vmatmul.f32.gmra.mxu2 %v1852_v53  ;;  %v1191_v39 = vadd.f32 %v1125_v36, %v905_v24  ;;  %v409_v11 = vld [vmem:[%s3486_s13 + $0xc8] sm:$0xff] }
 0x1a5   : > { %v1477_v45 = vadd.f32 %v1411_v31, %v1191_v39  ;;  %v1857_v31 = vld [vmem:[%s3163_s22 + $0x5c] sm:$0xff] }
 0x1a6   : > { %v842_v42 = vpop.f32.mrf.mxu2  ;;  %v1414_v44 = vpop.f32.mrf.mxu0 }
 0x1a7   : > { %v906_v48 = vadd.f32 %v842_v42, %v620_v26  ;;  %2211 = vmatmul.f32.gmra.mxu3 %v2138_v41  ;;  %1513 = vst [vmem:[%s3486_s13 + $0xa8] sm:$0xff] %v1477_v45  ;;  %v2429_v26 = vld [vmem:[%s3163_s22 + $0x5e] sm:$0xff] }
 0x1a8   : > { %v559_v49 = vpop.f32.mrf.mxu1 }
 0x1a9   : > { %2497 = vmatmul.f32.gmra.mxu0 %v2424_v47  ;;  %v621_v54 = vadd.f32 %v559_v49, %v407_v61  ;;  %v412_v49 = vld [vmem:[%s3486_s13 + $0xe0] sm:$0xff] }
 0x1aa   : > { %v1128_v35 = vpop.f32.mrf.mxu3 }
 0x1ab   : > { %1642 = vmatmul.f32.gmra.mxu1 %v1851_v22  ;;  %1928 = vmatmul.f32.gmra.mxu2 %v1853_v50  ;;  %v1192_v51 = vadd.f32 %v1128_v35, %v906_v48  ;;  %v2142_v22 = vld [vmem:[%s3163_s22 + $0x55] sm:$0xff] }
 0x1ad   : > { %v1478_v38 = vadd.f32 %v1414_v44, %v1192_v51  ;;  %v1858_v44 = vld [vmem:[%s3163_s22 + $0x64] sm:$0xff] }
 0x1ae   : > { %v845_v55 = vpop.f32.mrf.mxu2  ;;  %v1417_v56 = vpop.f32.mrf.mxu0 }
 0x1af   : > { %v907_v58 = vadd.f32 %v845_v55, %v621_v54  ;;  %2214 = vmatmul.f32.gmra.mxu3 %v2139_v52  ;;  %1514 = vst [vmem:[%s3486_s13 + $0xb0] sm:$0xff] %v1478_v38  ;;  %v2430_v54 = vld [vmem:[%s3163_s22 + $0x66] sm:$0xff] }
 0x1b0   : > { %v562_v59 = vpop.f32.mrf.mxu1 }
 0x1b1   : > { %2500 = vmatmul.f32.gmra.mxu0 %v2425_v57  ;;  %v622_v2 = vadd.f32 %v562_v59, %v408_v46  ;;  %v413_v59 = vld [vmem:[%s3486_s13 + $0xe8] sm:$0xff] }
 0x1b2   : > { %v1131_v62 = vpop.f32.mrf.mxu3 }
 0x1b3   : > { %1645 = vmatmul.f32.gmra.mxu1 %v1852_v53  ;;  %1931 = vmatmul.f32.gmra.mxu2 %v1854_v60  ;;  %v1193_v0 = vadd.f32 %v1131_v62, %v907_v58  ;;  %v2143_v53 = vld [vmem:[%s3163_s22 + $0x5d] sm:$0xff] }
 0x1b5   : > { %v1479_v34 = vadd.f32 %v1417_v56, %v1193_v0  ;;  %v1859_v56 = vld [vmem:[%s3163_s22 + $0x6c] sm:$0xff] }
 0x1b6   : > { %v848_v6 = vpop.f32.mrf.mxu2  ;;  %v1420_v63 = vpop.f32.mrf.mxu0 }
 0x1b7   : > { %v908_v4 = vadd.f32 %v848_v6, %v622_v2  ;;  %2217 = vmatmul.f32.gmra.mxu3 %v2140_v1  ;;  %1515 = vst [vmem:[%s3486_s13 + $0xb8] sm:$0xff] %v1479_v34  ;;  %v2431_v2 = vld [vmem:[%s3163_s22 + $0x6e] sm:$0xff] }
 0x1b8   : > { %v565_v5 = vpop.f32.mrf.mxu1 }
 0x1b9   : > { %2503 = vmatmul.f32.gmra.mxu0 %v2426_v3  ;;  %v623_v29 = vadd.f32 %v565_v5, %v409_v11  ;;  %v414_v5 = vld [vmem:[%s3486_s13 + $0xf0] sm:$0xff] }
 0x1ba   : > { %v1134_v9 = vpop.f32.mrf.mxu3 }
 0x1bb   : > { %1648 = vmatmul.f32.gmra.mxu1 %v1853_v50  ;;  %1934 = vmatmul.f32.gmra.mxu2 %v1855_v7  ;;  %v1194_v10 = vadd.f32 %v1134_v9, %v908_v4  ;;  %v2144_v50 = vld [vmem:[%s3163_s22 + $0x65] sm:$0xff] }
 0x1bd   : > { %v1480_v13 = vadd.f32 %v1420_v63, %v1194_v10  ;;  %v1860_v63 = vld [vmem:[%s3163_s22 + $0x74] sm:$0xff] }
 0x1be   : > { %v851_v14 = vpop.f32.mrf.mxu2  ;;  %v1423_v16 = vpop.f32.mrf.mxu0 }
 0x1bf   : > { %v909_v43 = vadd.f32 %v851_v14, %v623_v29  ;;  %2220 = vmatmul.f32.gmra.mxu3 %v2141_v12  ;;  %1516 = vst [vmem:[%s3486_s13 + $0xc0] sm:$0xff] %v1480_v13  ;;  %v2432_v29 = vld [vmem:[%s3163_s22 + $0x76] sm:$0xff] }
 0x1c0   : > { %v568_v15 = vpop.f32.mrf.mxu1 }
 0x1c1   : > { %2506 = vmatmul.f32.gmra.mxu0 %v2427_v8  ;;  %v624_v23 = vadd.f32 %v568_v15, %v410_v21  ;;  %v415_v15 = vld [vmem:[%s3486_s13 + $0xf8] sm:$0xff] }
 0x1c2   : > { %v1137_v19 = vpop.f32.mrf.mxu3 }
 0x1c3   : > { %1651 = vmatmul.f32.gmra.mxu1 %v1854_v60  ;;  %1937 = vmatmul.f32.gmra.mxu2 %v1856_v18  ;;  %v1195_v20 = vadd.f32 %v1137_v19, %v909_v43  ;;  %v2145_v60 = vld [vmem:[%s3163_s22 + $0x6d] sm:$0xff] }
 0x1c5   : > { %v1481_v37 = vadd.f32 %v1423_v16, %v1195_v20  ;;  %v1861_v16 = vld [vmem:[%s3163_s22 + $0x7c] sm:$0xff] }
 0x1c6   : > { %v854_v25 = vpop.f32.mrf.mxu2  ;;  %v1426_v27 = vpop.f32.mrf.mxu0 }
 0x1c7   : > { %v910_v30 = vadd.f32 %v854_v25, %v624_v23  ;;  %2223 = vmatmul.f32.gmra.mxu3 %v2142_v22  ;;  %1517 = vst [vmem:[%s3486_s13 + $0xc8] sm:$0xff] %v1481_v37  ;;  %v2433_v23 = vld [vmem:[%s3163_s22 + $0x7e] sm:$0xff] }
 0x1c8   : > { %v571_v17 = vpop.f32.mrf.mxu1 }
 0x1c9   : > { %2509 = vmatmul.f32.gmra.mxu0 %v2428_v28  ;;  %v625_v36 = vadd.f32 %v571_v17, %v411_v33  ;;  %v416_v17 = vld [vmem:[%s3486_s13 + $0x100] sm:$0xff] }
 0x1ca   : > { %v1140_v32 = vpop.f32.mrf.mxu3 }
 0x1cb   : > { %1654 = vmatmul.f32.gmra.mxu1 %v1855_v7  ;;  %1940 = vmatmul.f32.gmra.mxu2 %v1857_v31  ;;  %v1196_v24 = vadd.f32 %v1140_v32, %v910_v30  ;;  %v2146_v7 = vld [vmem:[%s3163_s22 + $0x75] sm:$0xff] }
 0x1cd   : > { %v1482_v39 = vadd.f32 %v1426_v27, %v1196_v24  ;;  %v1862_v27 = vld [vmem:[%s3163_s22 + $0x84] sm:$0xff] }
 0x1ce   : > { %v857_v40 = vpop.f32.mrf.mxu2  ;;  %v1429_v41 = vpop.f32.mrf.mxu0 }
 0x1cf   : > { %v911_v45 = vadd.f32 %v857_v40, %v625_v36  ;;  %2226 = vmatmul.f32.gmra.mxu3 %v2143_v53  ;;  %1518 = vst [vmem:[%s3486_s13 + $0xd0] sm:$0xff] %v1482_v39  ;;  %v2434_v36 = vld [vmem:[%s3163_s22 + $0x86] sm:$0xff] }
 0x1d0   : > { %v574_v42 = vpop.f32.mrf.mxu1 }
 0x1d1   : > { %2512 = vmatmul.f32.gmra.mxu0 %v2429_v26  ;;  %v626_v35 = vadd.f32 %v574_v42, %v412_v49  ;;  %v417_v42 = vld [vmem:[%s3486_s13 + $0x108] sm:$0xff] }
 0x1d2   : > { %v1143_v47 = vpop.f32.mrf.mxu3 }
 0x1d3   : > { %1657 = vmatmul.f32.gmra.mxu1 %v1856_v18  ;;  %1943 = vmatmul.f32.gmra.mxu2 %v1858_v44  ;;  %v1197_v48 = vadd.f32 %v1143_v47, %v911_v45  ;;  %v2147_v18 = vld [vmem:[%s3163_s22 + $0x7d] sm:$0xff] }
 0x1d5   : > { %v1483_v51 = vadd.f32 %v1429_v41, %v1197_v48  ;;  %v1863_v41 = vld [vmem:[%s3163_s22 + $0x8c] sm:$0xff] }
 0x1d6   : > { %v860_v61 = vpop.f32.mrf.mxu2  ;;  %v1432_v52 = vpop.f32.mrf.mxu0 }
 0x1d7   : > { %v912_v38 = vadd.f32 %v860_v61, %v626_v35  ;;  %2229 = vmatmul.f32.gmra.mxu3 %v2144_v50  ;;  %1519 = vst [vmem:[%s3486_s13 + $0xd8] sm:$0xff] %v1483_v51  ;;  %v2435_v35 = vld [vmem:[%s3163_s22 + $0x8e] sm:$0xff] }
 0x1d8   : > { %v577_v55 = vpop.f32.mrf.mxu1 }
 0x1d9   : > { %2515 = vmatmul.f32.gmra.mxu0 %v2430_v54  ;;  %v627_v62 = vadd.f32 %v577_v55, %v413_v59  ;;  %v418_v55 = vld [vmem:[%s3486_s13 + $0x110] sm:$0xff] }
 0x1da   : > { %v1146_v57 = vpop.f32.mrf.mxu3 }
 0x1db   : > { %1660 = vmatmul.f32.gmra.mxu1 %v1857_v31  ;;  %1946 = vmatmul.f32.gmra.mxu2 %v1859_v56  ;;  %v1198_v58 = vadd.f32 %v1146_v57, %v912_v38  ;;  %v2148_v31 = vld [vmem:[%s3163_s22 + $0x85] sm:$0xff] }
 0x1dd   : > { %v1484_v0 = vadd.f32 %v1432_v52, %v1198_v58  ;;  %v1864_v52 = vld [vmem:[%s3163_s22 + $0x94] sm:$0xff] }
 0x1de   : > { %v863_v46 = vpop.f32.mrf.mxu2  ;;  %v1435_v1 = vpop.f32.mrf.mxu0 }
 0x1df   : > { %v913_v34 = vadd.f32 %v863_v46, %v627_v62  ;;  %2232 = vmatmul.f32.gmra.mxu3 %v2145_v60  ;;  %1520 = vst [vmem:[%s3486_s13 + $0xe0] sm:$0xff] %v1484_v0  ;;  %v2436_v62 = vld [vmem:[%s3163_s22 + $0x96] sm:$0xff] }
 0x1e0   : > { %v580_v6 = vpop.f32.mrf.mxu1 }
 0x1e1   : > { %2518 = vmatmul.f32.gmra.mxu0 %v2431_v2  ;;  %v628_v9 = vadd.f32 %v580_v6, %v414_v5  ;;  %v419_v6 = vld [vmem:[%s3486_s13 + $0x118] sm:$0xff] }
 0x1e2   : > { %v1149_v3 = vpop.f32.mrf.mxu3 }
 0x1e3   : > { %1663 = vmatmul.f32.gmra.mxu1 %v1858_v44  ;;  %1949 = vmatmul.f32.gmra.mxu2 %v1860_v63  ;;  %v1199_v4 = vadd.f32 %v1149_v3, %v913_v34  ;;  %v2149_v44 = vld [vmem:[%s3163_s22 + $0x8d] sm:$0xff] }
 0x1e5   : > { %v1485_v10 = vadd.f32 %v1435_v1, %v1199_v4  ;;  %v1865_v1 = vld [vmem:[%s3163_s22 + $0x9c] sm:$0xff] }
 0x1e6   : > { %v866_v11 = vpop.f32.mrf.mxu2  ;;  %v1438_v12 = vpop.f32.mrf.mxu0 }
 0x1e7   : > { %v914_v13 = vadd.f32 %v866_v11, %v628_v9  ;;  %2235 = vmatmul.f32.gmra.mxu3 %v2146_v7  ;;  %1521 = vst [vmem:[%s3486_s13 + $0xe8] sm:$0xff] %v1485_v10  ;;  %v2437_v9 = vld [vmem:[%s3163_s22 + $0x9e] sm:$0xff] }
 0x1e8   : > { %v583_v14 = vpop.f32.mrf.mxu1 }
 0x1e9   : > { %2521 = vmatmul.f32.gmra.mxu0 %v2432_v29  ;;  %v629_v19 = vadd.f32 %v583_v14, %v415_v15  ;;  %v1528_v14 = vld [vmem:[%s3486_s13] sm:$0xff] }
 0x1ea   : > { %v1152_v8 = vpop.f32.mrf.mxu3 }
 0x1eb   : > { %1666 = vmatmul.f32.gmra.mxu1 %v1859_v56  ;;  %1952 = vmatmul.f32.gmra.mxu2 %v1861_v16  ;;  %v1200_v43 = vadd.f32 %v1152_v8, %v914_v13  ;;  %v2150_v56 = vld [vmem:[%s3163_s22 + $0x95] sm:$0xff] }
 0x1ed   : > { %v1486_v20 = vadd.f32 %v1438_v12, %v1200_v43  ;;  %v1866_v12 = vld [vmem:[%s3163_s22 + $0xa4] sm:$0xff] }
 0x1ee   : > { %v869_v21 = vpop.f32.mrf.mxu2  ;;  %v1441_v22 = vpop.f32.mrf.mxu0 }
 0x1ef   : > { %v915_v37 = vadd.f32 %v869_v21, %v629_v19  ;;  %2238 = vmatmul.f32.gmra.mxu3 %v2147_v18  ;;  %1522 = vst [vmem:[%s3486_s13 + $0xf0] sm:$0xff] %v1486_v20  ;;  %v2438_v19 = vld [vmem:[%s3163_s22 + $0xa6] sm:$0xff] }
 0x1f0   : > { %v586_v25 = vpop.f32.mrf.mxu1 }
 0x1f1   : > { %2524 = vmatmul.f32.gmra.mxu0 %v2433_v23  ;;  %v630_v32 = vadd.f32 %v586_v25, %v416_v17  ;;  %v3888_v25 = vld [vmem:[%s4057_s2] ss:$0 sm:$0xff] }
 0x1f2   : > { %v1155_v28 = vpop.f32.mrf.mxu3 }
 0x1f3   : > { %1669 = vmatmul.f32.gmra.mxu1 %v1860_v63  ;;  %1955 = vmatmul.f32.gmra.mxu2 %v1862_v27  ;;  %v1201_v30 = vadd.f32 %v1155_v28, %v915_v37  ;;  %v2151_v63 = vld [vmem:[%s3163_s22 + $0x9d] sm:$0xff]  ;;  %v2153_v28 = vld [vmem:[%s3163_s22 + $0xad] sm:$0xff] }
 0x1f5   : > { %v1487_v24 = vadd.f32 %v1441_v22, %v1201_v30  ;;  %v1867_v22 = vld [vmem:[%s3163_s22 + $0xac] sm:$0xff] }
 0x1f6   : > { %v872_v33 = vpop.f32.mrf.mxu2  ;;  %v1444_v53 = vpop.f32.mrf.mxu0 }
 0x1f7   : > { %v916_v39 = vadd.f32 %v872_v33, %v630_v32  ;;  %2241 = vmatmul.f32.gmra.mxu3 %v2148_v31  ;;  %1523 = vst [vmem:[%s3486_s13 + $0xf8] sm:$0xff] %v1487_v24  ;;  %v2439_v24 = vld [vmem:[%s3163_s22 + $0xae] sm:$0xff] }
 0x1f8   : > { %v589_v40 = vpop.f32.mrf.mxu1 }
 0x1f9   : > { %2527 = vmatmul.f32.gmra.mxu0 %v2434_v36  ;;  %v631_v47 = vadd.f32 %v589_v40, %v417_v42  ;;  %v2154_v42 = vld [vmem:[%s3163_s22 + $0xb5] sm:$0xff] }
 0x1fa   : > { %v1158_v26 = vpop.f32.mrf.mxu3 }
 0x1fb   : > { %1672 = vmatmul.f32.gmra.mxu1 %v1861_v16  ;;  %1958 = vmatmul.f32.gmra.mxu2 %v1863_v41  ;;  %v1202_v45 = vadd.f32 %v1158_v26, %v916_v39  ;;  %v2152_v16 = vld [vmem:[%s3163_s22 + $0xa5] sm:$0xff]  ;;  %v1868_v39 = vld [vmem:[%s3163_s22 + $0xb4] sm:$0xff] }
 0x1fd   : > { %v1488_v48 = vadd.f32 %v1444_v53, %v1202_v45  ;;  %v1530_v45 = vld [vmem:[%s3486_s13 + $0x10] sm:$0xff] }
 0x1fe   : > { %v875_v49 = vpop.f32.mrf.mxu2  ;;  %v1447_v50 = vpop.f32.mrf.mxu0 }
 0x1ff   : > { %v917_v51 = vadd.f32 %v875_v49, %v631_v47  ;;  %2244 = vmatmul.f32.gmra.mxu3 %v2149_v44  ;;  %1524 = vst [vmem:[%s3486_s13 + $0x100] sm:$0xff] %v1488_v48 }
 0x200   : > { %v592_v61 = vpop.f32.mrf.mxu1 }
 0x201   : > { %2530 = vmatmul.f32.gmra.mxu0 %v2435_v35  ;;  %v632_v57 = vadd.f32 %v592_v61, %v418_v55 }
 0x202   : > { %v1161_v54 = vpop.f32.mrf.mxu3 }
 0x203   : > { %1675 = vmatmul.f32.gmra.mxu1 %v1862_v27  ;;  %1961 = vmatmul.f32.gmra.mxu2 %v1864_v52  ;;  %v1203_v38 = vadd.f32 %v1161_v54, %v917_v51  ;;  %v1529_v27 = vld [vmem:[%s3486_s13 + $0x8] sm:$0xff] }
 0x205   : > { %v1489_v58 = vadd.f32 %v1447_v50, %v1203_v38  ;;  %v2440_v50 = vld [vmem:[%s3163_s22 + $0xb6] sm:$0xff] }
 0x206   : > { %v878_v59 = vpop.f32.mrf.mxu2  ;;  %v1450_v60 = vpop.f32.mrf.mxu0 }
 0x207   : > { %v918_v0 = vadd.f32 %v878_v59, %v632_v57  ;;  %2247 = vmatmul.f32.gmra.mxu3 %v2150_v56  ;;  %1525 = vst [vmem:[%s3486_s13 + $0x108] sm:$0xff] %v1489_v58  ;;  %v1531_v56 = vld [vmem:[%s3486_s13 + $0x18] sm:$0xff] }
 0x208   : > { %v595_v46 = vpop.f32.mrf.mxu1  ;;  %v2155_v57 = vld [vmem:[%s3163_s22 + $0xbd] sm:$0xff] }
 0x209   : > { %2533 = vmatmul.f32.gmra.mxu0 %v2436_v62  ;;  %v633_v3 = vadd.f32 %v595_v46, %v419_v6 }
 0x20a   : > { %v1164_v2 = vpop.f32.mrf.mxu3 }
 0x20b   : > { %1678 = vmatmul.f32.gmra.mxu1 %v1863_v41  ;;  %1964 = vmatmul.f32.gmra.mxu2 %v1865_v1  ;;  %v1204_v34 = vadd.f32 %v1164_v2, %v918_v0  ;;  %v2441_v0 = vld [vmem:[%s3163_s22 + $0xbe] sm:$0xff] }
 0x20d   : > { %v1490_v4 = vadd.f32 %v1450_v60, %v1204_v34  ;;  %v1870_v34 = vld [vmem:[%s3163_s22 + $0xc4] sm:$0xff] }
 0x20e   : > { %v881_v5 = vpop.f32.mrf.mxu2  ;;  %v1453_v7 = vpop.f32.mrf.mxu0 }
 0x20f   : > { %v919_v10 = vadd.f32 %v881_v5, %v633_v3  ;;  %2250 = vmatmul.f32.gmra.mxu3 %v2151_v63  ;;  %1526 = vst [vmem:[%s3486_s13 + $0x110] sm:$0xff] %v1490_v4  ;;  %v1532_v4 = vld [vmem:[%s3486_s13 + $0x20] sm:$0xff] }
 0x210   : > { %v1634_v11 = vpop.f32.mrf.mxu1  ;;  %v2156_v5 = vld [vmem:[%s3163_s22 + $0xc5] sm:$0xff] }
 0x211   : > { %2536 = vmatmul.f32.gmra.mxu0 %v2437_v9  ;;  %v1742_v8 = vadd.f32 %v1634_v11, %v1528_v14 }
 0x212   : > { %v1167_v29 = vpop.f32.mrf.mxu3 }
 0x213   : > { %1681 = vmatmul.f32.gmra.mxu1 %v1864_v52  ;;  %1967 = vmatmul.f32.gmra.mxu2 %v1866_v12  ;;  %v1205_v13 = vadd.f32 %v1167_v29, %v919_v10  ;;  %v1869_v52 = vld [vmem:[%s3163_s22 + $0xbc] sm:$0xff] }
 0x215   : > { %v1491_v43 = vadd.f32 %v1453_v7, %v1205_v13 }
 0x216   : > { %v1920_v15 = vpop.f32.mrf.mxu2  ;;  %v2492_v18 = vpop.f32.mrf.mxu0 }
 0x217   : > { %v2028_v20 = vadd.f32 %v1920_v15, %v1742_v8  ;;  %2253 = vmatmul.f32.gmra.mxu3 %v2152_v16  ;;  %1527 = vst [vmem:[%s3486_s13 + $0x118] sm:$0xff] %v1491_v43  ;;  %v1871_v16 = vld [vmem:[%s3163_s22 + $0xcc] sm:$0xff] }
 0x218   : > { %v1637_v21 = vpop.f32.mrf.mxu1 }
 0x219   : > { %2539 = vmatmul.f32.gmra.mxu0 %v2438_v19  ;;  %v1743_v30 = vadd.f32 %v1637_v21, %v1529_v27  ;;  %v2157_v19 = vld [vmem:[%s3163_s22 + $0xcd] sm:$0xff] }
 0x21a   : > { %v2206_v23 = vpop.f32.mrf.mxu3 }
 0x21b   : > { %1684 = vmatmul.f32.gmra.mxu1 %v1865_v1  ;;  %1970 = vmatmul.f32.gmra.mxu2 %v1867_v22  ;;  %v2314_v37 = vadd.f32 %v2206_v23, %v2028_v20 }
 0x21d   : > { %v2600_v17 = vadd.f32 %v2492_v18, %v2314_v37  ;;  %v1533_v18 = vld [vmem:[%s3486_s13 + $0x28] sm:$0xff] }
 0x21e   : > { %v1923_v31 = vpop.f32.mrf.mxu2  ;;  %v2495_v32 = vpop.f32.mrf.mxu0  ;;  %v2443_v37 = vld [vmem:[%s3163_s22 + $0xce] sm:$0xff] }
 0x21f   : > { %v2029_v33 = vadd.f32 %v1923_v31, %v1743_v30  ;;  %2256 = vmatmul.f32.gmra.mxu3 %v2153_v28  ;;  %v2712_v53 = vadd.f32 %v3888_v25, %v2600_v17  ;;  %v1872_v17 = vld [vmem:[%s3163_s22 + $0xd4] sm:$0xff] }
 0x220   : > { %v1640_v36 = vpop.f32.mrf.mxu1 }
 0x221   : > { %v2748_v40 = vmax.f32 %v2712_v53, 0.0  ;;  %2542 = vmatmul.f32.gmra.mxu0 %v2439_v24  ;;  %v1744_v44 = vadd.f32 %v1640_v36, %v1530_v45  ;;  %v2158_v53 = vld [vmem:[%s3163_s22 + $0xd5] sm:$0xff] }
 0x222   : > { %v2209_v41 = vpop.f32.mrf.mxu3 }
 0x223   : > { %1687 = vmatmul.f32.gmra.mxu1 %v1866_v12  ;;  %1973 = vmatmul.f32.gmra.mxu2 %v1868_v39  ;;  %v2315_v26 = vadd.f32 %v2209_v41, %v2029_v33  ;;  %2784 = vst [vmem:[%s3486_s13] sm:$0xff] %v2748_v40  ;;  %v2442_v12 = vld [vmem:[%s3163_s22 + $0xc6] sm:$0xff]  ;;  %v1534_v33 = vld [vmem:[%s3486_s13 + $0x30] sm:$0xff] }
 0x225   : > { %v2601_v47 = vadd.f32 %v2495_v32, %v2315_v26  ;;  %v2444_v26 = vld [vmem:[%s3163_s22 + $0xd6] sm:$0xff] }
 0x226   : > { %v1926_v48 = vpop.f32.mrf.mxu2  ;;  %v2498_v49 = vpop.f32.mrf.mxu0 }
 0x227   : > { %v2030_v35 = vadd.f32 %v1926_v48, %v1744_v44  ;;  %2259 = vmatmul.f32.gmra.mxu3 %v2154_v42  ;;  %v2713_v51 = vadd.f32 %v3888_v25, %v2601_v47  ;;  %v1873_v47 = vld [vmem:[%s3163_s22 + $0xdc] sm:$0xff] }
 0x228   : > { %v1643_v61 = vpop.f32.mrf.mxu1 }
 0x229   : > { %v2749_v54 = vmax.f32 %v2713_v51, 0.0  ;;  %2545 = vmatmul.f32.gmra.mxu0 %v2440_v50  ;;  %v1745_v58 = vadd.f32 %v1643_v61, %v1531_v56  ;;  %v2159_v51 = vld [vmem:[%s3163_s22 + $0xdd] sm:$0xff] }
 0x22a   : > { %v2212_v38 = vpop.f32.mrf.mxu3 }
 0x22b   : > { %1690 = vmatmul.f32.gmra.mxu1 %v1867_v22  ;;  %1976 = vmatmul.f32.gmra.mxu2 %v1869_v52  ;;  %v2316_v55 = vadd.f32 %v2212_v38, %v2030_v35  ;;  %2785 = vst [vmem:[%s3486_s13 + $0x8] sm:$0xff] %v2749_v54  ;;  %v1535_v35 = vld [vmem:[%s3486_s13 + $0x38] sm:$0xff] }
 0x22d   : > { %v2602_v59 = vadd.f32 %v2498_v49, %v2316_v55  ;;  %v2445_v55 = vld [vmem:[%s3163_s22 + $0xde] sm:$0xff] }
 0x22e   : > { %v1929_v60 = vpop.f32.mrf.mxu2  ;;  %v2501_v62 = vpop.f32.mrf.mxu0 }
 0x22f   : > { %v2031_v46 = vadd.f32 %v1929_v60, %v1745_v58  ;;  %2262 = vmatmul.f32.gmra.mxu3 %v2155_v57  ;;  %v2714_v1 = vadd.f32 %v3888_v25, %v2602_v59  ;;  %v1874_v59 = vld [vmem:[%s3163_s22 + $0xe4] sm:$0xff] }
 0x230   : > { %v1646_v2 = vpop.f32.mrf.mxu1 }
 0x231   : > { %v2750_v6 = vmax.f32 %v2714_v1, 0.0  ;;  %2548 = vmatmul.f32.gmra.mxu0 %v2441_v0  ;;  %v1746_v7 = vadd.f32 %v1646_v2, %v1532_v4  ;;  %v2160_v1 = vld [vmem:[%s3163_s22 + $0xe5] sm:$0xff] }
 0x232   : > { %v2215_v63 = vpop.f32.mrf.mxu3 }
 0x233   : > { %1693 = vmatmul.f32.gmra.mxu1 %v1868_v39  ;;  %1979 = vmatmul.f32.gmra.mxu2 %v1870_v34  ;;  %v2317_v3 = vadd.f32 %v2215_v63, %v2031_v46  ;;  %2786 = vst [vmem:[%s3486_s13 + $0x10] sm:$0xff] %v2750_v6  ;;  %v1536_v46 = vld [vmem:[%s3486_s13 + $0x40] sm:$0xff] }
 0x235   : > { %v2603_v9 = vadd.f32 %v2501_v62, %v2317_v3  ;;  %v2446_v3 = vld [vmem:[%s3163_s22 + $0xe6] sm:$0xff] }
 0x236   : > { %v1932_v10 = vpop.f32.mrf.mxu2  ;;  %v2504_v11 = vpop.f32.mrf.mxu0 }
 0x237   : > { %v2032_v29 = vadd.f32 %v1932_v10, %v1746_v7  ;;  %2265 = vmatmul.f32.gmra.mxu3 %v2156_v5  ;;  %v2715_v13 = vadd.f32 %v3888_v25, %v2603_v9  ;;  %v1875_v9 = vld [vmem:[%s3163_s22 + $0xec] sm:$0xff] }
 0x238   : > { %v1649_v14 = vpop.f32.mrf.mxu1 }
 0x239   : > { %v2751_v8 = vmax.f32 %v2715_v13, 0.0  ;;  %2551 = vmatmul.f32.gmra.mxu0 %v2442_v12  ;;  %v1747_v20 = vadd.f32 %v1649_v14, %v1533_v18  ;;  %v2161_v13 = vld [vmem:[%s3163_s22 + $0xed] sm:$0xff] }
 0x23a   : > { %v2218_v43 = vpop.f32.mrf.mxu3 }
 0x23b   : > { %1696 = vmatmul.f32.gmra.mxu1 %v1869_v52  ;;  %1982 = vmatmul.f32.gmra.mxu2 %v1871_v16  ;;  %v2318_v15 = vadd.f32 %v2218_v43, %v2032_v29  ;;  %2787 = vst [vmem:[%s3486_s13 + $0x18] sm:$0xff] %v2751_v8  ;;  %v1537_v29 = vld [vmem:[%s3486_s13 + $0x48] sm:$0xff] }
 0x23d   : > { %v2604_v21 = vadd.f32 %v2504_v11, %v2318_v15  ;;  %v2447_v15 = vld [vmem:[%s3163_s22 + $0xee] sm:$0xff] }
 0x23e   : > { %v1935_v22 = vpop.f32.mrf.mxu2  ;;  %v2507_v23 = vpop.f32.mrf.mxu0 }
 0x23f   : > { %v2033_v27 = vadd.f32 %v1935_v22, %v1747_v20  ;;  %2268 = vmatmul.f32.gmra.mxu3 %v2157_v19  ;;  %v2716_v28 = vadd.f32 %v3888_v25, %v2604_v21  ;;  %v1876_v21 = vld [vmem:[%s3163_s22 + $0xf4] sm:$0xff] }
 0x240   : > { %v1652_v30 = vpop.f32.mrf.mxu1 }
 0x241   : > { %v2752_v31 = vmax.f32 %v2716_v28, 0.0  ;;  %2554 = vmatmul.f32.gmra.mxu0 %v2443_v37  ;;  %v1748_v36 = vadd.f32 %v1652_v30, %v1534_v33  ;;  %v2162_v28 = vld [vmem:[%s3163_s22 + $0xf5] sm:$0xff] }
 0x242   : > { %v2221_v32 = vpop.f32.mrf.mxu3 }
 0x243   : > { %1699 = vmatmul.f32.gmra.mxu1 %v1870_v34  ;;  %1985 = vmatmul.f32.gmra.mxu2 %v1872_v17  ;;  %v2319_v24 = vadd.f32 %v2221_v32, %v2033_v27  ;;  %2788 = vst [vmem:[%s3486_s13 + $0x20] sm:$0xff] %v2752_v31  ;;  %v1538_v27 = vld [vmem:[%s3486_s13 + $0x50] sm:$0xff] }
 0x245   : > { %v2605_v39 = vadd.f32 %v2507_v23, %v2319_v24  ;;  %v2448_v24 = vld [vmem:[%s3163_s22 + $0xf6] sm:$0xff] }
 0x246   : > { %v1938_v40 = vpop.f32.mrf.mxu2  ;;  %v2510_v41 = vpop.f32.mrf.mxu0 }
 0x247   : > { %v2034_v45 = vadd.f32 %v1938_v40, %v1748_v36  ;;  %2271 = vmatmul.f32.gmra.mxu3 %v2158_v53  ;;  %v2717_v42 = vadd.f32 %v3888_v25, %v2605_v39  ;;  %v1877_v39 = vld [vmem:[%s3163_s22 + $0xfc] sm:$0xff] }
 0x248   : > { %v1655_v44 = vpop.f32.mrf.mxu1 }
 0x249   : > { %v2753_v48 = vmax.f32 %v2717_v42, 0.0  ;;  %2557 = vmatmul.f32.gmra.mxu0 %v2444_v26  ;;  %v1749_v61 = vadd.f32 %v1655_v44, %v1535_v35  ;;  %v2163_v42 = vld [vmem:[%s3163_s22 + $0xfd] sm:$0xff] }
 0x24a   : > { %v2224_v49 = vpop.f32.mrf.mxu3 }
 0x24b   : > { %1702 = vmatmul.f32.gmra.mxu1 %v1871_v16  ;;  %1988 = vmatmul.f32.gmra.mxu2 %v1873_v47  ;;  %v2320_v50 = vadd.f32 %v2224_v49, %v2034_v45  ;;  %2789 = vst [vmem:[%s3486_s13 + $0x28] sm:$0xff] %v2753_v48  ;;  %v1539_v45 = vld [vmem:[%s3486_s13 + $0x58] sm:$0xff] }
 0x24d   : > { %v2606_v52 = vadd.f32 %v2510_v41, %v2320_v50  ;;  %v2449_v50 = vld [vmem:[%s3163_s22 + $0xfe] sm:$0xff] }
 0x24e   : > { %v1941_v54 = vpop.f32.mrf.mxu2  ;;  %v2513_v38 = vpop.f32.mrf.mxu0 }
 0x24f   : > { %v2035_v56 = vadd.f32 %v1941_v54, %v1749_v61  ;;  %2274 = vmatmul.f32.gmra.mxu3 %v2159_v51  ;;  %v2718_v57 = vadd.f32 %v3888_v25, %v2606_v52  ;;  %v1878_v52 = vld [vmem:[%s3163_s22 + $0x104] sm:$0xff] }
 0x250   : > { %v1658_v58 = vpop.f32.mrf.mxu1 }
 0x251   : > { %v2754_v60 = vmax.f32 %v2718_v57, 0.0  ;;  %2560 = vmatmul.f32.gmra.mxu0 %v2445_v55  ;;  %v1750_v2 = vadd.f32 %v1658_v58, %v1536_v46  ;;  %v2164_v57 = vld [vmem:[%s3163_s22 + $0x105] sm:$0xff] }
 0x252   : > { %v2227_v62 = vpop.f32.mrf.mxu3 }
 0x253   : > { %1705 = vmatmul.f32.gmra.mxu1 %v1872_v17  ;;  %1991 = vmatmul.f32.gmra.mxu2 %v1874_v59  ;;  %v2321_v0 = vadd.f32 %v2227_v62, %v2035_v56  ;;  %2790 = vst [vmem:[%s3486_s13 + $0x30] sm:$0xff] %v2754_v60  ;;  %v1540_v56 = vld [vmem:[%s3486_s13 + $0x60] sm:$0xff] }
 0x255   : > { %v2607_v34 = vadd.f32 %v2513_v38, %v2321_v0  ;;  %v2450_v0 = vld [vmem:[%s3163_s22 + $0x106] sm:$0xff] }
 0x256   : > { %v1944_v6 = vpop.f32.mrf.mxu2  ;;  %v2516_v63 = vpop.f32.mrf.mxu0 }
 0x257   : > { %v2036_v4 = vadd.f32 %v1944_v6, %v1750_v2  ;;  %2277 = vmatmul.f32.gmra.mxu3 %v2160_v1  ;;  %v2719_v5 = vadd.f32 %v3888_v25, %v2607_v34  ;;  %v1879_v34 = vld [vmem:[%s3163_s22 + $0x10c] sm:$0xff] }
 0x258   : > { %v1661_v7 = vpop.f32.mrf.mxu1 }
 0x259   : > { %v2755_v10 = vmax.f32 %v2719_v5, 0.0  ;;  %2563 = vmatmul.f32.gmra.mxu0 %v2446_v3  ;;  %v1751_v14 = vadd.f32 %v1661_v7, %v1537_v29  ;;  %v2165_v5 = vld [vmem:[%s3163_s22 + $0x10d] sm:$0xff] }
 0x25a   : > { %v2230_v11 = vpop.f32.mrf.mxu3 }
 0x25b   : > { %1708 = vmatmul.f32.gmra.mxu1 %v1873_v47  ;;  %1994 = vmatmul.f32.gmra.mxu2 %v1875_v9  ;;  %v2322_v12 = vadd.f32 %v2230_v11, %v2036_v4  ;;  %2791 = vst [vmem:[%s3486_s13 + $0x38] sm:$0xff] %v2755_v10  ;;  %v1541_v4 = vld [vmem:[%s3486_s13 + $0x68] sm:$0xff] }
 0x25d   : > { %v2608_v16 = vadd.f32 %v2516_v63, %v2322_v12  ;;  %v2451_v12 = vld [vmem:[%s3163_s22 + $0x10e] sm:$0xff] }
 0x25e   : > { %v1947_v8 = vpop.f32.mrf.mxu2  ;;  %v2519_v43 = vpop.f32.mrf.mxu0 }
 0x25f   : > { %v2037_v18 = vadd.f32 %v1947_v8, %v1751_v14  ;;  %2280 = vmatmul.f32.gmra.mxu3 %v2161_v13  ;;  %v2720_v19 = vadd.f32 %v3888_v25, %v2608_v16  ;;  %v1880_v16 = vld [vmem:[%s3163_s22 + $0x114] sm:$0xff] }
 0x260   : > { %v1664_v20 = vpop.f32.mrf.mxu1 }
 0x261   : > { %v2756_v22 = vmax.f32 %v2720_v19, 0.0  ;;  %2566 = vmatmul.f32.gmra.mxu0 %v2447_v15  ;;  %v1752_v30 = vadd.f32 %v1664_v20, %v1538_v27  ;;  %v2166_v19 = vld [vmem:[%s3163_s22 + $0x115] sm:$0xff] }
 0x262   : > { %v2233_v23 = vpop.f32.mrf.mxu3 }
 0x263   : > { %1711 = vmatmul.f32.gmra.mxu1 %v1874_v59  ;;  %1997 = vmatmul.f32.gmra.mxu2 %v1876_v21  ;;  %v2323_v37 = vadd.f32 %v2233_v23, %v2037_v18  ;;  %2792 = vst [vmem:[%s3486_s13 + $0x40] sm:$0xff] %v2756_v22  ;;  %v1542_v18 = vld [vmem:[%s3486_s13 + $0x70] sm:$0xff] }
 0x265   : > { %v2609_v17 = vadd.f32 %v2519_v43, %v2323_v37  ;;  %v2452_v37 = vld [vmem:[%s3163_s22 + $0x116] sm:$0xff] }
 0x266   : > { %v1950_v31 = vpop.f32.mrf.mxu2  ;;  %v2522_v32 = vpop.f32.mrf.mxu0 }
 0x267   : > { %v2038_v33 = vadd.f32 %v1950_v31, %v1752_v30  ;;  %2283 = vmatmul.f32.gmra.mxu3 %v2162_v28  ;;  %v2721_v53 = vadd.f32 %v3888_v25, %v2609_v17  ;;  %v1881_v17 = vld [vmem:[%s3163_s22 + $0x11c] sm:$0xff] }
 0x268   : > { %v1667_v36 = vpop.f32.mrf.mxu1 }
 0x269   : > { %v2757_v40 = vmax.f32 %v2721_v53, 0.0  ;;  %2569 = vmatmul.f32.gmra.mxu0 %v2448_v24  ;;  %v1753_v44 = vadd.f32 %v1667_v36, %v1539_v45  ;;  %v2167_v53 = vld [vmem:[%s3163_s22 + $0x11d] sm:$0xff] }
 0x26a   : > { %v2236_v41 = vpop.f32.mrf.mxu3 }
 0x26b   : > { %1714 = vmatmul.f32.gmra.mxu1 %v1875_v9  ;;  %2000 = vmatmul.f32.gmra.mxu2 %v1877_v39  ;;  %v2324_v26 = vadd.f32 %v2236_v41, %v2038_v33  ;;  %2793 = vst [vmem:[%s3486_s13 + $0x48] sm:$0xff] %v2757_v40  ;;  %v1543_v33 = vld [vmem:[%s3486_s13 + $0x78] sm:$0xff] }
 0x26d   : > { %v2610_v47 = vadd.f32 %v2522_v32, %v2324_v26  ;;  %v2453_v26 = vld [vmem:[%s3163_s22 + $0x11e] sm:$0xff] }
 0x26e   : > { %v1953_v48 = vpop.f32.mrf.mxu2  ;;  %v2525_v49 = vpop.f32.mrf.mxu0 }
 0x26f   : > { %v2039_v35 = vadd.f32 %v1953_v48, %v1753_v44  ;;  %2286 = vmatmul.f32.gmra.mxu3 %v2163_v42  ;;  %v2722_v51 = vadd.f32 %v3888_v25, %v2610_v47  ;;  %v1882_v47 = vld [vmem:[%s3163_s22 + $0x124] sm:$0xff] }
 0x270   : > { %v1670_v61 = vpop.f32.mrf.mxu1 }
 0x271   : > { %v2758_v54 = vmax.f32 %v2722_v51, 0.0  ;;  %2572 = vmatmul.f32.gmra.mxu0 %v2449_v50  ;;  %v1754_v58 = vadd.f32 %v1670_v61, %v1540_v56  ;;  %v2168_v51 = vld [vmem:[%s3163_s22 + $0x125] sm:$0xff] }
 0x272   : > { %v2239_v38 = vpop.f32.mrf.mxu3 }
 0x273   : > { %1717 = vmatmul.f32.gmra.mxu1 %v1876_v21  ;;  %2003 = vmatmul.f32.gmra.mxu2 %v1878_v52  ;;  %v2325_v55 = vadd.f32 %v2239_v38, %v2039_v35  ;;  %2794 = vst [vmem:[%s3486_s13 + $0x50] sm:$0xff] %v2758_v54  ;;  %v1544_v35 = vld [vmem:[%s3486_s13 + $0x80] sm:$0xff] }
 0x275   : > { %v2611_v59 = vadd.f32 %v2525_v49, %v2325_v55  ;;  %v2454_v55 = vld [vmem:[%s3163_s22 + $0x126] sm:$0xff] }
 0x276   : > { %v1956_v60 = vpop.f32.mrf.mxu2  ;;  %v2528_v62 = vpop.f32.mrf.mxu0 }
 0x277   : > { %v2040_v46 = vadd.f32 %v1956_v60, %v1754_v58  ;;  %2289 = vmatmul.f32.gmra.mxu3 %v2164_v57  ;;  %v2723_v1 = vadd.f32 %v3888_v25, %v2611_v59  ;;  %v1883_v59 = vld [vmem:[%s3163_s22 + $0x12c] sm:$0xff] }
 0x278   : > { %v1673_v2 = vpop.f32.mrf.mxu1 }
 0x279   : > { %v2759_v6 = vmax.f32 %v2723_v1, 0.0  ;;  %2575 = vmatmul.f32.gmra.mxu0 %v2450_v0  ;;  %v1755_v7 = vadd.f32 %v1673_v2, %v1541_v4  ;;  %v2169_v1 = vld [vmem:[%s3163_s22 + $0x12d] sm:$0xff] }
 0x27a   : > { %v2242_v63 = vpop.f32.mrf.mxu3 }
 0x27b   : > { %1720 = vmatmul.f32.gmra.mxu1 %v1877_v39  ;;  %2006 = vmatmul.f32.gmra.mxu2 %v1879_v34  ;;  %v2326_v3 = vadd.f32 %v2242_v63, %v2040_v46  ;;  %2795 = vst [vmem:[%s3486_s13 + $0x58] sm:$0xff] %v2759_v6  ;;  %v1545_v46 = vld [vmem:[%s3486_s13 + $0x88] sm:$0xff] }
 0x27d   : > { %v2612_v9 = vadd.f32 %v2528_v62, %v2326_v3  ;;  %v2455_v3 = vld [vmem:[%s3163_s22 + $0x12e] sm:$0xff] }
 0x27e   : > { %v1959_v10 = vpop.f32.mrf.mxu2  ;;  %v2531_v11 = vpop.f32.mrf.mxu0 }
 0x27f   : > { %v2041_v29 = vadd.f32 %v1959_v10, %v1755_v7  ;;  %2292 = vmatmul.f32.gmra.mxu3 %v2165_v5  ;;  %v2724_v13 = vadd.f32 %v3888_v25, %v2612_v9  ;;  %v1884_v9 = vld [vmem:[%s3163_s22 + $0x134] sm:$0xff] }
 0x280   : > { %v1676_v14 = vpop.f32.mrf.mxu1 }
 0x281   : > { %v2760_v8 = vmax.f32 %v2724_v13, 0.0  ;;  %2578 = vmatmul.f32.gmra.mxu0 %v2451_v12  ;;  %v1756_v20 = vadd.f32 %v1676_v14, %v1542_v18  ;;  %v2170_v13 = vld [vmem:[%s3163_s22 + $0x135] sm:$0xff] }
 0x282   : > { %v2245_v43 = vpop.f32.mrf.mxu3 }
 0x283   : > { %1723 = vmatmul.f32.gmra.mxu1 %v1878_v52  ;;  %2009 = vmatmul.f32.gmra.mxu2 %v1880_v16  ;;  %v2327_v15 = vadd.f32 %v2245_v43, %v2041_v29  ;;  %2796 = vst [vmem:[%s3486_s13 + $0x60] sm:$0xff] %v2760_v8  ;;  %v1546_v29 = vld [vmem:[%s3486_s13 + $0x90] sm:$0xff] }
 0x285   : > { %v2613_v21 = vadd.f32 %v2531_v11, %v2327_v15  ;;  %v2456_v15 = vld [vmem:[%s3163_s22 + $0x136] sm:$0xff] }
 0x286   : > { %v1962_v22 = vpop.f32.mrf.mxu2  ;;  %v2534_v23 = vpop.f32.mrf.mxu0 }
 0x287   : > { %v2042_v27 = vadd.f32 %v1962_v22, %v1756_v20  ;;  %2295 = vmatmul.f32.gmra.mxu3 %v2166_v19  ;;  %v2725_v28 = vadd.f32 %v3888_v25, %v2613_v21  ;;  %v1885_v21 = vld [vmem:[%s3163_s22 + $0x13c] sm:$0xff] }
 0x288   : > { %v1679_v30 = vpop.f32.mrf.mxu1 }
 0x289   : > { %v2761_v31 = vmax.f32 %v2725_v28, 0.0  ;;  %2581 = vmatmul.f32.gmra.mxu0 %v2452_v37  ;;  %v1757_v36 = vadd.f32 %v1679_v30, %v1543_v33  ;;  %v2171_v28 = vld [vmem:[%s3163_s22 + $0x13d] sm:$0xff] }
 0x28a   : > { %v2248_v32 = vpop.f32.mrf.mxu3 }
 0x28b   : > { %1726 = vmatmul.f32.gmra.mxu1 %v1879_v34  ;;  %2012 = vmatmul.f32.gmra.mxu2 %v1881_v17  ;;  %v2328_v24 = vadd.f32 %v2248_v32, %v2042_v27  ;;  %2797 = vst [vmem:[%s3486_s13 + $0x68] sm:$0xff] %v2761_v31  ;;  %v1547_v27 = vld [vmem:[%s3486_s13 + $0x98] sm:$0xff] }
 0x28d   : > { %v2614_v39 = vadd.f32 %v2534_v23, %v2328_v24  ;;  %v2457_v24 = vld [vmem:[%s3163_s22 + $0x13e] sm:$0xff] }
 0x28e   : > { %v1965_v40 = vpop.f32.mrf.mxu2  ;;  %v2537_v41 = vpop.f32.mrf.mxu0 }
 0x28f   : > { %v2043_v45 = vadd.f32 %v1965_v40, %v1757_v36  ;;  %2298 = vmatmul.f32.gmra.mxu3 %v2167_v53  ;;  %v2726_v42 = vadd.f32 %v3888_v25, %v2614_v39 }
 0x290   : > { %v1682_v44 = vpop.f32.mrf.mxu1 }
 0x291   : > { %v2762_v48 = vmax.f32 %v2726_v42, 0.0  ;;  %2584 = vmatmul.f32.gmra.mxu0 %v2453_v26  ;;  %v1758_v61 = vadd.f32 %v1682_v44, %v1544_v35  ;;  %v1548_v26 = vld [vmem:[%s3486_s13 + $0xa0] sm:$0xff] }
 0x292   : > { %v2251_v49 = vpop.f32.mrf.mxu3 }
 0x293   : > { %1729 = vmatmul.f32.gmra.mxu1 %v1880_v16  ;;  %2015 = vmatmul.f32.gmra.mxu2 %v1882_v47  ;;  %v2329_v50 = vadd.f32 %v2251_v49, %v2043_v45  ;;  %2798 = vst [vmem:[%s3486_s13 + $0x70] sm:$0xff] %v2762_v48 }
 0x295   : > { %v2615_v52 = vadd.f32 %v2537_v41, %v2329_v50 }
 0x296   : > { %v1968_v54 = vpop.f32.mrf.mxu2  ;;  %v2540_v38 = vpop.f32.mrf.mxu0 }
 0x297   : > { %v2044_v56 = vadd.f32 %v1968_v54, %v1758_v61  ;;  %2301 = vmatmul.f32.gmra.mxu3 %v2168_v51  ;;  %v2727_v57 = vadd.f32 %v3888_v25, %v2615_v52  ;;  %v1549_v52 = vld [vmem:[%s3486_s13 + $0xa8] sm:$0xff] }
 0x298   : > { %v1685_v58 = vpop.f32.mrf.mxu1 }
 0x299   : > { %v2763_v60 = vmax.f32 %v2727_v57, 0.0  ;;  %2587 = vmatmul.f32.gmra.mxu0 %v2454_v55  ;;  %v1759_v2 = vadd.f32 %v1685_v58, %v1545_v46  ;;  %v1550_v46 = vld [vmem:[%s3486_s13 + $0xb0] sm:$0xff] }
 0x29a   : > { %v2254_v62 = vpop.f32.mrf.mxu3 }
 0x29b   : > { %1732 = vmatmul.f32.gmra.mxu1 %v1881_v17  ;;  %2018 = vmatmul.f32.gmra.mxu2 %v1883_v59  ;;  %v2330_v0 = vadd.f32 %v2254_v62, %v2044_v56  ;;  %2799 = vst [vmem:[%s3486_s13 + $0x78] sm:$0xff] %v2763_v60 }
 0x29d   : > { %v2616_v34 = vadd.f32 %v2540_v38, %v2330_v0 }
 0x29e   : > { %v1971_v6 = vpop.f32.mrf.mxu2  ;;  %v2543_v63 = vpop.f32.mrf.mxu0 }
 0x29f   : > { %v2045_v4 = vadd.f32 %v1971_v6, %v1759_v2  ;;  %2304 = vmatmul.f32.gmra.mxu3 %v2169_v1  ;;  %v2728_v5 = vadd.f32 %v3888_v25, %v2616_v34 }
 0x2a0   : > { %v1688_v7 = vpop.f32.mrf.mxu1 }
 0x2a1   : > { %v2764_v10 = vmax.f32 %v2728_v5, 0.0  ;;  %2590 = vmatmul.f32.gmra.mxu0 %v2455_v3  ;;  %v1760_v14 = vadd.f32 %v1688_v7, %v1546_v29 }
 0x2a2   : > { %v2257_v11 = vpop.f32.mrf.mxu3 }
 0x2a3   : > { %1735 = vmatmul.f32.gmra.mxu1 %v1882_v47  ;;  %2021 = vmatmul.f32.gmra.mxu2 %v1884_v9  ;;  %v2331_v12 = vadd.f32 %v2257_v11, %v2045_v4  ;;  %2800 = vst [vmem:[%s3486_s13 + $0x80] sm:$0xff] %v2764_v10  ;;  %v1551_v10 = vld [vmem:[%s3486_s13 + $0xb8] sm:$0xff] }
 0x2a5   : > { %v2617_v16 = vadd.f32 %v2543_v63, %v2331_v12 }
 0x2a6   : > { %v1974_v8 = vpop.f32.mrf.mxu2  ;;  %v2546_v43 = vpop.f32.mrf.mxu0 }
 0x2a7   : > { %v2046_v18 = vadd.f32 %v1974_v8, %v1760_v14  ;;  %2307 = vmatmul.f32.gmra.mxu3 %v2170_v13  ;;  %v2729_v19 = vadd.f32 %v3888_v25, %v2617_v16 }
 0x2a8   : > { %v1691_v20 = vpop.f32.mrf.mxu1 }
 0x2a9   : > { %v2765_v22 = vmax.f32 %v2729_v19, 0.0  ;;  %2593 = vmatmul.f32.gmra.mxu0 %v2456_v15  ;;  %v1761_v30 = vadd.f32 %v1691_v20, %v1547_v27  ;;  %v1552_v19 = vld [vmem:[%s3486_s13 + $0xc0] sm:$0xff] }
 0x2aa   : > { %v2260_v23 = vpop.f32.mrf.mxu3 }
 0x2ab   : > { %1738 = vmatmul.f32.gmra.mxu1 %v1883_v59  ;;  %2024 = vmatmul.f32.gmra.mxu2 %v1885_v21  ;;  %v2332_v37 = vadd.f32 %v2260_v23, %v2046_v18  ;;  %2801 = vst [vmem:[%s3486_s13 + $0x88] sm:$0xff] %v2765_v22 }
 0x2ad   : > { %v2618_v17 = vadd.f32 %v2546_v43, %v2332_v37 }
 0x2ae   : > { %v1977_v31 = vpop.f32.mrf.mxu2  ;;  %v2549_v32 = vpop.f32.mrf.mxu0 }
 0x2af   : > { %v2047_v33 = vadd.f32 %v1977_v31, %v1761_v30  ;;  %2310 = vmatmul.f32.gmra.mxu3 %v2171_v28  ;;  %v2730_v53 = vadd.f32 %v3888_v25, %v2618_v17 }
 0x2b0   : > { %v1694_v36 = vpop.f32.mrf.mxu1 }
 0x2b1   : > { %v2766_v39 = vmax.f32 %v2730_v53, 0.0  ;;  %2596 = vmatmul.f32.gmra.mxu0 %v2457_v24  ;;  %v1762_v45 = vadd.f32 %v1694_v36, %v1548_v26 }
 0x2b2   : > { %v2263_v40 = vpop.f32.mrf.mxu3 }
 0x2b3   : > { %v2333_v41 = vadd.f32 %v2263_v40, %v2047_v33  ;;  %2802 = vst [vmem:[%s3486_s13 + $0x90] sm:$0xff] %v2766_v39 }
 0x2b5   : > { %v2619_v42 = vadd.f32 %v2549_v32, %v2333_v41  ;;  %v1553_v32 = vld [vmem:[%s3486_s13 + $0xc8] sm:$0xff] }
 0x2b6   : > { %v1980_v44 = vpop.f32.mrf.mxu2  ;;  %v2552_v47 = vpop.f32.mrf.mxu0 }
 0x2b7   : > { %v2048_v48 = vadd.f32 %v1980_v44, %v1762_v45  ;;  %v2731_v49 = vadd.f32 %v3888_v25, %v2619_v42  ;;  %v1554_v44 = vld [vmem:[%s3486_s13 + $0xd0] sm:$0xff] }
 0x2b8   : > { %v1697_v50 = vpop.f32.mrf.mxu1 }
 0x2b9   : > { %v2767_v35 = vmax.f32 %v2731_v49, 0.0  ;;  %v1763_v54 = vadd.f32 %v1697_v50, %v1549_v52 }
 0x2ba   : > { %v2266_v51 = vpop.f32.mrf.mxu3 }
 0x2bb   : > { %v2334_v61 = vadd.f32 %v2266_v51, %v2048_v48  ;;  %2803 = vst [vmem:[%s3486_s13 + $0x98] sm:$0xff] %v2767_v35 }
 0x2bd   : > { %v2620_v38 = vadd.f32 %v2552_v47, %v2334_v61 }
 0x2be   : > { %v1983_v55 = vpop.f32.mrf.mxu2  ;;  %v2555_v56 = vpop.f32.mrf.mxu0 }
 0x2bf   : > { %v2049_v57 = vadd.f32 %v1983_v55, %v1763_v54  ;;  %v2732_v58 = vadd.f32 %v3888_v25, %v2620_v38  ;;  %v1555_v55 = vld [vmem:[%s3486_s13 + $0xd8] sm:$0xff] }
 0x2c0   : > { %v1700_v59 = vpop.f32.mrf.mxu1 }
 0x2c1   : > { %v2768_v60 = vmax.f32 %v2732_v58, 0.0  ;;  %v1764_v1 = vadd.f32 %v1700_v59, %v1550_v46 }
 0x2c2   : > { %v2269_v62 = vpop.f32.mrf.mxu3 }
 0x2c3   : > { %v2335_v0 = vadd.f32 %v2269_v62, %v2049_v57  ;;  %2804 = vst [vmem:[%s3486_s13 + $0xa0] sm:$0xff] %v2768_v60 }
 0x2c5   : > { %v2621_v2 = vadd.f32 %v2555_v56, %v2335_v0 }
 0x2c6   : > { %v1986_v34 = vpop.f32.mrf.mxu2  ;;  %v2558_v6 = vpop.f32.mrf.mxu0 }
 0x2c7   : > { %v2050_v63 = vadd.f32 %v1986_v34, %v1764_v1  ;;  %v2733_v3 = vadd.f32 %v3888_v25, %v2621_v2  ;;  %v1556_v34 = vld [vmem:[%s3486_s13 + $0xe0] sm:$0xff] }
 0x2c8   : > { %v1703_v4 = vpop.f32.mrf.mxu1 }
 0x2c9   : > { %v2769_v5 = vmax.f32 %v2733_v3, 0.0  ;;  %v1765_v11 = vadd.f32 %v1703_v4, %v1551_v10 }
 0x2ca   : > { %v2272_v7 = vpop.f32.mrf.mxu3 }
 0x2cb   : > { %v2336_v9 = vadd.f32 %v2272_v7, %v2050_v63  ;;  %2805 = vst [vmem:[%s3486_s13 + $0xa8] sm:$0xff] %v2769_v5 }
 0x2cd   : > { %v2622_v12 = vadd.f32 %v2558_v6, %v2336_v9 }
 0x2ce   : > { %v1989_v29 = vpop.f32.mrf.mxu2  ;;  %v2561_v13 = vpop.f32.mrf.mxu0 }
 0x2cf   : > { %v2051_v14 = vadd.f32 %v1989_v29, %v1765_v11  ;;  %v2734_v16 = vadd.f32 %v3888_v25, %v2622_v12  ;;  %v1557_v29 = vld [vmem:[%s3486_s13 + $0xe8] sm:$0xff] }
 0x2d0   : > { %v1706_v8 = vpop.f32.mrf.mxu1 }
 0x2d1   : > { %v2770_v43 = vmax.f32 %v2734_v16, 0.0  ;;  %v1766_v20 = vadd.f32 %v1706_v8, %v1552_v19 }
 0x2d2   : > { %v2275_v15 = vpop.f32.mrf.mxu3 }
 0x2d3   : > { %v2337_v18 = vadd.f32 %v2275_v15, %v2051_v14  ;;  %2806 = vst [vmem:[%s3486_s13 + $0xb0] sm:$0xff] %v2770_v43 }
 0x2d5   : > { %v2623_v21 = vadd.f32 %v2561_v13, %v2337_v18 }
 0x2d6   : > { %v1992_v22 = vpop.f32.mrf.mxu2  ;;  %v2564_v23 = vpop.f32.mrf.mxu0 }
 0x2d7   : > { %v2052_v37 = vadd.f32 %v1992_v22, %v1766_v20  ;;  %v2735_v27 = vadd.f32 %v3888_v25, %v2623_v21  ;;  %v1558_v22 = vld [vmem:[%s3486_s13 + $0xf0] sm:$0xff] }
 0x2d8   : > { %v1709_v28 = vpop.f32.mrf.mxu1 }
 0x2d9   : > { %v2771_v30 = vmax.f32 %v2735_v27, 0.0  ;;  %v1767_v24 = vadd.f32 %v1709_v28, %v1553_v32 }
 0x2da   : > { %v2278_v17 = vpop.f32.mrf.mxu3 }
 0x2db   : > { %v2338_v31 = vadd.f32 %v2278_v17, %v2052_v37  ;;  %2807 = vst [vmem:[%s3486_s13 + $0xb8] sm:$0xff] %v2771_v30 }
 0x2dd   : > { %v2624_v33 = vadd.f32 %v2564_v23, %v2338_v31 }
 0x2de   : > { %v1995_v53 = vpop.f32.mrf.mxu2  ;;  %v2567_v36 = vpop.f32.mrf.mxu0 }
 0x2df   : > { %v2053_v39 = vadd.f32 %v1995_v53, %v1767_v24  ;;  %v2736_v40 = vadd.f32 %v3888_v25, %v2624_v33  ;;  %v1559_v53 = vld [vmem:[%s3486_s13 + $0xf8] sm:$0xff] }
 0x2e0   : > { %v1712_v41 = vpop.f32.mrf.mxu1 }
 0x2e1   : > { %v2772_v26 = vmax.f32 %v2736_v40, 0.0  ;;  %v1768_v47 = vadd.f32 %v1712_v41, %v1554_v44 }
 0x2e2   : > { %v2281_v45 = vpop.f32.mrf.mxu3 }
 0x2e3   : > { %v2339_v42 = vadd.f32 %v2281_v45, %v2053_v39  ;;  %2808 = vst [vmem:[%s3486_s13 + $0xc0] sm:$0xff] %v2772_v26 }
 0x2e5   : > { %v2625_v48 = vadd.f32 %v2567_v36, %v2339_v42 }
 0x2e6   : > { %v1998_v49 = vpop.f32.mrf.mxu2  ;;  %v2570_v50 = vpop.f32.mrf.mxu0 }
 0x2e7   : > { %v2054_v35 = vadd.f32 %v1998_v49, %v1768_v47  ;;  %v2737_v51 = vadd.f32 %v3888_v25, %v2625_v48  ;;  %v1560_v49 = vld [vmem:[%s3486_s13 + $0x100] sm:$0xff] }
 0x2e8   : > { %v1715_v61 = vpop.f32.mrf.mxu1 }
 0x2e9   : > { %v2773_v52 = vmax.f32 %v2737_v51, 0.0  ;;  %v1769_v56 = vadd.f32 %v1715_v61, %v1555_v55 }
 0x2ea   : > { %v2284_v54 = vpop.f32.mrf.mxu3 }
 0x2eb   : > { %v2340_v38 = vadd.f32 %v2284_v54, %v2054_v35  ;;  %2809 = vst [vmem:[%s3486_s13 + $0xc8] sm:$0xff] %v2773_v52 }
 0x2ed   : > { %v2626_v57 = vadd.f32 %v2570_v50, %v2340_v38 }
 0x2ee   : > { %v2001_v58 = vpop.f32.mrf.mxu2  ;;  %v2573_v59 = vpop.f32.mrf.mxu0 }
 0x2ef   : > { %v2055_v60 = vadd.f32 %v2001_v58, %v1769_v56  ;;  %v2738_v62 = vadd.f32 %v3888_v25, %v2626_v57  ;;  %v1561_v58 = vld [vmem:[%s3486_s13 + $0x108] sm:$0xff] }
 0x2f0   : > { %v1718_v0 = vpop.f32.mrf.mxu1 }
 0x2f1   : > { %v2774_v46 = vmax.f32 %v2738_v62, 0.0  ;;  %v1770_v6 = vadd.f32 %v1718_v0, %v1556_v34 }
 0x2f2   : > { %v2287_v1 = vpop.f32.mrf.mxu3 }
 0x2f3   : > { %v2341_v2 = vadd.f32 %v2287_v1, %v2055_v60  ;;  %2810 = vst [vmem:[%s3486_s13 + $0xd0] sm:$0xff] %v2774_v46  ;;  %v3071_v1 = vld [vmem:[%s4057_s2] ss:$0 sm:$0xff] }
 0x2f5   : > { %v2627_v63 = vadd.f32 %v2573_v59, %v2341_v2 }
 0x2f6   : > { %v2004_v3 = vpop.f32.mrf.mxu2  ;;  %v2576_v4 = vpop.f32.mrf.mxu0 }
 0x2f7   : > { %v2056_v5 = vadd.f32 %v2004_v3, %v1770_v6  ;;  %v2739_v7 = vadd.f32 %v3888_v25, %v2627_v63  ;;  %v1562_v3 = vld [vmem:[%s3486_s13 + $0x110] sm:$0xff] }
 0x2f8   : > { %v1721_v9 = vpop.f32.mrf.mxu1 }
 0x2f9   : > { %v2775_v10 = vmax.f32 %v2739_v7, 0.0  ;;  %v1771_v13 = vadd.f32 %v1721_v9, %v1557_v29 }
 0x2fa   : > { %v2290_v11 = vpop.f32.mrf.mxu3 }
 0x2fb   : > { %v2342_v12 = vadd.f32 %v2290_v11, %v2056_v5  ;;  %2811 = vst [vmem:[%s3486_s13 + $0xd8] sm:$0xff] %v2775_v10 }
 0x2fd   : > { %v2628_v14 = vadd.f32 %v2576_v4, %v2342_v12 }
 0x2fe   : > { %v2007_v16 = vpop.f32.mrf.mxu2  ;;  %v2579_v8 = vpop.f32.mrf.mxu0 }
 0x2ff   : > { %v2057_v43 = vadd.f32 %v2007_v16, %v1771_v13  ;;  %v2740_v15 = vadd.f32 %v3888_v25, %v2628_v14  ;;  %v1563_v16 = vld [vmem:[%s3486_s13 + $0x118] sm:$0xff] }
 0x300   : > { %v1724_v18 = vpop.f32.mrf.mxu1 }
 0x301   : > { %v2776_v19 = vmax.f32 %v2740_v15, 0.0  ;;  %v1772_v23 = vadd.f32 %v1724_v18, %v1558_v22 }
 0x302   : > { %v2293_v20 = vpop.f32.mrf.mxu3 }
 0x303   : > { %v2343_v21 = vadd.f32 %v2293_v20, %v2057_v43  ;;  %2812 = vst [vmem:[%s3486_s13 + $0xe0] sm:$0xff] %v2776_v19 }
 0x305   : > { %v2629_v37 = vadd.f32 %v2579_v8, %v2343_v21 }
 0x306   : > { %v2010_v27 = vpop.f32.mrf.mxu2  ;;  %v2582_v28 = vpop.f32.mrf.mxu0 }
 0x307   : > { %v2058_v30 = vadd.f32 %v2010_v27, %v1772_v23  ;;  %v2741_v17 = vadd.f32 %v3888_v25, %v2629_v37 }
 0x308   : > { %v1727_v31 = vpop.f32.mrf.mxu1 }
 0x309   : > { %v2777_v32 = vmax.f32 %v2741_v17, 0.0  ;;  %v1773_v36 = vadd.f32 %v1727_v31, %v1559_v53 }
 0x30a   : > { %v2296_v24 = vpop.f32.mrf.mxu3 }
 0x30b   : > { %v2344_v33 = vadd.f32 %v2296_v24, %v2058_v30  ;;  %2813 = vst [vmem:[%s3486_s13 + $0xe8] sm:$0xff] %v2777_v32 }
 0x30d   : > { %v2630_v39 = vadd.f32 %v2582_v28, %v2344_v33 }
 0x30e   : > { %v2013_v40 = vpop.f32.mrf.mxu2  ;;  %v2585_v41 = vpop.f32.mrf.mxu0 }
 0x30f   : > { %v2059_v26 = vadd.f32 %v2013_v40, %v1773_v36  ;;  %v2742_v45 = vadd.f32 %v3888_v25, %v2630_v39 }
 0x310   : > { %v1730_v42 = vpop.f32.mrf.mxu1 }
 0x311   : > { %v2778_v44 = vmax.f32 %v2742_v45, 0.0  ;;  %v1774_v50 = vadd.f32 %v1730_v42, %v1560_v49 }
 0x312   : > { %v2299_v47 = vpop.f32.mrf.mxu3 }
 0x313   : > { %v2345_v48 = vadd.f32 %v2299_v47, %v2059_v26  ;;  %2814 = vst [vmem:[%s3486_s13 + $0xf0] sm:$0xff] %v2778_v44 }
 0x315   : > { %v2631_v35 = vadd.f32 %v2585_v41, %v2345_v48 }
 0x316   : > { %v2016_v51 = vpop.f32.mrf.mxu2  ;;  %v2588_v61 = vpop.f32.mrf.mxu0 }
 0x317   : > { %v2060_v52 = vadd.f32 %v2016_v51, %v1774_v50  ;;  %v2743_v54 = vadd.f32 %v3888_v25, %v2631_v35 }
 0x318   : > { %v1733_v38 = vpop.f32.mrf.mxu1 }
 0x319   : > { %v2779_v55 = vmax.f32 %v2743_v54, 0.0  ;;  %v1775_v59 = vadd.f32 %v1733_v38, %v1561_v58 }
 0x31a   : > { %v2302_v56 = vpop.f32.mrf.mxu3 }
 0x31b   : > { %v2346_v57 = vadd.f32 %v2302_v56, %v2060_v52  ;;  %2815 = vst [vmem:[%s3486_s13 + $0xf8] sm:$0xff] %v2779_v55 }
 0x31d   : > { %v2632_v60 = vadd.f32 %v2588_v61, %v2346_v57 }
 0x31e   : > { %v2019_v62 = vpop.f32.mrf.mxu2  ;;  %v2591_v0 = vpop.f32.mrf.mxu0 }
 0x31f   : > { %v2061_v46 = vadd.f32 %v2019_v62, %v1775_v59  ;;  %v2744_v2 = vadd.f32 %v3071_v1, %v2632_v60 }
 0x320   : > { %v1736_v34 = vpop.f32.mrf.mxu1 }
 0x321   : > { %v2780_v25 = vmax.f32 %v2744_v2, 0.0  ;;  %v1776_v4 = vadd.f32 %v1736_v34, %v1562_v3 }
 0x322   : > { %v2305_v6 = vpop.f32.mrf.mxu3 }
 0x323   : > { %v2347_v63 = vadd.f32 %v2305_v6, %v2061_v46  ;;  %2816 = vst [vmem:[%s3486_s13 + $0x100] sm:$0xff] %v2780_v25 }
 0x325   : > { %v2633_v5 = vadd.f32 %v2591_v0, %v2347_v63 }
 0x326   : > { %v2022_v7 = vpop.f32.mrf.mxu2  ;;  %v2594_v11 = vpop.f32.mrf.mxu0 }
 0x327   : > { %v2062_v9 = vadd.f32 %v2022_v7, %v1776_v4  ;;  %v2745_v10 = vadd.f32 %v3071_v1, %v2633_v5 }
 0x328   : > { %v1739_v29 = vpop.f32.mrf.mxu1 }
 0x329   : > { %v2781_v12 = vmax.f32 %v2745_v10, 0.0  ;;  %v1777_v8 = vadd.f32 %v1739_v29, %v1563_v16 }
 0x32a   : > { %v2308_v13 = vpop.f32.mrf.mxu3 }
 0x32b   : > { %v2348_v14 = vadd.f32 %v2308_v13, %v2062_v9  ;;  %2817 = vst [vmem:[%s3486_s13 + $0x108] sm:$0xff] %v2781_v12 }
 0x32d   : > { %v2634_v43 = vadd.f32 %v2594_v11, %v2348_v14 }
 0x32e   : > { %v2025_v15 = vpop.f32.mrf.mxu2  ;;  %v2597_v22 = vpop.f32.mrf.mxu0 }
 0x32f   : > { %v2063_v18 = vadd.f32 %v2025_v15, %v1777_v8  ;;  %v2746_v19 = vadd.f32 %v3071_v1, %v2634_v43 }
 0x331   : > { %v2782_v20 = vmax.f32 %v2746_v19, 0.0 }
 0x332   : > { %v2311_v21 = vpop.f32.mrf.mxu3 }
 0x333   : > { %v2349_v23 = vadd.f32 %v2311_v21, %v2063_v18  ;;  %2818 = vst [vmem:[%s3486_s13 + $0x110] sm:$0xff] %v2782_v20 }
 0x335   : > { %v2635_v37 = vadd.f32 %v2597_v22, %v2349_v23 }
 0x337   : > { %v2747_v27 = vadd.f32 %v3071_v1, %v2635_v37 }
 0x339   : > { %v2783_v28 = vmax.f32 %v2747_v27, 0.0 }
 0x33b   : > { %2819 = vst [vmem:[%s3486_s13 + $0x118] sm:$0xff] %v2783_v28 }
 0x33c PF: > { %s13_s12 = sadd.s32 1, %s3078_s12  }
 0x33d   : > { %p10_p4 = scmp.ge.s32.totalorder %s13_s12, 4  }
 0x33f   :  { %12 = sbr.rel (!%p10_p4) target bundleno = 1 (0x1), region = 70 }

// kernel: network_forward.13
= control target key start
LH: loop header
LB: loop body
LE: loop exit
PB: predicated region body
PF: predicated region fallthrough
CT: control target
= control target key end

     0   :  { %s1264_s12 = smov 0   ;;  %s1915_s0 = inlined_call_operand.vmem [shape: f32[2,83,128], index: 0, kind: input, shape index: {}]   ;;  %s1916_s1 = inlined_call_operand.vmem [shape: f32[9,128,128], index: 1, kind: input, shape index: {}]   ;;  %s1917_s2 = inlined_call_operand.vmem [shape: f32[1,128], index: 2, kind: input, shape index: {}]   ;;  %s1918_s3 = inlined_call_operand.vmem [shape: f32[2,63,128], index: 3, kind: output, shape index: {}]  }
   0x1 LB: > { %s1055_s13 = sadd.s32 4294967295, %s1242_s12   ;;  %p1059_p0 = scmp.ge.s32.totalorder %s1242_s12, 1  ;;  %s1242_s12 = sphi %s1264_s12, %s13_s12  }
   0x2   : > { %p137_p1 = scmp.lt.s32.totalorder %s1242_s12, 3 }
   0x4   : > { %p138_p2 = pnand %p1059_p0, %p137_p1 }
   0x5   : > { %p1325_p3 = scmp.lt.s32.totalorder (!%p138_p2), %s1055_s13, 1 }
   0x6   : > { %141 = sbr.rel (%p138_p2) target bundleno = 366 (0x16e), region = 32 }
   0xb   : > { %v194_v0 = vld [vmem:[%s1916_s1 + $0x78] sm:$0xff]  ;;  %v193_v1 = vld [vmem:[%s1916_s1 + $0x70] sm:$0xff]  ;;  %v192_v2 = vld [vmem:[%s1916_s1 + $0x68] sm:$0xff]  ;;  %s1921_s13 = smov (!%p1325_p3, %s1055_s13), 1 }
   0xc   : > { %1194 = vmatpush.msra.mxu1 %v194_v0  ;;  %195 = vmatpush.msra.mxu0 %v194_v0  ;;  %v191_v3 = vld [vmem:[%s1916_s1 + $0x60] sm:$0xff]  ;;  %v190_v4 = vld [vmem:[%s1916_s1 + $0x58] sm:$0xff]  ;;  %v1093_v6 = vld [vmem:[%s1916_s1 + $0x170] sm:$0xff]  ;;  %s1226_s23 = smul.u32 88, %s1921_s13  ;;  %s1193_s16 = sshll.u32 %s1921_s13, 6 }
   0xd   : > { %v1094_v5 = vld [vmem:[%s1916_s1 + $0x178] sm:$0xff]  ;;  %v189_v7 = vld [vmem:[%s1916_s1 + $0x50] sm:$0xff]  ;;  %v1092_v8 = vld [vmem:[%s1916_s1 + $0x168] sm:$0xff]  ;;  %s1834_s19 = scalar_lea.vmem %s1918_s3, %s1193_s16 }
   0xe   : > { %1195 = vmatpush.msra.mxu1 %v193_v1  ;;  %196 = vmatpush.msra.mxu0 %v193_v1  ;;  %v188_v9 = vld [vmem:[%s1916_s1 + $0x48] sm:$0xff]  ;;  %v1110_v10 = vld [vmem:[%s1916_s1 + $0x1f8] sm:$0xff]  ;;  %v1091_v11 = vld [vmem:[%s1916_s1 + $0x160] sm:$0xff]  ;;  %s1393_s11 = scalar_lea.vmem %s1915_s0, %s1226_s23 }
   0xf   : > { %367 = vmatpush.msra.mxu2 %v1094_v5  ;;  %v1109_v12 = vld [vmem:[%s1916_s1 + $0x1f0] sm:$0xff]  ;;  %v187_v13 = vld [vmem:[%s1916_s1 + $0x40] sm:$0xff]  ;;  %457 = vmatpush.msra.mxu3 %v1110_v10  ;;  %v1090_v14 = vld [vmem:[%s1916_s1 + $0x158] sm:$0xff] }
  0x10   : > { %1196 = vmatpush.msra.mxu1 %v192_v2  ;;  %197 = vmatpush.msra.mxu0 %v192_v2  ;;  %v1108_v15 = vld [vmem:[%s1916_s1 + $0x1e8] sm:$0xff]  ;;  %v186_v16 = vld [vmem:[%s1916_s1 + $0x38] sm:$0xff]  ;;  %v1089_v17 = vld [vmem:[%s1916_s1 + $0x150] sm:$0xff] }
  0x11   : > { %368 = vmatpush.msra.mxu2 %v1093_v6  ;;  %458 = vmatpush.msra.mxu3 %v1109_v12  ;;  %v1107_v18 = vld [vmem:[%s1916_s1 + $0x1e0] sm:$0xff]  ;;  %v185_v19 = vld [vmem:[%s1916_s1 + $0x30] sm:$0xff]  ;;  %v1088_v20 = vld [vmem:[%s1916_s1 + $0x148] sm:$0xff] }
  0x12   : > { %1197 = vmatpush.msra.mxu1 %v191_v3  ;;  %198 = vmatpush.msra.mxu0 %v191_v3  ;;  %v1106_v21 = vld [vmem:[%s1916_s1 + $0x1d8] sm:$0xff]  ;;  %v184_v22 = vld [vmem:[%s1916_s1 + $0x28] sm:$0xff]  ;;  %v1087_v23 = vld [vmem:[%s1916_s1 + $0x140] sm:$0xff] }
  0x13   : > { %369 = vmatpush.msra.mxu2 %v1092_v8  ;;  %459 = vmatpush.msra.mxu3 %v1108_v15  ;;  %v1105_v24 = vld [vmem:[%s1916_s1 + $0x1d0] sm:$0xff]  ;;  %v183_v25 = vld [vmem:[%s1916_s1 + $0x20] sm:$0xff]  ;;  %v1086_v26 = vld [vmem:[%s1916_s1 + $0x138] sm:$0xff] }
  0x14   : > { %1198 = vmatpush.msra.mxu1 %v190_v4  ;;  %199 = vmatpush.msra.mxu0 %v190_v4  ;;  %v1104_v27 = vld [vmem:[%s1916_s1 + $0x1c8] sm:$0xff]  ;;  %v182_v28 = vld [vmem:[%s1916_s1 + $0x18] sm:$0xff]  ;;  %v1085_v29 = vld [vmem:[%s1916_s1 + $0x130] sm:$0xff] }
  0x15   : > { %370 = vmatpush.msra.mxu2 %v1091_v11  ;;  %460 = vmatpush.msra.mxu3 %v1107_v18  ;;  %v1103_v30 = vld [vmem:[%s1916_s1 + $0x1c0] sm:$0xff]  ;;  %v181_v31 = vld [vmem:[%s1916_s1 + $0x10] sm:$0xff]  ;;  %v1084_v32 = vld [vmem:[%s1916_s1 + $0x128] sm:$0xff] }
  0x16   : > { %1199 = vmatpush.msra.mxu1 %v189_v7  ;;  %200 = vmatpush.msra.mxu0 %v189_v7  ;;  %v1102_v33 = vld [vmem:[%s1916_s1 + $0x1b8] sm:$0xff]  ;;  %v180_v34 = vld [vmem:[%s1916_s1 + $0x8] sm:$0xff]  ;;  %v1083_v35 = vld [vmem:[%s1916_s1 + $0x120] sm:$0xff] }
  0x17   : > { %371 = vmatpush.msra.mxu2 %v1090_v14  ;;  %461 = vmatpush.msra.mxu3 %v1106_v21  ;;  %v1101_v36 = vld [vmem:[%s1916_s1 + $0x1b0] sm:$0xff]  ;;  %v179_v37 = vld [vmem:[%s1916_s1] sm:$0xff]  ;;  %v1078_v40 = vld [vmem:[%s1916_s1 + $0xf8] sm:$0xff] }
  0x18   : > { %1200 = vmatpush.msra.mxu1 %v188_v9  ;;  %201 = vmatpush.msra.mxu0 %v188_v9  ;;  %v175_v38 = vld [vmem:[%s1393_s11 + $0x20] sm:$0xff]  ;;  %v1082_v41 = vld [vmem:[%s1916_s1 + $0x118] sm:$0xff]  ;;  %v1100_v43 = vld [vmem:[%s1916_s1 + $0x1a8] sm:$0xff] }
  0x19   : > { %372 = vmatpush.msra.mxu2 %v1089_v17  ;;  %462 = vmatpush.msra.mxu3 %v1105_v24  ;;  %v171_v39 = vld [vmem:[%s1393_s11] sm:$0xff]  ;;  %v1126_v42 = vld [vmem:[%s1916_s1 + $0x278] sm:$0xff]  ;;  %v1077_v44 = vld [vmem:[%s1916_s1 + $0xf0] sm:$0xff] }
  0x1a   : > { %1201 = vmatpush.msra.mxu1 %v187_v13  ;;  %202 = vmatpush.msra.mxu0 %v187_v13  ;;  %v1081_v45 = vld [vmem:[%s1916_s1 + $0x110] sm:$0xff]  ;;  %v1099_v47 = vld [vmem:[%s1916_s1 + $0x1a0] sm:$0xff]  ;;  %v1076_v48 = vld [vmem:[%s1916_s1 + $0xe8] sm:$0xff] }
  0x1b   : > { %373 = vmatpush.msra.mxu2 %v1088_v20  ;;  %463 = vmatpush.msra.mxu3 %v1104_v27  ;;  %v1125_v46 = vld [vmem:[%s1916_s1 + $0x270] sm:$0xff]  ;;  %v1080_v49 = vld [vmem:[%s1916_s1 + $0x108] sm:$0xff]  ;;  %v1098_v51 = vld [vmem:[%s1916_s1 + $0x198] sm:$0xff] }
  0x1c   : > { %1202 = vmatpush.msra.mxu1 %v186_v16  ;;  %203 = vmatpush.msra.mxu0 %v186_v16  ;;  %v1124_v50 = vld [vmem:[%s1916_s1 + $0x268] sm:$0xff]  ;;  %v1075_v52 = vld [vmem:[%s1916_s1 + $0xe0] sm:$0xff]  ;;  %v1074_v56 = vld [vmem:[%s1916_s1 + $0xd8] sm:$0xff] }
  0x1d   : > { %374 = vmatpush.msra.mxu2 %v1087_v23  ;;  %464 = vmatpush.msra.mxu3 %v1103_v30  ;;  %v1079_v53 = vld [vmem:[%s1916_s1 + $0x100] sm:$0xff]  ;;  %v176_v54 = vld [vmem:[%s1393_s11 + $0x28] sm:$0xff]  ;;  %v1158_v58 = vld [vmem:[%s1916_s1 + $0x378] sm:$0xff] }
  0x1e   : > { %1203 = vmatpush.msra.mxu1 %v185_v19  ;;  %204 = vmatpush.msra.mxu0 %v185_v19  ;;  %v172_v55 = vld [vmem:[%s1393_s11 + $0x8] sm:$0xff]  ;;  %v1123_v59 = vld [vmem:[%s1916_s1 + $0x260] sm:$0xff]  ;;  %v1073_v60 = vld [vmem:[%s1916_s1 + $0xd0] sm:$0xff] }
  0x1f   : > { %375 = vmatpush.msra.mxu2 %v1086_v26  ;;  %465 = vmatpush.msra.mxu3 %v1102_v33  ;;  %v342_v57 = vld [vmem:[%s1393_s11 + $0x2] sm:$0xff]  ;;  %v1097_v61 = vld [vmem:[%s1916_s1 + $0x190] sm:$0xff]  ;;  %v1122_v62 = vld [vmem:[%s1916_s1 + $0x258] sm:$0xff] }
  0x20   : > { %1204 = vmatpush.msra.mxu1 %v184_v22  ;;  %205 = vmatpush.msra.mxu0 %v184_v22  ;;  %v1157_v63 = vld [vmem:[%s1916_s1 + $0x370] sm:$0xff]  ;;  %v1072_v0 = vld [vmem:[%s1916_s1 + $0xc8] sm:$0xff]  ;;  %v1071_v4 = vld [vmem:[%s1916_s1 + $0xc0] sm:$0xff] }
  0x21   : > { %376 = vmatpush.msra.mxu2 %v1085_v29  ;;  %466 = vmatpush.msra.mxu3 %v1101_v36  ;;  %v1096_v1 = vld [vmem:[%s1916_s1 + $0x188] sm:$0xff]  ;;  %v1121_v2 = vld [vmem:[%s1916_s1 + $0x250] sm:$0xff]  ;;  %v1095_v5 = vld [vmem:[%s1916_s1 + $0x180] sm:$0xff] }
  0x22   : > { %1205 = vmatpush.msra.mxu1 %v183_v25  ;;  %206 = vmatpush.msra.mxu0 %v183_v25  ;;  %v1156_v3 = vld [vmem:[%s1916_s1 + $0x368] sm:$0xff]  ;;  %v177_v6 = vld [vmem:[%s1393_s11 + $0x30] sm:$0xff]  ;;  %v1070_v8 = vld [vmem:[%s1916_s1 + $0xb8] sm:$0xff] }
  0x23   : > { %377 = vmatpush.msra.mxu2 %v1084_v32  ;;  %467 = vmatpush.msra.mxu3 %v1100_v43  ;;  %v173_v7 = vld [vmem:[%s1393_s11 + $0x10] sm:$0xff]  ;;  %v1120_v9 = vld [vmem:[%s1916_s1 + $0x248] sm:$0xff]  ;;  %v1119_v13 = vld [vmem:[%s1916_s1 + $0x240] sm:$0xff] }
  0x24   : > { %1206 = vmatpush.msra.mxu1 %v182_v28  ;;  %207 = vmatpush.msra.mxu0 %v182_v28  ;;  %v1499_v10 = vld [vmem:[%s1393_s11 + $0x9] sm:$0xff]  ;;  %v1174_v14 = vld [vmem:[%s1916_s1 + $0x3f8] sm:$0xff]  ;;  %v1155_v15 = vld [vmem:[%s1916_s1 + $0x360] sm:$0xff] }
  0x25   : > { %378 = vmatpush.msra.mxu2 %v1083_v35  ;;  %468 = vmatpush.msra.mxu3 %v1099_v47  ;;  %v1502_v11 = vld [vmem:[%s1393_s11 + $0xa] sm:$0xff]  ;;  %v1118_v17 = vld [vmem:[%s1916_s1 + $0x238] sm:$0xff]  ;;  %v1067_v20 = vld [vmem:[%s1916_s1 + $0xa0] sm:$0xff] }
  0x26   : > { %1207 = vmatpush.msra.mxu1 %v181_v31  ;;  %208 = vmatpush.msra.mxu0 %v181_v31  ;;  %v1069_v12 = vld [vmem:[%s1916_s1 + $0xb0] sm:$0xff]  ;;  %v1068_v16 = vld [vmem:[%s1916_s1 + $0xa8] sm:$0xff]  ;;  %v1154_v19 = vld [vmem:[%s1916_s1 + $0x358] sm:$0xff] }
  0x27   : > { %379 = vmatpush.msra.mxu2 %v1082_v41  ;;  %469 = vmatpush.msra.mxu3 %v1098_v51  ;;  %v1173_v18 = vld [vmem:[%s1916_s1 + $0x3f0] sm:$0xff]  ;;  %v178_v22 = vld [vmem:[%s1393_s11 + $0x38] sm:$0x7f]  ;;  %v1116_v25 = vld [vmem:[%s1916_s1 + $0x228] sm:$0xff] }
  0x28   : > { %1208 = vmatpush.msra.mxu1 %v180_v34  ;;  %209 = vmatpush.msra.mxu0 %v180_v34  ;;  %v1117_v21 = vld [vmem:[%s1916_s1 + $0x230] sm:$0xff]  ;;  %v174_v23 = vld [vmem:[%s1393_s11 + $0x18] sm:$0xff]  ;;  %v1115_v29 = vld [vmem:[%s1916_s1 + $0x220] sm:$0xff] }
  0x29   : > { %380 = vmatpush.msra.mxu2 %v1081_v45  ;;  %470 = vmatpush.msra.mxu3 %v1097_v61  ;;  %v1066_v24 = vld [vmem:[%s1916_s1 + $0x98] sm:$0xff]  ;;  %v1065_v28 = vld [vmem:[%s1916_s1 + $0x90] sm:$0xff]  ;;  %v1172_v30 = vld [vmem:[%s1916_s1 + $0x3e8] sm:$0xff] }
  0x2a   : > { %1209 = vmatpush.msra.mxu1 %v179_v37  ;;  %210 = vmatpush.msra.mxu0 %v179_v37  ;;  %v1545_v26 = vld [vmem:[%s1393_s11 + $0x11] sm:$0xff]  ;;  %v1064_v32 = vld [vmem:[%s1916_s1 + $0x88] sm:$0xff]  ;;  %v1171_v34 = vld [vmem:[%s1916_s1 + $0x3e0] sm:$0xff] }
  0x2b   : > { %223 = vmatmul.f32.vlgmr.msra.gmra.mxu1 %v175_v38  ;;  %211 = vmatmul.f32.vlgmr.msra.gmra.mxu0 %v171_v39  ;;  %v1548_v27 = vld [vmem:[%s1393_s11 + $0x12] sm:$0xff]  ;;  %v1152_v35 = vld [vmem:[%s1916_s1 + $0x348] sm:$0xff]  ;;  %v1063_v36 = vld [vmem:[%s1916_s1 + $0x80] sm:$0xff] }
  0x2c   : > { %277 = vmatpush.msrb.mxu1 %v1078_v40  ;;  %547 = vmatpush.msrb.mxu0 %v1126_v42  ;;  %v1153_v31 = vld [vmem:[%s1916_s1 + $0x350] sm:$0xff]  ;;  %v1114_v33 = vld [vmem:[%s1916_s1 + $0x218] sm:$0xff]  ;;  %v252_v38 = vld [vmem:[%s1393_s11 + $0x1] sm:$0xff] }
  0x2d   : > { %381 = vmatpush.msra.mxu2 %v1080_v49  ;;  %471 = vmatpush.msra.mxu3 %v1096_v1  ;;  %v1113_v37 = vld [vmem:[%s1916_s1 + $0x210] sm:$0xff]  ;;  %v1170_v39 = vld [vmem:[%s1916_s1 + $0x3d8] sm:$0xff]  ;;  %v1112_v41 = vld [vmem:[%s1916_s1 + $0x208] sm:$0xff] }
  0x2e   : > { %278 = vmatpush.msrb.mxu1 %v1077_v44  ;;  %548 = vmatpush.msrb.mxu0 %v1125_v46  ;;  %v1142_v40 = vld [vmem:[%s1916_s1 + $0x2f8] sm:$0xff]  ;;  %v1141_v44 = vld [vmem:[%s1916_s1 + $0x2f0] sm:$0xff]  ;;  %v1111_v45 = vld [vmem:[%s1916_s1 + $0x200] sm:$0xff] }
  0x2f   : > { %382 = vmatpush.msra.mxu2 %v1079_v53  ;;  %472 = vmatpush.msra.mxu3 %v1095_v5  ;;  %v1593_v42 = vld [vmem:[%s1393_s11 + $0x19] sm:$0xff]  ;;  %v1140_v47 = vld [vmem:[%s1916_s1 + $0x2e8] sm:$0xff]  ;;  %v1133_v5 = vld [vmem:[%s1916_s1 + $0x2b0] sm:$0xff] }
  0x30   : > { %279 = vmatpush.msrb.mxu1 %v1076_v48  ;;  %549 = vmatpush.msrb.mxu0 %v1124_v50  ;;  %v1596_v43 = vld [vmem:[%s1393_s11 + $0x1a] sm:$0xff]  ;;  %v1169_v48 = vld [vmem:[%s1916_s1 + $0x3d0] sm:$0xff]  ;;  %v1168_v51 = vld [vmem:[%s1916_s1 + $0x3c8] sm:$0xff] }
  0x31   : > { %383 = vmatmul.f32.vlgmr.msra.gmra.mxu2 %v342_v57  ;;  %473 = vmatmul.f32.vlgmr.msra.gmra.mxu3 %v1499_v10  ;;  %v1151_v46 = vld [vmem:[%s1916_s1 + $0x340] sm:$0xff]  ;;  %v1150_v49 = vld [vmem:[%s1916_s1 + $0x338] sm:$0xff] }
  0x32   : > { %280 = vmatpush.msrb.mxu1 %v1075_v52  ;;  %727 = vmatpush.msrb.mxu2 %v1158_v58  ;;  %v1139_v50 = vld [vmem:[%s1916_s1 + $0x2e0] sm:$0xff]  ;;  %v1149_v52 = vld [vmem:[%s1916_s1 + $0x330] sm:$0xff]  ;;  %v1138_v53 = vld [vmem:[%s1916_s1 + $0x2d8] sm:$0xff] }
  0x33   : > { %226 = vmatmul.f32.gmra.mxu1 %v176_v54  ;;  %214 = vmatmul.f32.gmra.mxu0 %v172_v55  ;;  %v1632_v54 = vld [vmem:[%s1393_s11 + $0x21] sm:$0xff]  ;;  %v1658_v61 = vld [vmem:[%s1916_s1 + $0x478] sm:$0xff] }
  0x34   : > { %281 = vmatpush.msrb.mxu1 %v1074_v56  ;;  %550 = vmatpush.msrb.mxu0 %v1123_v59  ;;  %v1635_v55 = vld [vmem:[%s1393_s11 + $0x22] sm:$0xff]  ;;  %v1137_v56 = vld [vmem:[%s1916_s1 + $0x2d0] sm:$0xff]  ;;  %v1166_v59 = vld [vmem:[%s1916_s1 + $0x3b8] sm:$0xff] }
  0x35   : > { %728 = vmatpush.msrb.mxu2 %v1157_v63  ;;  %817 = vmatpush.msrb.mxu3 %v1174_v14  ;;  %v1167_v57 = vld [vmem:[%s1916_s1 + $0x3c0] sm:$0xff]  ;;  %v1148_v58 = vld [vmem:[%s1916_s1 + $0x328] sm:$0xff]  ;;  %v1146_v1 = vld [vmem:[%s1916_s1 + $0x318] sm:$0xff] }
  0x36   : > { %282 = vmatpush.msrb.mxu1 %v1073_v60  ;;  %551 = vmatpush.msrb.mxu0 %v1122_v62  ;;  %v1136_v60 = vld [vmem:[%s1916_s1 + $0x2c8] sm:$0xff]  ;;  %v1147_v62 = vld [vmem:[%s1916_s1 + $0x320] sm:$0xff] }
  0x37   : > { %729 = vmatpush.msrb.mxu2 %v1156_v3  ;;  %818 = vmatpush.msrb.mxu3 %v1173_v18  ;;  %v1135_v63 = vld [vmem:[%s1916_s1 + $0x2c0] sm:$0xff]  ;;  %v1680_v3 = vld [vmem:[%s1393_s11 + $0x29] sm:$0xff]  ;;  %v1730_v18 = vld [vmem:[%s1393_s11 + $0x31] sm:$0xff] }
  0x38   : > { %283 = vmatpush.msrb.mxu1 %v1072_v0  ;;  %552 = vmatpush.msrb.mxu0 %v1121_v2  ;;  %v1670_v0 = vld [vmem:[%s1916_s1 + $0x470] sm:$0xff]  ;;  %v1134_v2 = vld [vmem:[%s1916_s1 + $0x2b8] sm:$0xff]  ;;  %v1187_v14 = vld [vmem:[%s1916_s1 + $0x460] sm:$0xff] }
  0x39   : > { %386 = vmatmul.f32.gmra.mxu2 %v1502_v11  ;;  %476 = vmatmul.f32.gmra.mxu3 %v1545_v26 }
  0x3a   : > { %284 = vmatpush.msrb.mxu1 %v1071_v4  ;;  %553 = vmatpush.msrb.mxu0 %v1120_v9  ;;  %v1683_v4 = vld [vmem:[%s1393_s11 + $0x2a] sm:$0xff] }
  0x3b   : > { %229 = vmatmul.f32.gmra.mxu1 %v177_v6  ;;  %217 = vmatmul.f32.gmra.mxu0 %v173_v7  ;;  %v1165_v6 = vld [vmem:[%s1916_s1 + $0x3b0] sm:$0xff]  ;;  %v1164_v7 = vld [vmem:[%s1916_s1 + $0x3a8] sm:$0xff] }
  0x3c   : > { %285 = vmatpush.msrb.mxu1 %v1070_v8  ;;  %554 = vmatpush.msrb.mxu0 %v1119_v13  ;;  %v1145_v8 = vld [vmem:[%s1916_s1 + $0x310] sm:$0xff]  ;;  %v1132_v9 = vld [vmem:[%s1916_s1 + $0x2a8] sm:$0xff]  ;;  %v1163_v13 = vld [vmem:[%s1916_s1 + $0x3a0] sm:$0xff] }
  0x3d   : > { %730 = vmatpush.msrb.mxu2 %v1155_v15  ;;  %819 = vmatpush.msrb.mxu3 %v1172_v30  ;;  %v1130_v15 = vld [vmem:[%s1916_s1 + $0x298] sm:$0xff]  ;;  %v1183_v30 = vld [vmem:[%s1916_s1 + $0x440] sm:$0xff] }
  0x3e   : > { %286 = vmatpush.msrb.mxu1 %v1069_v12  ;;  %555 = vmatpush.msrb.mxu0 %v1118_v17  ;;  %v1131_v12 = vld [vmem:[%s1916_s1 + $0x2a0] sm:$0xff]  ;;  %v1186_v17 = vld [vmem:[%s1916_s1 + $0x458] sm:$0xff] }
  0x3f   : > { %731 = vmatpush.msrb.mxu2 %v1154_v19  ;;  %820 = vmatpush.msrb.mxu3 %v1171_v34  ;;  %v1733_v19 = vld [vmem:[%s1393_s11 + $0x32] sm:$0xff] }
  0x40   : > { %287 = vmatpush.msrb.mxu1 %v1068_v16  ;;  %556 = vmatpush.msrb.mxu0 %v1117_v21  ;;  %v1162_v16 = vld [vmem:[%s1916_s1 + $0x398] sm:$0xff]  ;;  %v1143_v21 = vld [vmem:[%s1916_s1 + $0x300] sm:$0xff]  ;;  %v1181_v34 = vld [vmem:[%s1916_s1 + $0x430] sm:$0xff] }
  0x41   : > { %389 = vmatmul.f32.gmra.mxu2 %v1548_v27  ;;  %821 = vmatpush.msrb.mxu3 %v1170_v39  ;;  %v1177_v39 = vld [vmem:[%s1916_s1 + $0x410] sm:$0xff] }
  0x42   : > { %288 = vmatpush.msrb.mxu1 %v1067_v20  ;;  %557 = vmatpush.msrb.mxu0 %v1116_v25  ;;  %v1129_v20 = vld [vmem:[%s1916_s1 + $0x290] sm:$0xff]  ;;  %v1160_v25 = vld [vmem:[%s1916_s1 + $0x388] sm:$0xff] }
  0x43   : > { %232 = vmatmul.f32.gmra.mxu1 %v178_v22  ;;  %220 = vmatmul.f32.gmra.mxu0 %v174_v23  ;;  %v1161_v22 = vld [vmem:[%s1916_s1 + $0x390] sm:$0xff]  ;;  %v1128_v23 = vld [vmem:[%s1916_s1 + $0x288] sm:$0xff] }
  0x44   : > { %289 = vmatpush.msrb.mxu1 %v1066_v24  ;;  %558 = vmatpush.msrb.mxu0 %v1115_v29  ;;  %v1185_v24 = vld [vmem:[%s1916_s1 + $0x450] sm:$0xff]  ;;  %v1159_v29 = vld [vmem:[%s1916_s1 + $0x380] sm:$0xff] }
  0x45   : > { %732 = vmatpush.msrb.mxu2 %v1153_v31  ;;  %479 = vmatmul.f32.gmra.mxu3 %v1593_v42  ;;  %v349_v31 = vld [vmem:[%s1393_s11 + $0x3a] sm:$0x7f] }
  0x46   : > { %290 = vmatpush.msrb.mxu1 %v1065_v28  ;;  %559 = vmatpush.msrb.mxu0 %v1114_v33  ;;  %v1184_v28 = vld [vmem:[%s1916_s1 + $0x448] sm:$0xff]  ;;  %v1182_v33 = vld [vmem:[%s1916_s1 + $0x438] sm:$0xff] }
  0x47   : > { %733 = vmatpush.msrb.mxu2 %v1152_v35  ;;  %822 = vmatpush.msrb.mxu3 %v1169_v48  ;;  %v1180_v35 = vld [vmem:[%s1916_s1 + $0x428] sm:$0xff]  ;;  %v882_v48 = vld [vmem:[%s1393_s11 + $0x14] sm:$0xff] }
  0x48   : > { %291 = vmatpush.msrb.mxu1 %v1064_v32  ;;  %560 = vmatpush.msrb.mxu0 %v1113_v37  ;;  %v438_v32 = vld [vmem:[%s1393_s11 + $0x39] sm:$0xff]  ;;  %v439_v37 = vld [vmem:[%s1393_s11 + $0x41] sm:$0x7f] }
  0x49   : > { %392 = vmatmul.f32.gmra.mxu2 %v1596_v43  ;;  %823 = vmatpush.msrb.mxu3 %v1168_v51  ;;  %v617_v51 = vld [vmem:[%s1393_s11 + $0x33] sm:$0xff] }
  0x4a   : > { %292 = vmatpush.msrb.mxu1 %v1063_v36  ;;  %561 = vmatpush.msrb.mxu0 %v1112_v41  ;;  %v1179_v36 = vld [vmem:[%s1916_s1 + $0x420] sm:$0xff]  ;;  %v613_v41 = vld [vmem:[%s1393_s11 + $0x13] sm:$0xff] }
  0x4b   : > { %293 = vmatmul.f32.vlgmr.msrb.gmra.mxu1 %v252_v38  ;;  %734 = vmatpush.msrb.mxu2 %v1151_v46  ;;  %v1178_v38 = vld [vmem:[%s1916_s1 + $0x418] sm:$0xff]  ;;  %v529_v46 = vld [vmem:[%s1393_s11 + $0x42] sm:$0x7f] }
  0x4c   : > { %637 = vmatpush.msra.mxu1 %v1142_v40  ;;  %562 = vmatpush.msrb.mxu0 %v1111_v45  ;;  %v1176_v40 = vld [vmem:[%s1916_s1 + $0x408] sm:$0xff]  ;;  %v614_v45 = vld [vmem:[%s1393_s11 + $0x1b] sm:$0xff] }
  0x4d   : > { %563 = vmatmul.f32.vlgmr.msrb.gmra.mxu0 %v1502_v11  ;;  %735 = vmatpush.msrb.mxu2 %v1150_v49  ;;  %v1144_v11 = vld [vmem:[%s1916_s1 + $0x308] sm:$0xff] }
  0x4e   : > { %638 = vmatpush.msra.mxu1 %v1141_v44  ;;  %824 = vmatpush.msrb.mxu3 %v1167_v57  ;;  %v259_v44 = vld [vmem:[%s1393_s11 + $0x39] sm:$0x7f]  ;;  %v616_v49 = vld [vmem:[%s1393_s11 + $0x2b] sm:$0xff] }
  0x4f   : > { %736 = vmatpush.msrb.mxu2 %v1149_v52  ;;  %482 = vmatmul.f32.gmra.mxu3 %v1632_v54  ;;  %v884_v52 = vld [vmem:[%s1393_s11 + $0x24] sm:$0xff] }
  0x50   : > { %639 = vmatpush.msra.mxu1 %v1140_v47  ;;  %825 = vmatpush.msrb.mxu3 %v1166_v59  ;;  %v615_v47 = vld [vmem:[%s1393_s11 + $0x23] sm:$0xff] }
  0x51   : > { %395 = vmatmul.f32.gmra.mxu2 %v1635_v55  ;;  %907 = vmatpush.msra.mxu0 %v1658_v61  ;;  %v798_v59 = vld [vmem:[%s1393_s11 + $0x43] sm:$0xff] }
  0x52   : > { %640 = vmatpush.msra.mxu1 %v1139_v50  ;;  %737 = vmatpush.msrb.mxu2 %v1148_v58  ;;  %v883_v50 = vld [vmem:[%s1393_s11 + $0x1c] sm:$0xff]  ;;  %v709_v58 = vld [vmem:[%s1393_s11 + $0x4a] sm:$0x7f] }
  0x53   : > { %296 = vmatmul.f32.gmra.mxu1 %v1499_v10  ;;  %908 = vmatpush.msra.mxu0 %v1670_v0  ;;  %v1188_v10 = vld [vmem:[%s1916_s1 + $0x468] sm:$0xff] }
  0x54   : > { %641 = vmatpush.msra.mxu1 %v1138_v53  ;;  %738 = vmatpush.msrb.mxu2 %v1147_v62  ;;  %v618_v53 = vld [vmem:[%s1393_s11 + $0x3b] sm:$0xff] }
  0x55   : > { %566 = vmatmul.f32.gmra.mxu0 %v1548_v27  ;;  %826 = vmatpush.msrb.mxu3 %v1165_v6 }
  0x56   : > { %642 = vmatpush.msra.mxu1 %v1137_v56  ;;  %739 = vmatpush.msrb.mxu2 %v1146_v1  ;;  %v887_v1 = vld [vmem:[%s1393_s11 + $0x3c] sm:$0xff] }
  0x57   : > { %485 = vmatmul.f32.gmra.mxu3 %v1680_v3  ;;  %909 = vmatpush.msra.mxu0 %v1188_v10 }
  0x58   : > { %643 = vmatpush.msra.mxu1 %v1136_v60  ;;  %827 = vmatpush.msrb.mxu3 %v1164_v7  ;;  %v886_v60 = vld [vmem:[%s1393_s11 + $0x34] sm:$0xff]  ;;  %v619_v7 = vld [vmem:[%s1393_s11 + $0x43] sm:$0x7f] }
  0x59   : > { %398 = vmatmul.f32.gmra.mxu2 %v1683_v4  ;;  %910 = vmatpush.msra.mxu0 %v1187_v14 }
  0x5a   : > { %644 = vmatpush.msra.mxu1 %v1135_v63  ;;  %740 = vmatpush.msrb.mxu2 %v1145_v8  ;;  %v799_v63 = vld [vmem:[%s1393_s11 + $0x4b] sm:$0x7f] }
  0x5b   : > { %299 = vmatmul.f32.gmra.mxu1 %v1545_v26  ;;  %828 = vmatpush.msrb.mxu3 %v1163_v13  ;;  %v1127_v26 = vld [vmem:[%s1916_s1 + $0x280] sm:$0xff] }
  0x5c   : > { %645 = vmatpush.msra.mxu1 %v1134_v2  ;;  %741 = vmatpush.msrb.mxu2 %v1144_v11 }
  0x5d   : > { %569 = vmatmul.f32.gmra.mxu0 %v1596_v43  ;;  %829 = vmatpush.msrb.mxu3 %v1162_v16 }
  0x5e   : > { %646 = vmatpush.msra.mxu1 %v1133_v5  ;;  %911 = vmatpush.msra.mxu0 %v1186_v17  ;;  %v889_v5 = vld [vmem:[%s1393_s11 + $0x4c] sm:$0x7f] }
  0x5f   : > { %488 = vmatmul.f32.gmra.mxu3 %v1730_v18  ;;  %742 = vmatpush.msrb.mxu2 %v1143_v21 }
  0x60   : > { %647 = vmatpush.msra.mxu1 %v1132_v9  ;;  %830 = vmatpush.msrb.mxu3 %v1161_v22 }
  0x61   : > { %401 = vmatmul.f32.gmra.mxu2 %v1733_v19  ;;  %912 = vmatpush.msra.mxu0 %v1185_v24 }
  0x62   : > { %648 = vmatpush.msra.mxu1 %v1131_v12  ;;  %831 = vmatpush.msrb.mxu3 %v1160_v25 }
  0x63   : > { %302 = vmatmul.f32.gmra.mxu1 %v1593_v42  ;;  %1210 = vmatpush.msra.mxu2 %v1658_v61  ;;  %v528_v42 = vld [vmem:[%s1393_s11 + $0x3a] sm:$0xff] }
  0x64   : > { %649 = vmatpush.msra.mxu1 %v1130_v15  ;;  %913 = vmatpush.msra.mxu0 %v1184_v28 }
  0x65   : > { %572 = vmatmul.f32.gmra.mxu0 %v1635_v55  ;;  %832 = vmatpush.msrb.mxu3 %v1159_v29 }
  0x66   : > { %650 = vmatpush.msra.mxu1 %v1129_v20  ;;  %914 = vmatpush.msra.mxu0 %v1183_v30 }
  0x67   : > { %1211 = vmatpush.msra.mxu2 %v1670_v0  ;;  %491 = vmatmul.f32.gmra.mxu3 %v438_v32  ;;  %v888_v0 = vld [vmem:[%s1393_s11 + $0x44] sm:$0xff] }
  0x68   : > { %651 = vmatpush.msra.mxu1 %v1128_v23  ;;  %915 = vmatpush.msra.mxu0 %v1182_v33 }
  0x69   : > { %404 = vmatmul.f32.gmra.mxu2 %v349_v31 }
  0x6a   : > { %652 = vmatpush.msra.mxu1 %v1127_v26  ;;  %1212 = vmatpush.msra.mxu2 %v1188_v10 }
  0x6b   : > { %305 = vmatmul.f32.gmra.mxu1 %v1632_v54  ;;  %916 = vmatpush.msra.mxu0 %v1181_v34  ;;  %v708_v54 = vld [vmem:[%s1393_s11 + $0x42] sm:$0xff] }
  0x6c   : > { %1213 = vmatpush.msra.mxu2 %v1187_v14 }
  0x6d   : > { %575 = vmatmul.f32.gmra.mxu0 %v1683_v4 }
  0x6e   : > { %917 = vmatpush.msra.mxu0 %v1180_v35  ;;  %1214 = vmatpush.msra.mxu2 %v1186_v17 }
  0x6f   : > { %494 = vmatmul.f32.gmra.mxu3 %v439_v37 }
  0x70   : > { %918 = vmatpush.msra.mxu0 %v1179_v36  ;;  %1215 = vmatpush.msra.mxu2 %v1185_v24 }
  0x71   : > { %743 = vmatmul.f32.vlgmr.msrb.gmra.mxu2 %v1548_v27  ;;  %v1175_v27 = vld [vmem:[%s1916_s1 + $0x400] sm:$0xff] }
  0x72   : > { %919 = vmatpush.msra.mxu0 %v1178_v38  ;;  %1216 = vmatpush.msra.mxu2 %v1184_v28 }
  0x73   : > { %308 = vmatmul.f32.gmra.mxu1 %v1680_v3 }
  0x74   : > { %920 = vmatpush.msra.mxu0 %v1177_v39  ;;  %1217 = vmatpush.msra.mxu2 %v1183_v30 }
  0x75   : > { %578 = vmatmul.f32.gmra.mxu0 %v1733_v19 }
  0x76   : > { %921 = vmatpush.msra.mxu0 %v1176_v40  ;;  %1218 = vmatpush.msra.mxu2 %v1182_v33 }
  0x77   : > { %833 = vmatmul.f32.vlgmr.msrb.gmra.mxu3 %v613_v41 }
  0x78   : > { %922 = vmatpush.msra.mxu0 %v1175_v27  ;;  %1219 = vmatpush.msra.mxu2 %v1181_v34 }
  0x79   : > { %746 = vmatmul.f32.gmra.mxu2 %v1596_v43  ;;  %v612_v43 = vld [vmem:[%s1393_s11 + $0xb] sm:$0xff] }
  0x7a   : > { %1220 = vmatpush.msra.mxu2 %v1180_v35 }
  0x7b   : > { %311 = vmatmul.f32.gmra.mxu1 %v1730_v18 }
  0x7c   : > { %1221 = vmatpush.msra.mxu2 %v1179_v36 }
  0x7d   : > { %581 = vmatmul.f32.gmra.mxu0 %v528_v42 }
  0x7e   : > { %1222 = vmatpush.msra.mxu2 %v1178_v38 }
  0x7f   : > { %836 = vmatmul.f32.gmra.mxu3 %v614_v45 }
  0x80   : > { %1223 = vmatpush.msra.mxu2 %v1177_v39 }
  0x81   : > { %749 = vmatmul.f32.gmra.mxu2 %v1635_v55  ;;  %v885_v55 = vld [vmem:[%s1393_s11 + $0x2c] sm:$0xff] }
  0x82   : > { %1224 = vmatpush.msra.mxu2 %v1176_v40 }
  0x83   : > { %314 = vmatmul.f32.gmra.mxu1 %v259_v44 }
  0x84   : > { %1225 = vmatpush.msra.mxu2 %v1175_v27 }
  0x85   : > { %584 = vmatmul.f32.gmra.mxu0 %v529_v46 }
  0x87   : > { %839 = vmatmul.f32.gmra.mxu3 %v615_v47 }
  0x89   : > { %752 = vmatmul.f32.gmra.mxu2 %v1683_v4 }
  0x8b   : > { %653 = vmatmul.f32.vlgmr.msra.gmra.mxu1 %v612_v43 }
  0x8d   : > { %923 = vmatmul.f32.vlgmr.msra.gmra.mxu0 %v882_v48 }
  0x8f   : > { %842 = vmatmul.f32.gmra.mxu3 %v616_v49 }
  0x91   : > { %755 = vmatmul.f32.gmra.mxu2 %v1733_v19 }
  0x93   : > { %656 = vmatmul.f32.gmra.mxu1 %v613_v41 }
  0x95   : > { %926 = vmatmul.f32.gmra.mxu0 %v883_v50 }
  0x97   : > { %845 = vmatmul.f32.gmra.mxu3 %v617_v51 }
  0x99   : > { %758 = vmatmul.f32.gmra.mxu2 %v528_v42 }
  0x9b   : > { %659 = vmatmul.f32.gmra.mxu1 %v614_v45 }
  0x9d   : > { %929 = vmatmul.f32.gmra.mxu0 %v884_v52 }
  0x9f   : > { %848 = vmatmul.f32.gmra.mxu3 %v618_v53 }
  0xa1   : > { %761 = vmatmul.f32.gmra.mxu2 %v708_v54 }
  0xa3   : > { %662 = vmatmul.f32.gmra.mxu1 %v615_v47 }
  0xa5   : > { %932 = vmatmul.f32.gmra.mxu0 %v885_v55 }
  0xa7   : > { %851 = vmatmul.f32.gmra.mxu3 %v798_v59 }
  0xa8   : > { %v224_v56 = vpop.f32.mrf.mxu1  ;;  %v212_v57 = vpop.f32.mrf.mxu0 }
  0xa9   : > { %764 = vmatmul.f32.gmra.mxu2 %v709_v58 }
  0xab   : > { %665 = vmatmul.f32.gmra.mxu1 %v616_v49 }
  0xad   : > { %935 = vmatmul.f32.gmra.mxu0 %v886_v60 }
  0xaf   : > { %854 = vmatmul.f32.gmra.mxu3 %v799_v63 }
  0xb0   : > { %v227_v61 = vpop.f32.mrf.mxu1  ;;  %v215_v62 = vpop.f32.mrf.mxu0 }
  0xb1   : > { %941 = vmatmul.f32.vlgmr.msra.gmra.mxu2 %v888_v0 }
  0xb3   : > { %668 = vmatmul.f32.gmra.mxu1 %v617_v51 }
  0xb4   : > { %v384_v2 = vpop.f32.mrf.mxu2  ;;  %v474_v9 = vpop.f32.mrf.mxu3 }
  0xb5   : > { %938 = vmatmul.f32.gmra.mxu0 %v887_v1 }
  0xb8   : > { %v230_v3 = vpop.f32.mrf.mxu1  ;;  %v218_v4 = vpop.f32.mrf.mxu0 }
  0xb9   : > { %944 = vmatmul.f32.gmra.mxu2 %v889_v5 }
  0xbb   : > { %671 = vmatmul.f32.gmra.mxu1 %v618_v53 }
  0xbc   : > { %v387_v8 = vpop.f32.mrf.mxu2  ;;  %v477_v14 = vpop.f32.mrf.mxu3 }
  0xc0   : > { %v233_v6 = vpop.f32.mrf.mxu1  ;;  %v221_v10 = vpop.f32.mrf.mxu0 }
  0xc1   : > { %243 = vst [vmem:[%s1834_s19 + $0x38] sm:$0x7f] %v233_v6 }
  0xc3   : > { %674 = vmatmul.f32.gmra.mxu1 %v619_v7  ;;  %v1869_v7 = vld [vmem:[%s1917_s2] ss:$0 sm:$0xff] }
  0xc4   : > { %v390_v13 = vpop.f32.mrf.mxu2 }
  0xc8   : > { %v294_v11 = vpop.f32.mrf.mxu1  ;;  %v480_v20 = vpop.f32.mrf.mxu3  ;;  %v251_v53 = vld [vmem:[%s1834_s19 + $0x38] sm:$0x7f] }
  0xc9   : > { %v318_v12 = vadd.f32 %v294_v11, %v212_v57 }
  0xca   : > { %v564_v16 = vpop.f32.mrf.mxu0 }
  0xcb   : > { %v408_v15 = vadd.f32 %v384_v2, %v318_v12 }
  0xcc   : > { %v393_v19 = vpop.f32.mrf.mxu2 }
  0xcd   : > { %v498_v58 = vadd.f32 %v474_v9, %v408_v15 }
  0xcf   : > { %v588_v60 = vadd.f32 %v564_v16, %v498_v58 }
  0xd0   : > { %v297_v17 = vpop.f32.mrf.mxu1 }
  0xd1   : > { %v319_v18 = vadd.f32 %v297_v17, %v215_v62 }
  0xd2   : > { %v567_v22 = vpop.f32.mrf.mxu0  ;;  %v1838_v26 = vpop.f32.mrf.mxu3 }
  0xd3   : > { %v409_v21 = vadd.f32 %v387_v8, %v319_v18 }
  0xd4   : > { %v396_v25 = vpop.f32.mrf.mxu2 }
  0xd5   : > { %v499_v2 = vadd.f32 %v477_v14, %v409_v21 }
  0xd7   : > { %v589_v8 = vadd.f32 %v567_v22, %v499_v2 }
  0xd8   : > { %v300_v23 = vpop.f32.mrf.mxu1 }
  0xd9   : > { %v320_v24 = vadd.f32 %v300_v23, %v218_v4 }
  0xda   : > { %v570_v29 = vpop.f32.mrf.mxu0  ;;  %v1840_v33 = vpop.f32.mrf.mxu3 }
  0xdb   : > { %v410_v28 = vadd.f32 %v390_v13, %v320_v24 }
  0xdc   : > { %v399_v32 = vpop.f32.mrf.mxu2 }
  0xdd   : > { %v500_v15 = vadd.f32 %v480_v20, %v410_v28 }
  0xdf   : > { %v590_v24 = vadd.f32 %v570_v29, %v500_v15 }
  0xe0   : > { %v303_v30 = vpop.f32.mrf.mxu1 }
  0xe1   : > { %v321_v31 = vadd.f32 %v303_v30, %v221_v10 }
  0xe2   : > { %v1844_v35 = vpop.f32.mrf.mxu0  ;;  %v1846_v39 = vpop.f32.mrf.mxu3 }
  0xe3   : > { %v1842_v34 = vadd.f32 %v393_v19, %v321_v31 }
  0xe4   : > { %v402_v38 = vpop.f32.mrf.mxu2 }
  0xe5   : > { %v501_v20 = vadd.f32 %v1838_v26, %v1842_v34 }
  0xe7   : > { %v591_v29 = vadd.f32 %v1844_v35, %v501_v20 }
  0xe8   : > { %v306_v36 = vpop.f32.mrf.mxu1 }
  0xe9   : > { %v322_v37 = vadd.f32 %v306_v36, %v224_v56 }
  0xea   : > { %v1850_v27 = vpop.f32.mrf.mxu0  ;;  %v1852_v45 = vpop.f32.mrf.mxu3 }
  0xeb   : > { %v1848_v40 = vadd.f32 %v396_v25, %v322_v37 }
  0xec   : > { %v405_v44 = vpop.f32.mrf.mxu2 }
  0xed   : > { %v502_v26 = vadd.f32 %v1840_v33, %v1848_v40 }
  0xef   : > { %v592_v35 = vadd.f32 %v1850_v27, %v502_v26 }
  0xf0   : > { %v309_v41 = vpop.f32.mrf.mxu1 }
  0xf1   : > { %v323_v42 = vadd.f32 %v309_v41, %v227_v61 }
  0xf2   : > { %v1856_v43 = vpop.f32.mrf.mxu0  ;;  %v495_v50 = vpop.f32.mrf.mxu3 }
  0xf3   : > { %v1854_v46 = vadd.f32 %v399_v32, %v323_v42 }
  0xf4   : > { %v744_v49 = vpop.f32.mrf.mxu2 }
  0xf8   : > { %v312_v47 = vpop.f32.mrf.mxu1 }
  0xf9   : > { %v324_v48 = vadd.f32 %v312_v47, %v230_v3 }
  0xfa   : > { %v1860_v52 = vpop.f32.mrf.mxu0  ;;  %v834_v57 = vpop.f32.mrf.mxu3 }
  0xfb   : > { %v1858_v51 = vadd.f32 %v402_v38, %v324_v48 }
  0xfc   : > { %v747_v56 = vpop.f32.mrf.mxu2 }
 0x100   : > { %v315_v54 = vpop.f32.mrf.mxu1 }
 0x101   : > { %v325_v55 = vadd.f32 %v315_v54, %v251_v53 }
 0x102   : > { %v585_v59 = vpop.f32.mrf.mxu0  ;;  %v837_v0 = vpop.f32.mrf.mxu3 }
 0x103   : > { %333 = vst [vmem:[%s1834_s19 + $0x38] sm:$0x7f] %v325_v55 }
 0x104   : > { %v750_v63 = vpop.f32.mrf.mxu2 }
 0x108   : > { %v654_v61 = vpop.f32.mrf.mxu1 }
 0x109   : > { %v678_v62 = vadd.f32 %v654_v61, %v588_v60 }
 0x10a   : > { %v341_v1 = vld [vmem:[%s1834_s19 + $0x38] sm:$0x7f]  ;;  %v924_v5 = vpop.f32.mrf.mxu0  ;;  %v840_v14 = vpop.f32.mrf.mxu3 }
 0x10b   : > { %v415_v3 = vadd.f32 %v405_v44, %v341_v1  ;;  %v768_v4 = vadd.f32 %v744_v49, %v678_v62 }
 0x10c   : > { %v753_v13 = vpop.f32.mrf.mxu2 }
 0x10d   : > { %423 = vst [vmem:[%s1834_s19 + $0x38] sm:$0x7f] %v415_v3  ;;  %v858_v6 = vadd.f32 %v834_v57, %v768_v4 }
 0x10f   : > { %v948_v9 = vadd.f32 %v924_v5, %v858_v6 }
 0x110   : > { %v657_v10 = vpop.f32.mrf.mxu1 }
 0x111   : > { %v679_v11 = vadd.f32 %v657_v10, %v589_v8  ;;  %v976_v12 = vadd.f32 %v1869_v7, %v948_v9  ;;  %v504_v9 = vadd.f32 %v1852_v45, %v1858_v51 }
 0x112   : > { %v927_v19 = vpop.f32.mrf.mxu0  ;;  %v843_v37 = vpop.f32.mrf.mxu3 }
 0x113   : > { %v769_v16 = vadd.f32 %v747_v56, %v679_v11  ;;  %v984_v17 = vmax.f32 %v976_v12, 0.0  ;;  %v594_v12 = vadd.f32 %v1860_v52, %v504_v9 }
 0x114   : > { %v431_v18 = vld [vmem:[%s1834_s19 + $0x38] sm:$0x7f]  ;;  %v756_v32 = vpop.f32.mrf.mxu2 }
 0x115   : > { %v505_v21 = vadd.f32 %v495_v50, %v431_v18  ;;  %v859_v23 = vadd.f32 %v837_v0, %v769_v16  ;;  %992 = vst [vmem:[%s1834_s19] sm:$0xff] %v984_v17 }
 0x117   : > { %513 = vst [vmem:[%s1834_s19 + $0x38] sm:$0x7f] %v505_v21  ;;  %v949_v22 = vadd.f32 %v927_v19, %v859_v23 }
 0x118   : > { %v660_v25 = vpop.f32.mrf.mxu1 }
 0x119   : > { %v680_v30 = vadd.f32 %v660_v25, %v590_v24  ;;  %v977_v31 = vadd.f32 %v1869_v7, %v949_v22 }
 0x11a   : > { %v930_v38 = vpop.f32.mrf.mxu0  ;;  %v846_v57 = vpop.f32.mrf.mxu3 }
 0x11b   : > { %v770_v28 = vadd.f32 %v750_v63, %v680_v30  ;;  %v985_v36 = vmax.f32 %v977_v31, 0.0  ;;  %v503_v63 = vadd.f32 %v1846_v39, %v1854_v46 }
 0x11c   : > { %v759_v53 = vpop.f32.mrf.mxu2 }
 0x11d   : > { %v860_v41 = vadd.f32 %v840_v14, %v770_v28  ;;  %993 = vst [vmem:[%s1834_s19 + $0x8] sm:$0xff] %v985_v36  ;;  %v593_v2 = vadd.f32 %v1856_v43, %v503_v63 }
 0x11e   : > { %v521_v42 = vld [vmem:[%s1834_s19 + $0x38] sm:$0x7f] }
 0x11f   : > { %v595_v44 = vadd.f32 %v585_v59, %v521_v42  ;;  %v950_v47 = vadd.f32 %v930_v38, %v860_v41 }
 0x120   : > { %v663_v48 = vpop.f32.mrf.mxu1 }
 0x121   : > { %603 = vst [vmem:[%s1834_s19 + $0x38] sm:$0x7f] %v595_v44  ;;  %v681_v49 = vadd.f32 %v663_v48, %v591_v29  ;;  %v978_v50 = vadd.f32 %v1869_v7, %v950_v47 }
 0x122   : > { %v933_v55 = vpop.f32.mrf.mxu0  ;;  %v849_v27 = vpop.f32.mrf.mxu3 }
 0x123   : > { %v771_v34 = vadd.f32 %v753_v13, %v681_v49  ;;  %v986_v54 = vmax.f32 %v978_v50, 0.0 }
 0x124   : > { %v762_v62 = vpop.f32.mrf.mxu2 }
 0x125   : > { %v861_v56 = vadd.f32 %v843_v37, %v771_v34  ;;  %994 = vst [vmem:[%s1834_s19 + $0x10] sm:$0xff] %v986_v54 }
 0x127   : > { %v951_v58 = vadd.f32 %v933_v55, %v861_v56 }
 0x128   : > { %v666_v59 = vpop.f32.mrf.mxu1  ;;  %v611_v52 = vld [vmem:[%s1834_s19 + $0x38] sm:$0x7f] }
 0x129   : > { %v682_v60 = vadd.f32 %v666_v59, %v592_v35  ;;  %v979_v61 = vadd.f32 %v1869_v7, %v951_v58 }
 0x12a   : > { %v936_v40 = vpop.f32.mrf.mxu0  ;;  %v852_v16 = vpop.f32.mrf.mxu3 }
 0x12b   : > { %v772_v0 = vadd.f32 %v756_v32, %v682_v60  ;;  %v987_v33 = vmax.f32 %v979_v61, 0.0 }
 0x12c   : > { %v765_v8 = vpop.f32.mrf.mxu2 }
 0x12d   : > { %v862_v1 = vadd.f32 %v846_v57, %v772_v0  ;;  %995 = vst [vmem:[%s1834_s19 + $0x18] sm:$0xff] %v987_v33 }
 0x12f   : > { %v952_v3 = vadd.f32 %v936_v40, %v862_v1 }
 0x130   : > { %v669_v4 = vpop.f32.mrf.mxu1 }
 0x131   : > { %v683_v5 = vadd.f32 %v669_v4, %v593_v2  ;;  %v980_v6 = vadd.f32 %v1869_v7, %v952_v3 }
 0x132   : > { %v939_v10 = vpop.f32.mrf.mxu0  ;;  %v855_v31 = vpop.f32.mrf.mxu3 }
 0x133   : > { %v773_v39 = vadd.f32 %v759_v53, %v683_v5  ;;  %v988_v46 = vmax.f32 %v980_v6, 0.0 }
 0x134   : > { %v942_v17 = vpop.f32.mrf.mxu2 }
 0x135   : > { %v863_v11 = vadd.f32 %v849_v27, %v773_v39  ;;  %996 = vst [vmem:[%s1834_s19 + $0x20] sm:$0xff] %v988_v46 }
 0x137   : > { %v953_v43 = vadd.f32 %v939_v10, %v863_v11 }
 0x138   : > { %v672_v13 = vpop.f32.mrf.mxu1 }
 0x139   : > { %v684_v14 = vadd.f32 %v672_v13, %v594_v12  ;;  %v981_v15 = vadd.f32 %v1869_v7, %v953_v43 }
 0x13b   : > { %v774_v45 = vadd.f32 %v762_v62, %v684_v14  ;;  %v989_v51 = vmax.f32 %v981_v15, 0.0 }
 0x13c   : > { %v945_v28 = vpop.f32.mrf.mxu2 }
 0x13d   : > { %v864_v18 = vadd.f32 %v852_v16, %v774_v45  ;;  %997 = vst [vmem:[%s1834_s19 + $0x28] sm:$0xff] %v989_v51 }
 0x13f   : > { %v954_v19 = vadd.f32 %v942_v17, %v864_v18 }
 0x140   : > { %v675_v21 = vpop.f32.mrf.mxu1 }
 0x141   : > { %v685_v23 = vadd.f32 %v675_v21, %v611_v52  ;;  %v982_v24 = vadd.f32 %v1869_v7, %v954_v19 }
 0x143   : > { %693 = vst [vmem:[%s1834_s19 + $0x38] sm:$0x7f] %v685_v23  ;;  %v990_v22 = vmax.f32 %v982_v24, 0.0 }
 0x145   : > { %998 = vst [vmem:[%s1834_s19 + $0x30] sm:$0xff] %v990_v22 }
 0x14a   : > { %v701_v25 = vld [vmem:[%s1834_s19 + $0x38] sm:$0x7f] }
 0x14b   : > { %v775_v30 = vadd.f32 %v765_v8, %v701_v25 }
 0x14d   : > { %783 = vst [vmem:[%s1834_s19 + $0x38] sm:$0x7f] %v775_v30 }
 0x154   : > { %v791_v32 = vld [vmem:[%s1834_s19 + $0x38] sm:$0x7f] }
 0x155   : > { %v865_v20 = vadd.f32 %v855_v31, %v791_v32 }
 0x157   : > { %873 = vst [vmem:[%s1834_s19 + $0x38] sm:$0x7f] %v865_v20 }
 0x15e   : > { %v881_v36 = vld [vmem:[%s1834_s19 + $0x38] sm:$0x7f] }
 0x15f   : > { %v955_v37 = vadd.f32 %v945_v28, %v881_v36 }
 0x161   : > { %963 = vst [vmem:[%s1834_s19 + $0x38] sm:$0x7f] %v955_v37 }
 0x168   : > { %v971_v38 = vld [vmem:[%s1834_s19 + $0x38] sm:$0x7f] }
 0x169   : > { %v983_v41 = vadd.f32 %v1869_v7, %v971_v38 }
 0x16b   : > { %v991_v42 = vmax.f32 %v983_v41, 0.0 }
 0x16d   : > { %999 = vst [vmem:[%s1834_s19 + $0x38] sm:$0x7f] %v991_v42 }
 0x16e PF: > { %s13_s12 = sadd.s32 1, %s1242_s12  }
 0x16f   : > { %p10_p4 = scmp.ge.s32.totalorder %s13_s12, 4  }
 0x171   :  { %12 = sbr.rel (!%p10_p4) target bundleno = 1 (0x1), region = 70 }

// kernel: network_forward.12
= control target key start
LH: loop header
LB: loop body
LE: loop exit
PB: predicated region body
PF: predicated region fallthrough
CT: control target
= control target key end

     0   :  { %s2579_s12 = smov 0   ;;  %s3484_s0 = inlined_call_operand.vmem [shape: f32[2,258,128], index: 0, kind: input, shape index: {}]   ;;  %s3485_s1 = inlined_call_operand.vmem [shape: f32[9,128,128], index: 1, kind: input, shape index: {}]   ;;  %s3486_s2 = inlined_call_operand.vmem [shape: f32[1,128], index: 2, kind: input, shape index: {}]   ;;  %s3487_s3 = inlined_call_operand.vmem [shape: f32[2,224,128], index: 3, kind: output, shape index: {}]  }
   0x1 LB: > { %s2355_s13 = sadd.s32 4294967295, %s2557_s12   ;;  %p2359_p0 = scmp.ge.s32.totalorder %s2557_s12, 1  ;;  %s2557_s12 = sphi %s2579_s12, %s13_s12  }
   0x2   : > { %p137_p1 = scmp.lt.s32.totalorder %s2557_s12, 3 }
   0x4   : > { %p138_p2 = pnand %p2359_p0, %p137_p1 }
   0x5   : > { %p161_p3 = scmp.lt.s32.totalorder (!%p138_p2), %s2355_s13, 1 }
   0x6   : > { %141 = sbr.rel (%p138_p2) target bundleno = 685 (0x2ad), region = 32 }
   0xb   : > { %v214_v0 = vld [vmem:[%s3485_s1 + $0x78] sm:$0xff]  ;;  %v213_v1 = vld [vmem:[%s3485_s1 + $0x70] sm:$0xff]  ;;  %v212_v2 = vld [vmem:[%s3485_s1 + $0x68] sm:$0xff]  ;;  %s3489_s13 = smov (!%p161_p3, %s2355_s13), 1 }
   0xc   : > { %2492 = vmatpush.msra.mxu1 %v214_v0  ;;  %2493 = vmatpush.msra.mxu2 %v214_v0  ;;  %v211_v3 = vld [vmem:[%s3485_s1 + $0x60] sm:$0xff]  ;;  %v210_v4 = vld [vmem:[%s3485_s1 + $0x58] sm:$0xff]  ;;  %v209_v5 = vld [vmem:[%s3485_s1 + $0x50] sm:$0xff]  ;;  %s2540_s15 = smul.u32 264, %s3489_s13 }
   0xd   : > { %2494 = vmatpush.msra.mxu3 %v214_v0  ;;  %215 = vmatpush.msra.mxu0 %v214_v0  ;;  %v208_v6 = vld [vmem:[%s3485_s1 + $0x48] sm:$0xff]  ;;  %v207_v7 = vld [vmem:[%s3485_s1 + $0x40] sm:$0xff]  ;;  %v206_v8 = vld [vmem:[%s3485_s1 + $0x38] sm:$0xff]  ;;  %s2541_s18 = smul.u32 224, %s3489_s13 }
   0xe   : > { %2495 = vmatpush.msra.mxu1 %v213_v1  ;;  %2496 = vmatpush.msra.mxu2 %v213_v1  ;;  %v205_v9 = vld [vmem:[%s3485_s1 + $0x30] sm:$0xff]  ;;  %v204_v10 = vld [vmem:[%s3485_s1 + $0x28] sm:$0xff]  ;;  %v203_v11 = vld [vmem:[%s3485_s1 + $0x20] sm:$0xff]  ;;  %s2642_s22 = scalar_lea.vmem %s3484_s0, %s2540_s15 }
   0xf   : > { %2497 = vmatpush.msra.mxu3 %v213_v1  ;;  %216 = vmatpush.msra.mxu0 %v213_v1  ;;  %v202_v12 = vld [vmem:[%s3485_s1 + $0x18] sm:$0xff]  ;;  %v201_v13 = vld [vmem:[%s3485_s1 + $0x10] sm:$0xff]  ;;  %v200_v14 = vld [vmem:[%s3485_s1 + $0x8] sm:$0xff]  ;;  %s3048_s21 = scalar_lea.vmem %s3487_s3, %s2541_s18 }
  0x10   : > { %2498 = vmatpush.msra.mxu1 %v212_v2  ;;  %2499 = vmatpush.msra.mxu2 %v212_v2  ;;  %v199_v15 = vld [vmem:[%s3485_s1] sm:$0xff]  ;;  %v2648_v16 = vld [vmem:[%s2642_s22 + $0x38] sm:$0xff]  ;;  %v2651_v17 = vld [vmem:[%s2642_s22 + $0x70] sm:$0xff] }
  0x11   : > { %2500 = vmatpush.msra.mxu3 %v212_v2  ;;  %217 = vmatpush.msra.mxu0 %v212_v2  ;;  %v2377_v18 = vld [vmem:[%s3485_s1 + $0xf8] sm:$0xff]  ;;  %v2376_v20 = vld [vmem:[%s3485_s1 + $0xf0] sm:$0xff]  ;;  %v192_v22 = vld [vmem:[%s2642_s22 + $0xa8] sm:$0xff] }
  0x12   : > { %2501 = vmatpush.msra.mxu1 %v211_v3  ;;  %2502 = vmatpush.msra.mxu2 %v211_v3  ;;  %v2393_v19 = vld [vmem:[%s3485_s1 + $0x178] sm:$0xff]  ;;  %v2392_v21 = vld [vmem:[%s3485_s1 + $0x170] sm:$0xff]  ;;  %v171_v23 = vld [vmem:[%s2642_s22] sm:$0xff] }
  0x13   : > { %2503 = vmatpush.msra.mxu3 %v211_v3  ;;  %218 = vmatpush.msra.mxu0 %v211_v3  ;;  %v2375_v24 = vld [vmem:[%s3485_s1 + $0xe8] sm:$0xff]  ;;  %v2409_v26 = vld [vmem:[%s3485_s1 + $0x1f8] sm:$0xff]  ;;  %v2374_v28 = vld [vmem:[%s3485_s1 + $0xe0] sm:$0xff] }
  0x14   : > { %2504 = vmatpush.msra.mxu1 %v210_v4  ;;  %2505 = vmatpush.msra.mxu2 %v210_v4  ;;  %v2391_v25 = vld [vmem:[%s3485_s1 + $0x168] sm:$0xff]  ;;  %v2425_v27 = vld [vmem:[%s3485_s1 + $0x278] sm:$0xff]  ;;  %v2390_v29 = vld [vmem:[%s3485_s1 + $0x160] sm:$0xff] }
  0x15   : > { %2506 = vmatpush.msra.mxu3 %v210_v4  ;;  %219 = vmatpush.msra.mxu0 %v210_v4  ;;  %v2688_v30 = vld [vmem:[%s2642_s22 + $0x40] sm:$0xff]  ;;  %v2691_v31 = vld [vmem:[%s2642_s22 + $0x78] sm:$0xff]  ;;  %v2408_v34 = vld [vmem:[%s3485_s1 + $0x1f0] sm:$0xff] }
  0x16   : > { %2507 = vmatpush.msra.mxu1 %v209_v5  ;;  %2508 = vmatpush.msra.mxu2 %v209_v5  ;;  %v2373_v32 = vld [vmem:[%s3485_s1 + $0xd8] sm:$0xff]  ;;  %v2424_v35 = vld [vmem:[%s3485_s1 + $0x270] sm:$0xff]  ;;  %v2407_v38 = vld [vmem:[%s3485_s1 + $0x1e8] sm:$0xff] }
  0x17   : > { %2509 = vmatpush.msra.mxu3 %v209_v5  ;;  %220 = vmatpush.msra.mxu0 %v209_v5  ;;  %v2389_v33 = vld [vmem:[%s3485_s1 + $0x158] sm:$0xff]  ;;  %v2372_v36 = vld [vmem:[%s3485_s1 + $0xd0] sm:$0xff]  ;;  %v2423_v39 = vld [vmem:[%s3485_s1 + $0x268] sm:$0xff] }
  0x18   : > { %2510 = vmatpush.msra.mxu1 %v208_v6  ;;  %2511 = vmatpush.msra.mxu2 %v208_v6  ;;  %v2388_v37 = vld [vmem:[%s3485_s1 + $0x150] sm:$0xff]  ;;  %v2371_v40 = vld [vmem:[%s3485_s1 + $0xc8] sm:$0xff]  ;;  %v2406_v43 = vld [vmem:[%s3485_s1 + $0x1e0] sm:$0xff] }
  0x19   : > { %2512 = vmatpush.msra.mxu3 %v208_v6  ;;  %221 = vmatpush.msra.mxu0 %v208_v6  ;;  %v193_v41 = vld [vmem:[%s2642_s22 + $0xb0] sm:$0xff]  ;;  %v2387_v42 = vld [vmem:[%s3485_s1 + $0x148] sm:$0xff]  ;;  %v2370_v44 = vld [vmem:[%s3485_s1 + $0xc0] sm:$0xff] }
  0x1a   : > { %2513 = vmatpush.msra.mxu1 %v207_v7  ;;  %2514 = vmatpush.msra.mxu2 %v207_v7  ;;  %v172_v45 = vld [vmem:[%s2642_s22 + $0x8] sm:$0xff]  ;;  %v2737_v47 = vld [vmem:[%s2642_s22 + $0x80] sm:$0xff]  ;;  %v2369_v48 = vld [vmem:[%s3485_s1 + $0xb8] sm:$0xff] }
  0x1b   : > { %2515 = vmatpush.msra.mxu3 %v207_v7  ;;  %222 = vmatpush.msra.mxu0 %v207_v7  ;;  %v2734_v46 = vld [vmem:[%s2642_s22 + $0x48] sm:$0xff]  ;;  %v2405_v49 = vld [vmem:[%s3485_s1 + $0x1d8] sm:$0xff]  ;;  %v2386_v50 = vld [vmem:[%s3485_s1 + $0x140] sm:$0xff] }
  0x1c   : > { %2516 = vmatpush.msra.mxu1 %v206_v8  ;;  %2517 = vmatpush.msra.mxu2 %v206_v8  ;;  %v2422_v51 = vld [vmem:[%s3485_s1 + $0x260] sm:$0xff]  ;;  %v2368_v52 = vld [vmem:[%s3485_s1 + $0xb0] sm:$0xff]  ;;  %v2385_v54 = vld [vmem:[%s3485_s1 + $0x138] sm:$0xff] }
  0x1d   : > { %2518 = vmatpush.msra.mxu3 %v206_v8  ;;  %223 = vmatpush.msra.mxu0 %v206_v8  ;;  %v2404_v53 = vld [vmem:[%s3485_s1 + $0x1d0] sm:$0xff]  ;;  %v2421_v55 = vld [vmem:[%s3485_s1 + $0x258] sm:$0xff]  ;;  %v2367_v57 = vld [vmem:[%s3485_s1 + $0xa8] sm:$0xff] }
  0x1e   : > { %2519 = vmatpush.msra.mxu1 %v205_v9  ;;  %2520 = vmatpush.msra.mxu2 %v205_v9  ;;  %v194_v56 = vld [vmem:[%s2642_s22 + $0xb8] sm:$0xff]  ;;  %v2403_v58 = vld [vmem:[%s3485_s1 + $0x1c8] sm:$0xff]  ;;  %v2384_v59 = vld [vmem:[%s3485_s1 + $0x130] sm:$0xff] }
  0x1f   : > { %2521 = vmatpush.msra.mxu3 %v205_v9  ;;  %224 = vmatpush.msra.mxu0 %v205_v9  ;;  %v2366_v60 = vld [vmem:[%s3485_s1 + $0xa0] sm:$0xff]  ;;  %v2779_v61 = vld [vmem:[%s2642_s22 + $0x10] sm:$0xff]  ;;  %v2785_v63 = vld [vmem:[%s2642_s22 + $0x88] sm:$0xff] }
  0x20   : > { %2522 = vmatpush.msra.mxu1 %v204_v10  ;;  %2523 = vmatpush.msra.mxu2 %v204_v10  ;;  %v2782_v62 = vld [vmem:[%s2642_s22 + $0x50] sm:$0xff]  ;;  %v2383_v0 = vld [vmem:[%s3485_s1 + $0x128] sm:$0xff]  ;;  %v2402_v1 = vld [vmem:[%s3485_s1 + $0x1c0] sm:$0xff] }
  0x21   : > { %2524 = vmatpush.msra.mxu3 %v204_v10  ;;  %225 = vmatpush.msra.mxu0 %v204_v10  ;;  %v2365_v2 = vld [vmem:[%s3485_s1 + $0x98] sm:$0xff]  ;;  %v2420_v3 = vld [vmem:[%s3485_s1 + $0x250] sm:$0xff]  ;;  %v2382_v5 = vld [vmem:[%s3485_s1 + $0x120] sm:$0xff] }
  0x22   : > { %2525 = vmatpush.msra.mxu1 %v203_v11  ;;  %2526 = vmatpush.msra.mxu2 %v203_v11  ;;  %v2401_v4 = vld [vmem:[%s3485_s1 + $0x1b8] sm:$0xff]  ;;  %v2364_v6 = vld [vmem:[%s3485_s1 + $0x90] sm:$0xff]  ;;  %v2419_v7 = vld [vmem:[%s3485_s1 + $0x248] sm:$0xff] }
  0x23   : > { %2527 = vmatpush.msra.mxu3 %v203_v11  ;;  %226 = vmatpush.msra.mxu0 %v203_v11  ;;  %v195_v8 = vld [vmem:[%s2642_s22 + $0xc0] sm:$0xff]  ;;  %v2381_v9 = vld [vmem:[%s3485_s1 + $0x118] sm:$0xff]  ;;  %v2400_v10 = vld [vmem:[%s3485_s1 + $0x1b0] sm:$0xff] }
  0x24   : > { %2528 = vmatpush.msra.mxu1 %v202_v12  ;;  %2529 = vmatpush.msra.mxu2 %v202_v12  ;;  %v2363_v11 = vld [vmem:[%s3485_s1 + $0x88] sm:$0xff] }
  0x25   : > { %2530 = vmatpush.msra.mxu3 %v202_v12  ;;  %227 = vmatpush.msra.mxu0 %v202_v12  ;;  %v2380_v12 = vld [vmem:[%s3485_s1 + $0x110] sm:$0xff] }
  0x26   : > { %2531 = vmatpush.msra.mxu1 %v201_v13  ;;  %2532 = vmatpush.msra.mxu2 %v201_v13 }
  0x27   : > { %2533 = vmatpush.msra.mxu3 %v201_v13  ;;  %228 = vmatpush.msra.mxu0 %v201_v13  ;;  %v2828_v13 = vld [vmem:[%s2642_s22 + $0x18] sm:$0xff] }
  0x28   : > { %2534 = vmatpush.msra.mxu1 %v200_v14  ;;  %2535 = vmatpush.msra.mxu2 %v200_v14 }
  0x29   : > { %2536 = vmatpush.msra.mxu3 %v200_v14  ;;  %229 = vmatpush.msra.mxu0 %v200_v14  ;;  %v2831_v14 = vld [vmem:[%s2642_s22 + $0x58] sm:$0xff] }
  0x2a   : > { %2537 = vmatpush.msra.mxu1 %v199_v15  ;;  %2538 = vmatpush.msra.mxu2 %v199_v15 }
  0x2b   : > { %252 = vmatmul.f32.vlgmr.msra.gmra.mxu1 %v2648_v16  ;;  %273 = vmatmul.f32.vlgmr.msra.gmra.mxu2 %v2651_v17 }
  0x2c   : > { %417 = vmatpush.msrb.mxu1 %v2377_v18  ;;  %647 = vmatpush.msrb.mxu2 %v2393_v19  ;;  %v2399_v18 = vld [vmem:[%s3485_s1 + $0x1a8] sm:$0xff]  ;;  %v2362_v19 = vld [vmem:[%s3485_s1 + $0x80] sm:$0xff] }
  0x2d   : > { %2539 = vmatpush.msra.mxu3 %v199_v15  ;;  %230 = vmatpush.msra.mxu0 %v199_v15  ;;  %v2834_v15 = vld [vmem:[%s2642_s22 + $0x90] sm:$0xff] }
  0x2e   : > { %418 = vmatpush.msrb.mxu1 %v2376_v20  ;;  %648 = vmatpush.msrb.mxu2 %v2392_v21  ;;  %v2379_v20 = vld [vmem:[%s3485_s1 + $0x108] sm:$0xff]  ;;  %v2418_v21 = vld [vmem:[%s3485_s1 + $0x240] sm:$0xff] }
  0x2f   : > { %294 = vmatmul.f32.vlgmr.msra.gmra.mxu3 %v192_v22  ;;  %231 = vmatmul.f32.vlgmr.msra.gmra.mxu0 %v171_v23  ;;  %v2398_v22 = vld [vmem:[%s3485_s1 + $0x1a0] sm:$0xff]  ;;  %v2441_v23 = vld [vmem:[%s3485_s1 + $0x2f8] sm:$0xff] }
  0x30   : > { %419 = vmatpush.msrb.mxu1 %v2375_v24  ;;  %649 = vmatpush.msrb.mxu2 %v2391_v25  ;;  %v2378_v24 = vld [vmem:[%s3485_s1 + $0x100] sm:$0xff]  ;;  %v2417_v25 = vld [vmem:[%s3485_s1 + $0x238] sm:$0xff] }
  0x31   : > { %877 = vmatpush.msrb.mxu3 %v2409_v26  ;;  %1107 = vmatpush.msrb.mxu0 %v2425_v27  ;;  %v196_v26 = vld [vmem:[%s2642_s22 + $0xc8] sm:$0xff]  ;;  %v2457_v27 = vld [vmem:[%s3485_s1 + $0x378] sm:$0xff] }
  0x32   : > { %420 = vmatpush.msrb.mxu1 %v2374_v28  ;;  %650 = vmatpush.msrb.mxu2 %v2390_v29  ;;  %v2397_v28 = vld [vmem:[%s3485_s1 + $0x198] sm:$0xff]  ;;  %v2416_v29 = vld [vmem:[%s3485_s1 + $0x230] sm:$0xff] }
  0x33   : > { %255 = vmatmul.f32.gmra.mxu1 %v2688_v30  ;;  %276 = vmatmul.f32.gmra.mxu2 %v2691_v31 }
  0x34   : > { %421 = vmatpush.msrb.mxu1 %v2373_v32  ;;  %651 = vmatpush.msrb.mxu2 %v2389_v33  ;;  %v2874_v32 = vld [vmem:[%s2642_s22 + $0x20] sm:$0xff]  ;;  %v2440_v33 = vld [vmem:[%s3485_s1 + $0x2f0] sm:$0xff] }
  0x35   : > { %878 = vmatpush.msrb.mxu3 %v2408_v34  ;;  %1108 = vmatpush.msrb.mxu0 %v2424_v35  ;;  %v2880_v34 = vld [vmem:[%s2642_s22 + $0x60] sm:$0xff]  ;;  %v2883_v35 = vld [vmem:[%s2642_s22 + $0x98] sm:$0xff] }
  0x36   : > { %422 = vmatpush.msrb.mxu1 %v2372_v36  ;;  %652 = vmatpush.msrb.mxu2 %v2388_v37  ;;  %v2396_v36 = vld [vmem:[%s3485_s1 + $0x190] sm:$0xff]  ;;  %v2415_v37 = vld [vmem:[%s3485_s1 + $0x228] sm:$0xff] }
  0x37   : > { %879 = vmatpush.msrb.mxu3 %v2407_v38  ;;  %1109 = vmatpush.msrb.mxu0 %v2423_v39  ;;  %v2395_v38 = vld [vmem:[%s3485_s1 + $0x188] sm:$0xff]  ;;  %v2414_v39 = vld [vmem:[%s3485_s1 + $0x220] sm:$0xff] }
  0x38   : > { %423 = vmatpush.msrb.mxu1 %v2371_v40  ;;  %297 = vmatmul.f32.gmra.mxu3 %v193_v41  ;;  %v2456_v40 = vld [vmem:[%s3485_s1 + $0x370] sm:$0xff] }
  0x39   : > { %653 = vmatpush.msrb.mxu2 %v2387_v42  ;;  %880 = vmatpush.msrb.mxu3 %v2406_v43  ;;  %v197_v41 = vld [vmem:[%s2642_s22 + $0xd0] sm:$0xff]  ;;  %v2413_v42 = vld [vmem:[%s3485_s1 + $0x218] sm:$0xff]  ;;  %v2394_v43 = vld [vmem:[%s3485_s1 + $0x180] sm:$0xff] }
  0x3a   : > { %424 = vmatpush.msrb.mxu1 %v2370_v44  ;;  %234 = vmatmul.f32.gmra.mxu0 %v172_v45  ;;  %v2911_v44 = vld [vmem:[%s2642_s22 + $0x28] sm:$0xff]  ;;  %v2473_v45 = vld [vmem:[%s3485_s1 + $0x3f8] sm:$0xff] }
  0x3b   : > { %258 = vmatmul.f32.gmra.mxu1 %v2734_v46  ;;  %279 = vmatmul.f32.gmra.mxu2 %v2737_v47 }
  0x3c   : > { %425 = vmatpush.msrb.mxu1 %v2369_v48  ;;  %881 = vmatpush.msrb.mxu3 %v2405_v49  ;;  %v2917_v48 = vld [vmem:[%s2642_s22 + $0x68] sm:$0xff]  ;;  %v2920_v49 = vld [vmem:[%s2642_s22 + $0xa0] sm:$0xff] }
  0x3d   : > { %654 = vmatpush.msrb.mxu2 %v2386_v50  ;;  %1110 = vmatpush.msrb.mxu0 %v2422_v51  ;;  %v2412_v50 = vld [vmem:[%s3485_s1 + $0x210] sm:$0xff]  ;;  %v2411_v51 = vld [vmem:[%s3485_s1 + $0x208] sm:$0xff] }
  0x3e   : > { %426 = vmatpush.msrb.mxu1 %v2368_v52  ;;  %882 = vmatpush.msrb.mxu3 %v2404_v53  ;;  %v2439_v52 = vld [vmem:[%s3485_s1 + $0x2e8] sm:$0xff]  ;;  %v2472_v53 = vld [vmem:[%s3485_s1 + $0x3f0] sm:$0xff] }
  0x3f   : > { %655 = vmatpush.msrb.mxu2 %v2385_v54  ;;  %1111 = vmatpush.msrb.mxu0 %v2421_v55  ;;  %v198_v54 = vld [vmem:[%s2642_s22 + $0xd8] sm:$0xff]  ;;  %v2410_v55 = vld [vmem:[%s3485_s1 + $0x200] sm:$0xff] }
  0x40   : > { %300 = vmatmul.f32.gmra.mxu3 %v194_v56  ;;  %427 = vmatpush.msrb.mxu1 %v2367_v57  ;;  %v2489_v56 = vld [vmem:[%s3485_s1 + $0x478] sm:$0xff]  ;;  %v177_v57 = vld [vmem:[%s2642_s22 + $0x30] sm:$0xff] }
  0x41   : > { %883 = vmatpush.msrb.mxu3 %v2403_v58  ;;  %656 = vmatpush.msrb.mxu2 %v2384_v59  ;;  %v372_v58 = vld [vmem:[%s2642_s22 + $0x1] sm:$0xff] }
  0x42   : > { %428 = vmatpush.msrb.mxu1 %v2366_v60  ;;  %237 = vmatmul.f32.gmra.mxu0 %v2779_v61  ;;  %v602_v59 = vld [vmem:[%s2642_s22 + $0x2] sm:$0xff] }
  0x43   : > { %261 = vmatmul.f32.gmra.mxu1 %v2782_v62  ;;  %282 = vmatmul.f32.gmra.mxu2 %v2785_v63  ;;  %v2455_v60 = vld [vmem:[%s3485_s1 + $0x368] sm:$0xff] }
  0x44   : > { %657 = vmatpush.msrb.mxu2 %v2383_v0  ;;  %884 = vmatpush.msrb.mxu3 %v2402_v1  ;;  %v374_v0 = vld [vmem:[%s2642_s22 + $0x11] sm:$0xff]  ;;  %v373_v1 = vld [vmem:[%s2642_s22 + $0x9] sm:$0xff] }
  0x45   : > { %429 = vmatpush.msrb.mxu1 %v2365_v2  ;;  %1112 = vmatpush.msrb.mxu0 %v2420_v3  ;;  %v603_v2 = vld [vmem:[%s2642_s22 + $0xa] sm:$0xff]  ;;  %v2438_v3 = vld [vmem:[%s3485_s1 + $0x2e0] sm:$0xff] }
  0x46   : > { %885 = vmatpush.msrb.mxu3 %v2401_v4  ;;  %658 = vmatpush.msrb.mxu2 %v2382_v5  ;;  %v2471_v4 = vld [vmem:[%s3485_s1 + $0x3e8] sm:$0xff]  ;;  %v2488_v5 = vld [vmem:[%s3485_s1 + $0x470] sm:$0xff] }
  0x47   : > { %430 = vmatpush.msrb.mxu1 %v2364_v6  ;;  %1113 = vmatpush.msrb.mxu0 %v2419_v7  ;;  %v375_v6 = vld [vmem:[%s2642_s22 + $0x19] sm:$0xff] }
  0x48   : > { %303 = vmatmul.f32.gmra.mxu3 %v195_v8  ;;  %659 = vmatpush.msrb.mxu2 %v2381_v9  ;;  %v604_v7 = vld [vmem:[%s2642_s22 + $0x12] sm:$0xff]  ;;  %v376_v8 = vld [vmem:[%s2642_s22 + $0x21] sm:$0xff] }
  0x49   : > { %886 = vmatpush.msrb.mxu3 %v2400_v10  ;;  %431 = vmatpush.msrb.mxu1 %v2363_v11  ;;  %v605_v9 = vld [vmem:[%s2642_s22 + $0x1a] sm:$0xff] }
  0x4a   : > { %660 = vmatpush.msrb.mxu2 %v2380_v12  ;;  %240 = vmatmul.f32.gmra.mxu0 %v2828_v13  ;;  %v2437_v10 = vld [vmem:[%s3485_s1 + $0x2d8] sm:$0xff]  ;;  %v2470_v11 = vld [vmem:[%s3485_s1 + $0x3e0] sm:$0xff]  ;;  %v2487_v12 = vld [vmem:[%s3485_s1 + $0x468] sm:$0xff] }
  0x4b   : > { %264 = vmatmul.f32.gmra.mxu1 %v2831_v14  ;;  %285 = vmatmul.f32.gmra.mxu2 %v2834_v15 }
  0x4c   : > { %887 = vmatpush.msrb.mxu3 %v2399_v18  ;;  %432 = vmatpush.msrb.mxu1 %v2362_v19  ;;  %v377_v18 = vld [vmem:[%s2642_s22 + $0x29] sm:$0xff] }
  0x4d   : > { %661 = vmatpush.msrb.mxu2 %v2379_v20  ;;  %1114 = vmatpush.msrb.mxu0 %v2418_v21  ;;  %v606_v19 = vld [vmem:[%s2642_s22 + $0x22] sm:$0xff]  ;;  %v378_v20 = vld [vmem:[%s2642_s22 + $0x31] sm:$0xff] }
  0x4e   : > { %888 = vmatpush.msrb.mxu3 %v2398_v22  ;;  %1337 = vmatpush.msra.mxu1 %v2441_v23  ;;  %v607_v21 = vld [vmem:[%s2642_s22 + $0x2a] sm:$0xff]  ;;  %v2469_v23 = vld [vmem:[%s3485_s1 + $0x3d8] sm:$0xff] }
  0x4f   : > { %662 = vmatpush.msrb.mxu2 %v2378_v24  ;;  %1115 = vmatpush.msrb.mxu0 %v2417_v25  ;;  %v2436_v22 = vld [vmem:[%s3485_s1 + $0x2d0] sm:$0xff]  ;;  %v2486_v24 = vld [vmem:[%s3485_s1 + $0x460] sm:$0xff] }
  0x50   : > { %306 = vmatmul.f32.gmra.mxu3 %v196_v26  ;;  %1338 = vmatpush.msra.mxu1 %v2440_v33  ;;  %v2452_v25 = vld [vmem:[%s3485_s1 + $0x350] sm:$0xff]  ;;  %v379_v26 = vld [vmem:[%s2642_s22 + $0x39] sm:$0xff] }
  0x51   : > { %1567 = vmatpush.msra.mxu2 %v2457_v27  ;;  %889 = vmatpush.msrb.mxu3 %v2397_v28  ;;  %v608_v27 = vld [vmem:[%s2642_s22 + $0x32] sm:$0xff]  ;;  %v2435_v28 = vld [vmem:[%s3485_s1 + $0x2c8] sm:$0xff]  ;;  %v609_v33 = vld [vmem:[%s2642_s22 + $0x3a] sm:$0xff] }
  0x52   : > { %1116 = vmatpush.msrb.mxu0 %v2416_v29  ;;  %1339 = vmatpush.msra.mxu1 %v2439_v52  ;;  %v2468_v29 = vld [vmem:[%s3485_s1 + $0x3d0] sm:$0xff] }
  0x53   : > { %243 = vmatmul.f32.gmra.mxu0 %v2874_v32  ;;  %267 = vmatmul.f32.gmra.mxu1 %v2880_v34 }
  0x54   : > { %288 = vmatmul.f32.gmra.mxu2 %v2883_v35  ;;  %890 = vmatpush.msrb.mxu3 %v2396_v36  ;;  %v2451_v36 = vld [vmem:[%s3485_s1 + $0x348] sm:$0xff] }
  0x55   : > { %1117 = vmatpush.msrb.mxu0 %v2415_v37  ;;  %1568 = vmatpush.msra.mxu2 %v2456_v40  ;;  %v381_v37 = vld [vmem:[%s2642_s22 + $0x49] sm:$0xff] }
  0x56   : > { %891 = vmatpush.msrb.mxu3 %v2395_v38  ;;  %1340 = vmatpush.msra.mxu1 %v2438_v3  ;;  %v610_v38 = vld [vmem:[%s2642_s22 + $0x42] sm:$0xff]  ;;  %v2484_v40 = vld [vmem:[%s3485_s1 + $0x450] sm:$0xff] }
  0x57   : > { %1118 = vmatpush.msrb.mxu0 %v2414_v39  ;;  %1569 = vmatpush.msra.mxu2 %v2455_v60  ;;  %v2467_v39 = vld [vmem:[%s3485_s1 + $0x3c8] sm:$0xff]  ;;  %v613_v60 = vld [vmem:[%s2642_s22 + $0x5a] sm:$0xff] }
  0x58   : > { %309 = vmatmul.f32.gmra.mxu3 %v197_v41  ;;  %1341 = vmatpush.msra.mxu1 %v2437_v10 }
  0x59   : > { %1119 = vmatpush.msrb.mxu0 %v2413_v42  ;;  %892 = vmatpush.msrb.mxu3 %v2394_v43  ;;  %v611_v42 = vld [vmem:[%s2642_s22 + $0x4a] sm:$0xff]  ;;  %v2450_v43 = vld [vmem:[%s3485_s1 + $0x340] sm:$0xff] }
  0x5a   : > { %1342 = vmatpush.msra.mxu1 %v2436_v22 }
  0x5b   : > { %246 = vmatmul.f32.gmra.mxu0 %v2911_v44  ;;  %1797 = vmatpush.msra.mxu3 %v2473_v45 }
  0x5c   : > { %270 = vmatmul.f32.gmra.mxu1 %v2917_v48  ;;  %291 = vmatmul.f32.gmra.mxu2 %v2920_v49 }
  0x5d   : > { %1120 = vmatpush.msrb.mxu0 %v2412_v50  ;;  %1798 = vmatpush.msra.mxu3 %v2472_v53  ;;  %v383_v50 = vld [vmem:[%s2642_s22 + $0x59] sm:$0xff] }
  0x5e   : > { %1343 = vmatpush.msra.mxu1 %v2435_v28  ;;  %v2433_v53 = vld [vmem:[%s3485_s1 + $0x2b8] sm:$0xff]  ;;  %v388_v28 = vld [vmem:[%s2642_s22 + $0x81] sm:$0xff] }
  0x5f   : > { %1121 = vmatpush.msrb.mxu0 %v2411_v51  ;;  %1799 = vmatpush.msra.mxu3 %v2471_v4  ;;  %v612_v51 = vld [vmem:[%s2642_s22 + $0x52] sm:$0xff] }
  0x60   : > { %312 = vmatmul.f32.gmra.mxu3 %v198_v54  ;;  %v2466_v54 = vld [vmem:[%s3485_s1 + $0x3c0] sm:$0xff] }
  0x61   : > { %1122 = vmatpush.msrb.mxu0 %v2410_v55  ;;  %1800 = vmatpush.msra.mxu3 %v2470_v11  ;;  %v2483_v55 = vld [vmem:[%s3485_s1 + $0x448] sm:$0xff] }
  0x63   : > { %2027 = vmatpush.msra.mxu0 %v2489_v56  ;;  %1801 = vmatpush.msra.mxu3 %v2469_v23  ;;  %v616_v23 = vld [vmem:[%s2642_s22 + $0x72] sm:$0xff] }
  0x64   : > { %249 = vmatmul.f32.gmra.mxu0 %v177_v57  ;;  %433 = vmatmul.f32.vlgmr.msrb.gmra.mxu1 %v372_v58 }
  0x65   : > { %663 = vmatmul.f32.vlgmr.msrb.gmra.mxu2 %v602_v59  ;;  %2028 = vmatpush.msra.mxu0 %v2488_v5  ;;  %v614_v5 = vld [vmem:[%s2642_s22 + $0x62] sm:$0xff] }
  0x66   : > { %1802 = vmatpush.msra.mxu3 %v2468_v29 }
  0x67   : > { %2029 = vmatpush.msra.mxu0 %v2487_v12  ;;  %v615_v12 = vld [vmem:[%s2642_s22 + $0x6a] sm:$0xff] }
  0x68   : > { %893 = vmatmul.f32.vlgmr.msrb.gmra.mxu3 %v2779_v61  ;;  %v2454_v61 = vld [vmem:[%s3485_s1 + $0x360] sm:$0xff] }
  0x69   : > { %1570 = vmatpush.msra.mxu2 %v2454_v61  ;;  %2030 = vmatpush.msra.mxu0 %v2486_v24  ;;  %v2465_v61 = vld [vmem:[%s3485_s1 + $0x3b8] sm:$0xff] }
  0x6a   : > { %1803 = vmatpush.msra.mxu3 %v2467_v39  ;;  %v2481_v24 = vld [vmem:[%s3485_s1 + $0x438] sm:$0xff] }
  0x6c   : > { %1123 = vmatmul.f32.vlgmr.msrb.gmra.mxu0 %v374_v0  ;;  %436 = vmatmul.f32.gmra.mxu1 %v373_v1 }
  0x6d   : > { %666 = vmatmul.f32.gmra.mxu2 %v603_v2  ;;  %1804 = vmatpush.msra.mxu3 %v2466_v54  ;;  %v385_v2 = vld [vmem:[%s2642_s22 + $0x69] sm:$0xff] }
  0x6f   : > { %1805 = vmatpush.msra.mxu3 %v2465_v61 }
  0x70   : > { %896 = vmatmul.f32.gmra.mxu3 %v2828_v13  ;;  %v2453_v13 = vld [vmem:[%s3485_s1 + $0x358] sm:$0xff] }
  0x71   : > { %1571 = vmatpush.msra.mxu2 %v2453_v13 }
  0x73   : > { %1572 = vmatpush.msra.mxu2 %v2452_v25 }
  0x74   : > { %1126 = vmatmul.f32.gmra.mxu0 %v375_v6  ;;  %439 = vmatmul.f32.gmra.mxu1 %v374_v0 }
  0x75   : > { %669 = vmatmul.f32.gmra.mxu2 %v604_v7  ;;  %v2482_v7 = vld [vmem:[%s3485_s1 + $0x440] sm:$0xff] }
  0x76   : > { %1573 = vmatpush.msra.mxu2 %v2451_v36  ;;  %v2463_v36 = vld [vmem:[%s3485_s1 + $0x3a8] sm:$0xff] }
  0x78   : > { %899 = vmatmul.f32.gmra.mxu3 %v2874_v32  ;;  %v380_v32 = vld [vmem:[%s2642_s22 + $0x41] sm:$0xff]  ;;  %1574 = vmatpush.msra.mxu2 %v2450_v43 }
  0x7c   : > { %1129 = vmatmul.f32.gmra.mxu0 %v376_v8  ;;  %442 = vmatmul.f32.gmra.mxu1 %v375_v6 }
  0x7d   : > { %672 = vmatmul.f32.gmra.mxu2 %v605_v9  ;;  %v386_v9 = vld [vmem:[%s2642_s22 + $0x71] sm:$0xff] }
  0x80   : > { %902 = vmatmul.f32.gmra.mxu3 %v2911_v44 }
  0x84   : > { %1132 = vmatmul.f32.gmra.mxu0 %v377_v18  ;;  %445 = vmatmul.f32.gmra.mxu1 %v376_v8 }
  0x85   : > { %675 = vmatmul.f32.gmra.mxu2 %v606_v19  ;;  %v2464_v19 = vld [vmem:[%s3485_s1 + $0x3b0] sm:$0xff] }
  0x86   : > { %1806 = vmatpush.msra.mxu3 %v2464_v19  ;;  %v392_v19 = vld [vmem:[%s2642_s22 + $0xa1] sm:$0xff] }
  0x88   : > { %905 = vmatmul.f32.gmra.mxu3 %v177_v57  ;;  %v384_v57 = vld [vmem:[%s2642_s22 + $0x61] sm:$0xff] }
  0x89   : > { %1807 = vmatpush.msra.mxu3 %v2463_v36  ;;  %v393_v36 = vld [vmem:[%s2642_s22 + $0xa9] sm:$0xff] }
  0x8c   : > { %1135 = vmatmul.f32.gmra.mxu0 %v378_v20  ;;  %448 = vmatmul.f32.gmra.mxu1 %v377_v18  ;;  %v2431_v18 = vld [vmem:[%s3485_s1 + $0x2a8] sm:$0xff] }
  0x8d   : > { %678 = vmatmul.f32.gmra.mxu2 %v607_v21 }
  0x90   : > { %908 = vmatmul.f32.gmra.mxu3 %v2648_v16  ;;  %v2485_v16 = vld [vmem:[%s3485_s1 + $0x458] sm:$0xff] }
  0x91   : > { %2031 = vmatpush.msra.mxu0 %v2485_v16  ;;  %v2430_v16 = vld [vmem:[%s3485_s1 + $0x2a0] sm:$0xff] }
  0x93   : > { %2032 = vmatpush.msra.mxu0 %v2484_v40  ;;  %v618_v40 = vld [vmem:[%s2642_s22 + $0x82] sm:$0xff] }
  0x94   : > { %1138 = vmatmul.f32.gmra.mxu0 %v379_v26  ;;  %451 = vmatmul.f32.gmra.mxu1 %v378_v20 }
  0x95   : > { %681 = vmatmul.f32.gmra.mxu2 %v608_v27  ;;  %2033 = vmatpush.msra.mxu0 %v2483_v55  ;;  %v619_v55 = vld [vmem:[%s2642_s22 + $0x8a] sm:$0xff] }
  0x97   : > { %2034 = vmatpush.msra.mxu0 %v2482_v7 }
  0x98   : > { %911 = vmatmul.f32.gmra.mxu3 %v2688_v30  ;;  %v2434_v30 = vld [vmem:[%s3485_s1 + $0x2c0] sm:$0xff] }
  0x99   : > { %1344 = vmatpush.msra.mxu1 %v2434_v30  ;;  %2035 = vmatpush.msra.mxu0 %v2481_v24  ;;  %v621_v24 = vld [vmem:[%s2642_s22 + $0x9a] sm:$0xff] }
  0x9b   : > { %1345 = vmatpush.msra.mxu1 %v2433_v53 }
  0x9c   : > { %1141 = vmatmul.f32.gmra.mxu0 %v380_v32  ;;  %454 = vmatmul.f32.gmra.mxu1 %v379_v26  ;;  %v2447_v26 = vld [vmem:[%s3485_s1 + $0x328] sm:$0xff] }
  0x9d   : > { %684 = vmatmul.f32.gmra.mxu2 %v609_v33 }
  0xa0   : > { %914 = vmatmul.f32.gmra.mxu3 %v2734_v46  ;;  %v382_v46 = vld [vmem:[%s2642_s22 + $0x51] sm:$0xff] }
  0xa4   : > { %1144 = vmatmul.f32.gmra.mxu0 %v381_v37  ;;  %457 = vmatmul.f32.gmra.mxu1 %v380_v32  ;;  %v617_v32 = vld [vmem:[%s2642_s22 + $0x7a] sm:$0xff] }
  0xa5   : > { %687 = vmatmul.f32.gmra.mxu2 %v610_v38  ;;  %v389_v38 = vld [vmem:[%s2642_s22 + $0x89] sm:$0xff] }
  0xa8   : > { %v3032_v41 = vpop.f32.mrf.mxu1  ;;  %917 = vmatmul.f32.gmra.mxu3 %v2782_v62 }
  0xac   : > { %1147 = vmatmul.f32.gmra.mxu0 %v382_v46  ;;  %460 = vmatmul.f32.gmra.mxu1 %v381_v37  ;;  %v3040_v44 = vpop.f32.mrf.mxu0 }
  0xad   : > { %690 = vmatmul.f32.gmra.mxu2 %v611_v42 }
  0xae   : > { %v3042_v45 = vpop.f32.mrf.mxu2 }
  0xb0   : > { %v3050_v62 = vpop.f32.mrf.mxu1  ;;  %920 = vmatmul.f32.gmra.mxu3 %v2831_v14  ;;  %v2449_v14 = vld [vmem:[%s3485_s1 + $0x338] sm:$0xff] }
  0xb1   : > { %1575 = vmatpush.msra.mxu2 %v2449_v14  ;;  %v2429_v14 = vld [vmem:[%s3485_s1 + $0x298] sm:$0xff] }
  0xb2   : > { %v295_v52 = vpop.f32.mrf.mxu3 }
  0xb3   : > { %337 = vst [vmem:[%s3048_s21 + $0xa8] sm:$0xff] %v295_v52 }
  0xb4   : > { %1150 = vmatmul.f32.gmra.mxu0 %v383_v50  ;;  %463 = vmatmul.f32.gmra.mxu1 %v382_v46  ;;  %v2446_v46 = vld [vmem:[%s3485_s1 + $0x320] sm:$0xff] }
  0xb5   : > { %693 = vmatmul.f32.gmra.mxu2 %v612_v51  ;;  %v390_v51 = vld [vmem:[%s2642_s22 + $0x91] sm:$0xff] }
  0xb6   : > { %v3067_v56 = vpop.f32.mrf.mxu2 }
  0xb7   : > { %v3070_v58 = vpop.f32.mrf.mxu0 }
  0xb8   : > { %v3072_v59 = vpop.f32.mrf.mxu1  ;;  %923 = vmatmul.f32.gmra.mxu3 %v2880_v34  ;;  %v2432_v34 = vld [vmem:[%s3485_s1 + $0x2b0] sm:$0xff] }
  0xb9   : > { %1346 = vmatpush.msra.mxu1 %v2432_v34  ;;  %v391_v34 = vld [vmem:[%s2642_s22 + $0x99] sm:$0xff] }
  0xbb   : > { %v298_v0 = vpop.f32.mrf.mxu3  ;;  %1347 = vmatpush.msra.mxu1 %v2431_v18 }
  0xbc   : > { %1153 = vmatmul.f32.gmra.mxu0 %v384_v57  ;;  %466 = vmatmul.f32.gmra.mxu1 %v383_v50  ;;  %338 = vst [vmem:[%s3048_s21 + $0xb0] sm:$0xff] %v298_v0 }
  0xbd   : > { %696 = vmatmul.f32.gmra.mxu2 %v613_v60  ;;  %1348 = vmatpush.msra.mxu1 %v2430_v16  ;;  %v2445_v60 = vld [vmem:[%s3485_s1 + $0x318] sm:$0xff] }
  0xbe   : > { %v3077_v1 = vpop.f32.mrf.mxu2 }
  0xbf   : > { %v3080_v3 = vpop.f32.mrf.mxu0  ;;  %1349 = vmatpush.msra.mxu1 %v2429_v14  ;;  %v623_v14 = vld [vmem:[%s2642_s22 + $0xaa] sm:$0xff] }
  0xc0   : > { %v3082_v4 = vpop.f32.mrf.mxu1  ;;  %926 = vmatmul.f32.gmra.mxu3 %v2917_v48  ;;  %v2448_v48 = vld [vmem:[%s3485_s1 + $0x330] sm:$0xff] }
  0xc1   : > { %1576 = vmatpush.msra.mxu2 %v2448_v48  ;;  %v620_v48 = vld [vmem:[%s2642_s22 + $0x92] sm:$0xff] }
  0xc3   : > { %v301_v6 = vpop.f32.mrf.mxu3  ;;  %1577 = vmatpush.msra.mxu2 %v2447_v26  ;;  %v2444_v26 = vld [vmem:[%s3485_s1 + $0x310] sm:$0xff] }
  0xc4   : > { %1156 = vmatmul.f32.gmra.mxu0 %v385_v2  ;;  %469 = vmatmul.f32.gmra.mxu1 %v384_v57  ;;  %339 = vst [vmem:[%s3048_s21 + $0xb8] sm:$0xff] %v301_v6  ;;  %v2479_v57 = vld [vmem:[%s3485_s1 + $0x428] sm:$0xff] }
  0xc5   : > { %699 = vmatmul.f32.gmra.mxu2 %v614_v5 }
  0xc6   : > { %v3099_v8 = vpop.f32.mrf.mxu2  ;;  %1578 = vmatpush.msra.mxu2 %v2446_v46  ;;  %v2460_v46 = vld [vmem:[%s3485_s1 + $0x390] sm:$0xff] }
  0xc7   : > { %v3102_v10 = vpop.f32.mrf.mxu0 }
  0xc8   : > { %v3104_v11 = vpop.f32.mrf.mxu1  ;;  %929 = vmatmul.f32.gmra.mxu3 %v2651_v17  ;;  %v387_v17 = vld [vmem:[%s2642_s22 + $0x79] sm:$0xff]  ;;  %1579 = vmatpush.msra.mxu2 %v2445_v60 }
  0xc9   : > { %v853_v60 = vld [vmem:[%s2642_s22 + $0xb8] sm:$0xff] }
  0xca   : > { %1580 = vmatpush.msra.mxu2 %v2444_v26 }
  0xcb   : > { %v304_v13 = vpop.f32.mrf.mxu3 }
  0xcc   : > { %1159 = vmatmul.f32.gmra.mxu0 %v386_v9  ;;  %472 = vmatmul.f32.gmra.mxu1 %v385_v2  ;;  %340 = vst [vmem:[%s3048_s21 + $0xc0] sm:$0xff] %v304_v13 }
  0xcd   : > { %702 = vmatmul.f32.gmra.mxu2 %v615_v12 }
  0xce   : > { %v286_v20 = vpop.f32.mrf.mxu2 }
  0xcf   : > { %334 = vst [vmem:[%s3048_s21 + $0x90] sm:$0xff] %v286_v20 }
  0xd0   : > { %v3117_v21 = vpop.f32.mrf.mxu0  ;;  %v3119_v22 = vpop.f32.mrf.mxu1  ;;  %932 = vmatmul.f32.gmra.mxu3 %v2691_v31 }
  0xd3   : > { %v307_v25 = vpop.f32.mrf.mxu3 }
  0xd4   : > { %1162 = vmatmul.f32.gmra.mxu0 %v387_v17  ;;  %475 = vmatmul.f32.gmra.mxu1 %v386_v9  ;;  %341 = vst [vmem:[%s3048_s21 + $0xc8] sm:$0xff] %v307_v25  ;;  %v2461_v25 = vld [vmem:[%s3485_s1 + $0x398] sm:$0xff] }
  0xd5   : > { %705 = vmatmul.f32.gmra.mxu2 %v616_v23 }
  0xd7   : > { %v289_v27 = vpop.f32.mrf.mxu2 }
  0xd8   : > { %335 = vst [vmem:[%s3048_s21 + $0x98] sm:$0xff] %v289_v27  ;;  %v3132_v31 = vpop.f32.mrf.mxu0  ;;  %935 = vmatmul.f32.gmra.mxu3 %v2737_v47  ;;  %v2480_v47 = vld [vmem:[%s3485_s1 + $0x430] sm:$0xff] }
  0xd9   : > { %v3134_v29 = vpop.f32.mrf.mxu1  ;;  %2036 = vmatpush.msra.mxu0 %v2480_v47 }
  0xdb   : > { %v310_v33 = vpop.f32.mrf.mxu3  ;;  %2037 = vmatpush.msra.mxu0 %v2479_v57  ;;  %v2443_v57 = vld [vmem:[%s3485_s1 + $0x308] sm:$0xff] }
  0xdc   : > { %1165 = vmatmul.f32.gmra.mxu0 %v388_v28  ;;  %478 = vmatmul.f32.gmra.mxu1 %v387_v17  ;;  %342 = vst [vmem:[%s3048_s21 + $0xd0] sm:$0xff] %v310_v33 }
  0xdd   : > { %708 = vmatmul.f32.gmra.mxu2 %v617_v32 }
  0xde   : > { %1581 = vmatpush.msra.mxu2 %v2443_v57 }
  0xdf   : > { %v292_v37 = vpop.f32.mrf.mxu2 }
  0xe0   : > { %336 = vst [vmem:[%s3048_s21 + $0xa0] sm:$0xff] %v292_v37  ;;  %938 = vmatmul.f32.gmra.mxu3 %v2785_v63 }
  0xe1   : > { %v3150_v30 = vpop.f32.mrf.mxu0  ;;  %v434_v39 = vpop.f32.mrf.mxu1 }
  0xe2   : > { %v518_v43 = vadd.f32 %v434_v39, %v3040_v44  ;;  %v2462_v44 = vld [vmem:[%s3485_s1 + $0x3a0] sm:$0xff] }
  0xe3   : > { %v313_v42 = vpop.f32.mrf.mxu3  ;;  %1808 = vmatpush.msra.mxu3 %v2462_v44  ;;  %v622_v39 = vld [vmem:[%s2642_s22 + $0xa2] sm:$0xff]  ;;  %v2477_v44 = vld [vmem:[%s3485_s1 + $0x418] sm:$0xff] }
  0xe4   : > { %1168 = vmatmul.f32.gmra.mxu0 %v389_v38  ;;  %481 = vmatmul.f32.gmra.mxu1 %v388_v28  ;;  %343 = vst [vmem:[%s3048_s21 + $0xd8] sm:$0xff] %v313_v42  ;;  %v851_v28 = vld [vmem:[%s2642_s22 + $0xa8] sm:$0xff] }
  0xe5   : > { %711 = vmatmul.f32.gmra.mxu2 %v618_v40  ;;  %1809 = vmatpush.msra.mxu3 %v2461_v25 }
  0xe7   : > { %1810 = vmatpush.msra.mxu3 %v2460_v46  ;;  %v856_v46 = vld [vmem:[%s2642_s22 + $0xd0] sm:$0xff] }
  0xe8   : > { %v664_v50 = vpop.f32.mrf.mxu2  ;;  %941 = vmatmul.f32.gmra.mxu3 %v2834_v15 }
  0xe9   : > { %v1124_v52 = vpop.f32.mrf.mxu0  ;;  %v437_v53 = vpop.f32.mrf.mxu1  ;;  %v748_v54 = vadd.f32 %v664_v50, %v518_v43  ;;  %v852_v43 = vld [vmem:[%s2642_s22 + $0xb0] sm:$0xff] }
  0xea   : > { %v519_v0 = vadd.f32 %v437_v53, %v3070_v58  ;;  %v394_v53 = vld [vmem:[%s2642_s22 + $0xb1] sm:$0xff] }
  0xeb   : > { %v894_v63 = vpop.f32.mrf.mxu3 }
  0xec   : > { %1171 = vmatmul.f32.gmra.mxu0 %v390_v51  ;;  %484 = vmatmul.f32.gmra.mxu1 %v389_v38  ;;  %v978_v15 = vadd.f32 %v894_v63, %v748_v54 }
  0xed   : > { %714 = vmatmul.f32.gmra.mxu2 %v619_v55 }
  0xee   : > { %v1208_v5 = vadd.f32 %v1124_v52, %v978_v15 }
  0xf0   : > { %v667_v2 = vpop.f32.mrf.mxu2  ;;  %944 = vmatmul.f32.gmra.mxu3 %v2883_v35  ;;  %1236 = vst [vmem:[%s3048_s21] sm:$0xff] %v1208_v5  ;;  %v2428_v35 = vld [vmem:[%s3485_s1 + $0x290] sm:$0xff] }
  0xf1   : > { %v1127_v61 = vpop.f32.mrf.mxu0  ;;  %v440_v6 = vpop.f32.mrf.mxu1  ;;  %v749_v7 = vadd.f32 %v667_v2, %v519_v0  ;;  %1350 = vmatpush.msra.mxu1 %v2428_v35 }
  0xf2   : > { %v520_v58 = vadd.f32 %v440_v6, %v3080_v3 }
  0xf3   : > { %v897_v9 = vpop.f32.mrf.mxu3 }
  0xf4   : > { %1174 = vmatmul.f32.gmra.mxu0 %v391_v34  ;;  %487 = vmatmul.f32.gmra.mxu1 %v390_v51  ;;  %v979_v12 = vadd.f32 %v897_v9, %v749_v7 }
  0xf5   : > { %717 = vmatmul.f32.gmra.mxu2 %v620_v48  ;;  %v624_v48 = vld [vmem:[%s2642_s22 + $0xb2] sm:$0xff] }
  0xf6   : > { %v1209_v18 = vadd.f32 %v1127_v61, %v979_v12  ;;  %v2459_v12 = vld [vmem:[%s3485_s1 + $0x388] sm:$0xff] }
  0xf7   : > { %1811 = vmatpush.msra.mxu3 %v2459_v12  ;;  %v1088_v12 = vld [vmem:[%s2642_s22 + $0xe1] sm:$0xff] }
  0xf8   : > { %v670_v13 = vpop.f32.mrf.mxu2  ;;  %947 = vmatmul.f32.gmra.mxu3 %v2920_v49  ;;  %1237 = vst [vmem:[%s3048_s21 + $0x8] sm:$0xff] %v1209_v18  ;;  %v2478_v49 = vld [vmem:[%s3485_s1 + $0x420] sm:$0xff] }
  0xf9   : > { %v1130_v20 = vpop.f32.mrf.mxu0  ;;  %v443_v17 = vpop.f32.mrf.mxu1  ;;  %v750_v23 = vadd.f32 %v670_v13, %v520_v58  ;;  %2038 = vmatpush.msra.mxu0 %v2478_v49  ;;  %v2476_v13 = vld [vmem:[%s3485_s1 + $0x410] sm:$0xff]  ;;  %v854_v18 = vld [vmem:[%s2642_s22 + $0xc0] sm:$0xff] }
  0xfa   : > { %v521_v32 = vadd.f32 %v443_v17, %v3102_v10  ;;  %v2427_v10 = vld [vmem:[%s3485_s1 + $0x288] sm:$0xff]  ;;  %v2442_v49 = vld [vmem:[%s3485_s1 + $0x300] sm:$0xff] }
  0xfb   : > { %v900_v3 = vpop.f32.mrf.mxu3  ;;  %1351 = vmatpush.msra.mxu1 %v2427_v10  ;;  %2039 = vmatpush.msra.mxu0 %v2477_v44  ;;  %v857_v44 = vld [vmem:[%s2642_s22 + $0xd8] sm:$0xff] }
  0xfc   : > { %1177 = vmatmul.f32.gmra.mxu0 %v392_v19  ;;  %490 = vmatmul.f32.gmra.mxu1 %v391_v34  ;;  %v980_v27 = vadd.f32 %v900_v3, %v750_v23  ;;  %v395_v34 = vld [vmem:[%s2642_s22 + $0xb9] sm:$0xff]  ;;  %v396_v23 = vld [vmem:[%s2642_s22 + $0xc1] sm:$0xff] }
  0xfd   : > { %720 = vmatmul.f32.gmra.mxu2 %v621_v24  ;;  %2040 = vmatpush.msra.mxu0 %v2476_v13  ;;  %v625_v3 = vld [vmem:[%s2642_s22 + $0xba] sm:$0xff] }
  0xfe   : > { %v1210_v16 = vadd.f32 %v1130_v20, %v980_v27  ;;  %1582 = vmatpush.msra.mxu2 %v2442_v49  ;;  %v855_v27 = vld [vmem:[%s2642_s22 + $0xc8] sm:$0xff] }
 0x100   : > { %v673_v33 = vpop.f32.mrf.mxu2  ;;  %950 = vmatmul.f32.gmra.mxu3 %v851_v28  ;;  %1238 = vst [vmem:[%s3048_s21 + $0x10] sm:$0xff] %v1210_v16  ;;  %v397_v16 = vld [vmem:[%s2642_s22 + $0xc9] sm:$0xff] }
 0x101   : > { %v1133_v47 = vpop.f32.mrf.mxu0  ;;  %v446_v37 = vpop.f32.mrf.mxu1  ;;  %v751_v38 = vadd.f32 %v673_v33, %v521_v32 }
 0x102   : > { %v522_v50 = vadd.f32 %v446_v37, %v3117_v21 }
 0x103   : > { %v903_v40 = vpop.f32.mrf.mxu3 }
 0x104   : > { %1180 = vmatmul.f32.gmra.mxu0 %v393_v36  ;;  %493 = vmatmul.f32.gmra.mxu1 %v392_v19  ;;  %v981_v42 = vadd.f32 %v903_v40, %v751_v38  ;;  %v626_v38 = vld [vmem:[%s2642_s22 + $0xc2] sm:$0xff] }
 0x105   : > { %723 = vmatmul.f32.gmra.mxu2 %v622_v39  ;;  %v2475_v40 = vld [vmem:[%s3485_s1 + $0x408] sm:$0xff] }
 0x106   : > { %v1211_v52 = vadd.f32 %v1133_v47, %v981_v42  ;;  %2041 = vmatpush.msra.mxu0 %v2475_v40 }
 0x108   : > { %v676_v51 = vpop.f32.mrf.mxu2  ;;  %953 = vmatmul.f32.gmra.mxu3 %v852_v43  ;;  %1239 = vst [vmem:[%s3048_s21 + $0x18] sm:$0xff] %v1211_v52 }
 0x109   : > { %v1136_v54 = vpop.f32.mrf.mxu0  ;;  %v449_v55 = vpop.f32.mrf.mxu1  ;;  %v752_v63 = vadd.f32 %v676_v51, %v522_v50  ;;  %v398_v51 = vld [vmem:[%s2642_s22 + $0xd1] sm:$0xff] }
 0x10a   : > { %v523_v0 = vadd.f32 %v449_v55, %v3132_v31  ;;  %v2426_v31 = vld [vmem:[%s3485_s1 + $0x280] sm:$0xff]  ;;  %v627_v55 = vld [vmem:[%s2642_s22 + $0xca] sm:$0xff] }
 0x10b   : > { %v906_v21 = vpop.f32.mrf.mxu3  ;;  %1352 = vmatpush.msra.mxu1 %v2426_v31 }
 0x10c   : > { %1183 = vmatmul.f32.gmra.mxu0 %v394_v53  ;;  %496 = vmatmul.f32.gmra.mxu1 %v393_v36  ;;  %v982_v15 = vadd.f32 %v906_v21, %v752_v63 }
 0x10d   : > { %726 = vmatmul.f32.gmra.mxu2 %v623_v14 }
 0x10e   : > { %v1212_v5 = vadd.f32 %v1136_v54, %v982_v15  ;;  %v2474_v15 = vld [vmem:[%s3485_s1 + $0x400] sm:$0xff] }
 0x10f   : > { %2042 = vmatpush.msra.mxu0 %v2474_v15 }
 0x110   : > { %v679_v2 = vpop.f32.mrf.mxu2  ;;  %956 = vmatmul.f32.gmra.mxu3 %v853_v60  ;;  %1240 = vst [vmem:[%s3048_s21 + $0x20] sm:$0xff] %v1212_v5  ;;  %v399_v60 = vld [vmem:[%s2642_s22 + $0xd9] sm:$0xff] }
 0x111   : > { %v1139_v61 = vpop.f32.mrf.mxu0  ;;  %v452_v6 = vpop.f32.mrf.mxu1  ;;  %v753_v7 = vadd.f32 %v679_v2, %v523_v0 }
 0x112   : > { %v524_v19 = vadd.f32 %v452_v6, %v3150_v30  ;;  %v858_v6 = vld [vmem:[%s2642_s22 + $0xe0] sm:$0xff] }
 0x113   : > { %v909_v9 = vpop.f32.mrf.mxu3 }
 0x114   : > { %1186 = vmatmul.f32.gmra.mxu0 %v395_v34  ;;  %499 = vmatmul.f32.gmra.mxu1 %v394_v53  ;;  %v983_v58 = vadd.f32 %v909_v9, %v753_v7 }
 0x115   : > { %729 = vmatmul.f32.gmra.mxu2 %v624_v48 }
 0x116   : > { %v1213_v17 = vadd.f32 %v1139_v61, %v983_v58 }
 0x118   : > { %v682_v20 = vpop.f32.mrf.mxu2  ;;  %959 = vmatmul.f32.gmra.mxu3 %v854_v18  ;;  %1241 = vst [vmem:[%s3048_s21 + $0x28] sm:$0xff] %v1213_v17  ;;  %v629_v18 = vld [vmem:[%s2642_s22 + $0xda] sm:$0xff]  ;;  %v859_v17 = vld [vmem:[%s2642_s22 + $0xe8] sm:$0xff] }
 0x119   : > { %v1142_v24 = vpop.f32.mrf.mxu0  ;;  %v455_v35 = vpop.f32.mrf.mxu1  ;;  %v754_v25 = vadd.f32 %v682_v20, %v524_v19 }
 0x11a   : > { %v525_v28 = vadd.f32 %v455_v35, %v3032_v41  ;;  %v2458_v41 = vld [vmem:[%s3485_s1 + $0x380] sm:$0xff] }
 0x11b   : > { %v912_v30 = vpop.f32.mrf.mxu3  ;;  %1812 = vmatpush.msra.mxu3 %v2458_v41  ;;  %v1523_v41 = vld [vmem:[%s2642_s22 + $0x28] sm:$0xff] }
 0x11c   : > { %1189 = vmatmul.f32.gmra.mxu0 %v396_v23  ;;  %502 = vmatmul.f32.gmra.mxu1 %v395_v34  ;;  %v984_v26 = vadd.f32 %v912_v30, %v754_v25  ;;  %v628_v34 = vld [vmem:[%s2642_s22 + $0xd2] sm:$0xff]  ;;  %v1089_v25 = vld [vmem:[%s2642_s22 + $0xe9] sm:$0xff] }
 0x11d   : > { %732 = vmatmul.f32.gmra.mxu2 %v625_v3  ;;  %v1292_v30 = vld [vmem:[%s2642_s22 + $0x12] sm:$0xff] }
 0x11e   : > { %v1214_v33 = vadd.f32 %v1142_v24, %v984_v26  ;;  %v1522_v26 = vld [vmem:[%s2642_s22 + $0x20] sm:$0xff] }
 0x120   : > { %v685_v32 = vpop.f32.mrf.mxu2  ;;  %962 = vmatmul.f32.gmra.mxu3 %v855_v27  ;;  %1242 = vst [vmem:[%s3048_s21 + $0x30] sm:$0xff] %v1214_v33 }
 0x121   : > { %v1145_v36 = vpop.f32.mrf.mxu0  ;;  %v458_v47 = vpop.f32.mrf.mxu1  ;;  %v755_v37 = vadd.f32 %v685_v32, %v525_v28  ;;  %v1752_v28 = vld [vmem:[%s2642_s22 + $0x21] sm:$0xff] }
 0x122   : > { %v526_v42 = vadd.f32 %v458_v47, %v3050_v62 }
 0x123   : > { %v915_v39 = vpop.f32.mrf.mxu3 }
 0x124   : > { %1192 = vmatmul.f32.gmra.mxu0 %v397_v16  ;;  %505 = vmatmul.f32.gmra.mxu1 %v396_v23  ;;  %v985_v10 = vadd.f32 %v915_v39, %v755_v37  ;;  %v1293_v39 = vld [vmem:[%s2642_s22 + $0x1a] sm:$0xff] }
 0x125   : > { %735 = vmatmul.f32.gmra.mxu2 %v626_v38 }
 0x126   : > { %v1215_v50 = vadd.f32 %v1145_v36, %v985_v10  ;;  %v1294_v36 = vld [vmem:[%s2642_s22 + $0x22] sm:$0xff] }
 0x128   : > { %v688_v43 = vpop.f32.mrf.mxu2  ;;  %965 = vmatmul.f32.gmra.mxu3 %v856_v46  ;;  %1243 = vst [vmem:[%s3048_s21 + $0x38] sm:$0xff] %v1215_v50  ;;  %v1295_v50 = vld [vmem:[%s2642_s22 + $0x2a] sm:$0xff] }
 0x129   : > { %v1148_v52 = vpop.f32.mrf.mxu0  ;;  %v461_v53 = vpop.f32.mrf.mxu1  ;;  %v756_v54 = vadd.f32 %v688_v43, %v526_v42 }
 0x12a   : > { %v527_v62 = vadd.f32 %v461_v53, %v3072_v59 }
 0x12b   : > { %v918_v63 = vpop.f32.mrf.mxu3 }
 0x12c   : > { %1195 = vmatmul.f32.gmra.mxu0 %v398_v51  ;;  %508 = vmatmul.f32.gmra.mxu1 %v397_v16  ;;  %v986_v14 = vadd.f32 %v918_v63, %v756_v54  ;;  %v1524_v54 = vld [vmem:[%s2642_s22 + $0x30] sm:$0xff] }
 0x12d   : > { %738 = vmatmul.f32.gmra.mxu2 %v627_v55 }
 0x12e   : > { %v1216_v57 = vadd.f32 %v1148_v52, %v986_v14  ;;  %v1754_v14 = vld [vmem:[%s2642_s22 + $0x31] sm:$0xff] }
 0x130   : > { %v691_v21 = vpop.f32.mrf.mxu2  ;;  %968 = vmatmul.f32.gmra.mxu3 %v857_v44  ;;  %1244 = vst [vmem:[%s3048_s21 + $0x40] sm:$0xff] %v1216_v57 }
 0x131   : > { %v1151_v0 = vpop.f32.mrf.mxu0  ;;  %v464_v2 = vpop.f32.mrf.mxu1  ;;  %v757_v5 = vadd.f32 %v691_v21, %v527_v62  ;;  %v1296_v21 = vld [vmem:[%s2642_s22 + $0x32] sm:$0xff] }
 0x132   : > { %v528_v7 = vadd.f32 %v464_v2, %v3082_v4 }
 0x133   : > { %v921_v59 = vpop.f32.mrf.mxu3 }
 0x134   : > { %1198 = vmatmul.f32.gmra.mxu0 %v399_v60  ;;  %511 = vmatmul.f32.gmra.mxu1 %v398_v51  ;;  %v987_v61 = vadd.f32 %v921_v59, %v757_v5 }
 0x135   : > { %741 = vmatmul.f32.gmra.mxu2 %v628_v34  ;;  %v1755_v34 = vld [vmem:[%s2642_s22 + $0x39] sm:$0xff] }
 0x136   : > { %v1217_v9 = vadd.f32 %v1151_v0, %v987_v61  ;;  %v1525_v0 = vld [vmem:[%s2642_s22 + $0x38] sm:$0xff] }
 0x138   : > { %v694_v48 = vpop.f32.mrf.mxu2  ;;  %971 = vmatmul.f32.gmra.mxu3 %v858_v6  ;;  %1245 = vst [vmem:[%s3048_s21 + $0x48] sm:$0xff] %v1217_v9  ;;  %v1297_v6 = vld [vmem:[%s2642_s22 + $0x3a] sm:$0xff] }
 0x139   : > { %v1154_v31 = vpop.f32.mrf.mxu0  ;;  %v467_v58 = vpop.f32.mrf.mxu1  ;;  %v758_v13 = vadd.f32 %v694_v48, %v528_v7 }
 0x13a   : > { %v529_v4 = vadd.f32 %v467_v58, %v3104_v11 }
 0x13b   : > { %v924_v19 = vpop.f32.mrf.mxu3 }
 0x13c   : > { %1201 = vmatmul.f32.gmra.mxu0 %v1088_v12  ;;  %514 = vmatmul.f32.gmra.mxu1 %v399_v60  ;;  %v988_v20 = vadd.f32 %v924_v19, %v758_v13  ;;  %v1756_v13 = vld [vmem:[%s2642_s22 + $0x41] sm:$0xff] }
 0x13d   : > { %744 = vmatmul.f32.gmra.mxu2 %v629_v18 }
 0x13e   : > { %v1218_v24 = vadd.f32 %v1154_v31, %v988_v20  ;;  %v1526_v31 = vld [vmem:[%s2642_s22 + $0x40] sm:$0xff] }
 0x13f   : > { %v1298_v20 = vld [vmem:[%s2642_s22 + $0x42] sm:$0xff] }
 0x140   : > { %v697_v23 = vpop.f32.mrf.mxu2  ;;  %974 = vmatmul.f32.gmra.mxu3 %v859_v17  ;;  %1246 = vst [vmem:[%s3048_s21 + $0x50] sm:$0xff] %v1218_v24  ;;  %v1527_v24 = vld [vmem:[%s2642_s22 + $0x48] sm:$0xff] }
 0x141   : > { %v1157_v35 = vpop.f32.mrf.mxu0  ;;  %v470_v3 = vpop.f32.mrf.mxu1  ;;  %v759_v49 = vadd.f32 %v697_v23, %v529_v4 }
 0x142   : > { %v530_v32 = vadd.f32 %v470_v3, %v3119_v22  ;;  %v1753_v22 = vld [vmem:[%s2642_s22 + $0x29] sm:$0xff] }
 0x143   : > { %v927_v27 = vpop.f32.mrf.mxu3  ;;  %v1757_v3 = vld [vmem:[%s2642_s22 + $0x49] sm:$0xff] }
 0x144   : > { %1204 = vmatmul.f32.gmra.mxu0 %v1089_v25  ;;  %1353 = vmatmul.f32.vlgmr.msra.gmra.mxu1 %v1292_v30  ;;  %v989_v11 = vadd.f32 %v927_v27, %v759_v49 }
 0x145   : > { %1583 = vmatmul.f32.vlgmr.msra.gmra.mxu2 %v1522_v26  ;;  %v1299_v26 = vld [vmem:[%s2642_s22 + $0x4a] sm:$0xff] }
 0x146   : > { %v1219_v16 = vadd.f32 %v1157_v35, %v989_v11 }
 0x148   : > { %v700_v33 = vpop.f32.mrf.mxu2  ;;  %1813 = vmatmul.f32.vlgmr.msra.gmra.mxu3 %v1752_v28  ;;  %1247 = vst [vmem:[%s3048_s21 + $0x58] sm:$0xff] %v1219_v16 }
 0x149   : > { %v1160_v47 = vpop.f32.mrf.mxu0  ;;  %v473_v37 = vpop.f32.mrf.mxu1  ;;  %v760_v38 = vadd.f32 %v700_v33, %v530_v32  ;;  %v1528_v32 = vld [vmem:[%s2642_s22 + $0x50] sm:$0xff] }
 0x14a   : > { %v531_v46 = vadd.f32 %v473_v37, %v3134_v29 }
 0x14b   : > { %v930_v40 = vpop.f32.mrf.mxu3 }
 0x14c   : > { %2043 = vmatmul.f32.vlgmr.msra.gmra.mxu0 %v1294_v36  ;;  %1356 = vmatmul.f32.gmra.mxu1 %v1293_v39  ;;  %v990_v10 = vadd.f32 %v930_v40, %v760_v38  ;;  %v1300_v39 = vld [vmem:[%s2642_s22 + $0x52] sm:$0xff] }
 0x14d   : > { %1586 = vmatmul.f32.gmra.mxu2 %v1523_v41 }
 0x14e   : > { %v1220_v43 = vadd.f32 %v1160_v47, %v990_v10 }
 0x150   : > { %v703_v42 = vpop.f32.mrf.mxu2  ;;  %1816 = vmatmul.f32.gmra.mxu3 %v1753_v22  ;;  %1248 = vst [vmem:[%s3048_s21 + $0x60] sm:$0xff] %v1220_v43  ;;  %v1529_v22 = vld [vmem:[%s2642_s22 + $0x58] sm:$0xff] }
 0x151   : > { %v1163_v51 = vpop.f32.mrf.mxu0  ;;  %v476_v52 = vpop.f32.mrf.mxu1  ;;  %v761_v53 = vadd.f32 %v703_v42, %v531_v46  ;;  %v363_v43 = vld [vmem:[%s3048_s21 + $0x98] sm:$0xff] }
 0x152   : > { %v532_v29 = vadd.f32 %v476_v52, %v3042_v45 }
 0x153   : > { %v933_v55 = vpop.f32.mrf.mxu3 }
 0x154   : > { %2046 = vmatmul.f32.gmra.mxu0 %v1295_v50  ;;  %1359 = vmatmul.f32.gmra.mxu1 %v1294_v36  ;;  %v991_v63 = vadd.f32 %v933_v55, %v761_v53  ;;  %v362_v36 = vld [vmem:[%s3048_s21 + $0x90] sm:$0xff] }
 0x155   : > { %1589 = vmatmul.f32.gmra.mxu2 %v1524_v54  ;;  %v1301_v54 = vld [vmem:[%s2642_s22 + $0x5a] sm:$0xff] }
 0x156   : > { %v1221_v62 = vadd.f32 %v1163_v51, %v991_v63 }
 0x158   : > { %v706_v44 = vpop.f32.mrf.mxu2  ;;  %1819 = vmatmul.f32.gmra.mxu3 %v1754_v14  ;;  %1249 = vst [vmem:[%s3048_s21 + $0x68] sm:$0xff] %v1221_v62 }
 0x159   : > { %v1166_v57 = vpop.f32.mrf.mxu0  ;;  %v479_v15 = vpop.f32.mrf.mxu1  ;;  %v762_v60 = vadd.f32 %v706_v44, %v532_v29  ;;  %v1530_v29 = vld [vmem:[%s2642_s22 + $0x60] sm:$0xff] }
 0x15a   : > { %v533_v45 = vadd.f32 %v479_v15, %v3067_v56 }
 0x15b   : > { %v936_v2 = vpop.f32.mrf.mxu3 }
 0x15c   : > { %2049 = vmatmul.f32.gmra.mxu0 %v1296_v21  ;;  %1362 = vmatmul.f32.gmra.mxu1 %v1295_v50  ;;  %v992_v5 = vadd.f32 %v936_v2, %v762_v60  ;;  %v1759_v50 = vld [vmem:[%s2642_s22 + $0x59] sm:$0xff]  ;;  %v1302_v2 = vld [vmem:[%s2642_s22 + $0x62] sm:$0xff] }
 0x15d   : > { %1592 = vmatmul.f32.gmra.mxu2 %v1525_v0 }
 0x15e   : > { %v1222_v61 = vadd.f32 %v1166_v57, %v992_v5  ;;  %v1760_v57 = vld [vmem:[%s2642_s22 + $0x61] sm:$0xff] }
 0x160   : > { %v709_v59 = vpop.f32.mrf.mxu2  ;;  %1822 = vmatmul.f32.gmra.mxu3 %v1755_v34  ;;  %1250 = vst [vmem:[%s3048_s21 + $0x70] sm:$0xff] %v1222_v61 }
 0x161   : > { %v1169_v7 = vpop.f32.mrf.mxu0  ;;  %v482_v48 = vpop.f32.mrf.mxu1  ;;  %v763_v9 = vadd.f32 %v709_v59, %v533_v45  ;;  %v1531_v59 = vld [vmem:[%s2642_s22 + $0x68] sm:$0xff] }
 0x162   : > { %v534_v56 = vadd.f32 %v482_v48, %v3077_v1  ;;  %v1761_v48 = vld [vmem:[%s2642_s22 + $0x69] sm:$0xff] }
 0x163   : > { %v939_v12 = vpop.f32.mrf.mxu3 }
 0x164   : > { %2052 = vmatmul.f32.gmra.mxu0 %v1297_v6  ;;  %1365 = vmatmul.f32.gmra.mxu1 %v1296_v21  ;;  %v993_v58 = vadd.f32 %v939_v12, %v763_v9  ;;  %v364_v21 = vld [vmem:[%s3048_s21 + $0xa0] sm:$0xff] }
 0x165   : > { %1595 = vmatmul.f32.gmra.mxu2 %v1526_v31 }
 0x166   : > { %v1223_v19 = vadd.f32 %v1169_v7, %v993_v58  ;;  %v365_v7 = vld [vmem:[%s3048_s21 + $0xa8] sm:$0xff] }
 0x167   : > { %v1303_v58 = vld [vmem:[%s2642_s22 + $0x6a] sm:$0xff] }
 0x168   : > { %v712_v18 = vpop.f32.mrf.mxu2  ;;  %1825 = vmatmul.f32.gmra.mxu3 %v1756_v13  ;;  %1251 = vst [vmem:[%s3048_s21 + $0x78] sm:$0xff] %v1223_v19  ;;  %v1532_v19 = vld [vmem:[%s2642_s22 + $0x70] sm:$0xff] }
 0x169   : > { %v1172_v17 = vpop.f32.mrf.mxu0  ;;  %v485_v4 = vpop.f32.mrf.mxu1  ;;  %v764_v23 = vadd.f32 %v712_v18, %v534_v56 }
 0x16a   : > { %v535_v1 = vadd.f32 %v485_v4, %v3099_v8  ;;  %v1758_v8 = vld [vmem:[%s2642_s22 + $0x51] sm:$0xff] }
 0x16b   : > { %v942_v35 = vpop.f32.mrf.mxu3  ;;  %v366_v4 = vld [vmem:[%s3048_s21 + $0xb0] sm:$0xff] }
 0x16c   : > { %2055 = vmatmul.f32.gmra.mxu0 %v1298_v20  ;;  %1368 = vmatmul.f32.gmra.mxu1 %v1297_v6  ;;  %v994_v25 = vadd.f32 %v942_v35, %v764_v23  ;;  %v1762_v23 = vld [vmem:[%s2642_s22 + $0x71] sm:$0xff] }
 0x16d   : > { %1598 = vmatmul.f32.gmra.mxu2 %v1527_v24 }
 0x16e   : > { %v1224_v30 = vadd.f32 %v1172_v17, %v994_v25 }
 0x170   : > { %v715_v49 = vpop.f32.mrf.mxu2  ;;  %1828 = vmatmul.f32.gmra.mxu3 %v1757_v3  ;;  %1252 = vst [vmem:[%s3048_s21 + $0x80] sm:$0xff] %v1224_v30  ;;  %v1304_v3 = vld [vmem:[%s2642_s22 + $0x72] sm:$0xff] }
 0x171   : > { %v1175_v27 = vpop.f32.mrf.mxu0  ;;  %v488_v11 = vpop.f32.mrf.mxu1  ;;  %v765_v28 = vadd.f32 %v715_v49, %v535_v1 }
 0x172   : > { %v536_v47 = vadd.f32 %v488_v11, %v362_v36 }
 0x173   : > { %v945_v33 = vpop.f32.mrf.mxu3 }
 0x174   : > { %2058 = vmatmul.f32.gmra.mxu0 %v1299_v26  ;;  %1371 = vmatmul.f32.gmra.mxu1 %v1298_v20  ;;  %v995_v16 = vadd.f32 %v945_v33, %v765_v28  ;;  %v367_v28 = vld [vmem:[%s3048_s21 + $0xb8] sm:$0xff] }
 0x175   : > { %1601 = vmatmul.f32.gmra.mxu2 %v1528_v32  ;;  %v1763_v32 = vld [vmem:[%s2642_s22 + $0x79] sm:$0xff] }
 0x176   : > { %v1225_v38 = vadd.f32 %v1175_v27, %v995_v16 }
 0x178   : > { %v718_v37 = vpop.f32.mrf.mxu2  ;;  %1831 = vmatmul.f32.gmra.mxu3 %v1758_v8  ;;  %1253 = vst [vmem:[%s3048_s21 + $0x88] sm:$0xff] %v1225_v38  ;;  %v1305_v8 = vld [vmem:[%s2642_s22 + $0x7a] sm:$0xff] }
 0x179   : > { %v1178_v41 = vpop.f32.mrf.mxu0  ;;  %v491_v40 = vpop.f32.mrf.mxu1  ;;  %v766_v10 = vadd.f32 %v718_v37, %v536_v47 }
 0x17a   : > { %v537_v51 = vadd.f32 %v491_v40, %v363_v43 }
 0x17b   : > { %v948_v46 = vpop.f32.mrf.mxu3 }
 0x17c   : > { %2061 = vmatmul.f32.gmra.mxu0 %v1300_v39  ;;  %1374 = vmatmul.f32.gmra.mxu1 %v1299_v26  ;;  %v996_v42 = vadd.f32 %v948_v46, %v766_v10  ;;  %v1533_v26 = vld [vmem:[%s2642_s22 + $0x78] sm:$0xff]  ;;  %v368_v10 = vld [vmem:[%s3048_s21 + $0xc0] sm:$0xff] }
 0x17d   : > { %1604 = vmatmul.f32.gmra.mxu2 %v1529_v22  ;;  %v1764_v22 = vld [vmem:[%s2642_s22 + $0x81] sm:$0xff] }
 0x17e   : > { %v1226_v53 = vadd.f32 %v1178_v41, %v996_v42 }
 0x180   : > { %v721_v52 = vpop.f32.mrf.mxu2  ;;  %1834 = vmatmul.f32.gmra.mxu3 %v1759_v50  ;;  %1254 = vst [vmem:[%s3048_s21 + $0x90] sm:$0xff] %v1226_v53  ;;  %v1306_v50 = vld [vmem:[%s2642_s22 + $0x82] sm:$0xff] }
 0x181   : > { %v1181_v55 = vpop.f32.mrf.mxu0  ;;  %v494_v63 = vpop.f32.mrf.mxu1  ;;  %v767_v14 = vadd.f32 %v721_v52, %v537_v51 }
 0x182   : > { %v538_v15 = vadd.f32 %v494_v63, %v364_v21 }
 0x183   : > { %v951_v44 = vpop.f32.mrf.mxu3 }
 0x184   : > { %2064 = vmatmul.f32.gmra.mxu0 %v1301_v54  ;;  %1377 = vmatmul.f32.gmra.mxu1 %v1300_v39  ;;  %v997_v62 = vadd.f32 %v951_v44, %v767_v14  ;;  %v1534_v39 = vld [vmem:[%s2642_s22 + $0x80] sm:$0xff]  ;;  %v369_v14 = vld [vmem:[%s3048_s21 + $0xc8] sm:$0xff] }
 0x185   : > { %1607 = vmatmul.f32.gmra.mxu2 %v1530_v29  ;;  %v1765_v29 = vld [vmem:[%s2642_s22 + $0x89] sm:$0xff] }
 0x186   : > { %v1227_v0 = vadd.f32 %v1181_v55, %v997_v62 }
 0x188   : > { %v724_v60 = vpop.f32.mrf.mxu2  ;;  %1837 = vmatmul.f32.gmra.mxu3 %v1760_v57  ;;  %1255 = vst [vmem:[%s3048_s21 + $0x98] sm:$0xff] %v1227_v0  ;;  %v1307_v57 = vld [vmem:[%s2642_s22 + $0x8a] sm:$0xff] }
 0x189   : > { %v1184_v5 = vpop.f32.mrf.mxu0  ;;  %v497_v34 = vpop.f32.mrf.mxu1  ;;  %v768_v45 = vadd.f32 %v724_v60, %v538_v15 }
 0x18a   : > { %v539_v9 = vadd.f32 %v497_v34, %v365_v7 }
 0x18b   : > { %v954_v61 = vpop.f32.mrf.mxu3 }
 0x18c   : > { %2067 = vmatmul.f32.gmra.mxu0 %v1302_v2  ;;  %1380 = vmatmul.f32.gmra.mxu1 %v1301_v54  ;;  %v998_v6 = vadd.f32 %v954_v61, %v768_v45  ;;  %v1535_v54 = vld [vmem:[%s2642_s22 + $0x88] sm:$0xff]  ;;  %v370_v45 = vld [vmem:[%s3048_s21 + $0xd0] sm:$0xff] }
 0x18d   : > { %1610 = vmatmul.f32.gmra.mxu2 %v1531_v59  ;;  %v1766_v59 = vld [vmem:[%s2642_s22 + $0x91] sm:$0xff] }
 0x18e   : > { %v1228_v12 = vadd.f32 %v1184_v5, %v998_v6 }
 0x190   : > { %v727_v31 = vpop.f32.mrf.mxu2  ;;  %1840 = vmatmul.f32.gmra.mxu3 %v1761_v48  ;;  %1256 = vst [vmem:[%s3048_s21 + $0xa0] sm:$0xff] %v1228_v12  ;;  %v1308_v48 = vld [vmem:[%s2642_s22 + $0x92] sm:$0xff] }
 0x191   : > { %v1187_v13 = vpop.f32.mrf.mxu0  ;;  %v500_v56 = vpop.f32.mrf.mxu1  ;;  %v769_v18 = vadd.f32 %v727_v31, %v539_v9 }
 0x192   : > { %v540_v24 = vadd.f32 %v500_v56, %v366_v4 }
 0x193   : > { %v957_v20 = vpop.f32.mrf.mxu3 }
 0x194   : > { %2070 = vmatmul.f32.gmra.mxu0 %v1303_v58  ;;  %1383 = vmatmul.f32.gmra.mxu1 %v1302_v2  ;;  %v999_v17 = vadd.f32 %v957_v20, %v769_v18  ;;  %v1536_v2 = vld [vmem:[%s2642_s22 + $0x90] sm:$0xff]  ;;  %v371_v18 = vld [vmem:[%s3048_s21 + $0xd8] sm:$0xff] }
 0x195   : > { %1613 = vmatmul.f32.gmra.mxu2 %v1532_v19  ;;  %v1767_v19 = vld [vmem:[%s2642_s22 + $0x99] sm:$0xff] }
 0x196   : > { %v1229_v25 = vadd.f32 %v1187_v13, %v999_v17 }
 0x198   : > { %v730_v35 = vpop.f32.mrf.mxu2  ;;  %1843 = vmatmul.f32.gmra.mxu3 %v1762_v23  ;;  %1257 = vst [vmem:[%s3048_s21 + $0xa8] sm:$0xff] %v1229_v25  ;;  %v1309_v23 = vld [vmem:[%s2642_s22 + $0x9a] sm:$0xff] }
 0x199   : > { %v1190_v1 = vpop.f32.mrf.mxu0  ;;  %v503_v49 = vpop.f32.mrf.mxu1  ;;  %v770_v30 = vadd.f32 %v730_v35, %v540_v24 }
 0x19a   : > { %v541_v33 = vadd.f32 %v503_v49, %v367_v28 }
 0x19b   : > { %v960_v27 = vpop.f32.mrf.mxu3 }
 0x19c   : > { %2073 = vmatmul.f32.gmra.mxu0 %v1304_v3  ;;  %1386 = vmatmul.f32.gmra.mxu1 %v1303_v58  ;;  %v1000_v11 = vadd.f32 %v960_v27, %v770_v30  ;;  %v1537_v58 = vld [vmem:[%s2642_s22 + $0x98] sm:$0xff]  ;;  %v1264_v30 = vld [vmem:[%s3048_s21] sm:$0xff] }
 0x19d   : > { %1616 = vmatmul.f32.gmra.mxu2 %v1533_v26  ;;  %v1768_v26 = vld [vmem:[%s2642_s22 + $0xa1] sm:$0xff] }
 0x19e   : > { %v1230_v36 = vadd.f32 %v1190_v1, %v1000_v11 }
 0x1a0   : > { %v733_v16 = vpop.f32.mrf.mxu2  ;;  %1846 = vmatmul.f32.gmra.mxu3 %v1763_v32  ;;  %1258 = vst [vmem:[%s3048_s21 + $0xb0] sm:$0xff] %v1230_v36  ;;  %v1310_v32 = vld [vmem:[%s2642_s22 + $0xa2] sm:$0xff] }
 0x1a1   : > { %v1193_v47 = vpop.f32.mrf.mxu0  ;;  %v506_v37 = vpop.f32.mrf.mxu1  ;;  %v771_v38 = vadd.f32 %v733_v16, %v541_v33 }
 0x1a2   : > { %v542_v46 = vadd.f32 %v506_v37, %v368_v10 }
 0x1a3   : > { %v963_v41 = vpop.f32.mrf.mxu3 }
 0x1a4   : > { %2076 = vmatmul.f32.gmra.mxu0 %v1305_v8  ;;  %1389 = vmatmul.f32.gmra.mxu1 %v1304_v3  ;;  %v1001_v40 = vadd.f32 %v963_v41, %v771_v38  ;;  %v1538_v3 = vld [vmem:[%s2642_s22 + $0xa0] sm:$0xff]  ;;  %v1769_v41 = vld [vmem:[%s2642_s22 + $0xa9] sm:$0xff] }
 0x1a5   : > { %1619 = vmatmul.f32.gmra.mxu2 %v1534_v39  ;;  %v3364_v38 = vld [vmem:[%s3486_s2] ss:$0 sm:$0xff]  ;;  %v1265_v39 = vld [vmem:[%s3048_s21 + $0x8] sm:$0xff] }
 0x1a6   : > { %v1231_v43 = vadd.f32 %v1193_v47, %v1001_v40 }
 0x1a8   : > { %v736_v42 = vpop.f32.mrf.mxu2  ;;  %1849 = vmatmul.f32.gmra.mxu3 %v1764_v22  ;;  %1259 = vst [vmem:[%s3048_s21 + $0xb8] sm:$0xff] %v1231_v43 }
 0x1a9   : > { %v1196_v51 = vpop.f32.mrf.mxu0  ;;  %v509_v52 = vpop.f32.mrf.mxu1  ;;  %v772_v53 = vadd.f32 %v736_v42, %v542_v46  ;;  %v1311_v46 = vld [vmem:[%s2642_s22 + $0xaa] sm:$0xff] }
 0x1aa   : > { %v543_v44 = vadd.f32 %v509_v52, %v369_v14  ;;  %v1770_v14 = vld [vmem:[%s2642_s22 + $0xb1] sm:$0xff] }
 0x1ab   : > { %v966_v55 = vpop.f32.mrf.mxu3 }
 0x1ac   : > { %2079 = vmatmul.f32.gmra.mxu0 %v1306_v50  ;;  %1392 = vmatmul.f32.gmra.mxu1 %v1305_v8  ;;  %v1002_v63 = vadd.f32 %v966_v55, %v772_v53  ;;  %v1539_v8 = vld [vmem:[%s2642_s22 + $0xa8] sm:$0xff] }
 0x1ad   : > { %1622 = vmatmul.f32.gmra.mxu2 %v1535_v54 }
 0x1ae   : > { %v1232_v21 = vadd.f32 %v1196_v51, %v1002_v63  ;;  %v1540_v51 = vld [vmem:[%s2642_s22 + $0xb0] sm:$0xff] }
 0x1af   : > { %v1266_v63 = vld [vmem:[%s3048_s21 + $0x10] sm:$0xff] }
 0x1b0   : > { %v739_v62 = vpop.f32.mrf.mxu2  ;;  %1852 = vmatmul.f32.gmra.mxu3 %v1765_v29  ;;  %1260 = vst [vmem:[%s3048_s21 + $0xc0] sm:$0xff] %v1232_v21  ;;  %v1312_v21 = vld [vmem:[%s2642_s22 + $0xb2] sm:$0xff] }
 0x1b1   : > { %v1199_v15 = vpop.f32.mrf.mxu0  ;;  %v512_v60 = vpop.f32.mrf.mxu1  ;;  %v773_v0 = vadd.f32 %v739_v62, %v543_v44 }
 0x1b2   : > { %v544_v61 = vadd.f32 %v512_v60, %v370_v45 }
 0x1b3   : > { %v969_v5 = vpop.f32.mrf.mxu3 }
 0x1b4   : > { %2082 = vmatmul.f32.gmra.mxu0 %v1307_v57  ;;  %1395 = vmatmul.f32.gmra.mxu1 %v1306_v50  ;;  %v1003_v34 = vadd.f32 %v969_v5, %v773_v0  ;;  %v1541_v0 = vld [vmem:[%s2642_s22 + $0xb8] sm:$0xff] }
 0x1b5   : > { %1625 = vmatmul.f32.gmra.mxu2 %v1536_v2 }
 0x1b6   : > { %v1233_v7 = vadd.f32 %v1199_v15, %v1003_v34 }
 0x1b8   : > { %v742_v6 = vpop.f32.mrf.mxu2  ;;  %1855 = vmatmul.f32.gmra.mxu3 %v1766_v59  ;;  %1261 = vst [vmem:[%s3048_s21 + $0xc8] sm:$0xff] %v1233_v7  ;;  %v1267_v59 = vld [vmem:[%s3048_s21 + $0x18] sm:$0xff] }
 0x1b9   : > { %v1202_v9 = vpop.f32.mrf.mxu0  ;;  %v515_v31 = vpop.f32.mrf.mxu1  ;;  %v774_v12 = vadd.f32 %v742_v6, %v544_v61  ;;  %v1771_v61 = vld [vmem:[%s2642_s22 + $0xb9] sm:$0xff] }
 0x1ba   : > { %v545_v20 = vadd.f32 %v515_v31, %v371_v18 }
 0x1bb   : > { %v972_v13 = vpop.f32.mrf.mxu3 }
 0x1bc   : > { %2085 = vmatmul.f32.gmra.mxu0 %v1308_v48  ;;  %1398 = vmatmul.f32.gmra.mxu1 %v1307_v57  ;;  %v1004_v56 = vadd.f32 %v972_v13, %v774_v12  ;;  %v1542_v13 = vld [vmem:[%s2642_s22 + $0xc0] sm:$0xff] }
 0x1bd   : > { %1628 = vmatmul.f32.gmra.mxu2 %v1537_v58 }
 0x1be   : > { %v1234_v4 = vadd.f32 %v1202_v9, %v1004_v56  ;;  %v1313_v9 = vld [vmem:[%s2642_s22 + $0xba] sm:$0xff] }
 0x1c0   : > { %v745_v17 = vpop.f32.mrf.mxu2  ;;  %1858 = vmatmul.f32.gmra.mxu3 %v1767_v19  ;;  %1262 = vst [vmem:[%s3048_s21 + $0xd0] sm:$0xff] %v1234_v4  ;;  %v1772_v4 = vld [vmem:[%s2642_s22 + $0xc1] sm:$0xff] }
 0x1c1   : > { %v1205_v24 = vpop.f32.mrf.mxu0  ;;  %v1354_v35 = vpop.f32.mrf.mxu1  ;;  %v775_v25 = vadd.f32 %v745_v17, %v545_v20  ;;  %v1268_v17 = vld [vmem:[%s3048_s21 + $0x20] sm:$0xff] }
 0x1c2   : > { %v1438_v27 = vadd.f32 %v1354_v35, %v1264_v30  ;;  %v1543_v30 = vld [vmem:[%s2642_s22 + $0xc8] sm:$0xff] }
 0x1c3   : > { %v975_v1 = vpop.f32.mrf.mxu3 }
 0x1c4   : > { %2088 = vmatmul.f32.gmra.mxu0 %v1309_v23  ;;  %1401 = vmatmul.f32.gmra.mxu1 %v1308_v48  ;;  %v1005_v49 = vadd.f32 %v975_v1, %v775_v25  ;;  %v1314_v25 = vld [vmem:[%s2642_s22 + $0xc2] sm:$0xff] }
 0x1c5   : > { %1631 = vmatmul.f32.gmra.mxu2 %v1538_v3 }
 0x1c6   : > { %v1235_v28 = vadd.f32 %v1205_v24, %v1005_v49 }
 0x1c8   : > { %v1584_v11 = vpop.f32.mrf.mxu2  ;;  %1861 = vmatmul.f32.gmra.mxu3 %v1768_v26  ;;  %1263 = vst [vmem:[%s3048_s21 + $0xd8] sm:$0xff] %v1235_v28 }
 0x1c9   : > { %v2044_v33 = vpop.f32.mrf.mxu0  ;;  %v1357_v16 = vpop.f32.mrf.mxu1  ;;  %v1668_v36 = vadd.f32 %v1584_v11, %v1438_v27 }
 0x1ca   : > { %v1439_v40 = vadd.f32 %v1357_v16, %v1265_v39 }
 0x1cb   : > { %v1814_v47 = vpop.f32.mrf.mxu3 }
 0x1cc   : > { %2091 = vmatmul.f32.gmra.mxu0 %v1310_v32  ;;  %1404 = vmatmul.f32.gmra.mxu1 %v1309_v23  ;;  %v1898_v37 = vadd.f32 %v1814_v47, %v1668_v36  ;;  %v1315_v47 = vld [vmem:[%s2642_s22 + $0xca] sm:$0xff] }
 0x1cd   : > { %1634 = vmatmul.f32.gmra.mxu2 %v1539_v8 }
 0x1ce   : > { %v2128_v22 = vadd.f32 %v2044_v33, %v1898_v37  ;;  %v1773_v33 = vld [vmem:[%s2642_s22 + $0xc9] sm:$0xff] }
 0x1d0   : > { %v1587_v10 = vpop.f32.mrf.mxu2  ;;  %1864 = vmatmul.f32.gmra.mxu3 %v1769_v41  ;;  %v2216_v52 = vadd.f32 %v3364_v38, %v2128_v22 }
 0x1d1   : > { %v2047_v42 = vpop.f32.mrf.mxu0  ;;  %v1360_v43 = vpop.f32.mrf.mxu1  ;;  %v1669_v50 = vadd.f32 %v1587_v10, %v1439_v40  ;;  %v1544_v40 = vld [vmem:[%s2642_s22 + $0xd0] sm:$0xff] }
 0x1d2   : > { %v2244_v53 = vmax.f32 %v2216_v52, 0.0  ;;  %v1440_v29 = vadd.f32 %v1360_v43, %v1266_v63  ;;  %v1270_v43 = vld [vmem:[%s3048_s21 + $0x30] sm:$0xff] }
 0x1d3   : > { %v1817_v54 = vpop.f32.mrf.mxu3 }
 0x1d4   : > { %2094 = vmatmul.f32.gmra.mxu0 %v1311_v46  ;;  %1407 = vmatmul.f32.gmra.mxu1 %v1310_v32  ;;  %v1899_v55 = vadd.f32 %v1817_v54, %v1669_v50  ;;  %2272 = vst [vmem:[%s3048_s21] sm:$0xff] %v2244_v53  ;;  %v1269_v32 = vld [vmem:[%s3048_s21 + $0x28] sm:$0xff]  ;;  %v1774_v50 = vld [vmem:[%s2642_s22 + $0xd1] sm:$0xff] }
 0x1d5   : > { %1637 = vmatmul.f32.gmra.mxu2 %v1540_v51  ;;  %v1316_v54 = vld [vmem:[%s2642_s22 + $0xd2] sm:$0xff] }
 0x1d6   : > { %v2129_v62 = vadd.f32 %v2047_v42, %v1899_v55 }
 0x1d8   : > { %v1590_v44 = vpop.f32.mrf.mxu2  ;;  %1867 = vmatmul.f32.gmra.mxu3 %v1770_v14  ;;  %v2217_v2 = vadd.f32 %v3364_v38, %v2129_v62 }
 0x1d9   : > { %v2050_v57 = vpop.f32.mrf.mxu0  ;;  %v1363_v15 = vpop.f32.mrf.mxu1  ;;  %v1670_v60 = vadd.f32 %v1590_v44, %v1440_v29  ;;  %v1545_v29 = vld [vmem:[%s2642_s22 + $0xd8] sm:$0xff] }
 0x1da   : > { %v2245_v5 = vmax.f32 %v2217_v2, 0.0  ;;  %v1441_v6 = vadd.f32 %v1363_v15, %v1267_v59  ;;  %v1271_v15 = vld [vmem:[%s3048_s21 + $0x38] sm:$0xff] }
 0x1db   : > { %v1820_v34 = vpop.f32.mrf.mxu3 }
 0x1dc   : > { %2097 = vmatmul.f32.gmra.mxu0 %v1312_v21  ;;  %1410 = vmatmul.f32.gmra.mxu1 %v1311_v46  ;;  %v1900_v45 = vadd.f32 %v1820_v34, %v1670_v60  ;;  %2273 = vst [vmem:[%s3048_s21 + $0x8] sm:$0xff] %v2245_v5  ;;  %v1775_v60 = vld [vmem:[%s2642_s22 + $0xd9] sm:$0xff] }
 0x1dd   : > { %1640 = vmatmul.f32.gmra.mxu2 %v1541_v0  ;;  %v1317_v34 = vld [vmem:[%s2642_s22 + $0xda] sm:$0xff] }
 0x1de   : > { %v2130_v48 = vadd.f32 %v2050_v57, %v1900_v45 }
 0x1e0   : > { %v1593_v7 = vpop.f32.mrf.mxu2  ;;  %1870 = vmatmul.f32.gmra.mxu3 %v1771_v61  ;;  %v2218_v56 = vadd.f32 %v3364_v38, %v2130_v48 }
 0x1e1   : > { %v2053_v31 = vpop.f32.mrf.mxu0  ;;  %v1366_v12 = vpop.f32.mrf.mxu1  ;;  %v1671_v58 = vadd.f32 %v1593_v7, %v1441_v6  ;;  %v1546_v6 = vld [vmem:[%s2642_s22 + $0xe0] sm:$0xff] }
 0x1e2   : > { %v2246_v18 = vmax.f32 %v2218_v56, 0.0  ;;  %v1442_v23 = vadd.f32 %v1366_v12, %v1268_v17  ;;  %v1272_v12 = vld [vmem:[%s3048_s21 + $0x40] sm:$0xff] }
 0x1e3   : > { %v1823_v19 = vpop.f32.mrf.mxu3 }
 0x1e4   : > { %2100 = vmatmul.f32.gmra.mxu0 %v1313_v9  ;;  %1413 = vmatmul.f32.gmra.mxu1 %v1312_v21  ;;  %v1901_v20 = vadd.f32 %v1823_v19, %v1671_v58  ;;  %2274 = vst [vmem:[%s3048_s21 + $0x10] sm:$0xff] %v2246_v18  ;;  %v1776_v58 = vld [vmem:[%s2642_s22 + $0xe1] sm:$0xff] }
 0x1e5   : > { %1643 = vmatmul.f32.gmra.mxu2 %v1542_v13  ;;  %v1318_v19 = vld [vmem:[%s2642_s22 + $0xe2] sm:$0xff] }
 0x1e6   : > { %v2131_v35 = vadd.f32 %v2053_v31, %v1901_v20 }
 0x1e8   : > { %v1596_v24 = vpop.f32.mrf.mxu2  ;;  %1873 = vmatmul.f32.gmra.mxu3 %v1772_v4  ;;  %v2219_v26 = vadd.f32 %v3364_v38, %v2131_v35 }
 0x1e9   : > { %v2056_v3 = vpop.f32.mrf.mxu0  ;;  %v1369_v1 = vpop.f32.mrf.mxu1  ;;  %v1672_v49 = vadd.f32 %v1596_v24, %v1442_v23  ;;  %v1547_v23 = vld [vmem:[%s2642_s22 + $0xe8] sm:$0xff] }
 0x1ea   : > { %v2247_v27 = vmax.f32 %v2219_v26, 0.0  ;;  %v1443_v16 = vadd.f32 %v1369_v1, %v1269_v32  ;;  %v1273_v1 = vld [vmem:[%s3048_s21 + $0x48] sm:$0xff] }
 0x1eb   : > { %v1826_v11 = vpop.f32.mrf.mxu3 }
 0x1ec   : > { %2103 = vmatmul.f32.gmra.mxu0 %v1314_v25  ;;  %1416 = vmatmul.f32.gmra.mxu1 %v1313_v9  ;;  %v1902_v28 = vadd.f32 %v1826_v11, %v1672_v49  ;;  %2275 = vst [vmem:[%s3048_s21 + $0x18] sm:$0xff] %v2247_v27  ;;  %v1777_v49 = vld [vmem:[%s2642_s22 + $0xe9] sm:$0xff] }
 0x1ed   : > { %1646 = vmatmul.f32.gmra.mxu2 %v1543_v30  ;;  %v1319_v11 = vld [vmem:[%s2642_s22 + $0xea] sm:$0xff] }
 0x1ee   : > { %v2132_v8 = vadd.f32 %v2056_v3, %v1902_v28 }
 0x1f0   : > { %v1599_v36 = vpop.f32.mrf.mxu2  ;;  %1876 = vmatmul.f32.gmra.mxu3 %v1773_v33  ;;  %v2220_v10 = vadd.f32 %v3364_v38, %v2132_v8 }
 0x1f1   : > { %v2059_v37 = vpop.f32.mrf.mxu0  ;;  %v1372_v39 = vpop.f32.mrf.mxu1  ;;  %v1673_v41 = vadd.f32 %v1599_v36, %v1443_v16  ;;  %v1548_v16 = vld [vmem:[%s2642_s22 + $0xf0] sm:$0xff] }
 0x1f2   : > { %v2248_v22 = vmax.f32 %v2220_v10, 0.0  ;;  %v1444_v51 = vadd.f32 %v1372_v39, %v1270_v43  ;;  %v1274_v39 = vld [vmem:[%s3048_s21 + $0x50] sm:$0xff] }
 0x1f3   : > { %v1829_v46 = vpop.f32.mrf.mxu3 }
 0x1f4   : > { %2106 = vmatmul.f32.gmra.mxu0 %v1315_v47  ;;  %1419 = vmatmul.f32.gmra.mxu1 %v1314_v25  ;;  %v1903_v42 = vadd.f32 %v1829_v46, %v1673_v41  ;;  %2276 = vst [vmem:[%s3048_s21 + $0x20] sm:$0xff] %v2248_v22  ;;  %v1778_v41 = vld [vmem:[%s2642_s22 + $0xf1] sm:$0xff] }
 0x1f5   : > { %1649 = vmatmul.f32.gmra.mxu2 %v1544_v40 }
 0x1f6   : > { %v2133_v53 = vadd.f32 %v2059_v37, %v1903_v42  ;;  %v2008_v42 = vld [vmem:[%s2642_s22 + $0xf2] sm:$0xff] }
 0x1f8   : > { %v1602_v52 = vpop.f32.mrf.mxu2  ;;  %1879 = vmatmul.f32.gmra.mxu3 %v1774_v50  ;;  %v2221_v44 = vadd.f32 %v3364_v38, %v2133_v53 }
 0x1f9   : > { %v2062_v55 = vpop.f32.mrf.mxu0  ;;  %v1375_v63 = vpop.f32.mrf.mxu1  ;;  %v1674_v14 = vadd.f32 %v1602_v52, %v1444_v51  ;;  %v1549_v51 = vld [vmem:[%s2642_s22 + $0xf8] sm:$0xff] }
 0x1fa   : > { %v2249_v62 = vmax.f32 %v2221_v44, 0.0  ;;  %v1445_v0 = vadd.f32 %v1375_v63, %v1271_v15  ;;  %v1275_v63 = vld [vmem:[%s3048_s21 + $0x58] sm:$0xff] }
 0x1fb   : > { %v1832_v21 = vpop.f32.mrf.mxu3 }
 0x1fc   : > { %2109 = vmatmul.f32.gmra.mxu0 %v1316_v54  ;;  %1422 = vmatmul.f32.gmra.mxu1 %v1315_v47  ;;  %v1904_v57 = vadd.f32 %v1832_v21, %v1674_v14  ;;  %2277 = vst [vmem:[%s3048_s21 + $0x28] sm:$0xff] %v2249_v62  ;;  %v1779_v14 = vld [vmem:[%s2642_s22 + $0xf9] sm:$0xff] }
 0x1fd   : > { %1652 = vmatmul.f32.gmra.mxu2 %v1545_v29 }
 0x1fe   : > { %v2134_v5 = vadd.f32 %v2062_v55, %v1904_v57  ;;  %v2009_v57 = vld [vmem:[%s2642_s22 + $0xfa] sm:$0xff] }
 0x200   : > { %v1605_v2 = vpop.f32.mrf.mxu2  ;;  %1882 = vmatmul.f32.gmra.mxu3 %v1775_v60  ;;  %v2222_v7 = vadd.f32 %v3364_v38, %v2134_v5 }
 0x201   : > { %v2065_v45 = vpop.f32.mrf.mxu0  ;;  %v1378_v59 = vpop.f32.mrf.mxu1  ;;  %v1675_v61 = vadd.f32 %v1605_v2, %v1445_v0 }
 0x202   : > { %v2250_v48 = vmax.f32 %v2222_v7, 0.0  ;;  %v1446_v13 = vadd.f32 %v1378_v59, %v1272_v12 }
 0x203   : > { %v1835_v9 = vpop.f32.mrf.mxu3 }
 0x204   : > { %2112 = vmatmul.f32.gmra.mxu0 %v1317_v34  ;;  %1425 = vmatmul.f32.gmra.mxu1 %v1316_v54  ;;  %v1905_v31 = vadd.f32 %v1835_v9, %v1675_v61  ;;  %2278 = vst [vmem:[%s3048_s21 + $0x30] sm:$0xff] %v2250_v48 }
 0x205   : > { %1655 = vmatmul.f32.gmra.mxu2 %v1546_v6 }
 0x206   : > { %v2135_v18 = vadd.f32 %v2065_v45, %v1905_v31  ;;  %v1276_v45 = vld [vmem:[%s3048_s21 + $0x60] sm:$0xff] }
 0x208   : > { %v1608_v56 = vpop.f32.mrf.mxu2  ;;  %1885 = vmatmul.f32.gmra.mxu3 %v1776_v58  ;;  %v2223_v24 = vadd.f32 %v3364_v38, %v2135_v18 }
 0x209   : > { %v2068_v20 = vpop.f32.mrf.mxu0  ;;  %v1381_v17 = vpop.f32.mrf.mxu1  ;;  %v1676_v4 = vadd.f32 %v1608_v56, %v1446_v13  ;;  %v1277_v56 = vld [vmem:[%s3048_s21 + $0x68] sm:$0xff] }
 0x20a   : > { %v2251_v35 = vmax.f32 %v2223_v24, 0.0  ;;  %v1447_v30 = vadd.f32 %v1381_v17, %v1273_v1  ;;  %v1278_v1 = vld [vmem:[%s3048_s21 + $0x70] sm:$0xff] }
 0x20b   : > { %v1838_v25 = vpop.f32.mrf.mxu3 }
 0x20c   : > { %2115 = vmatmul.f32.gmra.mxu0 %v1318_v19  ;;  %1428 = vmatmul.f32.gmra.mxu1 %v1317_v34  ;;  %v1906_v3 = vadd.f32 %v1838_v25, %v1676_v4  ;;  %2279 = vst [vmem:[%s3048_s21 + $0x38] sm:$0xff] %v2251_v35 }
 0x20d   : > { %1658 = vmatmul.f32.gmra.mxu2 %v1547_v23 }
 0x20e   : > { %v2136_v27 = vadd.f32 %v2068_v20, %v1906_v3 }
 0x210   : > { %v1611_v26 = vpop.f32.mrf.mxu2  ;;  %1888 = vmatmul.f32.gmra.mxu3 %v1777_v49  ;;  %v2224_v36 = vadd.f32 %v3364_v38, %v2136_v27 }
 0x211   : > { %v2071_v28 = vpop.f32.mrf.mxu0  ;;  %v1384_v32 = vpop.f32.mrf.mxu1  ;;  %v1677_v33 = vadd.f32 %v1611_v26, %v1447_v30 }
 0x212   : > { %v2252_v8 = vmax.f32 %v2224_v36, 0.0  ;;  %v1448_v40 = vadd.f32 %v1384_v32, %v1274_v39 }
 0x213   : > { %v1841_v47 = vpop.f32.mrf.mxu3 }
 0x214   : > { %2118 = vmatmul.f32.gmra.mxu0 %v1319_v11  ;;  %1431 = vmatmul.f32.gmra.mxu1 %v1318_v19  ;;  %v1907_v37 = vadd.f32 %v1841_v47, %v1677_v33  ;;  %2280 = vst [vmem:[%s3048_s21 + $0x40] sm:$0xff] %v2252_v8  ;;  %v1279_v8 = vld [vmem:[%s3048_s21 + $0x78] sm:$0xff] }
 0x215   : > { %1661 = vmatmul.f32.gmra.mxu2 %v1548_v16 }
 0x216   : > { %v2137_v22 = vadd.f32 %v2071_v28, %v1907_v37 }
 0x218   : > { %v1614_v10 = vpop.f32.mrf.mxu2  ;;  %1891 = vmatmul.f32.gmra.mxu3 %v1778_v41  ;;  %v2225_v52 = vadd.f32 %v3364_v38, %v2137_v22 }
 0x219   : > { %v2074_v46 = vpop.f32.mrf.mxu0  ;;  %v1387_v43 = vpop.f32.mrf.mxu1  ;;  %v1678_v50 = vadd.f32 %v1614_v10, %v1448_v40 }
 0x21a   : > { %v2253_v53 = vmax.f32 %v2225_v52, 0.0  ;;  %v1449_v29 = vadd.f32 %v1387_v43, %v1275_v63 }
 0x21b   : > { %v1844_v54 = vpop.f32.mrf.mxu3 }
 0x21c   : > { %2121 = vmatmul.f32.gmra.mxu0 %v2008_v42  ;;  %1434 = vmatmul.f32.gmra.mxu1 %v1319_v11  ;;  %v1908_v55 = vadd.f32 %v1844_v54, %v1678_v50  ;;  %2281 = vst [vmem:[%s3048_s21 + $0x48] sm:$0xff] %v2253_v53  ;;  %v1280_v50 = vld [vmem:[%s3048_s21 + $0x80] sm:$0xff] }
 0x21d   : > { %1664 = vmatmul.f32.gmra.mxu2 %v1549_v51 }
 0x21e   : > { %v2138_v62 = vadd.f32 %v2074_v46, %v1908_v55 }
 0x220   : > { %v1617_v44 = vpop.f32.mrf.mxu2  ;;  %1894 = vmatmul.f32.gmra.mxu3 %v1779_v14  ;;  %v2226_v0 = vadd.f32 %v3364_v38, %v2138_v62 }
 0x221   : > { %v2077_v21 = vpop.f32.mrf.mxu0  ;;  %v1390_v15 = vpop.f32.mrf.mxu1  ;;  %v1679_v60 = vadd.f32 %v1617_v44, %v1449_v29 }
 0x222   : > { %v2254_v2 = vmax.f32 %v2226_v0, 0.0  ;;  %v1450_v59 = vadd.f32 %v1390_v15, %v1276_v45 }
 0x223   : > { %v1847_v5 = vpop.f32.mrf.mxu3 }
 0x224   : > { %2124 = vmatmul.f32.gmra.mxu0 %v2009_v57  ;;  %v1909_v34 = vadd.f32 %v1847_v5, %v1679_v60  ;;  %2282 = vst [vmem:[%s3048_s21 + $0x50] sm:$0xff] %v2254_v2 }
 0x226   : > { %v2139_v6 = vadd.f32 %v2077_v21, %v1909_v34  ;;  %v1281_v21 = vld [vmem:[%s3048_s21 + $0x88] sm:$0xff] }
 0x228   : > { %v1620_v61 = vpop.f32.mrf.mxu2  ;;  %v2227_v31 = vadd.f32 %v3364_v38, %v2139_v6  ;;  %v1282_v6 = vld [vmem:[%s3048_s21 + $0x90] sm:$0xff] }
 0x229   : > { %v2080_v7 = vpop.f32.mrf.mxu0  ;;  %v1393_v48 = vpop.f32.mrf.mxu1  ;;  %v1680_v9 = vadd.f32 %v1620_v61, %v1450_v59 }
 0x22a   : > { %v2255_v12 = vmax.f32 %v2227_v31, 0.0  ;;  %v1451_v18 = vadd.f32 %v1393_v48, %v1277_v56 }
 0x22b   : > { %v1850_v58 = vpop.f32.mrf.mxu3 }
 0x22c   : > { %v1910_v13 = vadd.f32 %v1850_v58, %v1680_v9  ;;  %2283 = vst [vmem:[%s3048_s21 + $0x58] sm:$0xff] %v2255_v12 }
 0x22e   : > { %v2140_v20 = vadd.f32 %v2080_v7, %v1910_v13 }
 0x230   : > { %v1623_v19 = vpop.f32.mrf.mxu2  ;;  %v2228_v24 = vadd.f32 %v3364_v38, %v2140_v20  ;;  %v1283_v20 = vld [vmem:[%s3048_s21 + $0x98] sm:$0xff] }
 0x231   : > { %v2083_v17 = vpop.f32.mrf.mxu0  ;;  %v1396_v4 = vpop.f32.mrf.mxu1  ;;  %v1681_v23 = vadd.f32 %v1623_v19, %v1451_v18 }
 0x232   : > { %v2256_v35 = vmax.f32 %v2228_v24, 0.0  ;;  %v1452_v49 = vadd.f32 %v1396_v4, %v1278_v1 }
 0x233   : > { %v1853_v25 = vpop.f32.mrf.mxu3 }
 0x234   : > { %v1911_v3 = vadd.f32 %v1853_v25, %v1681_v23  ;;  %2284 = vst [vmem:[%s3048_s21 + $0x60] sm:$0xff] %v2256_v35 }
 0x236   : > { %v2141_v26 = vadd.f32 %v2083_v17, %v1911_v3 }
 0x238   : > { %v1626_v30 = vpop.f32.mrf.mxu2  ;;  %v2229_v32 = vadd.f32 %v3364_v38, %v2141_v26  ;;  %v1284_v26 = vld [vmem:[%s3048_s21 + $0xa0] sm:$0xff] }
 0x239   : > { %v2086_v27 = vpop.f32.mrf.mxu0  ;;  %v1399_v11 = vpop.f32.mrf.mxu1  ;;  %v1682_v28 = vadd.f32 %v1626_v30, %v1452_v49 }
 0x23a   : > { %v2257_v33 = vmax.f32 %v2229_v32, 0.0  ;;  %v1453_v47 = vadd.f32 %v1399_v11, %v1279_v8 }
 0x23b   : > { %v1856_v16 = vpop.f32.mrf.mxu3 }
 0x23c   : > { %v1912_v36 = vadd.f32 %v1856_v16, %v1682_v28  ;;  %2285 = vst [vmem:[%s3048_s21 + $0x68] sm:$0xff] %v2257_v33 }
 0x23e   : > { %v2142_v39 = vadd.f32 %v2086_v27, %v1912_v36 }
 0x240   : > { %v1629_v37 = vpop.f32.mrf.mxu2  ;;  %v2230_v22 = vadd.f32 %v3364_v38, %v2142_v39  ;;  %v1285_v39 = vld [vmem:[%s3048_s21 + $0xa8] sm:$0xff] }
 0x241   : > { %v2089_v41 = vpop.f32.mrf.mxu0  ;;  %v1402_v40 = vpop.f32.mrf.mxu1  ;;  %v1683_v10 = vadd.f32 %v1629_v37, %v1453_v47 }
 0x242   : > { %v2258_v46 = vmax.f32 %v2230_v22, 0.0  ;;  %v1454_v51 = vadd.f32 %v1402_v40, %v1280_v50 }
 0x243   : > { %v1859_v42 = vpop.f32.mrf.mxu3 }
 0x244   : > { %v1913_v43 = vadd.f32 %v1859_v42, %v1683_v10  ;;  %2286 = vst [vmem:[%s3048_s21 + $0x70] sm:$0xff] %v2258_v46 }
 0x246   : > { %v2143_v53 = vadd.f32 %v2089_v41, %v1913_v43 }
 0x248   : > { %v1632_v52 = vpop.f32.mrf.mxu2  ;;  %v2231_v14 = vadd.f32 %v3364_v38, %v2143_v53  ;;  %v1286_v53 = vld [vmem:[%s3048_s21 + $0xb0] sm:$0xff] }
 0x249   : > { %v2092_v54 = vpop.f32.mrf.mxu0  ;;  %v1405_v55 = vpop.f32.mrf.mxu1  ;;  %v1684_v63 = vadd.f32 %v1632_v52, %v1454_v51 }
 0x24a   : > { %v2259_v29 = vmax.f32 %v2231_v14, 0.0  ;;  %v1455_v57 = vadd.f32 %v1405_v55, %v1281_v21 }
 0x24b   : > { %v1862_v44 = vpop.f32.mrf.mxu3 }
 0x24c   : > { %v1914_v62 = vadd.f32 %v1862_v44, %v1684_v63  ;;  %2287 = vst [vmem:[%s3048_s21 + $0x78] sm:$0xff] %v2259_v29 }
 0x24e   : > { %v2144_v60 = vadd.f32 %v2092_v54, %v1914_v62 }
 0x250   : > { %v1635_v15 = vpop.f32.mrf.mxu2  ;;  %v2232_v34 = vadd.f32 %v3364_v38, %v2144_v60  ;;  %v1287_v60 = vld [vmem:[%s3048_s21 + $0xb8] sm:$0xff] }
 0x251   : > { %v2095_v0 = vpop.f32.mrf.mxu0  ;;  %v1408_v2 = vpop.f32.mrf.mxu1  ;;  %v1685_v5 = vadd.f32 %v1635_v15, %v1455_v57 }
 0x252   : > { %v2260_v45 = vmax.f32 %v2232_v34, 0.0  ;;  %v1456_v7 = vadd.f32 %v1408_v2, %v1282_v6 }
 0x253   : > { %v1865_v59 = vpop.f32.mrf.mxu3 }
 0x254   : > { %v1915_v61 = vadd.f32 %v1865_v59, %v1685_v5  ;;  %2288 = vst [vmem:[%s3048_s21 + $0x80] sm:$0xff] %v2260_v45 }
 0x256   : > { %v2145_v9 = vadd.f32 %v2095_v0, %v1915_v61 }
 0x258   : > { %v1638_v48 = vpop.f32.mrf.mxu2  ;;  %v2233_v13 = vadd.f32 %v3364_v38, %v2145_v9  ;;  %v1288_v9 = vld [vmem:[%s3048_s21 + $0xc0] sm:$0xff] }
 0x259   : > { %v2098_v31 = vpop.f32.mrf.mxu0  ;;  %v1411_v12 = vpop.f32.mrf.mxu1  ;;  %v1686_v58 = vadd.f32 %v1638_v48, %v1456_v7 }
 0x25a   : > { %v2261_v56 = vmax.f32 %v2233_v13, 0.0  ;;  %v1457_v17 = vadd.f32 %v1411_v12, %v1283_v20 }
 0x25b   : > { %v1868_v18 = vpop.f32.mrf.mxu3 }
 0x25c   : > { %v1916_v19 = vadd.f32 %v1868_v18, %v1686_v58  ;;  %2289 = vst [vmem:[%s3048_s21 + $0x88] sm:$0xff] %v2261_v56 }
 0x25e   : > { %v2146_v23 = vadd.f32 %v2098_v31, %v1916_v19 }
 0x260   : > { %v1641_v4 = vpop.f32.mrf.mxu2  ;;  %v2234_v3 = vadd.f32 %v3364_v38, %v2146_v23  ;;  %v1289_v23 = vld [vmem:[%s3048_s21 + $0xc8] sm:$0xff] }
 0x261   : > { %v2101_v24 = vpop.f32.mrf.mxu0  ;;  %v1414_v35 = vpop.f32.mrf.mxu1  ;;  %v1687_v25 = vadd.f32 %v1641_v4, %v1457_v17 }
 0x262   : > { %v2262_v1 = vmax.f32 %v2234_v3, 0.0  ;;  %v1458_v27 = vadd.f32 %v1414_v35, %v1284_v26 }
 0x263   : > { %v1871_v49 = vpop.f32.mrf.mxu3 }
 0x264   : > { %v1917_v30 = vadd.f32 %v1871_v49, %v1687_v25  ;;  %2290 = vst [vmem:[%s3048_s21 + $0x90] sm:$0xff] %v2262_v1 }
 0x266   : > { %v2147_v28 = vadd.f32 %v2101_v24, %v1917_v30 }
 0x268   : > { %v1644_v11 = vpop.f32.mrf.mxu2  ;;  %v2235_v36 = vadd.f32 %v3364_v38, %v2147_v28  ;;  %v1290_v28 = vld [vmem:[%s3048_s21 + $0xd0] sm:$0xff] }
 0x269   : > { %v2104_v32 = vpop.f32.mrf.mxu0  ;;  %v1417_v33 = vpop.f32.mrf.mxu1  ;;  %v1688_v16 = vadd.f32 %v1644_v11, %v1458_v27 }
 0x26a   : > { %v2263_v8 = vmax.f32 %v2235_v36, 0.0  ;;  %v1459_v41 = vadd.f32 %v1417_v33, %v1285_v39 }
 0x26b   : > { %v1874_v47 = vpop.f32.mrf.mxu3 }
 0x26c   : > { %v1918_v37 = vadd.f32 %v1874_v47, %v1688_v16  ;;  %2291 = vst [vmem:[%s3048_s21 + $0x98] sm:$0xff] %v2263_v8 }
 0x26e   : > { %v2148_v10 = vadd.f32 %v2104_v32, %v1918_v37 }
 0x270   : > { %v1647_v40 = vpop.f32.mrf.mxu2  ;;  %v2236_v43 = vadd.f32 %v3364_v38, %v2148_v10  ;;  %v1291_v10 = vld [vmem:[%s3048_s21 + $0xd8] sm:$0xff] }
 0x271   : > { %v2107_v22 = vpop.f32.mrf.mxu0  ;;  %v1420_v46 = vpop.f32.mrf.mxu1  ;;  %v1689_v42 = vadd.f32 %v1647_v40, %v1459_v41 }
 0x272   : > { %v2264_v50 = vmax.f32 %v2236_v43, 0.0  ;;  %v1460_v54 = vadd.f32 %v1420_v46, %v1286_v53 }
 0x273   : > { %v1877_v51 = vpop.f32.mrf.mxu3 }
 0x274   : > { %v1919_v52 = vadd.f32 %v1877_v51, %v1689_v42  ;;  %2292 = vst [vmem:[%s3048_s21 + $0xa0] sm:$0xff] %v2264_v50 }
 0x276   : > { %v2149_v63 = vadd.f32 %v2107_v22, %v1919_v52 }
 0x278   : > { %v1650_v55 = vpop.f32.mrf.mxu2  ;;  %v2237_v62 = vadd.f32 %v3364_v38, %v2149_v63 }
 0x279   : > { %v2110_v14 = vpop.f32.mrf.mxu0  ;;  %v1423_v29 = vpop.f32.mrf.mxu1  ;;  %v1690_v44 = vadd.f32 %v1650_v55, %v1460_v54 }
 0x27a   : > { %v2265_v21 = vmax.f32 %v2237_v62, 0.0  ;;  %v1461_v0 = vadd.f32 %v1423_v29, %v1287_v60 }
 0x27b   : > { %v1880_v57 = vpop.f32.mrf.mxu3 }
 0x27c   : > { %v1920_v15 = vadd.f32 %v1880_v57, %v1690_v44  ;;  %2293 = vst [vmem:[%s3048_s21 + $0xa8] sm:$0xff] %v2265_v21 }
 0x27e   : > { %v2150_v5 = vadd.f32 %v2110_v14, %v1920_v15 }
 0x280   : > { %v1653_v2 = vpop.f32.mrf.mxu2  ;;  %v2238_v61 = vadd.f32 %v3364_v38, %v2150_v5 }
 0x281   : > { %v2113_v34 = vpop.f32.mrf.mxu0  ;;  %v1426_v45 = vpop.f32.mrf.mxu1  ;;  %v1691_v59 = vadd.f32 %v1653_v2, %v1461_v0 }
 0x282   : > { %v2266_v6 = vmax.f32 %v2238_v61, 0.0  ;;  %v1462_v31 = vadd.f32 %v1426_v45, %v1288_v9 }
 0x283   : > { %v1883_v7 = vpop.f32.mrf.mxu3 }
 0x284   : > { %v1921_v48 = vadd.f32 %v1883_v7, %v1691_v59  ;;  %2294 = vst [vmem:[%s3048_s21 + $0xb0] sm:$0xff] %v2266_v6 }
 0x286   : > { %v2151_v58 = vadd.f32 %v2113_v34, %v1921_v48 }
 0x288   : > { %v1656_v12 = vpop.f32.mrf.mxu2  ;;  %v2239_v19 = vadd.f32 %v3364_v38, %v2151_v58 }
 0x289   : > { %v2116_v13 = vpop.f32.mrf.mxu0  ;;  %v1429_v56 = vpop.f32.mrf.mxu1  ;;  %v1692_v18 = vadd.f32 %v1656_v12, %v1462_v31 }
 0x28a   : > { %v2267_v20 = vmax.f32 %v2239_v19, 0.0  ;;  %v1463_v24 = vadd.f32 %v1429_v56, %v1289_v23 }
 0x28b   : > { %v1886_v17 = vpop.f32.mrf.mxu3 }
 0x28c   : > { %v1922_v4 = vadd.f32 %v1886_v17, %v1692_v18  ;;  %2295 = vst [vmem:[%s3048_s21 + $0xb8] sm:$0xff] %v2267_v20 }
 0x28e   : > { %v2152_v25 = vadd.f32 %v2116_v13, %v1922_v4 }
 0x290   : > { %v1659_v35 = vpop.f32.mrf.mxu2  ;;  %v2240_v49 = vadd.f32 %v3364_v38, %v2152_v25 }
 0x291   : > { %v2119_v3 = vpop.f32.mrf.mxu0  ;;  %v1693_v1 = vadd.f32 %v1659_v35, %v1463_v24  ;;  %v1432_v30 = vpop.f32.mrf.mxu1 }
 0x292   : > { %v2268_v26 = vmax.f32 %v2240_v49, 0.0  ;;  %v1464_v32 = vadd.f32 %v1432_v30, %v1290_v28 }
 0x293   : > { %v1889_v27 = vpop.f32.mrf.mxu3 }
 0x294   : > { %v1923_v11 = vadd.f32 %v1889_v27, %v1693_v1  ;;  %2296 = vst [vmem:[%s3048_s21 + $0xc0] sm:$0xff] %v2268_v26 }
 0x296   : > { %v2153_v16 = vadd.f32 %v2119_v3, %v1923_v11 }
 0x298   : > { %v1662_v33 = vpop.f32.mrf.mxu2  ;;  %v2241_v8 = vadd.f32 %v3364_v38, %v2153_v16 }
 0x299   : > { %v1694_v36 = vadd.f32 %v1662_v33, %v1464_v32  ;;  %v2122_v47 = vpop.f32.mrf.mxu0  ;;  %v1435_v39 = vpop.f32.mrf.mxu1 }
 0x29a   : > { %v2269_v37 = vmax.f32 %v2241_v8, 0.0  ;;  %v1465_v22 = vadd.f32 %v1435_v39, %v1291_v10 }
 0x29b   : > { %v1892_v41 = vpop.f32.mrf.mxu3 }
 0x29c   : > { %v1924_v40 = vadd.f32 %v1892_v41, %v1694_v36  ;;  %2297 = vst [vmem:[%s3048_s21 + $0xc8] sm:$0xff] %v2269_v37 }
 0x29e   : > { %v2154_v42 = vadd.f32 %v2122_v47, %v1924_v40 }
 0x2a0   : > { %v1665_v46 = vpop.f32.mrf.mxu2  ;;  %v2242_v50 = vadd.f32 %v3364_v38, %v2154_v42 }
 0x2a1   : > { %v1695_v43 = vadd.f32 %v1665_v46, %v1465_v22  ;;  %v2125_v53 = vpop.f32.mrf.mxu0 }
 0x2a2   : > { %v2270_v51 = vmax.f32 %v2242_v50, 0.0 }
 0x2a3   : > { %v1895_v52 = vpop.f32.mrf.mxu3 }
 0x2a4   : > { %v1925_v54 = vadd.f32 %v1895_v52, %v1695_v43  ;;  %2298 = vst [vmem:[%s3048_s21 + $0xd0] sm:$0xff] %v2270_v51 }
 0x2a6   : > { %v2155_v55 = vadd.f32 %v2125_v53, %v1925_v54 }
 0x2a8   : > { %v2243_v63 = vadd.f32 %v3364_v38, %v2155_v55 }
 0x2aa   : > { %v2271_v14 = vmax.f32 %v2243_v63, 0.0 }
 0x2ac   : > { %2299 = vst [vmem:[%s3048_s21 + $0xd8] sm:$0xff] %v2271_v14 }
 0x2ad PF: > { %s13_s12 = sadd.s32 1, %s2557_s12  }
 0x2ae   : > { %p10_p4 = scmp.ge.s32.totalorder %s13_s12, 4  }
 0x2b0   :  { %12 = sbr.rel (!%p10_p4) target bundleno = 1 (0x1), region = 70 }

// kernel: network_forward.15
= control target key start
LH: loop header
LB: loop body
LE: loop exit
PB: predicated region body
PF: predicated region fallthrough
CT: control target
= control target key end

     0   :  { %s1084_s12 = smov 0   ;;  %s1696_s0 = inlined_call_operand.vmem [shape: f32[2,51,128], index: 0, kind: input, shape index: {}]   ;;  %s1697_s1 = inlined_call_operand.vmem [shape: f32[9,128,128], index: 1, kind: input, shape index: {}]   ;;  %s1698_s2 = inlined_call_operand.vmem [shape: f32[1,128], index: 2, kind: input, shape index: {}]   ;;  %s1699_s3 = inlined_call_operand.vmem [shape: f32[2,35,128], index: 3, kind: output, shape index: {}]  }
   0x1 LB: > { %s860_s13 = sadd.s32 4294967295, %s1062_s12   ;;  %p864_p0 = scmp.ge.s32.totalorder %s1062_s12, 1  ;;  %s1062_s12 = sphi %s1084_s12, %s13_s12  }
   0x2   : > { %p137_p1 = scmp.lt.s32.totalorder %s1062_s12, 3 }
   0x4   : > { %p138_p2 = pnand %p864_p0, %p137_p1 }
   0x5   : > { %p1181_p3 = scmp.lt.s32.totalorder (!%p138_p2), %s860_s13, 1 }
   0x6   : > { %141 = sbr.rel (%p138_p2) target bundleno = 296 (0x128), region = 32 }
   0xb   : > { %v191_v0 = vld [vmem:[%s1697_s1 + $0x78] sm:$0xff]  ;;  %v190_v1 = vld [vmem:[%s1697_s1 + $0x70] sm:$0xff]  ;;  %v189_v3 = vld [vmem:[%s1697_s1 + $0x68] sm:$0xff]  ;;  %s1702_s13 = smov (!%p1181_p3, %s860_s13), 1 }
   0xc   : > { %192 = vmatpush.msra.mxu0 %v191_v0  ;;  %v882_v2 = vld [vmem:[%s1697_s1 + $0xf8] sm:$0xff]  ;;  %v881_v4 = vld [vmem:[%s1697_s1 + $0xf0] sm:$0xff]  ;;  %v880_v6 = vld [vmem:[%s1697_s1 + $0xe8] sm:$0xff]  ;;  %s1045_s28 = smul.u32 56, %s1702_s13 }
   0xd   : > { %256 = vmatpush.msra.mxu1 %v882_v2  ;;  %v898_v5 = vld [vmem:[%s1697_s1 + $0x178] sm:$0xff]  ;;  %v897_v7 = vld [vmem:[%s1697_s1 + $0x170] sm:$0xff]  ;;  %v188_v8 = vld [vmem:[%s1697_s1 + $0x60] sm:$0xff]  ;;  %s1046_s14 = smul.u32 40, %s1702_s13 }
   0xe   : > { %193 = vmatpush.msra.mxu0 %v190_v1  ;;  %325 = vmatpush.msra.mxu2 %v898_v5  ;;  %v896_v9 = vld [vmem:[%s1697_s1 + $0x168] sm:$0xff]  ;;  %v879_v10 = vld [vmem:[%s1697_s1 + $0xe0] sm:$0xff]  ;;  %v187_v11 = vld [vmem:[%s1697_s1 + $0x58] sm:$0xff]  ;;  %s1264_s22 = scalar_lea.vmem %s1696_s0, %s1045_s28 }
   0xf   : > { %257 = vmatpush.msra.mxu1 %v881_v4  ;;  %v895_v12 = vld [vmem:[%s1697_s1 + $0x160] sm:$0xff]  ;;  %v878_v13 = vld [vmem:[%s1697_s1 + $0xd8] sm:$0xff]  ;;  %v186_v14 = vld [vmem:[%s1697_s1 + $0x50] sm:$0xff]  ;;  %s1665_s17 = scalar_lea.vmem %s1699_s3, %s1046_s14 }
  0x10   : > { %194 = vmatpush.msra.mxu0 %v189_v3  ;;  %326 = vmatpush.msra.mxu2 %v897_v7  ;;  %v894_v15 = vld [vmem:[%s1697_s1 + $0x158] sm:$0xff]  ;;  %v877_v16 = vld [vmem:[%s1697_s1 + $0xd0] sm:$0xff]  ;;  %v185_v18 = vld [vmem:[%s1697_s1 + $0x48] sm:$0xff] }
  0x11   : > { %258 = vmatpush.msra.mxu1 %v880_v6  ;;  %v914_v17 = vld [vmem:[%s1697_s1 + $0x1f8] sm:$0xff]  ;;  %v893_v19 = vld [vmem:[%s1697_s1 + $0x150] sm:$0xff]  ;;  %v876_v21 = vld [vmem:[%s1697_s1 + $0xc8] sm:$0xff] }
  0x12   : > { %195 = vmatpush.msra.mxu0 %v188_v8  ;;  %327 = vmatpush.msra.mxu2 %v896_v9  ;;  %v913_v20 = vld [vmem:[%s1697_s1 + $0x1f0] sm:$0xff]  ;;  %v912_v22 = vld [vmem:[%s1697_s1 + $0x1e8] sm:$0xff]  ;;  %v184_v23 = vld [vmem:[%s1697_s1 + $0x40] sm:$0xff] }
  0x13   : > { %259 = vmatpush.msra.mxu1 %v879_v10  ;;  %394 = vmatpush.msra.mxu3 %v914_v17  ;;  %v892_v24 = vld [vmem:[%s1697_s1 + $0x148] sm:$0xff]  ;;  %v875_v25 = vld [vmem:[%s1697_s1 + $0xc0] sm:$0xff]  ;;  %v183_v27 = vld [vmem:[%s1697_s1 + $0x38] sm:$0xff] }
  0x14   : > { %196 = vmatpush.msra.mxu0 %v187_v11  ;;  %328 = vmatpush.msra.mxu2 %v895_v12  ;;  %v911_v26 = vld [vmem:[%s1697_s1 + $0x1e0] sm:$0xff]  ;;  %v874_v29 = vld [vmem:[%s1697_s1 + $0xb8] sm:$0xff]  ;;  %v182_v31 = vld [vmem:[%s1697_s1 + $0x30] sm:$0xff] }
  0x15   : > { %260 = vmatpush.msra.mxu1 %v878_v13  ;;  %395 = vmatpush.msra.mxu3 %v913_v20  ;;  %v891_v28 = vld [vmem:[%s1697_s1 + $0x140] sm:$0xff]  ;;  %v910_v30 = vld [vmem:[%s1697_s1 + $0x1d8] sm:$0xff]  ;;  %v873_v33 = vld [vmem:[%s1697_s1 + $0xb0] sm:$0xff] }
  0x16   : > { %197 = vmatpush.msra.mxu0 %v186_v14  ;;  %329 = vmatpush.msra.mxu2 %v894_v15  ;;  %v890_v32 = vld [vmem:[%s1697_s1 + $0x138] sm:$0xff]  ;;  %v909_v34 = vld [vmem:[%s1697_s1 + $0x1d0] sm:$0xff]  ;;  %v181_v35 = vld [vmem:[%s1697_s1 + $0x28] sm:$0xff] }
  0x17   : > { %261 = vmatpush.msra.mxu1 %v877_v16  ;;  %396 = vmatpush.msra.mxu3 %v912_v22  ;;  %v889_v36 = vld [vmem:[%s1697_s1 + $0x130] sm:$0xff]  ;;  %v872_v37 = vld [vmem:[%s1697_s1 + $0xa8] sm:$0xff]  ;;  %v180_v39 = vld [vmem:[%s1697_s1 + $0x20] sm:$0xff] }
  0x18   : > { %198 = vmatpush.msra.mxu0 %v185_v18  ;;  %330 = vmatpush.msra.mxu2 %v893_v19  ;;  %v908_v38 = vld [vmem:[%s1697_s1 + $0x1c8] sm:$0xff]  ;;  %v871_v41 = vld [vmem:[%s1697_s1 + $0xa0] sm:$0xff]  ;;  %v179_v43 = vld [vmem:[%s1697_s1 + $0x18] sm:$0xff] }
  0x19   : > { %262 = vmatpush.msra.mxu1 %v876_v21  ;;  %397 = vmatpush.msra.mxu3 %v911_v26  ;;  %v888_v40 = vld [vmem:[%s1697_s1 + $0x128] sm:$0xff]  ;;  %v907_v42 = vld [vmem:[%s1697_s1 + $0x1c0] sm:$0xff]  ;;  %v870_v45 = vld [vmem:[%s1697_s1 + $0x98] sm:$0xff] }
  0x1a   : > { %199 = vmatpush.msra.mxu0 %v184_v23  ;;  %331 = vmatpush.msra.mxu2 %v892_v24  ;;  %v887_v44 = vld [vmem:[%s1697_s1 + $0x120] sm:$0xff]  ;;  %v906_v46 = vld [vmem:[%s1697_s1 + $0x1b8] sm:$0xff]  ;;  %v178_v47 = vld [vmem:[%s1697_s1 + $0x10] sm:$0xff] }
  0x1b   : > { %263 = vmatpush.msra.mxu1 %v875_v25  ;;  %398 = vmatpush.msra.mxu3 %v910_v30  ;;  %v886_v48 = vld [vmem:[%s1697_s1 + $0x118] sm:$0xff]  ;;  %v869_v49 = vld [vmem:[%s1697_s1 + $0x90] sm:$0xff]  ;;  %v177_v51 = vld [vmem:[%s1697_s1 + $0x8] sm:$0xff] }
  0x1c   : > { %200 = vmatpush.msra.mxu0 %v183_v27  ;;  %332 = vmatpush.msra.mxu2 %v891_v28  ;;  %v905_v50 = vld [vmem:[%s1697_s1 + $0x1b0] sm:$0xff]  ;;  %v868_v53 = vld [vmem:[%s1697_s1 + $0x88] sm:$0xff]  ;;  %v176_v55 = vld [vmem:[%s1697_s1] sm:$0xff] }
  0x1d   : > { %264 = vmatpush.msra.mxu1 %v874_v29  ;;  %399 = vmatpush.msra.mxu3 %v909_v34  ;;  %v885_v52 = vld [vmem:[%s1697_s1 + $0x110] sm:$0xff]  ;;  %v904_v54 = vld [vmem:[%s1697_s1 + $0x1a8] sm:$0xff]  ;;  %v171_v57 = vld [vmem:[%s1264_s22] sm:$0xff] }
  0x1e   : > { %201 = vmatpush.msra.mxu0 %v182_v31  ;;  %333 = vmatpush.msra.mxu2 %v890_v32  ;;  %v884_v56 = vld [vmem:[%s1697_s1 + $0x108] sm:$0xff]  ;;  %v867_v58 = vld [vmem:[%s1697_s1 + $0x80] sm:$0xff]  ;;  %v930_v59 = vld [vmem:[%s1697_s1 + $0x278] sm:$0xff] }
  0x1f   : > { %265 = vmatpush.msra.mxu1 %v873_v33  ;;  %400 = vmatpush.msra.mxu3 %v908_v38  ;;  %v234_v60 = vld [vmem:[%s1264_s22 + $0x1] sm:$0xff]  ;;  %v946_v62 = vld [vmem:[%s1697_s1 + $0x2f8] sm:$0xff]  ;;  %v929_v63 = vld [vmem:[%s1697_s1 + $0x270] sm:$0xff] }
  0x20   : > { %202 = vmatpush.msra.mxu0 %v181_v35  ;;  %334 = vmatpush.msra.mxu2 %v889_v36  ;;  %v883_v61 = vld [vmem:[%s1697_s1 + $0x100] sm:$0xff]  ;;  %v945_v2 = vld [vmem:[%s1697_s1 + $0x2f0] sm:$0xff]  ;;  %v928_v3 = vld [vmem:[%s1697_s1 + $0x268] sm:$0xff] }
  0x21   : > { %266 = vmatpush.msra.mxu1 %v872_v37  ;;  %401 = vmatpush.msra.mxu3 %v907_v42  ;;  %v303_v0 = vld [vmem:[%s1264_s22 + $0x2] sm:$0xff]  ;;  %v962_v4 = vld [vmem:[%s1697_s1 + $0x378] sm:$0xff]  ;;  %v961_v8 = vld [vmem:[%s1697_s1 + $0x370] sm:$0xff] }
  0x22   : > { %203 = vmatpush.msra.mxu0 %v180_v39  ;;  %335 = vmatpush.msra.mxu2 %v888_v40  ;;  %v903_v1 = vld [vmem:[%s1697_s1 + $0x1a0] sm:$0xff]  ;;  %v902_v5 = vld [vmem:[%s1697_s1 + $0x198] sm:$0xff]  ;;  %v944_v6 = vld [vmem:[%s1697_s1 + $0x2e8] sm:$0xff] }
  0x23   : > { %267 = vmatpush.msra.mxu1 %v871_v41  ;;  %402 = vmatpush.msra.mxu3 %v906_v46  ;;  %v927_v7 = vld [vmem:[%s1697_s1 + $0x260] sm:$0xff]  ;;  %v1324_v9 = vld [vmem:[%s1264_s22 + $0x8] sm:$0xff]  ;;  %v901_v10 = vld [vmem:[%s1697_s1 + $0x190] sm:$0xff] }
  0x24   : > { %204 = vmatpush.msra.mxu0 %v179_v43  ;;  %336 = vmatpush.msra.mxu2 %v887_v44  ;;  %v926_v11 = vld [vmem:[%s1697_s1 + $0x258] sm:$0xff]  ;;  %v1333_v12 = vld [vmem:[%s1264_s22 + $0x9] sm:$0xff]  ;;  %v943_v13 = vld [vmem:[%s1697_s1 + $0x2e0] sm:$0xff] }
  0x25   : > { %268 = vmatpush.msra.mxu1 %v870_v45  ;;  %403 = vmatpush.msra.mxu3 %v905_v50  ;;  %v900_v14 = vld [vmem:[%s1697_s1 + $0x188] sm:$0xff]  ;;  %v925_v15 = vld [vmem:[%s1697_s1 + $0x250] sm:$0xff]  ;;  %v942_v18 = vld [vmem:[%s1697_s1 + $0x2d8] sm:$0xff] }
  0x26   : > { %205 = vmatpush.msra.mxu0 %v178_v47  ;;  %337 = vmatpush.msra.mxu2 %v886_v48  ;;  %v304_v16 = vld [vmem:[%s1264_s22 + $0xa] sm:$0xff]  ;;  %v899_v20 = vld [vmem:[%s1697_s1 + $0x180] sm:$0xff]  ;;  %v958_v26 = vld [vmem:[%s1697_s1 + $0x358] sm:$0xff] }
  0x27   : > { %269 = vmatpush.msra.mxu1 %v869_v49  ;;  %404 = vmatpush.msra.mxu3 %v904_v54  ;;  %v960_v17 = vld [vmem:[%s1697_s1 + $0x368] sm:$0xff]  ;;  %v959_v22 = vld [vmem:[%s1697_s1 + $0x360] sm:$0xff]  ;;  %v941_v24 = vld [vmem:[%s1697_s1 + $0x2d0] sm:$0xff] }
  0x28   : > { %206 = vmatpush.msra.mxu0 %v177_v51  ;;  %338 = vmatpush.msra.mxu2 %v885_v52  ;;  %v924_v19 = vld [vmem:[%s1697_s1 + $0x248] sm:$0xff]  ;;  %v923_v23 = vld [vmem:[%s1697_s1 + $0x240] sm:$0xff]  ;;  %v1370_v25 = vld [vmem:[%s1264_s22 + $0x10] sm:$0xff] }
  0x29   : > { %270 = vmatpush.msra.mxu1 %v868_v53  ;;  %405 = vmatpush.msra.mxu3 %v903_v1  ;;  %v372_v21 = vld [vmem:[%s1264_s22 + $0x7] sm:$0xff]  ;;  %v922_v27 = vld [vmem:[%s1697_s1 + $0x238] sm:$0xff]  ;;  %v921_v31 = vld [vmem:[%s1697_s1 + $0x230] sm:$0xff] }
  0x2a   : > { %207 = vmatpush.msra.mxu0 %v176_v55  ;;  %339 = vmatpush.msra.mxu2 %v884_v56  ;;  %v1379_v28 = vld [vmem:[%s1264_s22 + $0x11] sm:$0xff]  ;;  %v940_v30 = vld [vmem:[%s1697_s1 + $0x2c8] sm:$0xff]  ;;  %v939_v36 = vld [vmem:[%s1697_s1 + $0x2c0] sm:$0xff] }
  0x2b   : > { %208 = vmatmul.f32.vlgmr.msra.gmra.mxu0 %v171_v57  ;;  %271 = vmatpush.msra.mxu1 %v867_v58  ;;  %v978_v29 = vld [vmem:[%s1697_s1 + $0x3f8] sm:$0xff]  ;;  %v957_v33 = vld [vmem:[%s1697_s1 + $0x350] sm:$0xff]  ;;  %v920_v35 = vld [vmem:[%s1697_s1 + $0x228] sm:$0xff] }
  0x2c   : > { %463 = vmatpush.msrb.mxu0 %v930_v59  ;;  %272 = vmatmul.f32.vlgmr.msra.gmra.mxu1 %v234_v60  ;;  %v305_v32 = vld [vmem:[%s1264_s22 + $0x12] sm:$0xff]  ;;  %v956_v37 = vld [vmem:[%s1697_s1 + $0x348] sm:$0xff]  ;;  %v919_v39 = vld [vmem:[%s1697_s1 + $0x220] sm:$0xff] }
  0x2d   : > { %340 = vmatpush.msra.mxu2 %v883_v61  ;;  %532 = vmatpush.msrb.mxu1 %v946_v62  ;;  %v977_v34 = vld [vmem:[%s1697_s1 + $0x3f0] sm:$0xff]  ;;  %v976_v38 = vld [vmem:[%s1697_s1 + $0x3e8] sm:$0xff]  ;;  %v1418_v41 = vld [vmem:[%s1264_s22 + $0x18] sm:$0xff] }
  0x2e   : > { %464 = vmatpush.msrb.mxu0 %v929_v63  ;;  %341 = vmatmul.f32.vlgmr.msra.gmra.mxu2 %v303_v0  ;;  %v1415_v40 = vld [vmem:[%s1264_s22 + $0xf] sm:$0xff]  ;;  %v938_v42 = vld [vmem:[%s1697_s1 + $0x2b8] sm:$0xff]  ;;  %v955_v45 = vld [vmem:[%s1697_s1 + $0x340] sm:$0xff] }
  0x2f   : > { %533 = vmatpush.msrb.mxu1 %v945_v2  ;;  %601 = vmatpush.msrb.mxu2 %v962_v4  ;;  %v918_v43 = vld [vmem:[%s1697_s1 + $0x218] sm:$0xff]  ;;  %v975_v46 = vld [vmem:[%s1697_s1 + $0x3e0] sm:$0xff]  ;;  %v917_v47 = vld [vmem:[%s1697_s1 + $0x210] sm:$0xff] }
  0x30   : > { %465 = vmatpush.msrb.mxu0 %v928_v3  ;;  %406 = vmatpush.msra.mxu3 %v902_v5  ;;  %v1427_v44 = vld [vmem:[%s1264_s22 + $0x19] sm:$0xff]  ;;  %v937_v48 = vld [vmem:[%s1697_s1 + $0x2b0] sm:$0xff]  ;;  %v916_v52 = vld [vmem:[%s1697_s1 + $0x208] sm:$0xff] }
  0x31   : > { %534 = vmatpush.msrb.mxu1 %v944_v6  ;;  %602 = vmatpush.msrb.mxu2 %v961_v8  ;;  %v306_v49 = vld [vmem:[%s1264_s22 + $0x1a] sm:$0xff]  ;;  %v936_v53 = vld [vmem:[%s1697_s1 + $0x2a8] sm:$0xff]  ;;  %v973_v54 = vld [vmem:[%s1697_s1 + $0x3d0] sm:$0xff] }
  0x32   : > { %466 = vmatpush.msrb.mxu0 %v927_v7  ;;  %407 = vmatpush.msra.mxu3 %v901_v10  ;;  %v974_v50 = vld [vmem:[%s1697_s1 + $0x3d8] sm:$0xff]  ;;  %v953_v55 = vld [vmem:[%s1697_s1 + $0x330] sm:$0xff]  ;;  %v175_v57 = vld [vmem:[%s1264_s22 + $0x20] sm:$0x7] }
  0x33   : > { %211 = vmatmul.f32.gmra.mxu0 %v1324_v9  ;;  %535 = vmatpush.msrb.mxu1 %v943_v13  ;;  %v954_v51 = vld [vmem:[%s1697_s1 + $0x338] sm:$0xff]  ;;  %v935_v58 = vld [vmem:[%s1697_s1 + $0x2a0] sm:$0xff]  ;;  %v952_v60 = vld [vmem:[%s1697_s1 + $0x328] sm:$0xff] }
  0x34   : > { %467 = vmatpush.msrb.mxu0 %v926_v11  ;;  %275 = vmatmul.f32.gmra.mxu1 %v1333_v12  ;;  %v1464_v56 = vld [vmem:[%s1264_s22 + $0x17] sm:$0xff]  ;;  %v915_v59 = vld [vmem:[%s1697_s1 + $0x200] sm:$0xff]  ;;  %v972_v61 = vld [vmem:[%s1697_s1 + $0x3c8] sm:$0xff] }
  0x35   : > { %408 = vmatpush.msra.mxu3 %v900_v14  ;;  %603 = vmatpush.msrb.mxu2 %v960_v17  ;;  %v238_v62 = vld [vmem:[%s1264_s22 + $0x21] sm:$0x7]  ;;  %v934_v63 = vld [vmem:[%s1697_s1 + $0x298] sm:$0xff]  ;;  %v933_v3 = vld [vmem:[%s1697_s1 + $0x290] sm:$0xff] }
  0x36   : > { %468 = vmatpush.msrb.mxu0 %v925_v15  ;;  %344 = vmatmul.f32.gmra.mxu2 %v304_v16  ;;  %v951_v0 = vld [vmem:[%s1697_s1 + $0x320] sm:$0xff]  ;;  %v950_v4 = vld [vmem:[%s1697_s1 + $0x318] sm:$0xff]  ;;  %v932_v7 = vld [vmem:[%s1697_s1 + $0x288] sm:$0xff] }
  0x37   : > { %536 = vmatpush.msrb.mxu1 %v942_v18  ;;  %409 = vmatpush.msra.mxu3 %v899_v20  ;;  %v307_v1 = vld [vmem:[%s1264_s22 + $0x22] sm:$0x7]  ;;  %v970_v5 = vld [vmem:[%s1697_s1 + $0x3b8] sm:$0xff]  ;;  %v949_v8 = vld [vmem:[%s1697_s1 + $0x310] sm:$0xff] }
  0x38   : > { %469 = vmatpush.msrb.mxu0 %v924_v19  ;;  %410 = vmatmul.f32.vlgmr.msra.gmra.mxu3 %v372_v21  ;;  %v971_v2 = vld [vmem:[%s1697_s1 + $0x3c0] sm:$0xff]  ;;  %v1503_v6 = vld [vmem:[%s1697_s1 + $0x478] sm:$0xff]  ;;  %v948_v13 = vld [vmem:[%s1697_s1 + $0x308] sm:$0xff] }
  0x39   : > { %604 = vmatpush.msrb.mxu2 %v959_v22  ;;  %537 = vmatpush.msrb.mxu1 %v941_v24  ;;  %v1512_v10 = vld [vmem:[%s1264_s22 + $0x1f] sm:$0xff]  ;;  %v969_v14 = vld [vmem:[%s1697_s1 + $0x3b0] sm:$0xff]  ;;  %v968_v17 = vld [vmem:[%s1697_s1 + $0x3a8] sm:$0xff] }
  0x3a   : > { %470 = vmatpush.msrb.mxu0 %v923_v23  ;;  %670 = vmatpush.msrb.mxu3 %v978_v29  ;;  %v931_v11 = vld [vmem:[%s1697_s1 + $0x280] sm:$0xff]  ;;  %v993_v16 = vld [vmem:[%s1697_s1 + $0x470] sm:$0xff]  ;;  %v966_v21 = vld [vmem:[%s1697_s1 + $0x398] sm:$0xff] }
  0x3b   : > { %214 = vmatmul.f32.gmra.mxu0 %v1370_v25  ;;  %605 = vmatpush.msrb.mxu2 %v958_v26  ;;  %v947_v15 = vld [vmem:[%s1697_s1 + $0x300] sm:$0xff]  ;;  %v579_v18 = vld [vmem:[%s1264_s22 + $0xe] sm:$0xff]  ;;  %v1556_v22 = vld [vmem:[%s1697_s1 + $0x458] sm:$0xff] }
  0x3c   : > { %471 = vmatpush.msrb.mxu0 %v922_v27  ;;  %278 = vmatmul.f32.gmra.mxu1 %v1379_v28  ;;  %v967_v19 = vld [vmem:[%s1697_s1 + $0x3a0] sm:$0xff]  ;;  %v965_v23 = vld [vmem:[%s1697_s1 + $0x390] sm:$0xff]  ;;  %v964_v27 = vld [vmem:[%s1697_s1 + $0x388] sm:$0xff] }
  0x3d   : > { %538 = vmatpush.msrb.mxu1 %v940_v30  ;;  %606 = vmatpush.msrb.mxu2 %v957_v33  ;;  %v1546_v20 = vld [vmem:[%s1697_s1 + $0x460] sm:$0xff]  ;;  %v1567_v24 = vld [vmem:[%s1697_s1 + $0x450] sm:$0xff]  ;;  %v1578_v29 = vld [vmem:[%s1697_s1 + $0x448] sm:$0xff] }
  0x3e   : > { %472 = vmatpush.msrb.mxu0 %v921_v31  ;;  %347 = vmatmul.f32.gmra.mxu2 %v305_v32  ;;  %v580_v26 = vld [vmem:[%s1264_s22 + $0x16] sm:$0xff]  ;;  %v1587_v30 = vld [vmem:[%s1697_s1 + $0x440] sm:$0xff] }
  0x3f   : > { %671 = vmatpush.msrb.mxu3 %v977_v34  ;;  %539 = vmatpush.msrb.mxu1 %v939_v36  ;;  %v1595_v31 = vld [vmem:[%s1697_s1 + $0x438] sm:$0xff]  ;;  %v1607_v33 = vld [vmem:[%s1697_s1 + $0x430] sm:$0xff]  ;;  %v984_v34 = vld [vmem:[%s1697_s1 + $0x428] sm:$0xff] }
  0x40   : > { %473 = vmatpush.msrb.mxu0 %v920_v35  ;;  %607 = vmatpush.msrb.mxu2 %v956_v37  ;;  %v581_v32 = vld [vmem:[%s1264_s22 + $0x1e] sm:$0xff] }
  0x41   : > { %672 = vmatpush.msrb.mxu3 %v976_v38  ;;  %540 = vmatpush.msrb.mxu1 %v938_v42  ;;  %v444_v35 = vld [vmem:[%s1264_s22 + $0x20] sm:$0xff]  ;;  %v982_v38 = vld [vmem:[%s1697_s1 + $0x418] sm:$0xff]  ;;  %v445_v42 = vld [vmem:[%s1264_s22 + $0x28] sm:$0x7] }
  0x42   : > { %474 = vmatpush.msrb.mxu0 %v919_v39  ;;  %413 = vmatmul.f32.gmra.mxu3 %v1415_v40  ;;  %v983_v36 = vld [vmem:[%s1697_s1 + $0x420] sm:$0xff] }
  0x43   : > { %217 = vmatmul.f32.gmra.mxu0 %v1418_v41  ;;  %608 = vmatpush.msrb.mxu2 %v955_v45  ;;  %v513_v37 = vld [vmem:[%s1264_s22 + $0x21] sm:$0xff]  ;;  %v514_v45 = vld [vmem:[%s1264_s22 + $0x29] sm:$0x7] }
  0x44   : > { %475 = vmatpush.msrb.mxu0 %v918_v43  ;;  %281 = vmatmul.f32.gmra.mxu1 %v1427_v44  ;;  %v582_v39 = vld [vmem:[%s1264_s22 + $0x26] sm:$0xff] }
  0x45   : > { %673 = vmatpush.msrb.mxu3 %v975_v46  ;;  %541 = vmatpush.msrb.mxu1 %v937_v48  ;;  %v980_v43 = vld [vmem:[%s1697_s1 + $0x408] sm:$0xff] }
  0x46   : > { %476 = vmatpush.msrb.mxu0 %v917_v47  ;;  %350 = vmatmul.f32.gmra.mxu2 %v306_v49  ;;  %v583_v46 = vld [vmem:[%s1264_s22 + $0x2e] sm:$0x7] }
  0x47   : > { %674 = vmatpush.msrb.mxu3 %v974_v50  ;;  %609 = vmatpush.msrb.mxu2 %v954_v51  ;;  %v651_v47 = vld [vmem:[%s1264_s22 + $0x27] sm:$0xff]  ;;  %v721_v49 = vld [vmem:[%s1264_s22 + $0x30] sm:$0x7] }
  0x48   : > { %477 = vmatpush.msrb.mxu0 %v916_v52  ;;  %542 = vmatpush.msrb.mxu1 %v936_v53  ;;  %v720_v48 = vld [vmem:[%s1264_s22 + $0x28] sm:$0xff] }
  0x49   : > { %675 = vmatpush.msrb.mxu3 %v973_v54  ;;  %610 = vmatpush.msrb.mxu2 %v953_v55 }
  0x4a   : > { %416 = vmatmul.f32.gmra.mxu3 %v1464_v56  ;;  %543 = vmatpush.msrb.mxu1 %v935_v58 }
  0x4b   : > { %220 = vmatmul.f32.gmra.mxu0 %v175_v57  ;;  %611 = vmatpush.msrb.mxu2 %v952_v60 }
  0x4c   : > { %478 = vmatpush.msrb.mxu0 %v915_v59  ;;  %676 = vmatpush.msrb.mxu3 %v972_v61 }
  0x4d   : > { %284 = vmatmul.f32.gmra.mxu1 %v238_v62  ;;  %612 = vmatpush.msrb.mxu2 %v951_v0 }
  0x4e   : > { %544 = vmatpush.msrb.mxu1 %v934_v63  ;;  %353 = vmatmul.f32.gmra.mxu2 %v307_v1 }
  0x4f   : > { %677 = vmatpush.msrb.mxu3 %v971_v2  ;;  %613 = vmatpush.msrb.mxu2 %v950_v4 }
  0x50   : > { %545 = vmatpush.msrb.mxu1 %v933_v3  ;;  %739 = vmatpush.msra.mxu0 %v1503_v6 }
  0x51   : > { %678 = vmatpush.msrb.mxu3 %v970_v5  ;;  %614 = vmatpush.msrb.mxu2 %v949_v8 }
  0x52   : > { %546 = vmatpush.msrb.mxu1 %v932_v7  ;;  %419 = vmatmul.f32.gmra.mxu3 %v1512_v10 }
  0x53   : > { %479 = vmatmul.f32.vlgmr.msrb.gmra.mxu0 %v1324_v9  ;;  %615 = vmatpush.msrb.mxu2 %v948_v13  ;;  %v992_v9 = vld [vmem:[%s1697_s1 + $0x468] sm:$0xff] }
  0x54   : > { %547 = vmatpush.msrb.mxu1 %v931_v11  ;;  %679 = vmatpush.msrb.mxu3 %v969_v14 }
  0x55   : > { %548 = vmatmul.f32.vlgmr.msrb.gmra.mxu1 %v1333_v12  ;;  %616 = vmatpush.msrb.mxu2 %v947_v15  ;;  %v376_v12 = vld [vmem:[%s1264_s22 + $0x27] sm:$0x7] }
  0x56   : > { %740 = vmatpush.msra.mxu0 %v993_v16  ;;  %680 = vmatpush.msrb.mxu3 %v968_v17 }
  0x57   : > { %617 = vmatmul.f32.vlgmr.msrb.gmra.mxu2 %v579_v18  ;;  %997 = vmatpush.msra.mxu1 %v1503_v6 }
  0x58   : > { %741 = vmatpush.msra.mxu0 %v992_v9  ;;  %681 = vmatpush.msrb.mxu3 %v967_v19 }
  0x59   : > { %998 = vmatpush.msra.mxu2 %v1503_v6  ;;  %1000 = vmatpush.msra.mxu1 %v993_v16 }
  0x5a   : > { %742 = vmatpush.msra.mxu0 %v1546_v20  ;;  %422 = vmatmul.f32.gmra.mxu3 %v376_v12 }
  0x5b   : > { %482 = vmatmul.f32.gmra.mxu0 %v1370_v25  ;;  %682 = vmatpush.msrb.mxu3 %v966_v21 }
  0x5c   : > { %743 = vmatpush.msra.mxu0 %v1556_v22  ;;  %1001 = vmatpush.msra.mxu2 %v993_v16 }
  0x5d   : > { %551 = vmatmul.f32.gmra.mxu1 %v1379_v28  ;;  %683 = vmatpush.msrb.mxu3 %v965_v23  ;;  %v963_v28 = vld [vmem:[%s1697_s1 + $0x380] sm:$0xff] }
  0x5e   : > { %744 = vmatpush.msra.mxu0 %v1567_v24  ;;  %1003 = vmatpush.msra.mxu1 %v992_v9 }
  0x5f   : > { %620 = vmatmul.f32.gmra.mxu2 %v580_v26  ;;  %684 = vmatpush.msrb.mxu3 %v964_v27 }
  0x60   : > { %745 = vmatpush.msra.mxu0 %v1578_v29  ;;  %1004 = vmatpush.msra.mxu2 %v992_v9 }
  0x61   : > { %1006 = vmatpush.msra.mxu1 %v1546_v20  ;;  %685 = vmatpush.msrb.mxu3 %v963_v28 }
  0x62   : > { %746 = vmatpush.msra.mxu0 %v1587_v30  ;;  %686 = vmatmul.f32.vlgmr.msrb.gmra.mxu3 %v1415_v40  ;;  %v981_v40 = vld [vmem:[%s1697_s1 + $0x410] sm:$0xff] }
  0x63   : > { %485 = vmatmul.f32.gmra.mxu0 %v1418_v41  ;;  %1007 = vmatpush.msra.mxu2 %v1546_v20 }
  0x64   : > { %1009 = vmatpush.msra.mxu1 %v1556_v22  ;;  %747 = vmatpush.msra.mxu0 %v1595_v31 }
  0x65   : > { %554 = vmatmul.f32.gmra.mxu1 %v1427_v44  ;;  %999 = vmatpush.msra.mxu3 %v1503_v6  ;;  %v979_v44 = vld [vmem:[%s1697_s1 + $0x400] sm:$0xff] }
  0x66   : > { %1010 = vmatpush.msra.mxu2 %v1556_v22  ;;  %1012 = vmatpush.msra.mxu1 %v1567_v24 }
  0x67   : > { %623 = vmatmul.f32.gmra.mxu2 %v581_v32  ;;  %748 = vmatpush.msra.mxu0 %v1607_v33 }
  0x68   : > { %1002 = vmatpush.msra.mxu3 %v993_v16  ;;  %1013 = vmatpush.msra.mxu2 %v1567_v24 }
  0x69   : > { %1015 = vmatpush.msra.mxu1 %v1578_v29  ;;  %749 = vmatpush.msra.mxu0 %v984_v34 }
  0x6a   : > { %1005 = vmatpush.msra.mxu3 %v992_v9  ;;  %1016 = vmatpush.msra.mxu2 %v1578_v29 }
  0x6b   : > { %488 = vmatmul.f32.gmra.mxu0 %v444_v35  ;;  %1018 = vmatpush.msra.mxu1 %v1587_v30 }
  0x6c   : > { %750 = vmatpush.msra.mxu0 %v983_v36  ;;  %689 = vmatmul.f32.gmra.mxu3 %v1464_v56 }
  0x6d   : > { %557 = vmatmul.f32.gmra.mxu1 %v513_v37  ;;  %1019 = vmatpush.msra.mxu2 %v1587_v30 }
  0x6e   : > { %1021 = vmatpush.msra.mxu1 %v1595_v31  ;;  %751 = vmatpush.msra.mxu0 %v982_v38 }
  0x6f   : > { %626 = vmatmul.f32.gmra.mxu2 %v582_v39  ;;  %1008 = vmatpush.msra.mxu3 %v1546_v20 }
  0x70   : > { %1022 = vmatpush.msra.mxu2 %v1595_v31  ;;  %1024 = vmatpush.msra.mxu1 %v1607_v33 }
  0x71   : > { %752 = vmatpush.msra.mxu0 %v981_v40  ;;  %1011 = vmatpush.msra.mxu3 %v1556_v22 }
  0x72   : > { %1025 = vmatpush.msra.mxu2 %v1607_v33  ;;  %1027 = vmatpush.msra.mxu1 %v984_v34 }
  0x73   : > { %491 = vmatmul.f32.gmra.mxu0 %v445_v42  ;;  %1014 = vmatpush.msra.mxu3 %v1567_v24 }
  0x74   : > { %753 = vmatpush.msra.mxu0 %v980_v43  ;;  %1028 = vmatpush.msra.mxu2 %v984_v34 }
  0x75   : > { %1030 = vmatpush.msra.mxu1 %v983_v36  ;;  %692 = vmatmul.f32.gmra.mxu3 %v1512_v10 }
  0x76   : > { %754 = vmatpush.msra.mxu0 %v979_v44  ;;  %560 = vmatmul.f32.gmra.mxu1 %v514_v45 }
  0x77   : > { %1031 = vmatpush.msra.mxu2 %v983_v36  ;;  %1017 = vmatpush.msra.mxu3 %v1578_v29 }
  0x78   : > { %1033 = vmatpush.msra.mxu1 %v982_v38  ;;  %629 = vmatmul.f32.gmra.mxu2 %v583_v46 }
  0x79   : > { %1034 = vmatpush.msra.mxu2 %v982_v38  ;;  %1020 = vmatpush.msra.mxu3 %v1587_v30 }
  0x7a   : > { %1036 = vmatpush.msra.mxu1 %v981_v40 }
  0x7b   : > { %755 = vmatmul.f32.vlgmr.msra.gmra.mxu0 %v1370_v25  ;;  %1037 = vmatpush.msra.mxu2 %v981_v40  ;;  %v652_v25 = vld [vmem:[%s1264_s22 + $0x2f] sm:$0x7] }
  0x7c   : > { %1039 = vmatpush.msra.mxu1 %v980_v43  ;;  %1023 = vmatpush.msra.mxu3 %v1595_v31 }
  0x7d   : > { %1040 = vmatpush.msra.mxu2 %v980_v43  ;;  %695 = vmatmul.f32.gmra.mxu3 %v651_v47  ;;  %v1055_v47 = vld [vmem:[%s1698_s2] ss:$0 sm:$0xff] }
  0x7e   : > { %1042 = vmatpush.msra.mxu1 %v979_v44  ;;  %1026 = vmatpush.msra.mxu3 %v1607_v33 }
  0x7f   : > { %758 = vmatmul.f32.vlgmr.msra.gmra.mxu1 %v1418_v41  ;;  %1043 = vmatpush.msra.mxu2 %v979_v44 }
  0x80   : > { %761 = vmatmul.f32.vlgmr.msra.gmra.mxu2 %v444_v35  ;;  %1029 = vmatpush.msra.mxu3 %v984_v34 }
  0x82   : > { %1032 = vmatpush.msra.mxu3 %v983_v36 }
  0x84   : > { %1035 = vmatpush.msra.mxu3 %v982_v38 }
  0x85   : > { %698 = vmatmul.f32.gmra.mxu3 %v652_v25 }
  0x86   : > { %1038 = vmatpush.msra.mxu3 %v981_v40 }
  0x88   : > { %764 = vmatmul.f32.gmra.mxu2 %v720_v48  ;;  %1041 = vmatpush.msra.mxu3 %v980_v43 }
  0x8a   : > { %1044 = vmatpush.msra.mxu3 %v979_v44 }
  0x8d   : > { %767 = vmatmul.f32.vlgmr.msra.gmra.mxu3 %v721_v49 }
  0xa8   : > { %v209_v50 = vpop.f32.mrf.mxu0 }
  0xa9   : > { %v273_v51 = vpop.f32.mrf.mxu1 }
  0xaa   : > { %v288_v19 = vadd.f32 %v273_v51, %v209_v50 }
  0xb0   : > { %v212_v41 = vpop.f32.mrf.mxu0 }
  0xb1   : > { %v276_v52 = vpop.f32.mrf.mxu1  ;;  %v342_v53 = vpop.f32.mrf.mxu2 }
  0xb2   : > { %v357_v21 = vadd.f32 %v342_v53, %v288_v19  ;;  %v289_v23 = vadd.f32 %v276_v52, %v212_v41 }
  0xb8   : > { %v215_v54 = vpop.f32.mrf.mxu0 }
  0xb9   : > { %v279_v55 = vpop.f32.mrf.mxu1  ;;  %v345_v56 = vpop.f32.mrf.mxu2 }
  0xba   : > { %v358_v27 = vadd.f32 %v345_v56, %v289_v23  ;;  %v290_v34 = vadd.f32 %v279_v55, %v215_v54 }
  0xbb   : > { %v411_v57 = vpop.f32.mrf.mxu3 }
  0xbc   : > { %v426_v29 = vadd.f32 %v411_v57, %v357_v21 }
  0xc0   : > { %v218_v58 = vpop.f32.mrf.mxu0 }
  0xc1   : > { %v282_v59 = vpop.f32.mrf.mxu1  ;;  %v348_v60 = vpop.f32.mrf.mxu2 }
  0xc2   : > { %v359_v39 = vadd.f32 %v348_v60, %v290_v34  ;;  %v291_v48 = vadd.f32 %v282_v59, %v218_v58 }
  0xc5   : > { %v414_v61 = vpop.f32.mrf.mxu3 }
  0xc6   : > { %v427_v30 = vadd.f32 %v414_v61, %v358_v27 }
  0xc8   : > { %v221_v62 = vpop.f32.mrf.mxu0 }
  0xc9   : > { %228 = vst [vmem:[%s1665_s17 + $0x20] sm:$0x7] %v221_v62  ;;  %v351_v0 = vpop.f32.mrf.mxu2 }
  0xca   : > { %v285_v63 = vpop.f32.mrf.mxu1  ;;  %v360_v52 = vadd.f32 %v351_v0, %v291_v48 }
  0xcd   : > { %v417_v1 = vpop.f32.mrf.mxu3 }
  0xce   : > { %v428_v44 = vadd.f32 %v417_v1, %v359_v39 }
  0xd0   : > { %v233_v2 = vld [vmem:[%s1665_s17 + $0x20] sm:$0x7]  ;;  %v480_v3 = vpop.f32.mrf.mxu0 }
  0xd1   : > { %v292_v4 = vadd.f32 %v285_v63, %v233_v2  ;;  %v354_v5 = vpop.f32.mrf.mxu2  ;;  %v495_v28 = vadd.f32 %v480_v3, %v426_v29 }
  0xd2   : > { %v549_v6 = vpop.f32.mrf.mxu1 }
  0xd3   : > { %297 = vst [vmem:[%s1665_s17 + $0x20] sm:$0x7] %v292_v4  ;;  %v564_v36 = vadd.f32 %v549_v6, %v495_v28 }
  0xd5   : > { %v420_v7 = vpop.f32.mrf.mxu3 }
  0xd6   : > { %v429_v63 = vadd.f32 %v420_v7, %v360_v52 }
  0xd8   : > { %v483_v8 = vpop.f32.mrf.mxu0 }
  0xd9   : > { %v496_v35 = vadd.f32 %v483_v8, %v427_v30 }
  0xda   : > { %v302_v10 = vld [vmem:[%s1665_s17 + $0x20] sm:$0x7]  ;;  %v552_v11 = vpop.f32.mrf.mxu1  ;;  %v618_v13 = vpop.f32.mrf.mxu2 }
  0xdb   : > { %v361_v14 = vadd.f32 %v354_v5, %v302_v10  ;;  %v633_v40 = vadd.f32 %v618_v13, %v564_v36  ;;  %v565_v43 = vadd.f32 %v552_v11, %v496_v35 }
  0xdd   : > { %366 = vst [vmem:[%s1665_s17 + $0x20] sm:$0x7] %v361_v14  ;;  %v423_v15 = vpop.f32.mrf.mxu3 }
  0xe0   : > { %v486_v16 = vpop.f32.mrf.mxu0 }
  0xe1   : > { %v497_v49 = vadd.f32 %v486_v16, %v428_v44 }
  0xe2   : > { %v555_v17 = vpop.f32.mrf.mxu1  ;;  %v621_v18 = vpop.f32.mrf.mxu2 }
  0xe3   : > { %v634_v45 = vadd.f32 %v621_v18, %v565_v43  ;;  %v566_v60 = vadd.f32 %v555_v17, %v497_v49 }
  0xe4   : > { %v371_v9 = vld [vmem:[%s1665_s17 + $0x20] sm:$0x7] }
  0xe5   : > { %v430_v20 = vadd.f32 %v423_v15, %v371_v9  ;;  %v687_v12 = vpop.f32.mrf.mxu3 }
  0xe6   : > { %v702_v46 = vadd.f32 %v687_v12, %v633_v40 }
  0xe7   : > { %435 = vst [vmem:[%s1665_s17 + $0x20] sm:$0x7] %v430_v20 }
  0xe8   : > { %v489_v22 = vpop.f32.mrf.mxu0 }
  0xe9   : > { %v498_v1 = vadd.f32 %v489_v22, %v429_v63 }
  0xea   : > { %v558_v24 = vpop.f32.mrf.mxu1  ;;  %v624_v26 = vpop.f32.mrf.mxu2 }
  0xeb   : > { %v635_v58 = vadd.f32 %v624_v26, %v566_v60  ;;  %v567_v6 = vadd.f32 %v558_v24, %v498_v1 }
  0xee   : > { %v440_v31 = vld [vmem:[%s1665_s17 + $0x20] sm:$0x7] }
  0xef   : > { %v690_v33 = vpop.f32.mrf.mxu3 }
  0xf0   : > { %v492_v32 = vpop.f32.mrf.mxu0  ;;  %v703_v53 = vadd.f32 %v690_v33, %v634_v45 }
  0xf1   : > { %v499_v37 = vadd.f32 %v492_v32, %v440_v31 }
  0xf2   : > { %v627_v38 = vpop.f32.mrf.mxu2 }
  0xf3   : > { %504 = vst [vmem:[%s1665_s17 + $0x20] sm:$0x7] %v499_v37  ;;  %v561_v42 = vpop.f32.mrf.mxu1  ;;  %v636_v11 = vadd.f32 %v627_v38, %v567_v6 }
  0xf8   : > { %v756_v25 = vpop.f32.mrf.mxu0  ;;  %v693_v41 = vpop.f32.mrf.mxu3 }
  0xf9   : > { %v771_v50 = vadd.f32 %v756_v25, %v702_v46  ;;  %v704_v0 = vadd.f32 %v693_v41, %v635_v58 }
  0xfa   : > { %v509_v51 = vld [vmem:[%s1665_s17 + $0x20] sm:$0x7] }
  0xfb   : > { %v568_v54 = vadd.f32 %v561_v42, %v509_v51  ;;  %v790_v55 = vadd.f32 %v1055_v47, %v771_v50  ;;  %v630_v56 = vpop.f32.mrf.mxu2 }
  0xfc   : > { %v759_v57 = vpop.f32.mrf.mxu1 }
  0xfd   : > { %573 = vst [vmem:[%s1665_s17 + $0x20] sm:$0x7] %v568_v54  ;;  %v795_v61 = vmax.f32 %v790_v55, 0.0  ;;  %v772_v62 = vadd.f32 %v759_v57, %v703_v53 }
  0xff   : > { %800 = vst [vmem:[%s1665_s17] sm:$0xff] %v795_v61  ;;  %v791_v59 = vadd.f32 %v1055_v47, %v772_v62 }
 0x100   : > { %v696_v4 = vpop.f32.mrf.mxu3 }
 0x101   : > { %v796_v2 = vmax.f32 %v791_v59, 0.0  ;;  %v705_v14 = vadd.f32 %v696_v4, %v636_v11 }
 0x103   : > { %801 = vst [vmem:[%s1665_s17 + $0x8] sm:$0xff] %v796_v2  ;;  %v762_v5 = vpop.f32.mrf.mxu2 }
 0x104   : > { %v578_v3 = vld [vmem:[%s1665_s17 + $0x20] sm:$0x7]  ;;  %v773_v10 = vadd.f32 %v762_v5, %v704_v0 }
 0x105   : > { %v637_v8 = vadd.f32 %v630_v56, %v578_v3 }
 0x106   : > { %v792_v7 = vadd.f32 %v1055_v47, %v773_v10 }
 0x107   : > { %642 = vst [vmem:[%s1665_s17 + $0x20] sm:$0x7] %v637_v8 }
 0x108   : > { %v797_v13 = vmax.f32 %v792_v7, 0.0  ;;  %v699_v15 = vpop.f32.mrf.mxu3 }
 0x10a   : > { %802 = vst [vmem:[%s1665_s17 + $0x10] sm:$0xff] %v797_v13 }
 0x10b   : > { %v765_v16 = vpop.f32.mrf.mxu2 }
 0x10c   : > { %v774_v17 = vadd.f32 %v765_v16, %v705_v14 }
 0x10e   : > { %v647_v18 = vld [vmem:[%s1665_s17 + $0x20] sm:$0x7]  ;;  %v793_v19 = vadd.f32 %v1055_v47, %v774_v17 }
 0x10f   : > { %v706_v9 = vadd.f32 %v699_v15, %v647_v18 }
 0x110   : > { %v798_v20 = vmax.f32 %v793_v19, 0.0  ;;  %v768_v12 = vpop.f32.mrf.mxu3 }
 0x111   : > { %711 = vst [vmem:[%s1665_s17 + $0x20] sm:$0x7] %v706_v9 }
 0x112   : > { %803 = vst [vmem:[%s1665_s17 + $0x18] sm:$0xff] %v798_v20 }
 0x118   : > { %v716_v21 = vld [vmem:[%s1665_s17 + $0x20] sm:$0x7] }
 0x119   : > { %v775_v22 = vadd.f32 %v768_v12, %v716_v21 }
 0x11b   : > { %780 = vst [vmem:[%s1665_s17 + $0x20] sm:$0x7] %v775_v22 }
 0x122   : > { %v785_v23 = vld [vmem:[%s1665_s17 + $0x20] sm:$0x7] }
 0x123   : > { %v794_v24 = vadd.f32 %v1055_v47, %v785_v23 }
 0x125   : > { %v799_v26 = vmax.f32 %v794_v24, 0.0 }
 0x127   : > { %804 = vst [vmem:[%s1665_s17 + $0x20] sm:$0x7] %v799_v26 }
 0x128 PF: > { %s13_s12 = sadd.s32 1, %s1062_s12  }
 0x129   : > { %p10_p4 = scmp.ge.s32.totalorder %s13_s12, 4  }
 0x12b   :  { %12 = sbr.rel (!%p10_p4) target bundleno = 1 (0x1), region = 70 }

// kernel: network_forward.17
= control target key start
LH: loop header
LB: loop body
LE: loop exit
PB: predicated region body
PF: predicated region fallthrough
CT: control target
= control target key end

     0   :  { %s582_s12 = smov 0   ;;  %s840_s0 = inlined_call_operand.vmem [shape: f32[2,37,128], index: 0, kind: input, shape index: {}]   ;;  %s841_s1 = inlined_call_operand.vmem [shape: f32[4,128,128], index: 1, kind: input, shape index: {}]   ;;  %s842_s2 = inlined_call_operand.vmem [shape: f32[1,128], index: 2, kind: input, shape index: {}]   ;;  %s843_s3 = inlined_call_operand.vmem [shape: f32[2,30,128], index: 3, kind: output, shape index: {}]  }
   0x1 LB: > { %s485_s13 = sadd.s32 4294967295, %s560_s12   ;;  %p489_p0 = scmp.ge.s32.totalorder %s560_s12, 1  ;;  %s560_s12 = sphi %s582_s12, %s13_s12  }
   0x2   : > { %p137_p1 = scmp.lt.s32.totalorder %s560_s12, 3 }
   0x4   : > { %p138_p2 = pnand %p489_p0, %p137_p1 }
   0x5   : > { %p679_p3 = scmp.lt.s32.totalorder (!%p138_p2), %s485_s13, 1 }
   0x6   : > { %141 = sbr.rel (%p138_p2) target bundleno = 236 (0xec), region = 32 }
   0xb   : > { %v190_v0 = vld [vmem:[%s841_s1 + $0x78] sm:$0xff]  ;;  %v189_v1 = vld [vmem:[%s841_s1 + $0x70] sm:$0xff]  ;;  %v188_v3 = vld [vmem:[%s841_s1 + $0x68] sm:$0xff]  ;;  %s846_s13 = smov (!%p679_p3, %s485_s13), 1 }
   0xc   : > { %191 = vmatpush.msra.mxu0 %v190_v0  ;;  %v508_v2 = vld [vmem:[%s841_s1 + $0xf8] sm:$0xff]  ;;  %v507_v4 = vld [vmem:[%s841_s1 + $0xf0] sm:$0xff]  ;;  %v506_v5 = vld [vmem:[%s841_s1 + $0xe8] sm:$0xff]  ;;  %s544_s28 = smul.u32 40, %s846_s13  ;;  %s543_s25 = sshll.u32 %s846_s13, 5 }
   0xd   : > { %249 = vmatpush.msra.mxu1 %v508_v2  ;;  %v524_v6 = vld [vmem:[%s841_s1 + $0x178] sm:$0xff]  ;;  %v187_v7 = vld [vmem:[%s841_s1 + $0x60] sm:$0xff]  ;;  %v523_v8 = vld [vmem:[%s841_s1 + $0x170] sm:$0xff]  ;;  %s823_s27 = scalar_lea.vmem %s843_s3, %s543_s25 }
   0xe   : > { %192 = vmatpush.msra.mxu0 %v189_v1  ;;  %311 = vmatpush.msra.mxu2 %v524_v6  ;;  %v505_v9 = vld [vmem:[%s841_s1 + $0xe0] sm:$0xff]  ;;  %v522_v10 = vld [vmem:[%s841_s1 + $0x168] sm:$0xff]  ;;  %v186_v11 = vld [vmem:[%s841_s1 + $0x58] sm:$0xff]  ;;  %s762_s22 = scalar_lea.vmem %s840_s0, %s544_s28 }
   0xf   : > { %250 = vmatpush.msra.mxu1 %v507_v4  ;;  %v504_v12 = vld [vmem:[%s841_s1 + $0xd8] sm:$0xff]  ;;  %v521_v13 = vld [vmem:[%s841_s1 + $0x160] sm:$0xff]  ;;  %v185_v14 = vld [vmem:[%s841_s1 + $0x50] sm:$0xff] }
  0x10   : > { %193 = vmatpush.msra.mxu0 %v188_v3  ;;  %312 = vmatpush.msra.mxu2 %v523_v8  ;;  %v540_v15 = vld [vmem:[%s841_s1 + $0x1f8] sm:$0xff]  ;;  %v503_v16 = vld [vmem:[%s841_s1 + $0xd0] sm:$0xff]  ;;  %v184_v18 = vld [vmem:[%s841_s1 + $0x48] sm:$0xff] }
  0x11   : > { %251 = vmatpush.msra.mxu1 %v506_v5  ;;  %v520_v17 = vld [vmem:[%s841_s1 + $0x158] sm:$0xff]  ;;  %373 = vmatpush.msra.mxu3 %v540_v15  ;;  %v539_v19 = vld [vmem:[%s841_s1 + $0x1f0] sm:$0xff]  ;;  %v502_v20 = vld [vmem:[%s841_s1 + $0xc8] sm:$0xff] }
  0x12   : > { %194 = vmatpush.msra.mxu0 %v187_v7  ;;  %313 = vmatpush.msra.mxu2 %v522_v10  ;;  %v519_v21 = vld [vmem:[%s841_s1 + $0x150] sm:$0xff]  ;;  %v538_v22 = vld [vmem:[%s841_s1 + $0x1e8] sm:$0xff]  ;;  %v183_v23 = vld [vmem:[%s841_s1 + $0x40] sm:$0xff] }
  0x13   : > { %252 = vmatpush.msra.mxu1 %v505_v9  ;;  %374 = vmatpush.msra.mxu3 %v539_v19  ;;  %v537_v24 = vld [vmem:[%s841_s1 + $0x1e0] sm:$0xff]  ;;  %v518_v26 = vld [vmem:[%s841_s1 + $0x148] sm:$0xff]  ;;  %v182_v27 = vld [vmem:[%s841_s1 + $0x38] sm:$0xff] }
  0x14   : > { %195 = vmatpush.msra.mxu0 %v186_v11  ;;  %314 = vmatpush.msra.mxu2 %v521_v13  ;;  %v501_v25 = vld [vmem:[%s841_s1 + $0xc0] sm:$0xff]  ;;  %v536_v28 = vld [vmem:[%s841_s1 + $0x1d8] sm:$0xff]  ;;  %v181_v31 = vld [vmem:[%s841_s1 + $0x30] sm:$0xff] }
  0x15   : > { %253 = vmatpush.msra.mxu1 %v504_v12  ;;  %375 = vmatpush.msra.mxu3 %v538_v22  ;;  %v500_v29 = vld [vmem:[%s841_s1 + $0xb8] sm:$0xff]  ;;  %v517_v30 = vld [vmem:[%s841_s1 + $0x140] sm:$0xff]  ;;  %v535_v32 = vld [vmem:[%s841_s1 + $0x1d0] sm:$0xff] }
  0x16   : > { %196 = vmatpush.msra.mxu0 %v185_v14  ;;  %315 = vmatpush.msra.mxu2 %v520_v17  ;;  %v499_v33 = vld [vmem:[%s841_s1 + $0xb0] sm:$0xff]  ;;  %v516_v34 = vld [vmem:[%s841_s1 + $0x138] sm:$0xff]  ;;  %v180_v35 = vld [vmem:[%s841_s1 + $0x28] sm:$0xff] }
  0x17   : > { %254 = vmatpush.msra.mxu1 %v503_v16  ;;  %376 = vmatpush.msra.mxu3 %v537_v24  ;;  %v534_v36 = vld [vmem:[%s841_s1 + $0x1c8] sm:$0xff]  ;;  %v515_v38 = vld [vmem:[%s841_s1 + $0x130] sm:$0xff]  ;;  %v179_v39 = vld [vmem:[%s841_s1 + $0x20] sm:$0xff] }
  0x18   : > { %197 = vmatpush.msra.mxu0 %v184_v18  ;;  %316 = vmatpush.msra.mxu2 %v519_v21  ;;  %v498_v37 = vld [vmem:[%s841_s1 + $0xa8] sm:$0xff]  ;;  %v533_v40 = vld [vmem:[%s841_s1 + $0x1c0] sm:$0xff]  ;;  %v178_v43 = vld [vmem:[%s841_s1 + $0x18] sm:$0xff] }
  0x19   : > { %255 = vmatpush.msra.mxu1 %v502_v20  ;;  %377 = vmatpush.msra.mxu3 %v536_v28  ;;  %v497_v41 = vld [vmem:[%s841_s1 + $0xa0] sm:$0xff]  ;;  %v514_v42 = vld [vmem:[%s841_s1 + $0x128] sm:$0xff]  ;;  %v532_v44 = vld [vmem:[%s841_s1 + $0x1b8] sm:$0xff] }
  0x1a   : > { %198 = vmatpush.msra.mxu0 %v183_v23  ;;  %317 = vmatpush.msra.mxu2 %v518_v26  ;;  %v496_v45 = vld [vmem:[%s841_s1 + $0x98] sm:$0xff]  ;;  %v513_v46 = vld [vmem:[%s841_s1 + $0x120] sm:$0xff]  ;;  %v177_v47 = vld [vmem:[%s841_s1 + $0x10] sm:$0xff] }
  0x1b   : > { %256 = vmatpush.msra.mxu1 %v501_v25  ;;  %378 = vmatpush.msra.mxu3 %v535_v32  ;;  %v531_v48 = vld [vmem:[%s841_s1 + $0x1b0] sm:$0xff]  ;;  %v512_v50 = vld [vmem:[%s841_s1 + $0x118] sm:$0xff]  ;;  %v176_v51 = vld [vmem:[%s841_s1 + $0x8] sm:$0xff] }
  0x1c   : > { %199 = vmatpush.msra.mxu0 %v182_v27  ;;  %318 = vmatpush.msra.mxu2 %v517_v30  ;;  %v495_v49 = vld [vmem:[%s841_s1 + $0x90] sm:$0xff]  ;;  %v530_v52 = vld [vmem:[%s841_s1 + $0x1a8] sm:$0xff]  ;;  %v175_v55 = vld [vmem:[%s841_s1] sm:$0xff] }
  0x1d   : > { %257 = vmatpush.msra.mxu1 %v500_v29  ;;  %379 = vmatpush.msra.mxu3 %v534_v36  ;;  %v494_v53 = vld [vmem:[%s841_s1 + $0x88] sm:$0xff]  ;;  %v511_v54 = vld [vmem:[%s841_s1 + $0x110] sm:$0xff]  ;;  %v529_v56 = vld [vmem:[%s841_s1 + $0x1a0] sm:$0xff] }
  0x1e   : > { %200 = vmatpush.msra.mxu0 %v181_v31  ;;  %319 = vmatpush.msra.mxu2 %v516_v34  ;;  %v171_v57 = vld [vmem:[%s762_s22] sm:$0xff]  ;;  %v510_v60 = vld [vmem:[%s841_s1 + $0x108] sm:$0xff]  ;;  %v528_v61 = vld [vmem:[%s841_s1 + $0x198] sm:$0xff] }
  0x1f   : > { %258 = vmatpush.msra.mxu1 %v499_v33  ;;  %380 = vmatpush.msra.mxu3 %v533_v40  ;;  %v493_v58 = vld [vmem:[%s841_s1 + $0x80] sm:$0xff]  ;;  %v527_v0 = vld [vmem:[%s841_s1 + $0x190] sm:$0xff]  ;;  %v526_v1 = vld [vmem:[%s841_s1 + $0x188] sm:$0xff] }
  0x20   : > { %201 = vmatpush.msra.mxu0 %v180_v35  ;;  %320 = vmatpush.msra.mxu2 %v515_v38  ;;  %v228_v59 = vld [vmem:[%s762_s22 + $0x1] sm:$0xff]  ;;  %v229_v4 = vld [vmem:[%s762_s22 + $0x9] sm:$0xff]  ;;  %v230_v8 = vld [vmem:[%s762_s22 + $0x11] sm:$0xff] }
  0x21   : > { %259 = vmatpush.msra.mxu1 %v498_v37  ;;  %381 = vmatpush.msra.mxu3 %v532_v44  ;;  %v509_v62 = vld [vmem:[%s841_s1 + $0x100] sm:$0xff]  ;;  %v172_v2 = vld [vmem:[%s762_s22 + $0x8] sm:$0xff]  ;;  %v173_v7 = vld [vmem:[%s762_s22 + $0x10] sm:$0xff] }
  0x22   : > { %202 = vmatpush.msra.mxu0 %v179_v39  ;;  %321 = vmatpush.msra.mxu2 %v514_v42  ;;  %v290_v63 = vld [vmem:[%s762_s22 + $0x6] sm:$0xff]  ;;  %v291_v6 = vld [vmem:[%s762_s22 + $0xe] sm:$0xff]  ;;  %v292_v10 = vld [vmem:[%s762_s22 + $0x16] sm:$0xff] }
  0x23   : > { %260 = vmatpush.msra.mxu1 %v497_v41  ;;  %382 = vmatpush.msra.mxu3 %v531_v48  ;;  %v525_v3 = vld [vmem:[%s841_s1 + $0x180] sm:$0xff]  ;;  %v353_v9 = vld [vmem:[%s762_s22 + $0xf] sm:$0xff]  ;;  %v174_v11 = vld [vmem:[%s762_s22 + $0x18] sm:$0x3f] }
  0x24   : > { %203 = vmatpush.msra.mxu0 %v178_v43  ;;  %322 = vmatpush.msra.mxu2 %v513_v46  ;;  %v352_v5 = vld [vmem:[%s762_s22 + $0x7] sm:$0xff]  ;;  %v231_v12 = vld [vmem:[%s762_s22 + $0x19] sm:$0x3f]  ;;  %v355_v15 = vld [vmem:[%s762_s22 + $0x1f] sm:$0x3f] }
  0x25   : > { %261 = vmatpush.msra.mxu1 %v496_v45  ;;  %383 = vmatpush.msra.mxu3 %v530_v52  ;;  %v354_v13 = vld [vmem:[%s762_s22 + $0x17] sm:$0xff]  ;;  %v553_v23 = vld [vmem:[%s842_s2] ss:$0 sm:$0xff] }
  0x26   : > { %204 = vmatpush.msra.mxu0 %v177_v47  ;;  %323 = vmatpush.msra.mxu2 %v512_v50  ;;  %v293_v14 = vld [vmem:[%s762_s22 + $0x1e] sm:$0x3f] }
  0x27   : > { %262 = vmatpush.msra.mxu1 %v495_v49  ;;  %384 = vmatpush.msra.mxu3 %v529_v56 }
  0x28   : > { %205 = vmatpush.msra.mxu0 %v176_v51  ;;  %324 = vmatpush.msra.mxu2 %v511_v54 }
  0x29   : > { %263 = vmatpush.msra.mxu1 %v494_v53  ;;  %385 = vmatpush.msra.mxu3 %v528_v61 }
  0x2a   : > { %206 = vmatpush.msra.mxu0 %v175_v55  ;;  %325 = vmatpush.msra.mxu2 %v510_v60 }
  0x2b   : > { %207 = vmatmul.f32.vlgmr.msra.gmra.mxu0 %v171_v57  ;;  %264 = vmatpush.msra.mxu1 %v493_v58 }
  0x2c   : > { %265 = vmatmul.f32.vlgmr.msra.gmra.mxu1 %v228_v59  ;;  %326 = vmatpush.msra.mxu2 %v509_v62 }
  0x2d   : > { %327 = vmatmul.f32.vlgmr.msra.gmra.mxu2 %v290_v63  ;;  %386 = vmatpush.msra.mxu3 %v527_v0 }
  0x2f   : > { %387 = vmatpush.msra.mxu3 %v526_v1 }
  0x31   : > { %388 = vmatpush.msra.mxu3 %v525_v3 }
  0x32   : > { %389 = vmatmul.f32.vlgmr.msra.gmra.mxu3 %v352_v5 }
  0x33   : > { %210 = vmatmul.f32.gmra.mxu0 %v172_v2 }
  0x34   : > { %268 = vmatmul.f32.gmra.mxu1 %v229_v4 }
  0x35   : > { %330 = vmatmul.f32.gmra.mxu2 %v291_v6 }
  0x3a   : > { %392 = vmatmul.f32.gmra.mxu3 %v353_v9 }
  0x3b   : > { %213 = vmatmul.f32.gmra.mxu0 %v173_v7 }
  0x3c   : > { %271 = vmatmul.f32.gmra.mxu1 %v230_v8 }
  0x3d   : > { %333 = vmatmul.f32.gmra.mxu2 %v292_v10 }
  0x42   : > { %395 = vmatmul.f32.gmra.mxu3 %v354_v13 }
  0x43   : > { %216 = vmatmul.f32.gmra.mxu0 %v174_v11 }
  0x44   : > { %274 = vmatmul.f32.gmra.mxu1 %v231_v12 }
  0x45   : > { %336 = vmatmul.f32.gmra.mxu2 %v293_v14 }
  0x4a   : > { %398 = vmatmul.f32.gmra.mxu3 %v355_v15 }
  0xa8   : > { %v208_v16 = vpop.f32.mrf.mxu0 }
  0xa9   : > { %v266_v17 = vpop.f32.mrf.mxu1 }
  0xaa   : > { %v278_v19 = vadd.f32 %v266_v17, %v208_v16 }
  0xb0   : > { %v211_v18 = vpop.f32.mrf.mxu0  ;;  %v328_v20 = vpop.f32.mrf.mxu2 }
  0xb1   : > { %v269_v21 = vpop.f32.mrf.mxu1  ;;  %v340_v22 = vadd.f32 %v328_v20, %v278_v19 }
  0xb2   : > { %v279_v27 = vadd.f32 %v269_v21, %v211_v18 }
  0xb5   : > { %v390_v24 = vpop.f32.mrf.mxu3 }
  0xb6   : > { %v402_v26 = vadd.f32 %v390_v24, %v340_v22 }
  0xb8   : > { %v214_v25 = vpop.f32.mrf.mxu0  ;;  %v331_v28 = vpop.f32.mrf.mxu2  ;;  %v418_v29 = vadd.f32 %v553_v23, %v402_v26 }
  0xb9   : > { %v341_v30 = vadd.f32 %v331_v28, %v279_v27  ;;  %v272_v32 = vpop.f32.mrf.mxu1 }
  0xba   : > { %v422_v31 = vmax.f32 %v418_v29, 0.0  ;;  %v280_v36 = vadd.f32 %v272_v32, %v214_v25 }
  0xbc   : > { %426 = vst [vmem:[%s823_s27] sm:$0xff] %v422_v31 }
  0xbd   : > { %v393_v33 = vpop.f32.mrf.mxu3 }
  0xbe   : > { %v403_v35 = vadd.f32 %v393_v33, %v341_v30 }
  0xc0   : > { %v217_v34 = vpop.f32.mrf.mxu0  ;;  %v334_v37 = vpop.f32.mrf.mxu2  ;;  %v419_v38 = vadd.f32 %v553_v23, %v403_v35 }
  0xc1   : > { %223 = vst [vmem:[%s823_s27 + $0x18] sm:$0x3f] %v217_v34  ;;  %v342_v39 = vadd.f32 %v334_v37, %v280_v36  ;;  %v275_v41 = vpop.f32.mrf.mxu1 }
  0xc2   : > { %v423_v40 = vmax.f32 %v419_v38, 0.0 }
  0xc4   : > { %427 = vst [vmem:[%s823_s27 + $0x8] sm:$0xff] %v423_v40 }
  0xc5   : > { %v396_v42 = vpop.f32.mrf.mxu3 }
  0xc6   : > { %v404_v44 = vadd.f32 %v396_v42, %v342_v39 }
  0xc8   : > { %v227_v43 = vld [vmem:[%s823_s27 + $0x18] sm:$0x3f]  ;;  %v420_v46 = vadd.f32 %v553_v23, %v404_v44  ;;  %v337_v48 = vpop.f32.mrf.mxu2 }
  0xc9   : > { %v281_v45 = vadd.f32 %v275_v41, %v227_v43 }
  0xca   : > { %v424_v47 = vmax.f32 %v420_v46, 0.0 }
  0xcb   : > { %285 = vst [vmem:[%s823_s27 + $0x18] sm:$0x3f] %v281_v45 }
  0xcc   : > { %428 = vst [vmem:[%s823_s27 + $0x10] sm:$0xff] %v424_v47 }
  0xcd   : > { %v399_v51 = vpop.f32.mrf.mxu3 }
  0xd2   : > { %v289_v49 = vld [vmem:[%s823_s27 + $0x18] sm:$0x3f] }
  0xd3   : > { %v343_v50 = vadd.f32 %v337_v48, %v289_v49 }
  0xd5   : > { %347 = vst [vmem:[%s823_s27 + $0x18] sm:$0x3f] %v343_v50 }
  0xdc   : > { %v351_v52 = vld [vmem:[%s823_s27 + $0x18] sm:$0x3f] }
  0xdd   : > { %v405_v53 = vadd.f32 %v399_v51, %v351_v52 }
  0xdf   : > { %409 = vst [vmem:[%s823_s27 + $0x18] sm:$0x3f] %v405_v53 }
  0xe6   : > { %v413_v54 = vld [vmem:[%s823_s27 + $0x18] sm:$0x3f] }
  0xe7   : > { %v421_v55 = vadd.f32 %v553_v23, %v413_v54 }
  0xe9   : > { %v425_v56 = vmax.f32 %v421_v55, 0.0 }
  0xeb   : > { %429 = vst [vmem:[%s823_s27 + $0x18] sm:$0x3f] %v425_v56 }
  0xec PF: > { %s13_s12 = sadd.s32 1, %s560_s12  }
  0xed   : > { %p10_p4 = scmp.ge.s32.totalorder %s13_s12, 4  }
  0xef   :  { %12 = sbr.rel (!%p10_p4) target bundleno = 1 (0x1), region = 65 }

// kernel: network_forward.16
= control target key start
LH: loop header
LB: loop body
LE: loop exit
PB: predicated region body
PF: predicated region fallthrough
CT: control target
= control target key end

     0   :  { %s552_s12 = smov 0   ;;  %s792_s0 = inlined_call_operand.vmem [shape: f32[2,26,128], index: 0, kind: input, shape index: {}]   ;;  %s793_s1 = inlined_call_operand.vmem [shape: f32[4,128,128], index: 1, kind: input, shape index: {}]   ;;  %s794_s2 = inlined_call_operand.vmem [shape: f32[1,128], index: 2, kind: input, shape index: {}]   ;;  %s795_s3 = inlined_call_operand.vmem [shape: f32[2,20,128], index: 3, kind: output, shape index: {}]  }
   0x1 LB: > { %s455_s13 = sadd.s32 4294967295, %s530_s12   ;;  %p459_p0 = scmp.ge.s32.totalorder %s530_s12, 1  ;;  %s530_s12 = sphi %s552_s12, %s13_s12  }
   0x2   : > { %p137_p1 = scmp.lt.s32.totalorder %s530_s12, 3 }
   0x4   : > { %p138_p2 = pnand %p459_p0, %p137_p1 }
   0x5   : > { %p655_p3 = scmp.lt.s32.totalorder (!%p138_p2), %s455_s13, 1 }
   0x6   : > { %141 = sbr.rel (%p138_p2) target bundleno = 228 (0xe4), region = 32 }
   0xb   : > { %v189_v0 = vld [vmem:[%s793_s1 + $0x78] sm:$0xff]  ;;  %v188_v1 = vld [vmem:[%s793_s1 + $0x70] sm:$0xff]  ;;  %v187_v3 = vld [vmem:[%s793_s1 + $0x68] sm:$0xff]  ;;  %s798_s13 = smov (!%p655_p3, %s455_s13), 1 }
   0xc   : > { %190 = vmatpush.msra.mxu0 %v189_v0  ;;  %v478_v2 = vld [vmem:[%s793_s1 + $0xf8] sm:$0xff]  ;;  %v477_v4 = vld [vmem:[%s793_s1 + $0xf0] sm:$0xff]  ;;  %v476_v5 = vld [vmem:[%s793_s1 + $0xe8] sm:$0xff]  ;;  %s513_s30 = sshll.u32 %s798_s13, 5  ;;  %s514_s23 = smul.u32 24, %s798_s13 }
   0xd   : > { %242 = vmatpush.msra.mxu1 %v478_v2  ;;  %v494_v6 = vld [vmem:[%s793_s1 + $0x178] sm:$0xff]  ;;  %v186_v7 = vld [vmem:[%s793_s1 + $0x60] sm:$0xff]  ;;  %v493_v8 = vld [vmem:[%s793_s1 + $0x170] sm:$0xff]  ;;  %s732_s22 = scalar_lea.vmem %s792_s0, %s513_s30 }
   0xe   : > { %191 = vmatpush.msra.mxu0 %v188_v1  ;;  %297 = vmatpush.msra.mxu2 %v494_v6  ;;  %v475_v9 = vld [vmem:[%s793_s1 + $0xe0] sm:$0xff]  ;;  %v492_v10 = vld [vmem:[%s793_s1 + $0x168] sm:$0xff]  ;;  %v185_v11 = vld [vmem:[%s793_s1 + $0x58] sm:$0xff]  ;;  %s170_s28 = scalar_lea.vmem %s795_s3, %s514_s23 }
   0xf   : > { %243 = vmatpush.msra.mxu1 %v477_v4  ;;  %v474_v12 = vld [vmem:[%s793_s1 + $0xd8] sm:$0xff]  ;;  %v491_v13 = vld [vmem:[%s793_s1 + $0x160] sm:$0xff]  ;;  %v184_v14 = vld [vmem:[%s793_s1 + $0x50] sm:$0xff] }
  0x10   : > { %192 = vmatpush.msra.mxu0 %v187_v3  ;;  %298 = vmatpush.msra.mxu2 %v493_v8  ;;  %v510_v15 = vld [vmem:[%s793_s1 + $0x1f8] sm:$0xff]  ;;  %v473_v16 = vld [vmem:[%s793_s1 + $0xd0] sm:$0xff]  ;;  %v183_v18 = vld [vmem:[%s793_s1 + $0x48] sm:$0xff] }
  0x11   : > { %244 = vmatpush.msra.mxu1 %v476_v5  ;;  %v490_v17 = vld [vmem:[%s793_s1 + $0x158] sm:$0xff]  ;;  %352 = vmatpush.msra.mxu3 %v510_v15  ;;  %v509_v19 = vld [vmem:[%s793_s1 + $0x1f0] sm:$0xff]  ;;  %v472_v20 = vld [vmem:[%s793_s1 + $0xc8] sm:$0xff] }
  0x12   : > { %193 = vmatpush.msra.mxu0 %v186_v7  ;;  %299 = vmatpush.msra.mxu2 %v492_v10  ;;  %v489_v21 = vld [vmem:[%s793_s1 + $0x150] sm:$0xff]  ;;  %v508_v22 = vld [vmem:[%s793_s1 + $0x1e8] sm:$0xff]  ;;  %v182_v23 = vld [vmem:[%s793_s1 + $0x40] sm:$0xff] }
  0x13   : > { %245 = vmatpush.msra.mxu1 %v475_v9  ;;  %353 = vmatpush.msra.mxu3 %v509_v19  ;;  %v507_v24 = vld [vmem:[%s793_s1 + $0x1e0] sm:$0xff]  ;;  %v488_v26 = vld [vmem:[%s793_s1 + $0x148] sm:$0xff]  ;;  %v181_v27 = vld [vmem:[%s793_s1 + $0x38] sm:$0xff] }
  0x14   : > { %194 = vmatpush.msra.mxu0 %v185_v11  ;;  %300 = vmatpush.msra.mxu2 %v491_v13  ;;  %v471_v25 = vld [vmem:[%s793_s1 + $0xc0] sm:$0xff]  ;;  %v506_v28 = vld [vmem:[%s793_s1 + $0x1d8] sm:$0xff]  ;;  %v180_v31 = vld [vmem:[%s793_s1 + $0x30] sm:$0xff] }
  0x15   : > { %246 = vmatpush.msra.mxu1 %v474_v12  ;;  %354 = vmatpush.msra.mxu3 %v508_v22  ;;  %v470_v29 = vld [vmem:[%s793_s1 + $0xb8] sm:$0xff]  ;;  %v487_v30 = vld [vmem:[%s793_s1 + $0x140] sm:$0xff]  ;;  %v505_v32 = vld [vmem:[%s793_s1 + $0x1d0] sm:$0xff] }
  0x16   : > { %195 = vmatpush.msra.mxu0 %v184_v14  ;;  %301 = vmatpush.msra.mxu2 %v490_v17  ;;  %v469_v33 = vld [vmem:[%s793_s1 + $0xb0] sm:$0xff]  ;;  %v486_v34 = vld [vmem:[%s793_s1 + $0x138] sm:$0xff]  ;;  %v179_v35 = vld [vmem:[%s793_s1 + $0x28] sm:$0xff] }
  0x17   : > { %247 = vmatpush.msra.mxu1 %v473_v16  ;;  %355 = vmatpush.msra.mxu3 %v507_v24  ;;  %v504_v36 = vld [vmem:[%s793_s1 + $0x1c8] sm:$0xff]  ;;  %v485_v38 = vld [vmem:[%s793_s1 + $0x130] sm:$0xff]  ;;  %v178_v39 = vld [vmem:[%s793_s1 + $0x20] sm:$0xff] }
  0x18   : > { %196 = vmatpush.msra.mxu0 %v183_v18  ;;  %302 = vmatpush.msra.mxu2 %v489_v21  ;;  %v468_v37 = vld [vmem:[%s793_s1 + $0xa8] sm:$0xff]  ;;  %v503_v40 = vld [vmem:[%s793_s1 + $0x1c0] sm:$0xff]  ;;  %v177_v43 = vld [vmem:[%s793_s1 + $0x18] sm:$0xff] }
  0x19   : > { %248 = vmatpush.msra.mxu1 %v472_v20  ;;  %356 = vmatpush.msra.mxu3 %v506_v28  ;;  %v467_v41 = vld [vmem:[%s793_s1 + $0xa0] sm:$0xff]  ;;  %v484_v42 = vld [vmem:[%s793_s1 + $0x128] sm:$0xff]  ;;  %v502_v44 = vld [vmem:[%s793_s1 + $0x1b8] sm:$0xff] }
  0x1a   : > { %197 = vmatpush.msra.mxu0 %v182_v23  ;;  %303 = vmatpush.msra.mxu2 %v488_v26  ;;  %v466_v45 = vld [vmem:[%s793_s1 + $0x98] sm:$0xff]  ;;  %v483_v46 = vld [vmem:[%s793_s1 + $0x120] sm:$0xff]  ;;  %v176_v47 = vld [vmem:[%s793_s1 + $0x10] sm:$0xff] }
  0x1b   : > { %249 = vmatpush.msra.mxu1 %v471_v25  ;;  %357 = vmatpush.msra.mxu3 %v505_v32  ;;  %v501_v48 = vld [vmem:[%s793_s1 + $0x1b0] sm:$0xff]  ;;  %v482_v50 = vld [vmem:[%s793_s1 + $0x118] sm:$0xff]  ;;  %v175_v51 = vld [vmem:[%s793_s1 + $0x8] sm:$0xff] }
  0x1c   : > { %198 = vmatpush.msra.mxu0 %v181_v27  ;;  %304 = vmatpush.msra.mxu2 %v487_v30  ;;  %v465_v49 = vld [vmem:[%s793_s1 + $0x90] sm:$0xff]  ;;  %v500_v52 = vld [vmem:[%s793_s1 + $0x1a8] sm:$0xff]  ;;  %v174_v55 = vld [vmem:[%s793_s1] sm:$0xff] }
  0x1d   : > { %250 = vmatpush.msra.mxu1 %v470_v29  ;;  %358 = vmatpush.msra.mxu3 %v504_v36  ;;  %v464_v53 = vld [vmem:[%s793_s1 + $0x88] sm:$0xff]  ;;  %v481_v54 = vld [vmem:[%s793_s1 + $0x110] sm:$0xff]  ;;  %v499_v56 = vld [vmem:[%s793_s1 + $0x1a0] sm:$0xff] }
  0x1e   : > { %199 = vmatpush.msra.mxu0 %v180_v31  ;;  %305 = vmatpush.msra.mxu2 %v486_v34  ;;  %v171_v57 = vld [vmem:[%s732_s22] sm:$0xff]  ;;  %v480_v60 = vld [vmem:[%s793_s1 + $0x108] sm:$0xff]  ;;  %v498_v61 = vld [vmem:[%s793_s1 + $0x198] sm:$0xff] }
  0x1f   : > { %251 = vmatpush.msra.mxu1 %v469_v33  ;;  %359 = vmatpush.msra.mxu3 %v503_v40  ;;  %v463_v58 = vld [vmem:[%s793_s1 + $0x80] sm:$0xff]  ;;  %v497_v0 = vld [vmem:[%s793_s1 + $0x190] sm:$0xff]  ;;  %v496_v1 = vld [vmem:[%s793_s1 + $0x188] sm:$0xff] }
  0x20   : > { %200 = vmatpush.msra.mxu0 %v179_v35  ;;  %306 = vmatpush.msra.mxu2 %v485_v38  ;;  %v222_v59 = vld [vmem:[%s732_s22 + $0x1] sm:$0xff]  ;;  %v223_v4 = vld [vmem:[%s732_s22 + $0x9] sm:$0xff]  ;;  %v224_v8 = vld [vmem:[%s732_s22 + $0x11] sm:$0xf] }
  0x21   : > { %252 = vmatpush.msra.mxu1 %v468_v37  ;;  %360 = vmatpush.msra.mxu3 %v502_v44  ;;  %v479_v62 = vld [vmem:[%s793_s1 + $0x100] sm:$0xff]  ;;  %v172_v2 = vld [vmem:[%s732_s22 + $0x8] sm:$0xff]  ;;  %v173_v7 = vld [vmem:[%s732_s22 + $0x10] sm:$0xf] }
  0x22   : > { %201 = vmatpush.msra.mxu0 %v178_v39  ;;  %307 = vmatpush.msra.mxu2 %v484_v42  ;;  %v277_v63 = vld [vmem:[%s732_s22 + $0x5] sm:$0xff]  ;;  %v278_v6 = vld [vmem:[%s732_s22 + $0xd] sm:$0xff]  ;;  %v279_v10 = vld [vmem:[%s732_s22 + $0x15] sm:$0xf] }
  0x23   : > { %253 = vmatpush.msra.mxu1 %v467_v41  ;;  %361 = vmatpush.msra.mxu3 %v501_v48  ;;  %v495_v3 = vld [vmem:[%s793_s1 + $0x180] sm:$0xff]  ;;  %v333_v9 = vld [vmem:[%s732_s22 + $0xe] sm:$0xff]  ;;  %v334_v11 = vld [vmem:[%s732_s22 + $0x16] sm:$0xf] }
  0x24   : > { %202 = vmatpush.msra.mxu0 %v177_v43  ;;  %308 = vmatpush.msra.mxu2 %v483_v46  ;;  %v332_v5 = vld [vmem:[%s732_s22 + $0x6] sm:$0xff]  ;;  %v523_v19 = vld [vmem:[%s794_s2] ss:$0 sm:$0xff] }
  0x25   : > { %254 = vmatpush.msra.mxu1 %v466_v45  ;;  %362 = vmatpush.msra.mxu3 %v500_v52 }
  0x26   : > { %203 = vmatpush.msra.mxu0 %v176_v47  ;;  %309 = vmatpush.msra.mxu2 %v482_v50 }
  0x27   : > { %255 = vmatpush.msra.mxu1 %v465_v49  ;;  %363 = vmatpush.msra.mxu3 %v499_v56 }
  0x28   : > { %204 = vmatpush.msra.mxu0 %v175_v51  ;;  %310 = vmatpush.msra.mxu2 %v481_v54 }
  0x29   : > { %256 = vmatpush.msra.mxu1 %v464_v53  ;;  %364 = vmatpush.msra.mxu3 %v498_v61 }
  0x2a   : > { %205 = vmatpush.msra.mxu0 %v174_v55  ;;  %311 = vmatpush.msra.mxu2 %v480_v60 }
  0x2b   : > { %206 = vmatmul.f32.vlgmr.msra.gmra.mxu0 %v171_v57  ;;  %257 = vmatpush.msra.mxu1 %v463_v58 }
  0x2c   : > { %258 = vmatmul.f32.vlgmr.msra.gmra.mxu1 %v222_v59  ;;  %312 = vmatpush.msra.mxu2 %v479_v62 }
  0x2d   : > { %313 = vmatmul.f32.vlgmr.msra.gmra.mxu2 %v277_v63  ;;  %365 = vmatpush.msra.mxu3 %v497_v0 }
  0x2f   : > { %366 = vmatpush.msra.mxu3 %v496_v1 }
  0x31   : > { %367 = vmatpush.msra.mxu3 %v495_v3 }
  0x32   : > { %368 = vmatmul.f32.vlgmr.msra.gmra.mxu3 %v332_v5 }
  0x33   : > { %209 = vmatmul.f32.gmra.mxu0 %v172_v2 }
  0x34   : > { %261 = vmatmul.f32.gmra.mxu1 %v223_v4 }
  0x35   : > { %316 = vmatmul.f32.gmra.mxu2 %v278_v6 }
  0x3a   : > { %371 = vmatmul.f32.gmra.mxu3 %v333_v9 }
  0x3b   : > { %212 = vmatmul.f32.gmra.mxu0 %v173_v7 }
  0x3c   : > { %264 = vmatmul.f32.gmra.mxu1 %v224_v8 }
  0x3d   : > { %319 = vmatmul.f32.gmra.mxu2 %v279_v10 }
  0x42   : > { %374 = vmatmul.f32.gmra.mxu3 %v334_v11 }
  0xa8   : > { %v207_v12 = vpop.f32.mrf.mxu0 }
  0xa9   : > { %v259_v13 = vpop.f32.mrf.mxu1 }
  0xaa   : > { %v268_v15 = vadd.f32 %v259_v13, %v207_v12 }
  0xb0   : > { %v210_v14 = vpop.f32.mrf.mxu0  ;;  %v314_v16 = vpop.f32.mrf.mxu2 }
  0xb1   : > { %v323_v17 = vadd.f32 %v314_v16, %v268_v15  ;;  %v262_v18 = vpop.f32.mrf.mxu1 }
  0xb2   : > { %v269_v23 = vadd.f32 %v262_v18, %v210_v14 }
  0xb5   : > { %v369_v20 = vpop.f32.mrf.mxu3 }
  0xb6   : > { %v378_v22 = vadd.f32 %v369_v20, %v323_v17 }
  0xb8   : > { %v213_v21 = vpop.f32.mrf.mxu0  ;;  %v317_v24 = vpop.f32.mrf.mxu2  ;;  %v391_v25 = vadd.f32 %v523_v19, %v378_v22 }
  0xb9   : > { %218 = vst [vmem:[%s170_s28 + $0x10] sm:$0xf] %v213_v21  ;;  %v324_v26 = vadd.f32 %v317_v24, %v269_v23  ;;  %v265_v28 = vpop.f32.mrf.mxu1 }
  0xba   : > { %v394_v27 = vmax.f32 %v391_v25, 0.0 }
  0xbc   : > { %397 = vst [vmem:[%s170_s28] sm:$0xff] %v394_v27 }
  0xbd   : > { %v372_v29 = vpop.f32.mrf.mxu3 }
  0xbe   : > { %v379_v31 = vadd.f32 %v372_v29, %v324_v26 }
  0xc0   : > { %v221_v30 = vld [vmem:[%s170_s28 + $0x10] sm:$0xf]  ;;  %v392_v33 = vadd.f32 %v523_v19, %v379_v31  ;;  %v320_v35 = vpop.f32.mrf.mxu2 }
  0xc1   : > { %v270_v32 = vadd.f32 %v265_v28, %v221_v30 }
  0xc2   : > { %v395_v34 = vmax.f32 %v392_v33, 0.0 }
  0xc3   : > { %273 = vst [vmem:[%s170_s28 + $0x10] sm:$0xf] %v270_v32 }
  0xc4   : > { %398 = vst [vmem:[%s170_s28 + $0x8] sm:$0xff] %v395_v34 }
  0xc5   : > { %v375_v38 = vpop.f32.mrf.mxu3 }
  0xca   : > { %v276_v36 = vld [vmem:[%s170_s28 + $0x10] sm:$0xf] }
  0xcb   : > { %v325_v37 = vadd.f32 %v320_v35, %v276_v36 }
  0xcd   : > { %328 = vst [vmem:[%s170_s28 + $0x10] sm:$0xf] %v325_v37 }
  0xd4   : > { %v331_v39 = vld [vmem:[%s170_s28 + $0x10] sm:$0xf] }
  0xd5   : > { %v380_v40 = vadd.f32 %v375_v38, %v331_v39 }
  0xd7   : > { %383 = vst [vmem:[%s170_s28 + $0x10] sm:$0xf] %v380_v40 }
  0xde   : > { %v386_v41 = vld [vmem:[%s170_s28 + $0x10] sm:$0xf] }
  0xdf   : > { %v393_v42 = vadd.f32 %v523_v19, %v386_v41 }
  0xe1   : > { %v396_v43 = vmax.f32 %v393_v42, 0.0 }
  0xe3   : > { %399 = vst [vmem:[%s170_s28 + $0x10] sm:$0xf] %v396_v43 }
  0xe4 PF: > { %s13_s12 = sadd.s32 1, %s530_s12  }
  0xe5   : > { %p10_p4 = scmp.ge.s32.totalorder %s13_s12, 4  }
  0xe7   :  { %12 = sbr.rel (!%p10_p4) target bundleno = 1 (0x1), region = 65 }

// kernel: squeeze.9
= control target key start
LH: loop header
LB: loop body
LE: loop exit
PB: predicated region body
PF: predicated region fallthrough
CT: control target
= control target key end

     0   :  { %s80_s0 = inlined_call_operand.vmem [shape: f32[2,4], index: 0, kind: input, shape index: {}]   ;;  %s81_s1 = inlined_call_operand.hbm [shape: f32[8,1], index: 1, kind: output, shape index: {}]  }
   0x1   :  { %v5_v0 = vld [vmem:[%s80_s0] sm:$0x3] }
   0x2   :  { %2 = vsyncpa [#allocation1], 0  ;;  %6 = vst [vmem:[#allocation3] sm:$0x3] %v5_v0  ;;  %vm8_vm0 = vcmask 31744   ;;  %s62_s0 = smov 4  }
   0x3   :  { %vm14_vm1 = vcmask 64544   ;;  %s63_s8 = smov [#allocation0]   ;;  %s27_s1 = sshll.u32 %s81_s1, 4  ;;  %s28_s1 = int_to_ptr.hbm [resolvable:$true] %s27_s1 }
   0x4   :  { %s25_s9 = sshll.u32 %s63_s8, 4  ;;  %s26_s9 = int_to_ptr.vmem [resolvable:$true] %s25_s9 }
   0x9   :  { %v11_v1 = vld [vmem:[#allocation3 + $0x1] sm:$0x1]   ;;  %v7_v2 = vld [vmem:[#allocation3] sm:$0x1]  }
   0xa   :  { %12 = vrot.lane.b32.xlu0 %v11_v1, %s62_s0  ;;  %9 = vst.msk [vmem:[#allocation2] sm:$0x1] %vm8_vm0, %v7_v2  }
  0x7c   :  { %v13_v3 = vpop.permute.xlu0 %12  }
  0x7d   :  { %15 = vst.msk [vmem:[#allocation2] sm:$0x1] %vm14_vm1, %v13_v3  }
  0x84   :  { %v18_v4 = vld [vmem:[#allocation2] sm:$0x1] }
  0x85   :  { %21 = vst [vmem:[#allocation0] sm:$0x1] %v18_v4 }
  0x86   :  { %30 = dma.vmem_to_hbm [thread:$0]  %s26_s9, 16, %s28_s1, [#allocation1]  }
  0x87   :  { %60 = dma.done.wait [#allocation1], 16  }
  0x88   :  { %61 = vsyncadd [#allocation1], 4294967280 }
  0x89   :  { %33 = vsyncpa [#allocation1], 1 }

// kernel: network_forward.19
= control target key start
LH: loop header
LB: loop body
LE: loop exit
PB: predicated region body
PF: predicated region fallthrough
CT: control target
= control target key end

     0   :  { %s784_s30 = smov 0   ;;  %s1157_s0 = inlined_call_operand.vmem [shape: f32[2,4,128], index: 0, kind: input, shape index: {}]   ;;  %s1158_s1 = inlined_call_operand.vmem [shape: f32[128,128], index: 1, kind: input, shape index: {}]   ;;  %s1159_s2 = inlined_call_operand.vmem [shape: f32[1,128], index: 2, kind: input, shape index: {}]   ;;  %s1160_s3 = inlined_call_operand.vmem [shape: f32[128,128], index: 3, kind: input, shape index: {}]   ;;  %s1161_s4 = inlined_call_operand.vmem [shape: f32[1,128], index: 4, kind: input, shape index: {}]   ;;  %s1162_s5 = inlined_call_operand.vmem [shape: f32[128,128], index: 5, kind: input, shape index: {}]   ;;  %s1163_s6 = inlined_call_operand.vmem [shape: f32[1,128], index: 6, kind: input, shape index: {}]   ;;  %s1164_s7 = inlined_call_operand.vmem [shape: f32[4,128,128], index: 7, kind: input, shape index: {}]   ;;  %s1165_s8 = inlined_call_operand.vmem [shape: f32[1,128], index: 8, kind: input, shape index: {}]   ;;  %s1166_s9 = inlined_call_operand.vmem [shape: f32[2,1,128], index: 9, kind: output, shape index: {}]  }
   0x1 LB: > { %s657_s10 = sadd.s32 4294967295, %s732_s30   ;;  %p661_p0 = scmp.ge.s32.totalorder %s732_s30, 1  ;;  %s732_s30 = sphi %s784_s30, %s19_s30  }
   0x2   : > { %p286_p1 = scmp.lt.s32.totalorder %s732_s30, 3 }
   0x4   : > { %p287_p2 = pnand %p661_p0, %p286_p1 }
   0x5   : > { %p319_p3 = scmp.lt.s32.totalorder (!%p287_p2), %s657_s10, 1 }
   0x6   : > { %290 = sbr.rel (%p287_p2) target bundleno = 589 (0x24d), region = 56 }
   0xb   : > { %v342_v0 = vld [vmem:[%s1158_s1 + $0x78] sm:$0xff]  ;;  %v341_v1 = vld [vmem:[%s1158_s1 + $0x70] sm:$0xff]  ;;  %v340_v2 = vld [vmem:[%s1158_s1 + $0x68] sm:$0xff]  ;;  %s1168_s10 = smov (!%p319_p3, %s657_s10), 1 }
   0xc   : > { %347 = vmatpush.msra.mxu0 %v342_v0  ;;  %v339_v3 = vld [vmem:[%s1158_s1 + $0x60] sm:$0xff]  ;;  %v383_v4 = vld [vmem:[%s1160_s3 + $0x78] sm:$0xff]  ;;  %v382_v5 = vld [vmem:[%s1160_s3 + $0x70] sm:$0xff]  ;;  %s662_s19 = sshll.u32 %s1168_s10, 2  ;;  %s325_s21 = scalar_lea.vmem %s1166_s9, %s1168_s10 }
   0xd   : > { %v338_v6 = vld [vmem:[%s1158_s1 + $0x58] sm:$0xff]  ;;  %388 = vmatpush.msra.mxu1 %v383_v4  ;;  %v381_v7 = vld [vmem:[%s1160_s3 + $0x68] sm:$0xff]  ;;  %v337_v8 = vld [vmem:[%s1158_s1 + $0x50] sm:$0xff]  ;;  %s322_s11 = scalar_lea.vmem %s1157_s0, %s662_s19 }
   0xe   : > { %348 = vmatpush.msra.mxu0 %v341_v1  ;;  %v380_v9 = vld [vmem:[%s1160_s3 + $0x60] sm:$0xff]  ;;  %v336_v10 = vld [vmem:[%s1158_s1 + $0x48] sm:$0xff]  ;;  %v379_v11 = vld [vmem:[%s1160_s3 + $0x58] sm:$0xff] }
   0xf   : > { %389 = vmatpush.msra.mxu1 %v382_v5  ;;  %v335_v12 = vld [vmem:[%s1158_s1 + $0x40] sm:$0xff]  ;;  %v378_v13 = vld [vmem:[%s1160_s3 + $0x50] sm:$0xff]  ;;  %v334_v14 = vld [vmem:[%s1158_s1 + $0x38] sm:$0xff] }
  0x10   : > { %349 = vmatpush.msra.mxu0 %v340_v2  ;;  %v377_v15 = vld [vmem:[%s1160_s3 + $0x48] sm:$0xff]  ;;  %v333_v16 = vld [vmem:[%s1158_s1 + $0x30] sm:$0xff]  ;;  %v376_v17 = vld [vmem:[%s1160_s3 + $0x40] sm:$0xff] }
  0x11   : > { %390 = vmatpush.msra.mxu1 %v381_v7  ;;  %v332_v18 = vld [vmem:[%s1158_s1 + $0x28] sm:$0xff]  ;;  %v375_v19 = vld [vmem:[%s1160_s3 + $0x38] sm:$0xff]  ;;  %v331_v20 = vld [vmem:[%s1158_s1 + $0x20] sm:$0xff] }
  0x12   : > { %350 = vmatpush.msra.mxu0 %v339_v3  ;;  %v374_v21 = vld [vmem:[%s1160_s3 + $0x30] sm:$0xff]  ;;  %v330_v22 = vld [vmem:[%s1158_s1 + $0x18] sm:$0xff]  ;;  %v373_v23 = vld [vmem:[%s1160_s3 + $0x28] sm:$0xff] }
  0x13   : > { %391 = vmatpush.msra.mxu1 %v380_v9  ;;  %v329_v24 = vld [vmem:[%s1158_s1 + $0x10] sm:$0xff]  ;;  %v372_v25 = vld [vmem:[%s1160_s3 + $0x20] sm:$0xff]  ;;  %v328_v26 = vld [vmem:[%s1158_s1 + $0x8] sm:$0xff] }
  0x14   : > { %351 = vmatpush.msra.mxu0 %v338_v6  ;;  %v371_v27 = vld [vmem:[%s1160_s3 + $0x18] sm:$0xff]  ;;  %v327_v28 = vld [vmem:[%s1158_s1] sm:$0xff]  ;;  %v370_v30 = vld [vmem:[%s1160_s3 + $0x10] sm:$0xff] }
  0x15   : > { %392 = vmatpush.msra.mxu1 %v379_v11  ;;  %v326_v29 = vld [vmem:[%s322_s11] sm:$0xf]  ;;  %v369_v31 = vld [vmem:[%s1160_s3 + $0x8] sm:$0xff]  ;;  %v424_v33 = vld [vmem:[%s1162_s5 + $0x78] sm:$0xff] }
  0x16   : > { %352 = vmatpush.msra.mxu0 %v337_v8  ;;  %v368_v32 = vld [vmem:[%s1160_s3] sm:$0xff]  ;;  %v423_v34 = vld [vmem:[%s1162_s5 + $0x70] sm:$0xff]  ;;  %429 = vmatpush.msra.mxu2 %v424_v33  ;;  %v422_v35 = vld [vmem:[%s1162_s5 + $0x68] sm:$0xff] }
  0x17   : > { %393 = vmatpush.msra.mxu1 %v378_v13  ;;  %v421_v36 = vld [vmem:[%s1162_s5 + $0x60] sm:$0xff]  ;;  %v420_v37 = vld [vmem:[%s1162_s5 + $0x58] sm:$0xff]  ;;  %v419_v38 = vld [vmem:[%s1162_s5 + $0x50] sm:$0xff] }
  0x18   : > { %353 = vmatpush.msra.mxu0 %v336_v10  ;;  %430 = vmatpush.msra.mxu2 %v423_v34  ;;  %v418_v39 = vld [vmem:[%s1162_s5 + $0x48] sm:$0xff]  ;;  %v417_v40 = vld [vmem:[%s1162_s5 + $0x40] sm:$0xff]  ;;  %v416_v41 = vld [vmem:[%s1162_s5 + $0x38] sm:$0xff] }
  0x19   : > { %394 = vmatpush.msra.mxu1 %v377_v15  ;;  %v415_v42 = vld [vmem:[%s1162_s5 + $0x30] sm:$0xff]  ;;  %v414_v43 = vld [vmem:[%s1162_s5 + $0x28] sm:$0xff]  ;;  %v413_v44 = vld [vmem:[%s1162_s5 + $0x20] sm:$0xff] }
  0x1a   : > { %354 = vmatpush.msra.mxu0 %v335_v12  ;;  %431 = vmatpush.msra.mxu2 %v422_v35  ;;  %v412_v45 = vld [vmem:[%s1162_s5 + $0x18] sm:$0xff]  ;;  %v721_v46 = vld [vmem:[%s1159_s2] ss:$0 sm:$0xff]  ;;  %v411_v50 = vld [vmem:[%s1162_s5 + $0x10] sm:$0xff] }
  0x1b   : > { %395 = vmatpush.msra.mxu1 %v376_v17  ;;  %v410_v51 = vld [vmem:[%s1162_s5 + $0x8] sm:$0xff]  ;;  %v409_v52 = vld [vmem:[%s1162_s5] sm:$0xff]  ;;  %v465_v53 = vld [vmem:[%s1164_s7 + $0x78] sm:$0xff] }
  0x1c   : > { %355 = vmatpush.msra.mxu0 %v334_v14  ;;  %432 = vmatpush.msra.mxu2 %v421_v36  ;;  %v678_v54 = vld [vmem:[%s1164_s7 + $0xf8] sm:$0xff]  ;;  %v464_v55 = vld [vmem:[%s1164_s7 + $0x70] sm:$0xff]  ;;  %v463_v59 = vld [vmem:[%s1164_s7 + $0x68] sm:$0xff] }
  0x1d   : > { %396 = vmatpush.msra.mxu1 %v375_v19  ;;  %486 = vmatpush.msra.mxu3 %v678_v54  ;;  %v694_v56 = vld [vmem:[%s1164_s7 + $0x178] sm:$0xff]  ;;  %v677_v58 = vld [vmem:[%s1164_s7 + $0xf0] sm:$0xff]  ;;  %v676_v62 = vld [vmem:[%s1164_s7 + $0xe8] sm:$0xff] }
  0x1e   : > { %356 = vmatpush.msra.mxu0 %v333_v16  ;;  %433 = vmatpush.msra.mxu2 %v420_v37  ;;  %v710_v57 = vld [vmem:[%s1164_s7 + $0x1f8] sm:$0xff]  ;;  %v693_v60 = vld [vmem:[%s1164_s7 + $0x170] sm:$0xff]  ;;  %v692_v63 = vld [vmem:[%s1164_s7 + $0x168] sm:$0xff] }
  0x1f   : > { %397 = vmatpush.msra.mxu1 %v374_v21  ;;  %v709_v61 = vld [vmem:[%s1164_s7 + $0x1f0] sm:$0xff]  ;;  %487 = vmatpush.msra.mxu3 %v677_v58  ;;  %v462_v0 = vld [vmem:[%s1164_s7 + $0x60] sm:$0xff]  ;;  %v708_v1 = vld [vmem:[%s1164_s7 + $0x1e8] sm:$0xff] }
  0x20   : > { %357 = vmatpush.msra.mxu0 %v332_v18  ;;  %434 = vmatpush.msra.mxu2 %v419_v38  ;;  %v675_v2 = vld [vmem:[%s1164_s7 + $0xe0] sm:$0xff]  ;;  %v461_v5 = vld [vmem:[%s1164_s7 + $0x58] sm:$0xff]  ;;  %v460_v9 = vld [vmem:[%s1164_s7 + $0x50] sm:$0xff] }
  0x21   : > { %398 = vmatpush.msra.mxu1 %v373_v23  ;;  %488 = vmatpush.msra.mxu3 %v676_v62  ;;  %v691_v3 = vld [vmem:[%s1164_s7 + $0x160] sm:$0xff]  ;;  %v674_v6 = vld [vmem:[%s1164_s7 + $0xd8] sm:$0xff]  ;;  %v673_v10 = vld [vmem:[%s1164_s7 + $0xd0] sm:$0xff] }
  0x22   : > { %358 = vmatpush.msra.mxu0 %v331_v20  ;;  %435 = vmatpush.msra.mxu2 %v418_v39  ;;  %v707_v4 = vld [vmem:[%s1164_s7 + $0x1e0] sm:$0xff]  ;;  %v690_v7 = vld [vmem:[%s1164_s7 + $0x158] sm:$0xff]  ;;  %v689_v11 = vld [vmem:[%s1164_s7 + $0x150] sm:$0xff] }
  0x23   : > { %399 = vmatpush.msra.mxu1 %v372_v25  ;;  %489 = vmatpush.msra.mxu3 %v675_v2  ;;  %v706_v8 = vld [vmem:[%s1164_s7 + $0x1d8] sm:$0xff]  ;;  %v705_v12 = vld [vmem:[%s1164_s7 + $0x1d0] sm:$0xff]  ;;  %v459_v13 = vld [vmem:[%s1164_s7 + $0x48] sm:$0xff] }
  0x24   : > { %359 = vmatpush.msra.mxu0 %v330_v22  ;;  %436 = vmatpush.msra.mxu2 %v417_v40  ;;  %v672_v14 = vld [vmem:[%s1164_s7 + $0xc8] sm:$0xff]  ;;  %v458_v17 = vld [vmem:[%s1164_s7 + $0x40] sm:$0xff]  ;;  %v457_v21 = vld [vmem:[%s1164_s7 + $0x38] sm:$0xff] }
  0x25   : > { %400 = vmatpush.msra.mxu1 %v371_v27  ;;  %490 = vmatpush.msra.mxu3 %v674_v6  ;;  %v688_v15 = vld [vmem:[%s1164_s7 + $0x148] sm:$0xff]  ;;  %v671_v18 = vld [vmem:[%s1164_s7 + $0xc0] sm:$0xff]  ;;  %v670_v22 = vld [vmem:[%s1164_s7 + $0xb8] sm:$0xff] }
  0x26   : > { %360 = vmatpush.msra.mxu0 %v329_v24  ;;  %437 = vmatpush.msra.mxu2 %v416_v41  ;;  %v704_v16 = vld [vmem:[%s1164_s7 + $0x1c8] sm:$0xff]  ;;  %v687_v19 = vld [vmem:[%s1164_s7 + $0x140] sm:$0xff]  ;;  %v686_v23 = vld [vmem:[%s1164_s7 + $0x138] sm:$0xff] }
  0x27   : > { %401 = vmatpush.msra.mxu1 %v370_v30  ;;  %491 = vmatpush.msra.mxu3 %v673_v10  ;;  %v703_v20 = vld [vmem:[%s1164_s7 + $0x1c0] sm:$0xff]  ;;  %v702_v24 = vld [vmem:[%s1164_s7 + $0x1b8] sm:$0xff]  ;;  %v456_v25 = vld [vmem:[%s1164_s7 + $0x30] sm:$0xff] }
  0x28   : > { %361 = vmatpush.msra.mxu0 %v328_v26  ;;  %438 = vmatpush.msra.mxu2 %v415_v42  ;;  %v669_v26 = vld [vmem:[%s1164_s7 + $0xb0] sm:$0xff]  ;;  %v668_v30 = vld [vmem:[%s1164_s7 + $0xa8] sm:$0xff]  ;;  %v454_v33 = vld [vmem:[%s1164_s7 + $0x20] sm:$0xff] }
  0x29   : > { %402 = vmatpush.msra.mxu1 %v369_v31  ;;  %492 = vmatpush.msra.mxu3 %v672_v14  ;;  %v685_v27 = vld [vmem:[%s1164_s7 + $0x130] sm:$0xff]  ;;  %v684_v31 = vld [vmem:[%s1164_s7 + $0x128] sm:$0xff]  ;;  %v667_v34 = vld [vmem:[%s1164_s7 + $0xa0] sm:$0xff] }
  0x2a   : > { %362 = vmatpush.msra.mxu0 %v327_v28  ;;  %439 = vmatpush.msra.mxu2 %v414_v43  ;;  %v701_v28 = vld [vmem:[%s1164_s7 + $0x1b0] sm:$0xff]  ;;  %v683_v35 = vld [vmem:[%s1164_s7 + $0x120] sm:$0xff]  ;;  %v453_v37 = vld [vmem:[%s1164_s7 + $0x18] sm:$0xff] }
  0x2b   : > { %363 = vmatmul.f32.vlgmr.msra.gmra.mxu0 %v326_v29  ;;  %403 = vmatpush.msra.mxu1 %v368_v32  ;;  %v455_v29 = vld [vmem:[%s1164_s7 + $0x28] sm:$0xff]  ;;  %v699_v36 = vld [vmem:[%s1164_s7 + $0x1a0] sm:$0xff]  ;;  %v666_v42 = vld [vmem:[%s1164_s7 + $0x98] sm:$0xff] }
  0x2c   : > { %440 = vmatpush.msra.mxu2 %v413_v44  ;;  %506 = vmatpush.msrb.mxu0 %v465_v53  ;;  %v700_v32 = vld [vmem:[%s1164_s7 + $0x1a8] sm:$0xff]  ;;  %v722_v38 = vld [vmem:[%s1161_s4] ss:$0 sm:$0xff]  ;;  %v452_v43 = vld [vmem:[%s1164_s7 + $0x10] sm:$0xff] }
  0x2d   : > { %545 = vmatpush.msrb.mxu1 %v694_v56  ;;  %493 = vmatpush.msra.mxu3 %v671_v18  ;;  %v682_v44 = vld [vmem:[%s1164_s7 + $0x118] sm:$0xff]  ;;  %v696_v53 = vld [vmem:[%s1164_s7 + $0x188] sm:$0xff]  ;;  %v663_v54 = vld [vmem:[%s1164_s7 + $0x80] sm:$0xff] }
  0x2e   : > { %441 = vmatpush.msra.mxu2 %v412_v45  ;;  %507 = vmatpush.msrb.mxu0 %v464_v55  ;;  %v698_v45 = vld [vmem:[%s1164_s7 + $0x198] sm:$0xff]  ;;  %v679_v55 = vld [vmem:[%s1164_s7 + $0x100] sm:$0xff] }
  0x2f   : > { %546 = vmatpush.msrb.mxu1 %v693_v60  ;;  %494 = vmatpush.msra.mxu3 %v670_v22  ;;  %v695_v56 = vld [vmem:[%s1164_s7 + $0x180] sm:$0xff] }
  0x30   : > { %442 = vmatpush.msra.mxu2 %v411_v50  ;;  %508 = vmatpush.msrb.mxu0 %v463_v59  ;;  %v664_v50 = vld [vmem:[%s1164_s7 + $0x88] sm:$0xff]  ;;  %v606_v6 = vld [vmem:[%s1165_s8] sm:$0x1] }
  0x31   : > { %547 = vmatpush.msrb.mxu1 %v692_v63  ;;  %495 = vmatpush.msra.mxu3 %v669_v26 }
  0x32   : > { %443 = vmatpush.msra.mxu2 %v410_v51  ;;  %509 = vmatpush.msrb.mxu0 %v462_v0  ;;  %v450_v51 = vld [vmem:[%s1164_s7] sm:$0xff] }
  0x33   : > { %548 = vmatpush.msrb.mxu1 %v691_v3  ;;  %496 = vmatpush.msra.mxu3 %v668_v30 }
  0x34   : > { %444 = vmatpush.msra.mxu2 %v409_v52  ;;  %510 = vmatpush.msrb.mxu0 %v461_v5  ;;  %v680_v52 = vld [vmem:[%s1164_s7 + $0x108] sm:$0xff] }
  0x35   : > { %549 = vmatpush.msrb.mxu1 %v690_v7  ;;  %497 = vmatpush.msra.mxu3 %v667_v34 }
  0x36   : > { %585 = vmatpush.msrb.mxu2 %v710_v57  ;;  %511 = vmatpush.msrb.mxu0 %v460_v9  ;;  %v723_v57 = vld [vmem:[%s1163_s6] ss:$0 sm:$0xff] }
  0x37   : > { %550 = vmatpush.msrb.mxu1 %v689_v11  ;;  %498 = vmatpush.msra.mxu3 %v666_v42 }
  0x38   : > { %586 = vmatpush.msrb.mxu2 %v709_v61  ;;  %512 = vmatpush.msrb.mxu0 %v459_v13 }
  0x39   : > { %551 = vmatpush.msrb.mxu1 %v688_v15 }
  0x3a   : > { %587 = vmatpush.msrb.mxu2 %v708_v1  ;;  %513 = vmatpush.msrb.mxu0 %v458_v17 }
  0x3b   : > { %552 = vmatpush.msrb.mxu1 %v687_v19 }
  0x3c   : > { %588 = vmatpush.msrb.mxu2 %v707_v4  ;;  %514 = vmatpush.msrb.mxu0 %v457_v21 }
  0x3d   : > { %553 = vmatpush.msrb.mxu1 %v686_v23 }
  0x3e   : > { %589 = vmatpush.msrb.mxu2 %v706_v8  ;;  %515 = vmatpush.msrb.mxu0 %v456_v25 }
  0x3f   : > { %554 = vmatpush.msrb.mxu1 %v685_v27 }
  0x40   : > { %590 = vmatpush.msrb.mxu2 %v705_v12  ;;  %516 = vmatpush.msrb.mxu0 %v455_v29 }
  0x41   : > { %555 = vmatpush.msrb.mxu1 %v684_v31 }
  0x42   : > { %591 = vmatpush.msrb.mxu2 %v704_v16  ;;  %517 = vmatpush.msrb.mxu0 %v454_v33 }
  0x43   : > { %556 = vmatpush.msrb.mxu1 %v683_v35 }
  0x44   : > { %592 = vmatpush.msrb.mxu2 %v703_v20  ;;  %518 = vmatpush.msrb.mxu0 %v453_v37 }
  0x45   : > { %557 = vmatpush.msrb.mxu1 %v682_v44 }
  0x46   : > { %593 = vmatpush.msrb.mxu2 %v702_v24  ;;  %519 = vmatpush.msrb.mxu0 %v452_v43 }
  0x48   : > { %594 = vmatpush.msrb.mxu2 %v701_v28 }
  0x4a   : > { %595 = vmatpush.msrb.mxu2 %v700_v32 }
  0x4c   : > { %596 = vmatpush.msrb.mxu2 %v699_v36 }
  0x4e   : > { %597 = vmatpush.msrb.mxu2 %v698_v45 }
  0xa8   : > { %v364_v47 = vpop.f32.mrf.mxu0 }
  0xa9   : > { %v365_v48 = vadd.f32 %v721_v46, %v364_v47  ;;  %v665_v46 = vld [vmem:[%s1164_s7 + $0x90] sm:$0xff]  ;;  %v451_v47 = vld [vmem:[%s1164_s7 + $0x8] sm:$0xff] }
  0xaa   : > { %499 = vmatpush.msra.mxu3 %v665_v46  ;;  %520 = vmatpush.msrb.mxu0 %v451_v47 }
  0xab   : > { %v367_v49 = vmax.f32 %v365_v48, 0.0  ;;  %v681_v48 = vld [vmem:[%s1164_s7 + $0x110] sm:$0xff] }
  0xac   : > { %558 = vmatpush.msrb.mxu1 %v681_v48  ;;  %500 = vmatpush.msra.mxu3 %v664_v50 }
  0xad   : > { %404 = vmatmul.f32.vlgmr.msra.gmra.mxu1 %v367_v49  ;;  %v697_v49 = vld [vmem:[%s1164_s7 + $0x190] sm:$0xff]  ;;  %521 = vmatpush.msrb.mxu0 %v450_v51 }
  0xae   : > { %598 = vmatpush.msrb.mxu2 %v697_v49  ;;  %559 = vmatpush.msrb.mxu1 %v680_v52 }
  0xaf   : > { %501 = vmatpush.msra.mxu3 %v663_v54 }
  0xb0   : > { %599 = vmatpush.msrb.mxu2 %v696_v53  ;;  %560 = vmatpush.msrb.mxu1 %v679_v55 }
  0xb2   : > { %600 = vmatpush.msrb.mxu2 %v695_v56 }
 0x12a   : > { %v405_v39 = vpop.f32.mrf.mxu1 }
 0x12b   : > { %v406_v40 = vadd.f32 %v722_v38, %v405_v39 }
 0x12d   : > { %v408_v41 = vmax.f32 %v406_v40, 0.0 }
 0x12f   : > { %445 = vmatmul.f32.vlgmr.msra.gmra.mxu2 %v408_v41 }
 0x1b2   : > { %v446_v58 = vpop.f32.mrf.mxu2 }
 0x1b3   : > { %v447_v59 = vadd.f32 %v723_v57, %v446_v58 }
 0x1b5   : > { %v449_v60 = vmax.f32 %v447_v59, 0.0 }
 0x1b7   : > { %522 = vmatmul.f32.vlgmr.msrb.gmra.mxu0 %v449_v60  ;;  %v484_v61 = vrot.slane %v449_v60, 1  ;;  %v543_v62 = vrot.slane %v449_v60, 2  ;;  %v583_v63 = vrot.slane %v449_v60, 3 }
 0x1b9   : > { %502 = vmatmul.f32.vlgmr.msra.gmra.mxu3 %v484_v61  ;;  %561 = vmatmul.f32.vlgmr.msrb.gmra.mxu1 %v543_v62 }
 0x1ba   : > { %601 = vmatmul.f32.vlgmr.msrb.gmra.mxu2 %v583_v63 }
 0x234   : > { %v523_v0 = vpop.f32.mrf.mxu0 }
 0x236   : > { %v562_v3 = vpop.f32.mrf.mxu1 }
 0x23c   : > { %v503_v1 = vpop.f32.mrf.mxu3 }
 0x23d   : > { %v524_v2 = vadd.f32 %v523_v0, %v503_v1  ;;  %v602_v5 = vpop.f32.mrf.mxu2 }
 0x23f   : > { %v565_v4 = vadd.f32 %v562_v3, %v524_v2 }
 0x241   : > { %v605_v7 = vadd.f32 %v602_v5, %v565_v4 }
 0x243   : > { %v607_v8 = vadd.f32 %v606_v6, %v605_v7 }
 0x245   : > { %724 = vtanh.f32 %v607_v8 }
 0x24b   : > { %v725_v9 = vpop.eup %724 }
 0x24c   : > { %609 = vst [vmem:[%s325_s21] sm:$0x1] %v725_v9 }
 0x24d PF: > { %s19_s30 = sadd.s32 1, %s732_s30  }
 0x24e   : > { %p16_p4 = scmp.ge.s32.totalorder %s19_s30, 4  }
 0x250   :  { %18 = sbr.rel (!%p16_p4) target bundleno = 1 (0x1), region = 89 }

</bundles_post_ra>
